<compile_context>
chip_gen: v7x
topology: tpu7x:2x2x1
jax: 0.10.0
libtpu: 0.0.40
codegen_flags: <defaults>
</compile_context>

<pallas_src>
import functools

import jax
import jax.numpy as jnp
from jax.experimental import pallas as pl
from jax.experimental.pallas import tpu as pltpu

EPS = 1e-5  # nn.BatchNorm2d default eps


def _silu(v):
    return v * jax.nn.sigmoid(v)


def _leaky(v):  # LeakyReLU(0.1)
    return jnp.where(v >= 0.0, v, 0.1 * v)


# ---------------------------------------------------------------------------
# Fully fused BottleneckCSP: cv1 + n Bottlenecks + (cv3 | cv2) -> BN ->
# LeakyReLU -> cv4 (+BN) -> SiLU, all in ONE kernel per batch element.
# ---------------------------------------------------------------------------
def _csp_kernel(x_ref, prew_ref, preb_ref, w1_ref, b1_ref, w2_ref, b2_ref,
                w3_ref, bb1_ref, wc2_ref, bb2_ref, w4a_ref, w4b_ref, b4_ref,
                o_ref, pad_ref, *, n_blocks, shortcut):
    # x_ref:     (1, H, W, c1)            one batch element
    # prew/preb: CSP cv1 weight (BN scale folded) / bias
    # w1/b1:     (nb, c_, c_), (nb, 1, c_)      per-block Bottleneck cv1
    # w2/b2:     (nb, 9*c_, c_), (nb, 1, c_)    per-block Bottleneck cv2 (im2col)
    # w3/bb1:    cv3 weight (BN scale folded) / BN bias for y1 half
    # wc2/bb2:   CSP cv2 weight (BN scale folded) / BN bias for y2 half
    # w4a/w4b:   cv4 weight split over the concat halves (BN scale folded)
    # b4:        cv4 bias
    # o_ref:     (1, H, W, c2)
    # pad_ref:   (H+2, W+2, c_) VMEM scratch for the zero halo
    H, W, c1 = x_ref.shape[1], x_ref.shape[2], x_ref.shape[3]
    c_ = prew_ref.shape[1]
    c2 = o_ref.shape[3]

    x2d = x_ref[0].astype(jnp.float32).reshape(H * W, c1)

    # --- CSP cv1: 1x1 conv (BN scale pre-folded) + bias + SiLU ---------------
    t = _silu(jnp.dot(x2d, prew_ref[...], preferred_element_type=jnp.float32)
              + preb_ref[...])

    # zero the halo scratch once; the interior is overwritten every block
    pad_ref[...] = jnp.zeros_like(pad_ref)

    # --- n Bottleneck blocks, everything kept in VMEM ------------------------
    for i in range(n_blocks):
        # Bottleneck cv1: 1x1 conv + bias + SiLU
        a = _silu(jnp.dot(t, w1_ref[i], preferred_element_type=jnp.float32)
                  + b1_ref[i])

        # in-kernel zero padding (autopad(3) = 1): interior copy into scratch
        pad_ref[1:H + 1, 1:W + 1, :] = a.reshape(H, W, c_)
        xp = pad_ref[...]

        # im2col: one (H*W, 9*c_) x (9*c_, c_) matmul instead of 9 K=c_ dots
        cols = [xp[dh:dh + H, dw:dw + W, :].reshape(H * W, c_)
                for dh in range(3) for dw in range(3)]
        xcol = jnp.concatenate(cols, axis=-1)

        y = _silu(jnp.dot(xcol, w2_ref[i], preferred_element_type=jnp.float32)
                  + b2_ref[i])
        t = t + y if shortcut else y

    # --- tail: cv3 | cv2 -> (implicit concat) -> BN -> LeakyReLU -------------
    z1 = _leaky(jnp.dot(t, w3_ref[...], preferred_element_type=jnp.float32)
                + bb1_ref[...])
    z2 = _leaky(jnp.dot(x2d, wc2_ref[...], preferred_element_type=jnp.float32)
                + bb2_ref[...])

    # cv4 on the (implicit) concat, split into two matmuls; cv4 BN scale folded
    acc = (jnp.dot(z1, w4a_ref[...], preferred_element_type=jnp.float32)
           + jnp.dot(z2, w4b_ref[...], preferred_element_type=jnp.float32)
           + b4_ref[...])
    o_ref[0] = _silu(acc).reshape(H, W, c2).astype(o_ref.dtype)


def csp_fused(x_nhwc, pre_w, pre_b, w1_all, b1_all, w2_all, b2_all,
              w3f, bb1, w2f, bb2, w4a, w4b, b4, c_, c2, *,
              shortcut, n_blocks):
    N, H, W, c1 = x_nhwc.shape
    nb = w1_all.shape[0]
    kernel = functools.partial(_csp_kernel, n_blocks=n_blocks,
                               shortcut=shortcut)
    return pl.pallas_call(
        kernel,
        out_shape=jax.ShapeDtypeStruct((N, H, W, c2), x_nhwc.dtype),
        grid=(N,),
        in_specs=[
            pl.BlockSpec((1, H, W, c1), lambda b: (b, 0, 0, 0)),
            pl.BlockSpec((c1, c_), lambda b: (0, 0)),
            pl.BlockSpec((1, c_), lambda b: (0, 0)),
            pl.BlockSpec((nb, c_, c_), lambda b: (0, 0, 0)),
            pl.BlockSpec((nb, 1, c_), lambda b: (0, 0, 0)),
            pl.BlockSpec((nb, 9 * c_, c_), lambda b: (0, 0, 0)),
            pl.BlockSpec((nb, 1, c_), lambda b: (0, 0, 0)),
            pl.BlockSpec((c_, c_), lambda b: (0, 0)),
            pl.BlockSpec((1, c_), lambda b: (0, 0)),
            pl.BlockSpec((c1, c_), lambda b: (0, 0)),
            pl.BlockSpec((1, c_), lambda b: (0, 0)),
            pl.BlockSpec((c_, c2), lambda b: (0, 0)),
            pl.BlockSpec((c_, c2), lambda b: (0, 0)),
            pl.BlockSpec((1, c2), lambda b: (0, 0)),
        ],
        out_specs=pl.BlockSpec((1, H, W, c2), lambda b: (b, 0, 0, 0)),
        scratch_shapes=[pltpu.VMEM((H + 2, W + 2, c_), jnp.float32)],
        compiler_params=pltpu.CompilerParams(
            dimension_semantics=("parallel",)),
    )(x_nhwc, pre_w, pre_b, w1_all, b1_all, w2_all, b2_all,
      w3f, bb1, w2f, bb2, w4a, w4b, b4)


# ------------------------------ parameters ----------------------------------
def init_params(key, c1, c2, n=1, e=0.5):
    c_ = int(c2 * e)
    keys = iter(jax.random.split(key, 128))

    def w1x1(cin, cout):
        return jax.random.normal(next(keys), (cin, cout), jnp.float32) * 0.1

    def w3x3(cin, cout):
        return jax.random.normal(next(keys), (9, cin, cout), jnp.float32) * 0.1

    def bn(c):  # fold BatchNorm2d (eval mode) into per-channel scale/bias
        gamma = jax.random.uniform(next(keys), (1, c), jnp.float32, 0.5, 1.5)
        beta = jax.random.normal(next(keys), (1, c), jnp.float32) * 0.1
        mean = jax.random.normal(next(keys), (1, c), jnp.float32) * 0.1
        var = jax.random.uniform(next(keys), (1, c), jnp.float32, 0.5, 1.5)
        scale = gamma / jnp.sqrt(var + EPS)
        bias = beta - mean * scale
        return scale, bias

    p = {}
    p["cv1_w"] = w1x1(c1, c_)
    p["cv1_scale"], p["cv1_bias"] = bn(c_)
    p["cv2_w"] = w1x1(c1, c_)          # plain conv, no BN/act
    p["cv3_w"] = w1x1(c_, c_)          # plain conv, no BN/act
    p["cv4_w"] = w1x1(2 * c_, c2)
    p["cv4_scale"], p["cv4_bias"] = bn(c2)
    p["bn_scale"], p["bn_bias"] = bn(2 * c_)
    p["m"] = []
    for _ in range(n):
        blk = {}
        blk["cv1_w"] = w1x1(c_, c_)
        blk["cv1_scale"], blk["cv1_bias"] = bn(c_)
        blk["cv2_w"] = w3x3(c_, c_)    # Bottleneck e=1.0 -> hidden == c_
        blk["cv2_scale"], blk["cv2_bias"] = bn(c_)
        p["m"].append(blk)
    return p, c_


# ------------------------------ forward pass ---------------------------------
def bottleneck_csp_forward(x_nchw, params, c_, shortcut=True):
    x = jnp.transpose(x_nchw, (0, 2, 3, 1))  # NCHW -> NHWC
    N, H, W, c1 = x.shape
    n_blocks = len(params["m"])
    f32 = jnp.float32
    c2 = params["cv4_w"].shape[1]

    # ---- fold BN scales into conv weights (kernel does matmul + bias only) --
    pre_w = (params["cv1_w"] * params["cv1_scale"]).astype(f32)
    pre_b = params["cv1_bias"].astype(f32)
    if n_blocks > 0:
        w1_all = jnp.stack(
            [blk["cv1_w"] * blk["cv1_scale"] for blk in params["m"]])
        b1_all = jnp.stack([blk["cv1_bias"] for blk in params["m"]])
        w2_all = jnp.stack(
            [blk["cv2_w"].reshape(9 * c_, c_) * blk["cv2_scale"]
             for blk in params["m"]])
        b2_all = jnp.stack([blk["cv2_bias"] for blk in params["m"]])
    else:  # dummies (unused): keep BlockSpec shapes valid
        w1_all = jnp.zeros((1, c_, c_), f32)
        b1_all = jnp.zeros((1, 1, c_), f32)
        w2_all = jnp.zeros((1, 9 * c_, c_), f32)
        b2_all = jnp.zeros((1, 1, c_), f32)

    bn_s, bn_b = params["bn_scale"], params["bn_bias"]
    w3f = params["cv3_w"] * bn_s[:, :c_]      # cv3 is linear: fold BN scale
    bb1 = bn_b[:, :c_]
    w2f = params["cv2_w"] * bn_s[:, c_:]      # cv2 is linear: fold BN scale
    bb2 = bn_b[:, c_:]
    w4a = params["cv4_w"][:c_] * params["cv4_scale"]
    w4b = params["cv4_w"][c_:] * params["cv4_scale"]
    b4 = params["cv4_bias"]

    out = csp_fused(x, pre_w, pre_b, w1_all, b1_all, w2_all, b2_all,
                    w3f, bb1, w2f, bb2, w4a, w4b, b4, c_, c2,
                    shortcut=shortcut, n_blocks=n_blocks)
    return jnp.transpose(out, (0, 3, 1, 2))  # NHWC -> NCHW


# --------------------------- pure-JAX reference ------------------------------
def ref_forward(x_nchw, params, c_, shortcut=True):
    x = jnp.transpose(x_nchw, (0, 2, 3, 1))

    def conv1x1(t, w):
        return jnp.einsum("nhwc,cd->nhwd", t, w)

    def conv3x3(t, w9):
        N, H, W, _ = t.shape
        tp = jnp.pad(t, ((0, 0), (1, 1), (1, 1), (0, 0)))
        out = 0.0
        for dh in range(3):
            for dw in range(3):
                out = out + jnp.einsum("nhwc,cd->nhwd",
                                       tp[:, dh:dh + H, dw:dw + W, :],
                                       w9[dh * 3 + dw])
        return out

    silu = lambda v: v * jax.nn.sigmoid(v)
    leaky = lambda v: jnp.where(v >= 0, v, 0.1 * v)

    t = silu(conv1x1(x, params["cv1_w"]) * params["cv1_scale"]
             + params["cv1_bias"])
    for blk in params["m"]:
        a = silu(conv1x1(t, blk["cv1_w"]) * blk["cv1_scale"] + blk["cv1_bias"])
        b = silu(conv3x3(a, blk["cv2_w"]) * blk["cv2_scale"] + blk["cv2_bias"])
        t = t + b if shortcut else b
    y1 = conv1x1(t, params["cv3_w"])
    y2 = conv1x1(x, params["cv2_w"])
    ycat = jnp.concatenate([y1, y2], axis=-1)
    z = leaky(ycat * params["bn_scale"] + params["bn_bias"])
    out = silu(conv1x1(z, params["cv4_w"]) * params["cv4_scale"]
               + params["cv4_bias"])
    return jnp.transpose(out, (0, 3, 1, 2))


# ----------------------------------- main ------------------------------------
if __name__ == "__main__":
    key = jax.random.PRNGKey(0)
    kx, kp = jax.random.split(key)

    N, C1, H, W = 2, 16, 16, 16
    C2, n_blocks = 16, 2  # c_ = int(C2 * 0.5) = 8

    x = jax.random.normal(kx, (N, C1, H, W), jnp.float32)  # NCHW, like PyTorch
    params, c_ = init_params(kp, C1, C2, n=n_blocks, e=0.5)

    fwd = jax.jit(functools.partial(bottleneck_csp_forward, c_=c_))
    out = fwd(x, params)
    out = jax.block_until_ready(out)

    ref = ref_forward(x, params, c_)
    assert out.shape == (N, C2, H, W), out.shape
    err = float(jnp.max(jnp.abs(out - ref)))
    assert err < 2e-3, f"max abs err {err}"

    print("KERNEL_OK")
</pallas_src>

<mosaic_0001>
module attributes {stable_mosaic.version = 11 : i64} {
  func.func @_csp_kernel(%arg0: i32, %arg1: memref<1x16x16x16xf32, #tpu.memory_space<vmem>>, %arg2: memref<16x8xf32, #tpu.memory_space<vmem>>, %arg3: memref<1x8xf32, #tpu.memory_space<vmem>>, %arg4: memref<2x8x8xf32, #tpu.memory_space<vmem>>, %arg5: memref<2x1x8xf32, #tpu.memory_space<vmem>>, %arg6: memref<2x72x8xf32, #tpu.memory_space<vmem>>, %arg7: memref<2x1x8xf32, #tpu.memory_space<vmem>>, %arg8: memref<8x8xf32, #tpu.memory_space<vmem>>, %arg9: memref<1x8xf32, #tpu.memory_space<vmem>>, %arg10: memref<16x8xf32, #tpu.memory_space<vmem>>, %arg11: memref<1x8xf32, #tpu.memory_space<vmem>>, %arg12: memref<8x16xf32, #tpu.memory_space<vmem>>, %arg13: memref<8x16xf32, #tpu.memory_space<vmem>>, %arg14: memref<1x16xf32, #tpu.memory_space<vmem>>, %arg15: memref<1x16x16x16xf32, #tpu.memory_space<vmem>>, %arg16: memref<18x18x8xf32, #tpu.memory_space<vmem>>) attributes {dimension_semantics = [#tpu.dimension_semantics<parallel>], iteration_bounds = array<i64: 2>, scalar_prefetch = 0 : i64, scratch_operands = 1 : i64, tpu.core_type = #tpu.core_type<tc>, window_params = [{transform_indices = @transform_0, window_bounds = array<i64: 1, 16, 16, 16>}, {pipeline_mode = #tpu.pipeline_mode<synchronous>, transform_indices = @transform_1, window_bounds = array<i64: 16, 8>}, {pipeline_mode = #tpu.pipeline_mode<synchronous>, transform_indices = @transform_2, window_bounds = array<i64: 1, 8>}, {pipeline_mode = #tpu.pipeline_mode<synchronous>, transform_indices = @transform_3, window_bounds = array<i64: 2, 8, 8>}, {pipeline_mode = #tpu.pipeline_mode<synchronous>, transform_indices = @transform_4, window_bounds = array<i64: 2, 1, 8>}, {pipeline_mode = #tpu.pipeline_mode<synchronous>, transform_indices = @transform_5, window_bounds = array<i64: 2, 72, 8>}, {pipeline_mode = #tpu.pipeline_mode<synchronous>, transform_indices = @transform_6, window_bounds = array<i64: 2, 1, 8>}, {pipeline_mode = #tpu.pipeline_mode<synchronous>, transform_indices = @transform_7, window_bounds = array<i64: 8, 8>}, {pipeline_mode = #tpu.pipeline_mode<synchronous>, transform_indices = @transform_8, window_bounds = array<i64: 1, 8>}, {pipeline_mode = #tpu.pipeline_mode<synchronous>, transform_indices = @transform_9, window_bounds = array<i64: 16, 8>}, {pipeline_mode = #tpu.pipeline_mode<synchronous>, transform_indices = @transform_10, window_bounds = array<i64: 1, 8>}, {pipeline_mode = #tpu.pipeline_mode<synchronous>, transform_indices = @transform_11, window_bounds = array<i64: 8, 16>}, {pipeline_mode = #tpu.pipeline_mode<synchronous>, transform_indices = @transform_12, window_bounds = array<i64: 8, 16>}, {pipeline_mode = #tpu.pipeline_mode<synchronous>, transform_indices = @transform_13, window_bounds = array<i64: 1, 16>}, {transform_indices = @transform_14, window_bounds = array<i64: 1, 16, 16, 16>}]} {
    %c0 = arith.constant 0 : index
    %c0_0 = arith.constant 0 : index
    %c0_1 = arith.constant 0 : index
    %c0_2 = arith.constant 0 : index
    %0 = vector.load %arg1[%c0, %c0_0, %c0_1, %c0_2] : memref<1x16x16x16xf32, #tpu.memory_space<vmem>>, vector<1x16x16x16xf32>
    %1 = vector.shape_cast %0 : vector<1x16x16x16xf32> to vector<16x16x16xf32>
    %2 = vector.shape_cast %1 : vector<16x16x16xf32> to vector<256x16xf32>
    %c0_3 = arith.constant 0 : index
    %c0_4 = arith.constant 0 : index
    %3 = vector.load %arg2[%c0_3, %c0_4] : memref<16x8xf32, #tpu.memory_space<vmem>>, vector<16x8xf32>
    %cst = arith.constant dense<0.000000e+00> : vector<256x8xf32>
    %4 = tpu.matmul %2, %3, %cst {dimension_numbers = #tpu.dot_dimension_numbers<[1], [0], [0], [1], [0, 0, 1, 1], [], []>} : vector<256x16xf32>, vector<16x8xf32>, vector<256x8xf32> -> vector<256x8xf32>
    %c0_5 = arith.constant 0 : index
    %c0_6 = arith.constant 0 : index
    %5 = vector.load %arg3[%c0_5, %c0_6] : memref<1x8xf32, #tpu.memory_space<vmem>>, vector<1x8xf32>
    %6 = vector.broadcast %5 : vector<1x8xf32> to vector<256x8xf32>
    %7 = arith.addf %4, %6 : vector<256x8xf32>
    %8 = arith.negf %7 : vector<256x8xf32>
    %9 = math.exp %8 : vector<256x8xf32>
    %cst_7 = arith.constant 1.000000e+00 : f32
    %10 = vector.broadcast %cst_7 : f32 to vector<256x8xf32>
    %11 = arith.addf %10, %9 : vector<256x8xf32>
    %12 = arith.divf %10, %11 : vector<256x8xf32>
    %13 = arith.mulf %7, %12 : vector<256x8xf32>
    %cst_8 = arith.constant 0.000000e+00 : f32
    %14 = vector.broadcast %cst_8 : f32 to vector<18x18x8xf32>
    %c0_9 = arith.constant 0 : index
    %c0_10 = arith.constant 0 : index
    %c0_11 = arith.constant 0 : index
    %15 = vector.load %arg16[%c0_9, %c0_10, %c0_11] : memref<18x18x8xf32, #tpu.memory_space<vmem>>, vector<18x18x8xf32>
    tpu.vector_store %arg16[%c0_9, %c0_10, %c0_11], %14 {strides = array<i32>} : memref<18x18x8xf32, #tpu.memory_space<vmem>>, vector<18x18x8xf32>,
    %c0_12 = arith.constant 0 : index
    %c0_13 = arith.constant 0 : index
    %c0_14 = arith.constant 0 : index
    %16 = vector.load %arg4[%c0_12, %c0_13, %c0_14] : memref<2x8x8xf32, #tpu.memory_space<vmem>>, vector<1x8x8xf32>
    %17 = vector.shape_cast %16 : vector<1x8x8xf32> to vector<8x8xf32>
    %cst_15 = arith.constant dense<0.000000e+00> : vector<256x8xf32>
    %18 = tpu.matmul %13, %17, %cst_15 {dimension_numbers = #tpu.dot_dimension_numbers<[1], [0], [0], [1], [0, 0, 1, 1], [], []>} : vector<256x8xf32>, vector<8x8xf32>, vector<256x8xf32> -> vector<256x8xf32>
    %c0_16 = arith.constant 0 : index
    %c0_17 = arith.constant 0 : index
    %c0_18 = arith.constant 0 : index
    %19 = vector.load %arg5[%c0_16, %c0_17, %c0_18] : memref<2x1x8xf32, #tpu.memory_space<vmem>>, vector<1x1x8xf32>
    %20 = vector.shape_cast %19 : vector<1x1x8xf32> to vector<1x8xf32>
    %21 = vector.broadcast %20 : vector<1x8xf32> to vector<256x8xf32>
    %22 = arith.addf %18, %21 : vector<256x8xf32>
    %23 = arith.negf %22 : vector<256x8xf32>
    %24 = math.exp %23 : vector<256x8xf32>
    %cst_19 = arith.constant 1.000000e+00 : f32
    %25 = vector.broadcast %cst_19 : f32 to vector<256x8xf32>
    %26 = arith.addf %25, %24 : vector<256x8xf32>
    %27 = arith.divf %25, %26 : vector<256x8xf32>
    %28 = arith.mulf %22, %27 : vector<256x8xf32>
    %29 = vector.shape_cast %28 : vector<256x8xf32> to vector<16x16x8xf32>
    %c1 = arith.constant 1 : index
    %c1_20 = arith.constant 1 : index
    %c0_21 = arith.constant 0 : index
    %30 = vector.load %arg16[%c1, %c1_20, %c0_21] : memref<18x18x8xf32, #tpu.memory_space<vmem>>, vector<16x16x8xf32>
    tpu.vector_store %arg16[%c1, %c1_20, %c0_21], %29 {strides = array<i32>} : memref<18x18x8xf32, #tpu.memory_space<vmem>>, vector<16x16x8xf32>,
    %c0_22 = arith.constant 0 : index
    %c0_23 = arith.constant 0 : index
    %c0_24 = arith.constant 0 : index
    %31 = vector.load %arg16[%c0_22, %c0_23, %c0_24] : memref<18x18x8xf32, #tpu.memory_space<vmem>>, vector<18x18x8xf32>
    %32 = vector.extract_strided_slice %31 {offsets = [0, 0, 0], sizes = [16, 16, 8], strides = [1, 1, 1]} : vector<18x18x8xf32> to vector<16x16x8xf32>
    %33 = vector.shape_cast %32 : vector<16x16x8xf32> to vector<256x8xf32>
    %34 = vector.extract_strided_slice %31 {offsets = [0, 1, 0], sizes = [16, 16, 8], strides = [1, 1, 1]} : vector<18x18x8xf32> to vector<16x16x8xf32>
    %35 = vector.shape_cast %34 : vector<16x16x8xf32> to vector<256x8xf32>
    %36 = vector.extract_strided_slice %31 {offsets = [0, 2, 0], sizes = [16, 16, 8], strides = [1, 1, 1]} : vector<18x18x8xf32> to vector<16x16x8xf32>
    %37 = vector.shape_cast %36 : vector<16x16x8xf32> to vector<256x8xf32>
    %38 = vector.extract_strided_slice %31 {offsets = [1, 0, 0], sizes = [16, 16, 8], strides = [1, 1, 1]} : vector<18x18x8xf32> to vector<16x16x8xf32>
    %39 = vector.shape_cast %38 : vector<16x16x8xf32> to vector<256x8xf32>
    %40 = vector.extract_strided_slice %31 {offsets = [1, 1, 0], sizes = [16, 16, 8], strides = [1, 1, 1]} : vector<18x18x8xf32> to vector<16x16x8xf32>
    %41 = vector.shape_cast %40 : vector<16x16x8xf32> to vector<256x8xf32>
    %42 = vector.extract_strided_slice %31 {offsets = [1, 2, 0], sizes = [16, 16, 8], strides = [1, 1, 1]} : vector<18x18x8xf32> to vector<16x16x8xf32>
    %43 = vector.shape_cast %42 : vector<16x16x8xf32> to vector<256x8xf32>
    %44 = vector.extract_strided_slice %31 {offsets = [2, 0, 0], sizes = [16, 16, 8], strides = [1, 1, 1]} : vector<18x18x8xf32> to vector<16x16x8xf32>
    %45 = vector.shape_cast %44 : vector<16x16x8xf32> to vector<256x8xf32>
    %46 = vector.extract_strided_slice %31 {offsets = [2, 1, 0], sizes = [16, 16, 8], strides = [1, 1, 1]} : vector<18x18x8xf32> to vector<16x16x8xf32>
    %47 = vector.shape_cast %46 : vector<16x16x8xf32> to vector<256x8xf32>
    %48 = vector.extract_strided_slice %31 {offsets = [2, 2, 0], sizes = [16, 16, 8], strides = [1, 1, 1]} : vector<18x18x8xf32> to vector<16x16x8xf32>
    %49 = vector.shape_cast %48 : vector<16x16x8xf32> to vector<256x8xf32>
    %50 = tpu.concatenate %33, %35, %37, %39, %41, %43, %45, %47, %49 in 1 : vector<256x8xf32>, vector<256x8xf32>, vector<256x8xf32>, vector<256x8xf32>, vector<256x8xf32>, vector<256x8xf32>, vector<256x8xf32>, vector<256x8xf32>, vector<256x8xf32> -> vector<256x72xf32>
    %c0_25 = arith.constant 0 : index
    %c0_26 = arith.constant 0 : index
    %c0_27 = arith.constant 0 : index
    %51 = vector.load %arg6[%c0_25, %c0_26, %c0_27] : memref<2x72x8xf32, #tpu.memory_space<vmem>>, vector<1x72x8xf32>
    %52 = vector.shape_cast %51 : vector<1x72x8xf32> to vector<72x8xf32>
    %cst_28 = arith.constant dense<0.000000e+00> : vector<256x8xf32>
    %53 = tpu.matmul %50, %52, %cst_28 {dimension_numbers = #tpu.dot_dimension_numbers<[1], [0], [0], [1], [0, 0, 1, 1], [], []>} : vector<256x72xf32>, vector<72x8xf32>, vector<256x8xf32> -> vector<256x8xf32>
    %c0_29 = arith.constant 0 : index
    %c0_30 = arith.constant 0 : index
    %c0_31 = arith.constant 0 : index
    %54 = vector.load %arg7[%c0_29, %c0_30, %c0_31] : memref<2x1x8xf32, #tpu.memory_space<vmem>>, vector<1x1x8xf32>
    %55 = vector.shape_cast %54 : vector<1x1x8xf32> to vector<1x8xf32>
    %56 = vector.broadcast %55 : vector<1x8xf32> to vector<256x8xf32>
    %57 = arith.addf %53, %56 : vector<256x8xf32>
    %58 = arith.negf %57 : vector<256x8xf32>
    %59 = math.exp %58 : vector<256x8xf32>
    %cst_32 = arith.constant 1.000000e+00 : f32
    %60 = vector.broadcast %cst_32 : f32 to vector<256x8xf32>
    %61 = arith.addf %60, %59 : vector<256x8xf32>
    %62 = arith.divf %60, %61 : vector<256x8xf32>
    %63 = arith.mulf %57, %62 : vector<256x8xf32>
    %64 = arith.addf %13, %63 : vector<256x8xf32>
    %c1_33 = arith.constant 1 : index
    %c0_34 = arith.constant 0 : index
    %c0_35 = arith.constant 0 : index
    %65 = vector.load %arg4[%c1_33, %c0_34, %c0_35] : memref<2x8x8xf32, #tpu.memory_space<vmem>>, vector<1x8x8xf32>
    %66 = vector.shape_cast %65 : vector<1x8x8xf32> to vector<8x8xf32>
    %cst_36 = arith.constant dense<0.000000e+00> : vector<256x8xf32>
    %67 = tpu.matmul %64, %66, %cst_36 {dimension_numbers = #tpu.dot_dimension_numbers<[1], [0], [0], [1], [0, 0, 1, 1], [], []>} : vector<256x8xf32>, vector<8x8xf32>, vector<256x8xf32> -> vector<256x8xf32>
    %c1_37 = arith.constant 1 : index
    %c0_38 = arith.constant 0 : index
    %c0_39 = arith.constant 0 : index
    %68 = vector.load %arg5[%c1_37, %c0_38, %c0_39] : memref<2x1x8xf32, #tpu.memory_space<vmem>>, vector<1x1x8xf32>
    %69 = vector.shape_cast %68 : vector<1x1x8xf32> to vector<1x8xf32>
    %70 = vector.broadcast %69 : vector<1x8xf32> to vector<256x8xf32>
    %71 = arith.addf %67, %70 : vector<256x8xf32>
    %72 = arith.negf %71 : vector<256x8xf32>
    %73 = math.exp %72 : vector<256x8xf32>
    %cst_40 = arith.constant 1.000000e+00 : f32
    %74 = vector.broadcast %cst_40 : f32 to vector<256x8xf32>
    %75 = arith.addf %74, %73 : vector<256x8xf32>
    %76 = arith.divf %74, %75 : vector<256x8xf32>
    %77 = arith.mulf %71, %76 : vector<256x8xf32>
    %78 = vector.shape_cast %77 : vector<256x8xf32> to vector<16x16x8xf32>
    %c1_41 = arith.constant 1 : index
    %c1_42 = arith.constant 1 : index
    %c0_43 = arith.constant 0 : index
    %79 = vector.load %arg16[%c1_41, %c1_42, %c0_43] : memref<18x18x8xf32, #tpu.memory_space<vmem>>, vector<16x16x8xf32>
    tpu.vector_store %arg16[%c1_41, %c1_42, %c0_43], %78 {strides = array<i32>} : memref<18x18x8xf32, #tpu.memory_space<vmem>>, vector<16x16x8xf32>,
    %c0_44 = arith.constant 0 : index
    %c0_45 = arith.constant 0 : index
    %c0_46 = arith.constant 0 : index
    %80 = vector.load %arg16[%c0_44, %c0_45, %c0_46] : memref<18x18x8xf32, #tpu.memory_space<vmem>>, vector<18x18x8xf32>
    %81 = vector.extract_strided_slice %80 {offsets = [0, 0, 0], sizes = [16, 16, 8], strides = [1, 1, 1]} : vector<18x18x8xf32> to vector<16x16x8xf32>
    %82 = vector.shape_cast %81 : vector<16x16x8xf32> to vector<256x8xf32>
    %83 = vector.extract_strided_slice %80 {offsets = [0, 1, 0], sizes = [16, 16, 8], strides = [1, 1, 1]} : vector<18x18x8xf32> to vector<16x16x8xf32>
    %84 = vector.shape_cast %83 : vector<16x16x8xf32> to vector<256x8xf32>
    %85 = vector.extract_strided_slice %80 {offsets = [0, 2, 0], sizes = [16, 16, 8], strides = [1, 1, 1]} : vector<18x18x8xf32> to vector<16x16x8xf32>
    %86 = vector.shape_cast %85 : vector<16x16x8xf32> to vector<256x8xf32>
    %87 = vector.extract_strided_slice %80 {offsets = [1, 0, 0], sizes = [16, 16, 8], strides = [1, 1, 1]} : vector<18x18x8xf32> to vector<16x16x8xf32>
    %88 = vector.shape_cast %87 : vector<16x16x8xf32> to vector<256x8xf32>
    %89 = vector.extract_strided_slice %80 {offsets = [1, 1, 0], sizes = [16, 16, 8], strides = [1, 1, 1]} : vector<18x18x8xf32> to vector<16x16x8xf32>
    %90 = vector.shape_cast %89 : vector<16x16x8xf32> to vector<256x8xf32>
    %91 = vector.extract_strided_slice %80 {offsets = [1, 2, 0], sizes = [16, 16, 8], strides = [1, 1, 1]} : vector<18x18x8xf32> to vector<16x16x8xf32>
    %92 = vector.shape_cast %91 : vector<16x16x8xf32> to vector<256x8xf32>
    %93 = vector.extract_strided_slice %80 {offsets = [2, 0, 0], sizes = [16, 16, 8], strides = [1, 1, 1]} : vector<18x18x8xf32> to vector<16x16x8xf32>
    %94 = vector.shape_cast %93 : vector<16x16x8xf32> to vector<256x8xf32>
    %95 = vector.extract_strided_slice %80 {offsets = [2, 1, 0], sizes = [16, 16, 8], strides = [1, 1, 1]} : vector<18x18x8xf32> to vector<16x16x8xf32>
    %96 = vector.shape_cast %95 : vector<16x16x8xf32> to vector<256x8xf32>
    %97 = vector.extract_strided_slice %80 {offsets = [2, 2, 0], sizes = [16, 16, 8], strides = [1, 1, 1]} : vector<18x18x8xf32> to vector<16x16x8xf32>
    %98 = vector.shape_cast %97 : vector<16x16x8xf32> to vector<256x8xf32>
    %99 = tpu.concatenate %82, %84, %86, %88, %90, %92, %94, %96, %98 in 1 : vector<256x8xf32>, vector<256x8xf32>, vector<256x8xf32>, vector<256x8xf32>, vector<256x8xf32>, vector<256x8xf32>, vector<256x8xf32>, vector<256x8xf32>, vector<256x8xf32> -> vector<256x72xf32>
    %c1_47 = arith.constant 1 : index
    %c0_48 = arith.constant 0 : index
    %c0_49 = arith.constant 0 : index
    %100 = vector.load %arg6[%c1_47, %c0_48, %c0_49] : memref<2x72x8xf32, #tpu.memory_space<vmem>>, vector<1x72x8xf32>
    %101 = vector.shape_cast %100 : vector<1x72x8xf32> to vector<72x8xf32>
    %cst_50 = arith.constant dense<0.000000e+00> : vector<256x8xf32>
    %102 = tpu.matmul %99, %101, %cst_50 {dimension_numbers = #tpu.dot_dimension_numbers<[1], [0], [0], [1], [0, 0, 1, 1], [], []>} : vector<256x72xf32>, vector<72x8xf32>, vector<256x8xf32> -> vector<256x8xf32>
    %c1_51 = arith.constant 1 : index
    %c0_52 = arith.constant 0 : index
    %c0_53 = arith.constant 0 : index
    %103 = vector.load %arg7[%c1_51, %c0_52, %c0_53] : memref<2x1x8xf32, #tpu.memory_space<vmem>>, vector<1x1x8xf32>
    %104 = vector.shape_cast %103 : vector<1x1x8xf32> to vector<1x8xf32>
    %105 = vector.broadcast %104 : vector<1x8xf32> to vector<256x8xf32>
    %106 = arith.addf %102, %105 : vector<256x8xf32>
    %107 = arith.negf %106 : vector<256x8xf32>
    %108 = math.exp %107 : vector<256x8xf32>
    %cst_54 = arith.constant 1.000000e+00 : f32
    %109 = vector.broadcast %cst_54 : f32 to vector<256x8xf32>
    %110 = arith.addf %109, %108 : vector<256x8xf32>
    %111 = arith.divf %109, %110 : vector<256x8xf32>
    %112 = arith.mulf %106, %111 : vector<256x8xf32>
    %113 = arith.addf %64, %112 : vector<256x8xf32>
    %c0_55 = arith.constant 0 : index
    %c0_56 = arith.constant 0 : index
    %114 = vector.load %arg8[%c0_55, %c0_56] : memref<8x8xf32, #tpu.memory_space<vmem>>, vector<8x8xf32>
    %cst_57 = arith.constant dense<0.000000e+00> : vector<256x8xf32>
    %115 = tpu.matmul %113, %114, %cst_57 {dimension_numbers = #tpu.dot_dimension_numbers<[1], [0], [0], [1], [0, 0, 1, 1], [], []>} : vector<256x8xf32>, vector<8x8xf32>, vector<256x8xf32> -> vector<256x8xf32>
    %c0_58 = arith.constant 0 : index
    %c0_59 = arith.constant 0 : index
    %116 = vector.load %arg9[%c0_58, %c0_59] : memref<1x8xf32, #tpu.memory_space<vmem>>, vector<1x8xf32>
    %117 = vector.broadcast %116 : vector<1x8xf32> to vector<256x8xf32>
    %118 = arith.addf %115, %117 : vector<256x8xf32>
    %cst_60 = arith.constant 0.000000e+00 : f32
    %119 = vector.broadcast %cst_60 : f32 to vector<256x8xf32>
    %120 = arith.cmpf oge, %118, %119 : vector<256x8xf32>
    %cst_61 = arith.constant 1.000000e-01 : f32
    %121 = vector.broadcast %cst_61 : f32 to vector<256x8xf32>
    %122 = arith.mulf %121, %118 : vector<256x8xf32>
    %123 = arith.select %120, %118, %122 : vector<256x8xi1>, vector<256x8xf32>
    %c0_62 = arith.constant 0 : index
    %c0_63 = arith.constant 0 : index
    %124 = vector.load %arg10[%c0_62, %c0_63] : memref<16x8xf32, #tpu.memory_space<vmem>>, vector<16x8xf32>
    %cst_64 = arith.constant dense<0.000000e+00> : vector<256x8xf32>
    %125 = tpu.matmul %2, %124, %cst_64 {dimension_numbers = #tpu.dot_dimension_numbers<[1], [0], [0], [1], [0, 0, 1, 1], [], []>} : vector<256x16xf32>, vector<16x8xf32>, vector<256x8xf32> -> vector<256x8xf32>
    %c0_65 = arith.constant 0 : index
    %c0_66 = arith.constant 0 : index
    %126 = vector.load %arg11[%c0_65, %c0_66] : memref<1x8xf32, #tpu.memory_space<vmem>>, vector<1x8xf32>
    %127 = vector.broadcast %126 : vector<1x8xf32> to vector<256x8xf32>
    %128 = arith.addf %125, %127 : vector<256x8xf32>
    %cst_67 = arith.constant 0.000000e+00 : f32
    %129 = vector.broadcast %cst_67 : f32 to vector<256x8xf32>
    %130 = arith.cmpf oge, %128, %129 : vector<256x8xf32>
    %cst_68 = arith.constant 1.000000e-01 : f32
    %131 = vector.broadcast %cst_68 : f32 to vector<256x8xf32>
    %132 = arith.mulf %131, %128 : vector<256x8xf32>
    %133 = arith.select %130, %128, %132 : vector<256x8xi1>, vector<256x8xf32>
    %c0_69 = arith.constant 0 : index
    %c0_70 = arith.constant 0 : index
    %134 = vector.load %arg12[%c0_69, %c0_70] : memref<8x16xf32, #tpu.memory_space<vmem>>, vector<8x16xf32>
    %cst_71 = arith.constant dense<0.000000e+00> : vector<256x16xf32>
    %135 = tpu.matmul %123, %134, %cst_71 {dimension_numbers = #tpu.dot_dimension_numbers<[1], [0], [0], [1], [0, 0, 1, 1], [], []>} : vector<256x8xf32>, vector<8x16xf32>, vector<256x16xf32> -> vector<256x16xf32>
    %c0_72 = arith.constant 0 : index
    %c0_73 = arith.constant 0 : index
    %136 = vector.load %arg13[%c0_72, %c0_73] : memref<8x16xf32, #tpu.memory_space<vmem>>, vector<8x16xf32>
    %cst_74 = arith.constant dense<0.000000e+00> : vector<256x16xf32>
    %137 = tpu.matmul %133, %136, %cst_74 {dimension_numbers = #tpu.dot_dimension_numbers<[1], [0], [0], [1], [0, 0, 1, 1], [], []>} : vector<256x8xf32>, vector<8x16xf32>, vector<256x16xf32> -> vector<256x16xf32>
    %138 = arith.addf %135, %137 : vector<256x16xf32>
    %c0_75 = arith.constant 0 : index
    %c0_76 = arith.constant 0 : index
    %139 = vector.load %arg14[%c0_75, %c0_76] : memref<1x16xf32, #tpu.memory_space<vmem>>, vector<1x16xf32>
    %140 = vector.broadcast %139 : vector<1x16xf32> to vector<256x16xf32>
    %141 = arith.addf %138, %140 : vector<256x16xf32>
    %142 = arith.negf %141 : vector<256x16xf32>
    %143 = math.exp %142 : vector<256x16xf32>
    %cst_77 = arith.constant 1.000000e+00 : f32
    %144 = vector.broadcast %cst_77 : f32 to vector<256x16xf32>
    %145 = arith.addf %144, %143 : vector<256x16xf32>
    %146 = arith.divf %144, %145 : vector<256x16xf32>
    %147 = arith.mulf %141, %146 : vector<256x16xf32>
    %148 = vector.shape_cast %147 : vector<256x16xf32> to vector<16x16x16xf32>
    %c0_78 = arith.constant 0 : index
    %c0_79 = arith.constant 0 : index
    %c0_80 = arith.constant 0 : index
    %c0_81 = arith.constant 0 : index
    %149 = vector.load %arg15[%c0_78, %c0_79, %c0_80, %c0_81] : memref<1x16x16x16xf32, #tpu.memory_space<vmem>>, vector<1x16x16x16xf32>
    %150 = vector.shape_cast %149 : vector<1x16x16x16xf32> to vector<16x16x16xf32>
    %151 = vector.shape_cast %148 : vector<16x16x16xf32> to vector<1x16x16x16xf32>
    tpu.vector_store %arg15[%c0_78, %c0_79, %c0_80, %c0_81], %151 {strides = array<i32>} : memref<1x16x16x16xf32, #tpu.memory_space<vmem>>, vector<1x16x16x16xf32>,
    return
  }
  func.func @transform_0(%arg0: i32) -> (i32, i32, i32, i32) {
    %c0_i32 = arith.constant 0 : i32
    %c0_i32_0 = arith.constant 0 : i32
    %c0_i32_1 = arith.constant 0 : i32
    %c0_i32_2 = arith.constant 0 : i32
    return %arg0, %c0_i32, %c0_i32_0, %c0_i32_1 : i32, i32, i32, i32
  }
  func.func @transform_1(%arg0: i32) -> (i32, i32) {
    %c0_i32 = arith.constant 0 : i32
    %c0_i32_0 = arith.constant 0 : i32
    %c0_i32_1 = arith.constant 0 : i32
    return %c0_i32, %c0_i32_0 : i32, i32
  }
  func.func @transform_2(%arg0: i32) -> (i32, i32) {
    %c0_i32 = arith.constant 0 : i32
    %c0_i32_0 = arith.constant 0 : i32
    %c0_i32_1 = arith.constant 0 : i32
    return %c0_i32, %c0_i32_0 : i32, i32
  }
  func.func @transform_3(%arg0: i32) -> (i32, i32, i32) {
    %c0_i32 = arith.constant 0 : i32
    %c0_i32_0 = arith.constant 0 : i32
    %c0_i32_1 = arith.constant 0 : i32
    %c0_i32_2 = arith.constant 0 : i32
    return %c0_i32, %c0_i32_0, %c0_i32_1 : i32, i32, i32
  }
  func.func @transform_4(%arg0: i32) -> (i32, i32, i32) {
    %c0_i32 = arith.constant 0 : i32
    %c0_i32_0 = arith.constant 0 : i32
    %c0_i32_1 = arith.constant 0 : i32
    %c0_i32_2 = arith.constant 0 : i32
    return %c0_i32, %c0_i32_0, %c0_i32_1 : i32, i32, i32
  }
  func.func @transform_5(%arg0: i32) -> (i32, i32, i32) {
    %c0_i32 = arith.constant 0 : i32
    %c0_i32_0 = arith.constant 0 : i32
    %c0_i32_1 = arith.constant 0 : i32
    %c0_i32_2 = arith.constant 0 : i32
    return %c0_i32, %c0_i32_0, %c0_i32_1 : i32, i32, i32
  }
  func.func @transform_6(%arg0: i32) -> (i32, i32, i32) {
    %c0_i32 = arith.constant 0 : i32
    %c0_i32_0 = arith.constant 0 : i32
    %c0_i32_1 = arith.constant 0 : i32
    %c0_i32_2 = arith.constant 0 : i32
    return %c0_i32, %c0_i32_0, %c0_i32_1 : i32, i32, i32
  }
  func.func @transform_7(%arg0: i32) -> (i32, i32) {
    %c0_i32 = arith.constant 0 : i32
    %c0_i32_0 = arith.constant 0 : i32
    %c0_i32_1 = arith.constant 0 : i32
    return %c0_i32, %c0_i32_0 : i32, i32
  }
  func.func @transform_8(%arg0: i32) -> (i32, i32) {
    %c0_i32 = arith.constant 0 : i32
    %c0_i32_0 = arith.constant 0 : i32
    %c0_i32_1 = arith.constant 0 : i32
    return %c0_i32, %c0_i32_0 : i32, i32
  }
  func.func @transform_9(%arg0: i32) -> (i32, i32) {
    %c0_i32 = arith.constant 0 : i32
    %c0_i32_0 = arith.constant 0 : i32
    %c0_i32_1 = arith.constant 0 : i32
    return %c0_i32, %c0_i32_0 : i32, i32
  }
  func.func @transform_10(%arg0: i32) -> (i32, i32) {
    %c0_i32 = arith.constant 0 : i32
    %c0_i32_0 = arith.constant 0 : i32
    %c0_i32_1 = arith.constant 0 : i32
    return %c0_i32, %c0_i32_0 : i32, i32
  }
  func.func @transform_11(%arg0: i32) -> (i32, i32) {
    %c0_i32 = arith.constant 0 : i32
    %c0_i32_0 = arith.constant 0 : i32
    %c0_i32_1 = arith.constant 0 : i32
    return %c0_i32, %c0_i32_0 : i32, i32
  }
  func.func @transform_12(%arg0: i32) -> (i32, i32) {
    %c0_i32 = arith.constant 0 : i32
    %c0_i32_0 = arith.constant 0 : i32
    %c0_i32_1 = arith.constant 0 : i32
    return %c0_i32, %c0_i32_0 : i32, i32
  }
  func.func @transform_13(%arg0: i32) -> (i32, i32) {
    %c0_i32 = arith.constant 0 : i32
    %c0_i32_0 = arith.constant 0 : i32
    %c0_i32_1 = arith.constant 0 : i32
    return %c0_i32, %c0_i32_0 : i32, i32
  }
  func.func @transform_14(%arg0: i32) -> (i32, i32, i32, i32) {
    %c0_i32 = arith.constant 0 : i32
    %c0_i32_0 = arith.constant 0 : i32
    %c0_i32_1 = arith.constant 0 : i32
    %c0_i32_2 = arith.constant 0 : i32
    return %arg0, %c0_i32, %c0_i32_0, %c0_i32_1 : i32, i32, i32, i32
  }
}

</mosaic_0001>

<bundles_post_ra>
// kernel: bottleneck_csp_forward.1
= control target key start
LH: loop header
LB: loop body
LE: loop exit
PB: predicated region body
PF: predicated region fallthrough
CT: control target
= control target key end

     0   :  { %s10188_s29 = smov 0   ;;  %s14519_s0 = inlined_call_operand.vmem [shape: f32[2,16,16,16], index: 0, kind: input, shape index: {}]   ;;  %s14520_s1 = inlined_call_operand.vmem [shape: f32[16,8], index: 1, kind: input, shape index: {}]   ;;  %s14521_s2 = inlined_call_operand.vmem [shape: f32[1,8], index: 2, kind: input, shape index: {}]   ;;  %s14522_s3 = inlined_call_operand.vmem [shape: f32[2,8,8], index: 3, kind: input, shape index: {}]   ;;  %s14523_s4 = inlined_call_operand.vmem [shape: f32[2,1,8], index: 4, kind: input, shape index: {}]   ;;  %s14524_s5 = inlined_call_operand.vmem [shape: f32[2,72,8], index: 5, kind: input, shape index: {}]   ;;  %s14525_s6 = inlined_call_operand.vmem [shape: f32[2,1,8], index: 6, kind: input, shape index: {}]   ;;  %s14526_s7 = inlined_call_operand.vmem [shape: f32[8,8], index: 7, kind: input, shape index: {}]   ;;  %s14527_s8 = inlined_call_operand.vmem [shape: f32[1,8], index: 8, kind: input, shape index: {}]   ;;  %s14528_s9 = inlined_call_operand.vmem [shape: f32[16,8], index: 9, kind: input, shape index: {}]   ;;  %s14529_s10 = inlined_call_operand.vmem [shape: f32[1,8], index: 10, kind: input, shape index: {}]   ;;  %s14530_s11 = inlined_call_operand.vmem [shape: f32[8,16], index: 11, kind: input, shape index: {}]   ;;  %s14531_s12 = inlined_call_operand.vmem [shape: f32[8,16], index: 12, kind: input, shape index: {}]   ;;  %s14532_s13 = inlined_call_operand.vmem [shape: f32[1,16], index: 13, kind: input, shape index: {}]   ;;  %s14533_s14 = inlined_call_operand.vmem [shape: f32[2,16,16,16], index: 14, kind: output, shape index: {}]  }
   0x1 LB: > { %s7854_s30 = sadd.s32 4294967295, %s10102_s29   ;;  %p7858_p0 = scmp.ge.s32.totalorder %s10102_s29, 1  ;;  %s10102_s29 = sphi %s10188_s29, %s24_s29  }
   0x2   : > { %p412_p1 = scmp.lt.s32.totalorder %s10102_s29, 3 }
   0x4   : > { %p413_p2 = pnand %p7858_p0, %p412_p1 }
   0x6   : > { %416 = sbr.rel (%p413_p2) target bundleno = 2502 (0x9c6), region = 76 }
   0xd   : > { %v500_v0 = vld [vmem:[%s14520_s1] sm:$0xff]  ;;  %v501_v1 = vld [vmem:[%s14520_s1 + $0x8] sm:$0xff]  ;;  %p458_p3 = scmp.lt.s32.totalorder %s7854_s30, 1  ;;  %vm509_vm0 = vcmask 130048   ;;  %vm1055_vm1 = vcmask 64512   ;;  %vm1058_vm2 = vcmask 58368  }
   0xe   : > { %v9168_v2 = vpack.c.bf16 %v501_v1, %v500_v0  ;;  %v1111_v35 = vld [vmem:[%s14522_s3] sm:$0xff]  ;;  %v10104_v36 = vmov 0.0   ;;  %s10105_s27 = smov 48   ;;  %vm1799_vm3 = vcmask 1046528   ;;  %vm1880_vm4 = vcmask 1045504   ;;  %s10106_s28 = smov 8  }
   0xf   : > { %s14639_s30 = smov (!%p458_p3, %s7854_s30), 1  ;;  %1061 = vst.msk [vmem:[#allocation2 + $0x20] sm:$0xff] %vm1055_vm1, %v10104_v36  ;;  %1056 = vst.msk [vmem:[#allocation2] sm:$0xff] %vm1055_vm1, %v10104_v36  ;;  %v10336_v37 = vld [vmem:[%s14521_s2] ss:$0 sm:$0xff]  ;;  %s10107_s15 = smov 16  }
  0x10   : > { %9169 = vmatprep.subr.bf16.mxu0 %v9168_v2  ;;  %9208 = vmatprep.subr.bf16.mxu1 %v9168_v2  ;;  %s8365_s19 = sshll.u32 %s14639_s30, 8  ;;  %1062 = vst.msk [vmem:[#allocation2 + $0x28] sm:$0x3] %vm1058_vm2, %v10104_v36  ;;  %1059 = vst.msk [vmem:[#allocation2 + $0x10] sm:$0x3] %vm1058_vm2, %v10104_v36  ;;  %s10108_s16 = smov 56  }
  0x11   : > { %9171 = vmatpush3.bf16.msra.mxu0 %v9168_v2  ;;  %9209 = vmatpush3.bf16.msra.mxu1 %v9168_v2  ;;  %s10210_s22 = scalar_lea.vmem %s14519_s0, %s8365_s19  ;;  %1057 = vst.msk [vmem:[#allocation2 + $0x8] sm:$0xff] %vm1055_vm1, %v10104_v36  ;;  %1060 = vst.msk [vmem:[#allocation2 + $0x18] sm:$0xff] %vm1055_vm1, %v10104_v36  ;;  %s10109_s20 = smov 24   ;;  %vm2819_vm5 = vcmask 195584   ;;  %vm2852_vm6 = vcmask 261120   ;;  %vm2885_vm7 = vcmask 326656  }
  0x12   : > { %v468_v3 = vld [vmem:[%s10210_s22] sm:$0xff]  ;;  %v469_v4 = vld [vmem:[%s10210_s22 + $0x8] sm:$0xff]  ;;  %v470_v5 = vld [vmem:[%s10210_s22 + $0x10] sm:$0xff]  ;;  %8734 = vmatprep.subr.mxu1 %v1111_v35  ;;  %1063 = vst.msk [vmem:[#allocation2 + $0x30] sm:$0xff] %vm1055_vm1, %v10104_v36  ;;  %s10110_s21 = smov 32   ;;  %s10111_s23 = smov 40  }
  0x13   : > { %8686 = vmatprep.mubr.msk.f32.mxu0 %vm509_vm0, %v468_v3  ;;  %v471_v6 = vld [vmem:[%s10210_s22 + $0x18] sm:$0xff]  ;;  %v472_v7 = vld [vmem:[%s10210_s22 + $0x20] sm:$0xff]  ;;  %v485_v9 = vld [vmem:[%s10210_s22 + $0x88] sm:$0xff]  ;;  %1064 = vst.msk [vmem:[#allocation2 + $0x38] sm:$0xff] %vm1055_vm1, %v10104_v36  ;;  %s10112_s24 = smov 64   ;;  %vm2918_vm8 = vcmask 392192  }
  0x14   : > { %8687 = vmatmul.mubr.msk.f32.vlgmr.msra.gmra.mrb[0].mxu0 %vm509_vm0, %v469_v4  ;;  %v484_v8 = vld [vmem:[%s10210_s22 + $0x80] sm:$0xff]  ;;  %v486_v10 = vld [vmem:[%s10210_s22 + $0x90] sm:$0xff]  ;;  %v473_v11 = vld [vmem:[%s10210_s22 + $0x28] sm:$0xff]  ;;  %1065 = vst.msk [vmem:[#allocation2 + $0x40] sm:$0x3] %vm1058_vm2, %v10104_v36  ;;  %vm2951_vm9 = vcmask 457728  }
  0x15   : > { %8689 = vmatprep.mubr.msk.f32.mxu0 %vm509_vm0, %v470_v5  ;;  %8710 = vmatprep.mubr.msk.f32.mxu1 %vm509_vm0, %v484_v8  ;;  %v474_v12 = vld [vmem:[%s10210_s22 + $0x30] sm:$0xff]  ;;  %v487_v13 = vld [vmem:[%s10210_s22 + $0x98] sm:$0xff]  ;;  %v488_v14 = vld [vmem:[%s10210_s22 + $0xa0] sm:$0xff]  ;;  %1066 = vst.msk [vmem:[#allocation2 + $0x48] sm:$0xff] %vm1055_vm1, %v10104_v36  ;;  %vm2984_vm10 = vcmask 523264   ;;  %vm3033_vm11 = vcmask 588800  }
  0x16   : > { %8711 = vmatmul.mubr.msk.f32.vlgmr.msra.gmra.mrb[0].mxu1 %vm509_vm0, %v485_v9  ;;  %v475_v15 = vld [vmem:[%s10210_s22 + $0x38] sm:$0xff]  ;;  %v476_v16 = vld [vmem:[%s10210_s22 + $0x40] sm:$0xff]  ;;  %v489_v17 = vld [vmem:[%s10210_s22 + $0xa8] sm:$0xff]  ;;  %1067 = vst.msk [vmem:[#allocation2 + $0x50] sm:$0xff] %vm1055_vm1, %v10104_v36 }
  0x17   : > { %8713 = vmatprep.mubr.msk.f32.mxu1 %vm509_vm0, %v486_v10  ;;  %v490_v18 = vld [vmem:[%s10210_s22 + $0xb0] sm:$0xff]  ;;  %v477_v19 = vld [vmem:[%s10210_s22 + $0x48] sm:$0xff]  ;;  %v491_v21 = vld [vmem:[%s10210_s22 + $0xb8] sm:$0xff]  ;;  %8735 = vmatpush3.msra.mxu1 %v1111_v35  ;;  %1068 = vst.msk [vmem:[#allocation2 + $0x58] sm:$0x3] %vm1058_vm2, %v10104_v36 }
  0x18   : > { %8690 = vmatmul.mubr.msk.f32.gmra.mrb[2].mxu0 %vm509_vm0, %v471_v6  ;;  %v478_v20 = vld [vmem:[%s10210_s22 + $0x50] sm:$0xff]  ;;  %v492_v22 = vld [vmem:[%s10210_s22 + $0xc0] sm:$0xff]  ;;  %v479_v23 = vld [vmem:[%s10210_s22 + $0x58] sm:$0xff]  ;;  %1069 = vst.msk [vmem:[#allocation2 + $0x60] sm:$0xff] %vm1055_vm1, %v10104_v36 }
  0x19   : > { %8692 = vmatprep.mubr.msk.f32.mxu0 %vm509_vm0, %v472_v7  ;;  %v480_v24 = vld [vmem:[%s10210_s22 + $0x60] sm:$0xff]  ;;  %v493_v25 = vld [vmem:[%s10210_s22 + $0xc8] sm:$0xff]  ;;  %v494_v26 = vld [vmem:[%s10210_s22 + $0xd0] sm:$0xff]  ;;  %1070 = vst.msk [vmem:[#allocation2 + $0x68] sm:$0xff] %vm1055_vm1, %v10104_v36 }
  0x1a   : > { %8714 = vmatmul.mubr.msk.f32.gmra.mrb[2].mxu1 %vm509_vm0, %v487_v13  ;;  %v481_v27 = vld [vmem:[%s10210_s22 + $0x68] sm:$0xff]  ;;  %v482_v28 = vld [vmem:[%s10210_s22 + $0x70] sm:$0xff]  ;;  %v495_v29 = vld [vmem:[%s10210_s22 + $0xd8] sm:$0xff]  ;;  %1071 = vst.msk [vmem:[#allocation2 + $0x70] sm:$0x3] %vm1058_vm2, %v10104_v36 }
  0x1b   : > { %8716 = vmatprep.mubr.msk.f32.mxu1 %vm509_vm0, %v488_v14  ;;  %v496_v30 = vld [vmem:[%s10210_s22 + $0xe0] sm:$0xff]  ;;  %v483_v31 = vld [vmem:[%s10210_s22 + $0x78] sm:$0xff]  ;;  %v497_v32 = vld [vmem:[%s10210_s22 + $0xe8] sm:$0xff]  ;;  %1072 = vst.msk [vmem:[#allocation2 + $0x78] sm:$0xff] %vm1055_vm1, %v10104_v36 }
  0x1c   : > { %8693 = vmatmul.mubr.msk.f32.gmra.mrb[4].mxu0 %vm509_vm0, %v473_v11  ;;  %v498_v33 = vld [vmem:[%s10210_s22 + $0xf0] sm:$0xff]  ;;  %v499_v34 = vld [vmem:[%s10210_s22 + $0xf8] sm:$0xff]  ;;  %1073 = vst.msk [vmem:[#allocation2 + $0x80] sm:$0xff] %vm1055_vm1, %v10104_v36  ;;  %1075 = vst.msk [vmem:[#allocation2 + $0x90] sm:$0xff] %vm1055_vm1, %v10104_v36 }
  0x1d   : > { %8695 = vmatprep.mubr.msk.f32.mxu0 %vm509_vm0, %v474_v12  ;;  %1074 = vst.msk [vmem:[#allocation2 + $0x88] sm:$0x3] %vm1058_vm2, %v10104_v36  ;;  %1077 = vst.msk [vmem:[#allocation2 + $0xa0] sm:$0x3] %vm1058_vm2, %v10104_v36 }
  0x1e   : > { %8717 = vmatmul.mubr.msk.f32.gmra.mrb[4].mxu1 %vm509_vm0, %v489_v17  ;;  %1076 = vst.msk [vmem:[#allocation2 + $0x98] sm:$0xff] %vm1055_vm1, %v10104_v36  ;;  %1078 = vst.msk [vmem:[#allocation2 + $0xa8] sm:$0xff] %vm1055_vm1, %v10104_v36 }
  0x1f   : > { %8719 = vmatprep.mubr.msk.f32.mxu1 %vm509_vm0, %v490_v18  ;;  %1079 = vst.msk [vmem:[#allocation2 + $0xb0] sm:$0xff] %vm1055_vm1, %v10104_v36  ;;  %1081 = vst.msk [vmem:[#allocation2 + $0xc0] sm:$0xff] %vm1055_vm1, %v10104_v36 }
  0x20   : > { %8696 = vmatmul.mubr.msk.f32.gmra.mrb[6].mxu0 %vm509_vm0, %v475_v15  ;;  %1080 = vst.msk [vmem:[#allocation2 + $0xb8] sm:$0x3] %vm1058_vm2, %v10104_v36  ;;  %1083 = vst.msk [vmem:[#allocation2 + $0xd0] sm:$0x3] %vm1058_vm2, %v10104_v36 }
  0x21   : > { %8698 = vmatprep.mubr.msk.f32.mxu0 %vm509_vm0, %v476_v16  ;;  %1082 = vst.msk [vmem:[#allocation2 + $0xc8] sm:$0xff] %vm1055_vm1, %v10104_v36  ;;  %1084 = vst.msk [vmem:[#allocation2 + $0xd8] sm:$0xff] %vm1055_vm1, %v10104_v36 }
  0x22   : > { %8720 = vmatmul.mubr.msk.f32.gmra.mrb[6].mxu1 %vm509_vm0, %v491_v21  ;;  %1085 = vst.msk [vmem:[#allocation2 + $0xe0] sm:$0xff] %vm1055_vm1, %v10104_v36  ;;  %1087 = vst.msk [vmem:[#allocation2 + $0xf0] sm:$0xff] %vm1055_vm1, %v10104_v36 }
  0x23   : > { %8722 = vmatprep.mubr.msk.f32.mxu1 %vm509_vm0, %v492_v22  ;;  %1086 = vst.msk [vmem:[#allocation2 + $0xe8] sm:$0x3] %vm1058_vm2, %v10104_v36  ;;  %1089 = vst.msk [vmem:[#allocation2 + $0x100] sm:$0x3] %vm1058_vm2, %v10104_v36 }
  0x24   : > { %8699 = vmatmul.mubr.msk.f32.gmra.mrb[8].mxu0 %vm509_vm0, %v477_v19  ;;  %1088 = vst.msk [vmem:[#allocation2 + $0xf8] sm:$0xff] %vm1055_vm1, %v10104_v36  ;;  %1090 = vst.msk [vmem:[#allocation2 + $0x108] sm:$0xff] %vm1055_vm1, %v10104_v36 }
  0x25   : > { %8701 = vmatprep.mubr.msk.f32.mxu0 %vm509_vm0, %v478_v20  ;;  %1091 = vst.msk [vmem:[#allocation2 + $0x110] sm:$0xff] %vm1055_vm1, %v10104_v36  ;;  %1093 = vst.msk [vmem:[#allocation2 + $0x120] sm:$0xff] %vm1055_vm1, %v10104_v36 }
  0x26   : > { %8723 = vmatmul.mubr.msk.f32.gmra.mrb[8].mxu1 %vm509_vm0, %v493_v25  ;;  %1092 = vst.msk [vmem:[#allocation2 + $0x118] sm:$0x3] %vm1058_vm2, %v10104_v36  ;;  %1095 = vst.msk [vmem:[#allocation2 + $0x130] sm:$0x3] %vm1058_vm2, %v10104_v36 }
  0x27   : > { %8725 = vmatprep.mubr.msk.f32.mxu1 %vm509_vm0, %v494_v26  ;;  %1094 = vst.msk [vmem:[#allocation2 + $0x128] sm:$0xff] %vm1055_vm1, %v10104_v36  ;;  %1096 = vst.msk [vmem:[#allocation2 + $0x138] sm:$0xff] %vm1055_vm1, %v10104_v36 }
  0x28   : > { %8702 = vmatmul.mubr.msk.f32.gmra.mrb[10].mxu0 %vm509_vm0, %v479_v23  ;;  %1097 = vst.msk [vmem:[#allocation2 + $0x140] sm:$0xff] %vm1055_vm1, %v10104_v36  ;;  %1099 = vst.msk [vmem:[#allocation2 + $0x150] sm:$0xff] %vm1055_vm1, %v10104_v36 }
  0x29   : > { %8704 = vmatprep.mubr.msk.f32.mxu0 %vm509_vm0, %v480_v24  ;;  %1098 = vst.msk [vmem:[#allocation2 + $0x148] sm:$0x3] %vm1058_vm2, %v10104_v36  ;;  %1101 = vst.msk [vmem:[#allocation2 + $0x160] sm:$0x3] %vm1058_vm2, %v10104_v36 }
  0x2a   : > { %8726 = vmatmul.mubr.msk.f32.gmra.mrb[10].mxu1 %vm509_vm0, %v495_v29  ;;  %1100 = vst.msk [vmem:[#allocation2 + $0x158] sm:$0xff] %vm1055_vm1, %v10104_v36  ;;  %1102 = vst.msk [vmem:[#allocation2 + $0x168] sm:$0xff] %vm1055_vm1, %v10104_v36 }
  0x2b   : > { %8728 = vmatprep.mubr.msk.f32.mxu1 %vm509_vm0, %v496_v30  ;;  %1103 = vst.msk [vmem:[#allocation2 + $0x170] sm:$0xff] %vm1055_vm1, %v10104_v36  ;;  %1105 = vst.msk [vmem:[#allocation2 + $0x180] sm:$0xff] %vm1055_vm1, %v10104_v36 }
  0x2c   : > { %8705 = vmatmul.mubr.msk.f32.gmra.mrb[12].mxu0 %vm509_vm0, %v481_v27  ;;  %1104 = vst.msk [vmem:[#allocation2 + $0x178] sm:$0x3] %vm1058_vm2, %v10104_v36  ;;  %1107 = vst.msk [vmem:[#allocation2 + $0x190] sm:$0x3] %vm1058_vm2, %v10104_v36 }
  0x2d   : > { %8707 = vmatprep.mubr.msk.f32.mxu0 %vm509_vm0, %v482_v28  ;;  %1106 = vst.msk [vmem:[#allocation2 + $0x188] sm:$0xff] %vm1055_vm1, %v10104_v36  ;;  %1108 = vst.msk [vmem:[#allocation2 + $0x198] sm:$0xff] %vm1055_vm1, %v10104_v36 }
  0x2e   : > { %8729 = vmatmul.mubr.msk.f32.gmra.mrb[12].mxu1 %vm509_vm0, %v497_v32  ;;  %1109 = vst.msk [vmem:[#allocation2 + $0x1a0] sm:$0xff] %vm1055_vm1, %v10104_v36 }
  0x2f   : > { %8731 = vmatprep.mubr.msk.f32.mxu1 %vm509_vm0, %v498_v33  ;;  %1110 = vst.msk [vmem:[#allocation2 + $0x1a8] sm:$0x3] %vm1058_vm2, %v10104_v36 }
  0x30   : > { %8708 = vmatmul.mubr.msk.f32.gmra.mrb[14].mxu0 %vm509_vm0, %v483_v31 }
  0x32   : > { %8732 = vmatmul.mubr.msk.f32.gmra.mrb[14].mxu1 %vm509_vm0, %v499_v34 }
  0xe7   : > { %v8688_v38 = vpop.f32.mrb[0].mxu0 }
  0xe8   : > { %v10339_v39 = vadd.f32 %v8688_v38, %v10336_v37  ;;  %v672_v40 = vpop.f32.mrb[1].mxu0 }
  0xe9   : > { %v10342_v41 = vadd.f32 %v10336_v37, %v672_v40  ;;  %v8712_v47 = vpop.f32.mrb[0].mxu1 }
  0xea   : > { %v7897_v42 = vmul.f32 -1.442695, %v10339_v39  ;;  %v10353_v49 = vadd.f32 %v8712_v47, %v10336_v37  ;;  %v752_v50 = vpop.f32.mrb[1].mxu1 }
  0xeb   : > { %v7896_v43 = vmul.f32 -1.442695, %v10342_v41  ;;  %v8691_v44 = vpop.f32.mrb[2].mxu0  ;;  %v10357_v52 = vadd.f32 %v10336_v37, %v752_v50 }
  0xec   : > { %9259 = vpow2.f32 %v7897_v42  ;;  %v10347_v45 = vadd.f32 %v8691_v44, %v10336_v37  ;;  %v682_v46 = vpop.f32.mrb[3].mxu0  ;;  %v7913_v55 = vmul.f32 -1.442695, %v10353_v49 }
  0xed   : > { %9261 = vpow2.f32 %v7896_v43  ;;  %v10350_v48 = vadd.f32 %v10336_v37, %v682_v46  ;;  %v7912_v58 = vmul.f32 -1.442695, %v10357_v52  ;;  %v8715_v59 = vpop.f32.mrb[2].mxu1 }
  0xee   : > { %v7899_v51 = vmul.f32 -1.442695, %v10347_v45  ;;  %v10369_v61 = vadd.f32 %v8715_v59, %v10336_v37  ;;  %v762_v62 = vpop.f32.mrb[3].mxu1 }
  0xef   : > { %v7898_v53 = vmul.f32 -1.442695, %v10350_v48  ;;  %v8694_v54 = vpop.f32.mrb[4].mxu0  ;;  %v10373_v0 = vadd.f32 %v10336_v37, %v762_v62 }
  0xf0   : > { %9263 = vpow2.f32 %v7899_v51  ;;  %v10362_v56 = vadd.f32 %v8694_v54, %v10336_v37  ;;  %v692_v57 = vpop.f32.mrb[5].mxu0  ;;  %v7915_v3 = vmul.f32 -1.442695, %v10369_v61 }
  0xf1   : > { %9265 = vpow2.f32 %v7898_v53  ;;  %v10366_v60 = vadd.f32 %v10336_v37, %v692_v57  ;;  %v7914_v6 = vmul.f32 -1.442695, %v10373_v0  ;;  %v10381_v7 = vpop.f32.mrb[4].mxu1 }
  0xf2   : > { %v7901_v63 = vmul.f32 -1.442695, %v10362_v56  ;;  %9267 = vpow2.f32 %v7913_v55  ;;  %v10386_v9 = vpop.f32.mrb[5].mxu1 }
  0xf3   : > { %v7900_v1 = vmul.f32 -1.442695, %v10366_v60  ;;  %v8697_v2 = vpop.f32.mrb[6].mxu0  ;;  %9269 = vpow2.f32 %v7912_v58 }
  0xf4   : > { %9271 = vpow2.f32 %v7901_v63  ;;  %v10378_v4 = vadd.f32 %v8697_v2, %v10336_v37  ;;  %v702_v5 = vpop.f32.mrb[7].mxu0 }
  0xf5   : > { %9273 = vpow2.f32 %v7900_v1  ;;  %v10384_v8 = vadd.f32 %v10336_v37, %v702_v5  ;;  %v10393_v19 = vpop.f32.mrb[6].mxu1 }
  0xf6   : > { %v9260_v10 = vpop.eup %9259  ;;  %v7903_v11 = vmul.f32 -1.442695, %v10378_v4  ;;  %9275 = vpow2.f32 %v7915_v3  ;;  %v10398_v21 = vpop.f32.mrb[7].mxu1 }
  0xf7   : > { %v9262_v12 = vpop.eup %9261  ;;  %v928_v13 = vadd.f32 1.0, %v9260_v10  ;;  %v7902_v14 = vmul.f32 -1.442695, %v10384_v8  ;;  %v8700_v15 = vpop.f32.mrb[8].mxu0  ;;  %9277 = vpow2.f32 %v7914_v6 }
  0xf8   : > { %v927_v16 = vadd.f32 1.0, %v9262_v12  ;;  %9279 = vpow2.f32 %v7903_v11  ;;  %v10391_v17 = vadd.f32 %v8700_v15, %v10336_v37  ;;  %v712_v18 = vpop.f32.mrb[9].mxu0 }
  0xf9   : > { %9281 = vrcp.f32 %v928_v13  ;;  %v10396_v20 = vadd.f32 %v10336_v37, %v712_v18  ;;  %v10405_v32 = vpop.f32.mrb[8].mxu1 }
  0xfa   : > { %v9264_v22 = vpop.eup %9263  ;;  %9283 = vrcp.f32 %v927_v16  ;;  %v7905_v23 = vmul.f32 -1.442695, %v10391_v17  ;;  %v10410_v35 = vpop.f32.mrb[9].mxu1 }
  0xfb   : > { %v9266_v24 = vpop.eup %9265  ;;  %v930_v25 = vadd.f32 1.0, %v9264_v22  ;;  %9285 = vpow2.f32 %v7902_v14  ;;  %v7904_v26 = vmul.f32 -1.442695, %v10396_v20  ;;  %v8703_v27 = vpop.f32.mrb[10].mxu0 }
  0xfc   : > { %v9268_v28 = vpop.eup %9267  ;;  %v929_v29 = vadd.f32 1.0, %v9266_v24  ;;  %9287 = vpow2.f32 %v7905_v23  ;;  %v10403_v30 = vadd.f32 %v8703_v27, %v10336_v37  ;;  %v722_v31 = vpop.f32.mrb[11].mxu0 }
  0xfd   : > { %v9270_v33 = vpop.eup %9269  ;;  %9289 = vrcp.f32 %v930_v25  ;;  %v10408_v34 = vadd.f32 %v10336_v37, %v722_v31  ;;  %v10417_v53 = vpop.f32.mrb[10].mxu1  ;;  %v944_v3 = vadd.f32 1.0, %v9268_v28 }
  0xfe   : > { %v9272_v36 = vpop.eup %9271  ;;  %9291 = vrcp.f32 %v929_v29  ;;  %v7907_v38 = vmul.f32 -1.442695, %v10403_v30  ;;  %v10422_v57 = vpop.f32.mrb[11].mxu1 }
  0xff   : > { %v9274_v40 = vpop.eup %9273  ;;  %v932_v42 = vadd.f32 1.0, %v9272_v36  ;;  %9293 = vpow2.f32 %v7904_v26  ;;  %v7906_v43 = vmul.f32 -1.442695, %v10408_v34  ;;  %v8706_v44 = vpop.f32.mrb[12].mxu0 }
 0x100   : > { %v9276_v46 = vpop.eup %9275  ;;  %v931_v47 = vadd.f32 1.0, %v9274_v40  ;;  %9295 = vpow2.f32 %v7907_v38  ;;  %v10415_v50 = vadd.f32 %v8706_v44, %v10336_v37  ;;  %v732_v51 = vpop.f32.mrb[13].mxu0  ;;  %v943_v40 = vadd.f32 1.0, %v9270_v33 }
 0x101   : > { %v9278_v54 = vpop.eup %9277  ;;  %9297 = vrcp.f32 %v932_v42  ;;  %v10420_v55 = vadd.f32 %v10336_v37, %v732_v51  ;;  %v10429_v11 = vpop.f32.mrb[12].mxu1  ;;  %v946_v44 = vadd.f32 1.0, %v9276_v46  ;;  %v10474_v46 = vadd.f32 %v10336_v37, %v10386_v9 }
 0x102   : > { %v9280_v58 = vpop.eup %9279  ;;  %9299 = vrcp.f32 %v931_v47  ;;  %v7909_v59 = vmul.f32 -1.442695, %v10415_v50  ;;  %v10437_v15 = vpop.f32.mrb[13].mxu1 }
 0x103   : > { %v9282_v62 = vpop.eup %9281  ;;  %v934_v63 = vadd.f32 1.0, %v9280_v58  ;;  %9301 = vpow2.f32 %v7906_v43  ;;  %v7908_v1 = vmul.f32 -1.442695, %v10420_v55  ;;  %v8709_v2 = vpop.f32.mrb[14].mxu0 }
 0x104   : > { %v9284_v5 = vpop.eup %9283  ;;  %9303 = vpow2.f32 %v7909_v59  ;;  %v10427_v6 = vadd.f32 %v8709_v2, %v10336_v37  ;;  %v742_v10 = vpop.f32.mrb[15].mxu0  ;;  %v10440_v18 = vmul.f32 %v9282_v62, %v10339_v39  ;;  %v945_v59 = vadd.f32 1.0, %v9278_v54 }
 0x105   : > { %v9286_v12 = vpop.eup %9285  ;;  %v10432_v13 = vmul.f32 %v9284_v5, %v10342_v41  ;;  %9305 = vrcp.f32 %v934_v63  ;;  %v10435_v14 = vadd.f32 %v10336_v37, %v742_v10  ;;  %v10448_v27 = vpop.f32.mrb[14].mxu1  ;;  %v10478_v62 = vadd.f32 %v10393_v19, %v10336_v37 }
 0x106   : > { %v9288_v16 = vpop.eup %9287  ;;  %v933_v22 = vadd.f32 1.0, %v9286_v12  ;;  %9307 = vpow2.f32 %v7908_v1  ;;  %v7911_v23 = vmul.f32 -1.442695, %v10427_v6  ;;  %v10453_v29 = vpop.f32.mrb[15].mxu1  ;;  %v7916_v19 = vmul.f32 -1.442695, %v10474_v46 }
 0x107   : > { %v9290_v24 = vpop.eup %9289  ;;  %8736 = vmatprep.mubr.msk.f32.mxu1 %vm1055_vm1, %v10432_v13  ;;  %v936_v41 = vadd.f32 1.0, %v9288_v16  ;;  %v7910_v25 = vmul.f32 -1.442695, %v10435_v14  ;;  %9309 = vrcp.f32 %v944_v3  ;;  %v10490_v2 = vadd.f32 %v10336_v37, %v10398_v21 }
 0x108   : > { %v9292_v26 = vpop.eup %9291  ;;  %9311 = vrcp.f32 %v933_v22  ;;  %8737 = vmatmul.mubr.msk.f32.vlgmr.msra.gmra.mrb[16].mxu1 %vm1055_vm1, %v10440_v18  ;;  %v10456_v36 = vmul.f32 %v9290_v24, %v10347_v45  ;;  %v10467_v45 = vadd.f32 %v10381_v7, %v10336_v37  ;;  %v7919_v10 = vmul.f32 -1.442695, %v10478_v62 }
 0x109   : > { %v9294_v39 = vpop.eup %9293  ;;  %v10451_v28 = vmul.f32 %v9292_v26, %v10350_v48  ;;  %9313 = vrcp.f32 %v936_v41  ;;  %v10498_v12 = vadd.f32 %v10405_v32, %v10336_v37  ;;  %v10505_v21 = vadd.f32 %v10336_v37, %v10410_v35 }
 0x10a   : > { %v9296_v31 = vpop.eup %9295  ;;  %v935_v38 = vadd.f32 1.0, %v9294_v39  ;;  %9315 = vpow2.f32 %v7911_v23  ;;  %v7917_v9 = vmul.f32 -1.442695, %v10467_v45  ;;  %v10516_v41 = vadd.f32 %v10336_v37, %v10422_v57 }
 0x10b   : > { %v9298_v42 = vpop.eup %9297  ;;  %8739 = vmatprep.mubr.msk.f32.mxu1 %vm1055_vm1, %v10451_v28  ;;  %v938_v43 = vadd.f32 1.0, %v9296_v31  ;;  %9317 = vpow2.f32 %v7910_v25  ;;  %v7921_v26 = vmul.f32 -1.442695, %v10498_v12  ;;  %v10530_v57 = vadd.f32 %v10336_v37, %v10437_v15 }
 0x10c   : > { %v9300_v47 = vpop.eup %9299  ;;  %v10461_v48 = vmul.f32 %v9298_v42, %v10362_v56  ;;  %8740 = vmatmul.mubr.msk.f32.gmra.mrb[18].mxu1 %vm1055_vm1, %v10456_v36  ;;  %9319 = vrcp.f32 %v935_v38  ;;  %v7920_v38 = vmul.f32 -1.442695, %v10505_v21  ;;  %v10535_v42 = vadd.f32 %v10429_v11, %v10336_v37 }
 0x10d   : > { %v9302_v33 = vpop.eup %9301  ;;  %v10470_v51 = vmul.f32 %v9300_v47, %v10366_v60  ;;  %9321 = vrcp.f32 %v938_v43 }
 0x10e   : > { %v9304_v58 = vpop.eup %9303  ;;  %v937_v56 = vadd.f32 1.0, %v9302_v33  ;;  %9323 = vrcp.f32 %v943_v40  ;;  %v7924_v33 = vmul.f32 -1.442695, %v10530_v57 }
 0x10f   : > { %v9306_v63 = vpop.eup %9305  ;;  %8742 = vmatprep.mubr.msk.f32.mxu1 %vm1055_vm1, %v10470_v51  ;;  %v940_v7 = vadd.f32 1.0, %v9304_v58  ;;  %9325 = vrcp.f32 %v946_v44  ;;  %v10553_v58 = vadd.f32 %v10448_v27, %v10336_v37 }
 0x110   : > { %v9308_v60 = vpop.eup %9307  ;;  %8743 = vmatmul.mubr.msk.f32.gmra.mrb[20].mxu1 %vm1055_vm1, %v10461_v48  ;;  %9327 = vrcp.f32 %v937_v56  ;;  %v10493_v5 = vmul.f32 %v9306_v63, %v10378_v4  ;;  %v10509_v4 = vadd.f32 %v10417_v53, %v10336_v37 }
 0x111   : > { %v10485_v1 = vpop.eup %9309  ;;  %9329 = vrcp.f32 %v940_v7  ;;  %v939_v54 = vadd.f32 1.0, %v9308_v60 }
 0x112   : > { %v9312_v3 = vpop.eup %9311  ;;  %9331 = vrcp.f32 %v945_v59  ;;  %v7923_v40 = vmul.f32 -1.442695, %v10509_v4  ;;  %v10558_v59 = vadd.f32 %v10336_v37, %v10453_v29  ;;  %v7927_v37 = vmul.f32 -1.442695, %v10553_v58 }
 0x113   : > { %v9314_v16 = vpop.eup %9313  ;;  %v10501_v22 = vmul.f32 %v9312_v3, %v10384_v8  ;;  %9333 = vrcp.f32 %v939_v54  ;;  %v7918_v8 = vmul.f32 -1.442695, %v10490_v2 }
 0x114   : > { %v9316_v23 = vpop.eup %9315  ;;  %9335 = vpow2.f32 %v7917_v9  ;;  %v10519_v25 = vmul.f32 %v9314_v16, %v10391_v17 }
 0x115   : > { %v9318_v24 = vpop.eup %9317  ;;  %8745 = vmatprep.mubr.msk.f32.mxu1 %vm1055_vm1, %v10501_v22  ;;  %v942_v32 = vadd.f32 1.0, %v9316_v23  ;;  %9337 = vpow2.f32 %v7916_v19 }
 0x116   : > { %v9320_v35 = vpop.eup %9319  ;;  %8746 = vmatmul.mubr.msk.f32.gmra.mrb[22].mxu1 %vm1055_vm1, %v10493_v5  ;;  %v941_v53 = vadd.f32 1.0, %v9318_v24  ;;  %9339 = vpow2.f32 %v7919_v10 }
 0x117   : > { %v9322_v39 = vpop.eup %9321  ;;  %v10525_v31 = vmul.f32 %v9320_v35, %v10396_v20  ;;  %9341 = vrcp.f32 %v942_v32  ;;  %v7922_v20 = vmul.f32 -1.442695, %v10516_v41 }
 0x118   : > { %v9324_v17 = vpop.eup %9323  ;;  %9343 = vrcp.f32 %v941_v53  ;;  %v10543_v15 = vmul.f32 %v9322_v39, %v10403_v30  ;;  %v7925_v30 = vmul.f32 -1.442695, %v10535_v42 }
 0x119   : > { %v10537_v43 = vpop.eup %9325  ;;  %8748 = vmatprep.mubr.msk.f32.mxu1 %vm1055_vm1, %v10525_v31  ;;  %9345 = vpow2.f32 %v7918_v8  ;;  %v10583_v24 = vmul.f32 %v9324_v17, %v10357_v52 }
 0x11a   : > { %v9328_v44 = vpop.eup %9327  ;;  %8749 = vmatmul.mubr.msk.f32.gmra.mrb[24].mxu1 %vm1055_vm1, %v10519_v25  ;;  %9347 = vpow2.f32 %v7921_v26  ;;  %v10589_v26 = vmul.f32 %v10485_v1, %v10353_v49  ;;  %v10600_v49 = vmul.f32 %v10537_v43, %v10369_v61 }
 0x11b   : > { %v9330_v47 = vpop.eup %9329  ;;  %v10548_v11 = vmul.f32 %v9328_v44, %v10408_v34  ;;  %9349 = vpow2.f32 %v7920_v38  ;;  %14570 = vst [vmem:[#allocation5_spill] sm:$0xff] %v10583_v24 }
 0x11c   : > { %v9332_v56 = vpop.eup %9331  ;;  %9351 = vpow2.f32 %v7923_v40  ;;  %v10563_v7 = vmul.f32 %v9330_v47, %v10415_v50  ;;  %v7926_v50 = vmul.f32 -1.442695, %v10558_v59  ;;  %14571 = vst [vmem:[#allocation6_spill] sm:$0xff] %v10589_v26  ;;  %14573 = vst [vmem:[#allocation8_spill] sm:$0xff] %v10600_v49 }
 0x11d   : > { %v9334_v63 = vpop.eup %9333  ;;  %8751 = vmatprep.mubr.msk.f32.mxu1 %vm1055_vm1, %v10548_v11  ;;  %9353 = vpow2.f32 %v7922_v20  ;;  %v10594_v39 = vmul.f32 %v9332_v56, %v10373_v0 }
 0x11e   : > { %v9336_v34 = vpop.eup %9335  ;;  %v10566_v27 = vmul.f32 %v9334_v63, %v10420_v55  ;;  %8752 = vmatmul.mubr.msk.f32.gmra.mrb[26].mxu1 %vm1055_vm1, %v10543_v15  ;;  %9355 = vpow2.f32 %v7924_v33 }
 0x11f   : > { %v9338_v60 = vpop.eup %9337  ;;  %v948_v9 = vadd.f32 1.0, %v9336_v34  ;;  %9357 = vpow2.f32 %v7925_v30  ;;  %14572 = vst [vmem:[#allocation7_spill] sm:$0xff] %v10594_v39 }
 0x120   : > { %v9340_v29 = vpop.eup %9339  ;;  %8754 = vmatprep.mubr.msk.f32.mxu1 %vm1055_vm1, %v10566_v27  ;;  %v947_v54 = vadd.f32 1.0, %v9338_v60 }
 0x121   : > { %v9342_v19 = vpop.eup %9341  ;;  %9359 = vrcp.f32 %v948_v9  ;;  %v950_v55 = vadd.f32 1.0, %v9340_v29 }
 0x122   : > { %v9344_v3 = vpop.eup %9343  ;;  %v10575_v10 = vmul.f32 %v9342_v19, %v10427_v6  ;;  %8755 = vmatmul.mubr.msk.f32.gmra.mrb[28].mxu1 %vm1055_vm1, %v10563_v7  ;;  %9361 = vrcp.f32 %v947_v54 }
 0x123   : > { %v9346_v16 = vpop.eup %9345  ;;  %v10580_v23 = vmul.f32 %v9344_v3, %v10435_v14  ;;  %9363 = vpow2.f32 %v7927_v37 }
 0x124   : > { %14568 = vst [vmem:[#allocation3_spill] sm:$0xff] %v10575_v10  ;;  %v9348_v32 = vpop.eup %9347  ;;  %v949_v8 = vadd.f32 1.0, %v9346_v16  ;;  %9365 = vpow2.f32 %v7926_v50 }
 0x125   : > { %14569 = vst [vmem:[#allocation4_spill] sm:$0xff] %v10580_v23  ;;  %v9350_v35 = vpop.eup %9349  ;;  %9367 = vrcp.f32 %v950_v55  ;;  %v952_v53 = vadd.f32 1.0, %v9348_v32  ;;  %8757 = vmatprep.mubr.msk.f32.mxu1 %vm1055_vm1, %v10580_v23  ;;  %v1697_v32 = vld [vmem:[#allocation2] sm:$0xff] }
 0x126   : > { %v9352_v6 = vpop.eup %9351  ;;  %9369 = vrcp.f32 %v949_v8  ;;  %v951_v14 = vadd.f32 1.0, %v9350_v35  ;;  %8758 = vmatmul.mubr.msk.f32.gmra.mrb[30].mxu1 %vm1055_vm1, %v10575_v10  ;;  %v1698_v8 = vld [vmem:[#allocation2 + $0x8] sm:$0xff] }
 0x127   : > { %v9354_v52 = vpop.eup %9353  ;;  %8760 = vmatprep.mubr.msk.f32.mxu1 %vm1055_vm1, %v10583_v24  ;;  %v954_v40 = vadd.f32 1.0, %v9352_v6  ;;  %v1801_v35 = vrot.slane %v1698_v8, 1  ;;  %v1882_v6 = vrot.slane %v1698_v8, 2 }
 0x128   : > { %9371 = vrcp.f32 %v951_v14  ;;  %v953_v38 = vadd.f32 1.0, %v9354_v52  ;;  %v9356_v17 = vpop.eup %9355 }
 0x129   : > { %9373 = vrcp.f32 %v952_v53  ;;  %v9358_v20 = vpop.eup %9357  ;;  %v955_v1 = vadd.f32 1.0, %v9356_v17  ;;  %v1881_v53 = vrot.slane %v1697_v32, 2 }
 0x12a   : > { %9375 = vrcp.f32 %v953_v38  ;;  %8761 = vmatmul.mubr.msk.f32.gmra.mrb[32].mxu1 %vm1055_vm1, %v10589_v26  ;;  %v956_v56 = vadd.f32 1.0, %v9358_v20  ;;  %v1699_v38 = vld [vmem:[#allocation2 + $0x10] sm:$0x3] }
 0x12b   : > { %v9360_v0 = vpop.eup %9359  ;;  %8763 = vmatprep.mubr.msk.f32.mxu1 %vm1055_vm1, %v10594_v39  ;;  %9377 = vrcp.f32 %v954_v40  ;;  %v1883_v52 = vsel %vm1880_vm4, %v1881_v53, %v1882_v6  ;;  %v1803_v17 = vrot.slane %v1699_v38, 1  ;;  %v1884_v40 = vrot.slane %v1699_v38, 2 }
 0x12c   : > { %v9362_v44 = vpop.eup %9361  ;;  %v10610_v61 = vmul.f32 %v9360_v0, %v10467_v45  ;;  %9379 = vrcp.f32 %v955_v1  ;;  %v1750_v0 = vld [vmem:[#allocation2 + $0x1a8] sm:$0x3] }
 0x12d   : > { %v9364_v47 = vpop.eup %9363  ;;  %v10607_v33 = vmul.f32 %v9362_v44, %v10474_v46  ;;  %9381 = vrcp.f32 %v956_v56  ;;  %v1804_v20 = vsel %vm1799_vm3, %v1801_v35, %v1803_v17  ;;  %v1885_v1 = vsel %vm1880_vm4, %v1882_v6, %v1884_v40 }
 0x12e   : > { %v9366_v30 = vpop.eup %9365  ;;  %14575 = vst [vmem:[#allocation10_spill] sm:$0xff] %v10610_v61  ;;  %8764 = vmatmul.mubr.msk.f32.gmra.mrb[34].mxu1 %vm1055_vm1, %v10600_v49  ;;  %v958_v46 = vadd.f32 1.0, %v9364_v47  ;;  %v1980_v56 = vrot.slane %v1750_v0, 1  ;;  %v3017_v0 = vld [vmem:[%s14524_s5] sm:$0xff] }
 0x12f   : > { %14574 = vst [vmem:[#allocation9_spill] sm:$0xff] %v10607_v33  ;;  %v9368_v43 = vpop.eup %9367  ;;  %v957_v63 = vadd.f32 1.0, %v9366_v30  ;;  %8766 = vmatprep.mubr.msk.f32.mxu1 %vm1055_vm1, %v10607_v33 }
 0x130   : > { %v9370_v34 = vpop.eup %9369  ;;  %v10620_v37 = vmul.f32 %v9368_v43, %v10478_v62 }
 0x131   : > { %v10617_v60 = vmul.f32 %v9370_v34, %v10490_v2  ;;  %9383 = vrcp.f32 %v957_v63  ;;  %v10685_v63 = vld [vmem:[%s14523_s4] ss:$0 sm:$0xff] }
 0x132   : > { %v9372_v9 = vpop.eup %9371  ;;  %14577 = vst [vmem:[#allocation12_spill] sm:$0xff] %v10620_v37  ;;  %8767 = vmatmul.mubr.msk.f32.gmra.mrb[36].mxu1 %vm1055_vm1, %v10610_v61  ;;  %9385 = vrcp.f32 %v958_v46 }
 0x133   : > { %14576 = vst [vmem:[#allocation11_spill] sm:$0xff] %v10617_v60  ;;  %v9374_v45 = vpop.eup %9373  ;;  %v10625_v29 = vmul.f32 %v9372_v9, %v10505_v21  ;;  %8769 = vmatprep.mubr.msk.f32.mxu1 %vm1055_vm1, %v10617_v60 }
 0x134   : > { %v9376_v54 = vpop.eup %9375  ;;  %v10630_v2 = vmul.f32 %v9374_v45, %v10498_v12 }
 0x135   : > { %14578 = vst [vmem:[#allocation13_spill] sm:$0xff] %v10625_v29  ;;  %v9378_v62 = vpop.eup %9377  ;;  %v10635_v50 = vmul.f32 %v9376_v54, %v10516_v41 }
 0x136   : > { %14579 = vst [vmem:[#allocation14_spill] sm:$0xff] %v10630_v2  ;;  %8770 = vmatmul.mubr.msk.f32.gmra.mrb[38].mxu1 %vm1055_vm1, %v10620_v37  ;;  %v9380_v21 = vpop.eup %9379  ;;  %v10640_v19 = vmul.f32 %v9378_v62, %v10509_v4 }
 0x137   : > { %14580 = vst [vmem:[#allocation15_spill] sm:$0xff] %v10635_v50  ;;  %8772 = vmatprep.mubr.msk.f32.mxu1 %vm1055_vm1, %v10625_v29  ;;  %v9382_v55 = vpop.eup %9381  ;;  %v10645_v12 = vmul.f32 %v9380_v21, %v10530_v57 }
 0x138   : > { %14581 = vst [vmem:[#allocation16_spill] sm:$0xff] %v10640_v19  ;;  %v10650_v41 = vmul.f32 %v9382_v55, %v10535_v42  ;;  %v1748_v42 = vld [vmem:[#allocation2 + $0x198] sm:$0xff] }
 0x139   : > { %14582 = vst [vmem:[#allocation17_spill] sm:$0xff] %v10645_v12  ;;  %2527 = vrot.lane.b32.xlu0 %v1748_v42, %s10105_s27  ;;  %v1977_v44 = vrot.slane %v1748_v42, 1 }
 0x13a   : > { %8773 = vmatmul.mubr.msk.f32.gmra.mrb[40].mxu1 %vm1055_vm1, %v10630_v2  ;;  %14583 = vst [vmem:[#allocation18_spill] sm:$0xff] %v10650_v41 }
 0x13b   : > { %8775 = vmatprep.mubr.msk.f32.mxu1 %vm1055_vm1, %v10635_v50  ;;  %v9384_v3 = vpop.eup %9383 }
 0x13c   : > { %v9386_v16 = vpop.eup %9385  ;;  %v10655_v4 = vmul.f32 %v9384_v3, %v10558_v59  ;;  %v1749_v59 = vld [vmem:[#allocation2 + $0x1a0] sm:$0xff] }
 0x13d   : > { %v10660_v57 = vmul.f32 %v9386_v16, %v10553_v58  ;;  %2529 = vrot.lane.b32.xlu1 %v1749_v59, %s10105_s27  ;;  %v1800_v58 = vrot.slane %v1697_v32, 1  ;;  %v1978_v47 = vrot.slane %v1749_v59, 1 }
 0x13e   : > { %8776 = vmatmul.mubr.msk.f32.gmra.mrb[42].mxu1 %vm1055_vm1, %v10640_v19  ;;  %14584 = vst [vmem:[#allocation19_spill] sm:$0xff] %v10655_v4 }
 0x13f   : > { %8778 = vmatprep.mubr.msk.f32.mxu1 %vm1055_vm1, %v10645_v12  ;;  %14585 = vst [vmem:[#allocation20_spill] sm:$0xff] %v10660_v57  ;;  %v1802_v14 = vsel %vm1799_vm3, %v1800_v58, %v1801_v35  ;;  %v1981_v30 = vsel %vm1799_vm3, %v1978_v47, %v1980_v56  ;;  %v1979_v43 = vsel %vm1799_vm3, %v1977_v44, %v1978_v47  ;;  %v3018_v44 = vld [vmem:[%s14524_s5 + $0x8] sm:$0xff] }
 0x140   : > { %1987 = vrot.lane.b32.xlu0 %v1802_v14, %s10106_s28 }
 0x141   : > { %2083 = vrot.lane.b32.xlu1 %v1883_v52, %s10107_s15 }
 0x142   : > { %8779 = vmatmul.mubr.msk.f32.gmra.mrb[44].mxu1 %vm1055_vm1, %v10650_v41 }
 0x143   : > { %8781 = vmatprep.mubr.msk.f32.mxu1 %vm1055_vm1, %v10655_v4 }
 0x144   : > { %1989 = vrot.lane.b32.xlu0 %v1804_v20, %s10106_s28 }
 0x145   : > { %2085 = vrot.lane.b32.xlu1 %v1885_v1, %s10107_s15 }
 0x146   : > { %8782 = vmatmul.mubr.msk.f32.gmra.mrb[46].mxu1 %vm1055_vm1, %v10660_v57 }
 0x148   : > { %2623 = vrot.lane.b32.xlu0 %v1979_v43, %s10108_s16 }
 0x149   : > { %2625 = vrot.lane.b32.xlu1 %v1981_v30, %s10108_s16  ;;  %v9172_v30 = vpack.c.bf16 %v3018_v44, %v3017_v0 }
 0x14b   : > { %9173 = vmatprep.subr.bf16.mxu1 %v9172_v30 }
 0x14c   : > { %9175 = vmatpush3.bf16.msra.mxu1 %v9172_v30 }
 0x1db   : > { %v8738_v34 = vpop.f32.mrb[16].mxu1 }
 0x1dc   : > { %v10688_v46 = vadd.f32 %v8738_v34, %v10685_v63  ;;  %v1281_v9 = vpop.f32.mrb[17].mxu1 }
 0x1dd   : > { %v10691_v45 = vadd.f32 %v10685_v63, %v1281_v9 }
 0x1de   : > { %v7962_v54 = vmul.f32 -1.442695, %v10688_v46 }
 0x1df   : > { %v7961_v62 = vmul.f32 -1.442695, %v10691_v45  ;;  %v8741_v21 = vpop.f32.mrb[18].mxu1 }
 0x1e0   : > { %9387 = vpow2.f32 %v7962_v54  ;;  %v10696_v55 = vadd.f32 %v8741_v21, %v10685_v63  ;;  %v1291_v3 = vpop.f32.mrb[19].mxu1 }
 0x1e1   : > { %9389 = vpow2.f32 %v7961_v62  ;;  %v10699_v16 = vadd.f32 %v10685_v63, %v1291_v3 }
 0x1e2   : > { %v7964_v42 = vmul.f32 -1.442695, %v10696_v55 }
 0x1e3   : > { %v7963_v59 = vmul.f32 -1.442695, %v10699_v16  ;;  %v8744_v32 = vpop.f32.mrb[20].mxu1 }
 0x1e4   : > { %9391 = vpow2.f32 %v7964_v42  ;;  %v10704_v8 = vadd.f32 %v8744_v32, %v10685_v63  ;;  %v1301_v58 = vpop.f32.mrb[21].mxu1 }
 0x1e5   : > { %9393 = vpow2.f32 %v7963_v59  ;;  %v10707_v35 = vadd.f32 %v10685_v63, %v1301_v58 }
 0x1e6   : > { %v7966_v53 = vmul.f32 -1.442695, %v10704_v8 }
 0x1e7   : > { %v7965_v6 = vmul.f32 -1.442695, %v10707_v35 }
 0x1e8   : > { %9395 = vpow2.f32 %v7966_v53 }
 0x1e9   : > { %9397 = vpow2.f32 %v7965_v6  ;;  %v8747_v14 = vpop.f32.mrb[22].mxu1 }
 0x1ea   : > { %v9388_v52 = vpop.eup %9387  ;;  %v10712_v38 = vadd.f32 %v8747_v14, %v10685_v63  ;;  %v1311_v17 = vpop.f32.mrb[23].mxu1 }
 0x1eb   : > { %v9390_v40 = vpop.eup %9389  ;;  %v1537_v20 = vadd.f32 1.0, %v9388_v52  ;;  %v10715_v1 = vadd.f32 %v10685_v63, %v1311_v17 }
 0x1ec   : > { %v1536_v47 = vadd.f32 1.0, %v9390_v40  ;;  %v7968_v56 = vmul.f32 -1.442695, %v10712_v38 }
 0x1ed   : > { %9399 = vrcp.f32 %v1537_v20  ;;  %v7967_v43 = vmul.f32 -1.442695, %v10715_v1  ;;  %v8750_v34 = vpop.f32.mrb[24].mxu1 }
 0x1ee   : > { %v9392_v9 = vpop.eup %9391  ;;  %9401 = vrcp.f32 %v1536_v47  ;;  %v10726_v54 = vadd.f32 %v8750_v34, %v10685_v63  ;;  %v1321_v62 = vpop.f32.mrb[25].mxu1 }
 0x1ef   : > { %v9394_v21 = vpop.eup %9393  ;;  %v1539_v3 = vadd.f32 1.0, %v9392_v9  ;;  %9403 = vpow2.f32 %v7968_v56  ;;  %v10729_v42 = vadd.f32 %v10685_v63, %v1321_v62 }
 0x1f0   : > { %v1538_v59 = vadd.f32 1.0, %v9394_v21  ;;  %9405 = vpow2.f32 %v7967_v43  ;;  %v7970_v32 = vmul.f32 -1.442695, %v10726_v54 }
 0x1f1   : > { %9407 = vrcp.f32 %v1539_v3  ;;  %v7969_v58 = vmul.f32 -1.442695, %v10729_v42  ;;  %v8753_v53 = vpop.f32.mrb[26].mxu1 }
 0x1f2   : > { %v9396_v6 = vpop.eup %9395  ;;  %9409 = vrcp.f32 %v1538_v59  ;;  %v10734_v14 = vadd.f32 %v8753_v53, %v10685_v63  ;;  %v1331_v52 = vpop.f32.mrb[27].mxu1 }
 0x1f3   : > { %v9398_v17 = vpop.eup %9397  ;;  %v1541_v40 = vadd.f32 1.0, %v9396_v6  ;;  %9411 = vpow2.f32 %v7970_v32  ;;  %v10737_v20 = vadd.f32 %v10685_v63, %v1331_v52 }
 0x1f4   : > { %v1540_v0 = vadd.f32 1.0, %v9398_v17  ;;  %9413 = vpow2.f32 %v7969_v58  ;;  %v7972_v44 = vmul.f32 -1.442695, %v10734_v14 }
 0x1f5   : > { %9415 = vrcp.f32 %v1541_v40  ;;  %v7971_v47 = vmul.f32 -1.442695, %v10737_v20  ;;  %v8756_v56 = vpop.f32.mrb[28].mxu1 }
 0x1f6   : > { %9417 = vrcp.f32 %v1540_v0  ;;  %v10742_v30 = vadd.f32 %v8756_v56, %v10685_v63  ;;  %v1341_v43 = vpop.f32.mrb[29].mxu1 }
 0x1f7   : > { %v9400_v34 = vpop.eup %9399  ;;  %9419 = vpow2.f32 %v7972_v44  ;;  %v10745_v9 = vadd.f32 %v10685_v63, %v1341_v43 }
 0x1f8   : > { %v9402_v62 = vpop.eup %9401  ;;  %v1633_v21 = vmul.f32 %v9400_v34, %v10688_v46  ;;  %9421 = vpow2.f32 %v7971_v47  ;;  %v7974_v3 = vmul.f32 -1.442695, %v10742_v30  ;;  %v3019_v46 = vld [vmem:[%s14524_s5 + $0x10] sm:$0xff] }
 0x1f9   : > { %v9404_v59 = vpop.eup %9403  ;;  %v1632_v32 = vmul.f32 %v9402_v62, %v10691_v45  ;;  %v7973_v58 = vmul.f32 -1.442695, %v10745_v9  ;;  %v8759_v53 = vpop.f32.mrb[30].mxu1  ;;  %v3020_v45 = vld [vmem:[%s14524_s5 + $0x18] sm:$0xff] }
 0x1fa   : > { %v9406_v6 = vpop.eup %9405  ;;  %1666 = vst.msk [vmem:[#allocation2 + $0x21] sm:$0xff] %vm1055_vm1, %v1633_v21  ;;  %v1543_v52 = vadd.f32 1.0, %v9404_v59  ;;  %9423 = vpow2.f32 %v7974_v3  ;;  %v10753_v17 = vadd.f32 %v8759_v53, %v10685_v63  ;;  %v1351_v40 = vpop.f32.mrb[31].mxu1  ;;  %v9176_v56 = vpack.c.bf16 %v3020_v45, %v3019_v46 }
 0x1fb   : > { %v9408_v0 = vpop.eup %9407  ;;  %1665 = vst.msk [vmem:[#allocation2 + $0x19] sm:$0xff] %vm1055_vm1, %v1632_v32  ;;  %v1542_v44 = vadd.f32 1.0, %v9406_v6  ;;  %9425 = vpow2.f32 %v7973_v58  ;;  %v10763_v47 = vadd.f32 %v10685_v63, %v1351_v40 }
 0x1fc   : > { %v9410_v43 = vpop.eup %9409  ;;  %v1635_v34 = vmul.f32 %v9408_v0, %v10696_v55  ;;  %9427 = vrcp.f32 %v1543_v52  ;;  %v7976_v62 = vmul.f32 -1.442695, %v10753_v17  ;;  %9177 = vmatprep.subr.bf16.mxu1 %v9176_v56 }
 0x1fd   : > { %v9412_v21 = vpop.eup %9411  ;;  %v1634_v3 = vmul.f32 %v9410_v43, %v10699_v16  ;;  %9429 = vrcp.f32 %v1542_v44  ;;  %v7975_v59 = vmul.f32 -1.442695, %v10763_v47  ;;  %v8762_v53 = vpop.f32.mrb[32].mxu1  ;;  %9179 = vmatpush3.bf16.msra.mxu1 %v9176_v56 }
 0x1fe   : > { %v9414_v32 = vpop.eup %9413  ;;  %1668 = vst.msk [vmem:[#allocation2 + $0x39] sm:$0xff] %vm1055_vm1, %v1635_v34  ;;  %v1545_v58 = vadd.f32 1.0, %v9412_v21  ;;  %9431 = vpow2.f32 %v7976_v62  ;;  %v10771_v6 = vadd.f32 %v8762_v53, %v10685_v63  ;;  %v1361_v55 = vpop.f32.mrb[33].mxu1 }
 0x1ff   : > { %v9416_v52 = vpop.eup %9415  ;;  %1667 = vst.msk [vmem:[#allocation2 + $0x31] sm:$0xff] %vm1055_vm1, %v1634_v3  ;;  %v1544_v40 = vadd.f32 1.0, %v9414_v32  ;;  %9433 = vpow2.f32 %v7975_v59  ;;  %v10778_v43 = vadd.f32 %v10685_v63, %v1361_v55 }
 0x200   : > { %v9418_v16 = vpop.eup %9417  ;;  %v1637_v46 = vmul.f32 %v9416_v52, %v10704_v8  ;;  %9435 = vrcp.f32 %v1545_v58  ;;  %v7978_v45 = vmul.f32 -1.442695, %v10771_v6 }
 0x201   : > { %v9420_v0 = vpop.eup %9419  ;;  %v1636_v44 = vmul.f32 %v9418_v16, %v10707_v35  ;;  %9437 = vrcp.f32 %v1544_v40  ;;  %v8765_v34 = vpop.f32.mrb[34].mxu1  ;;  %v10785_v3 = vld [vmem:[#allocation2 + $0x28] sm:$0x3]  ;;  %v7977_v16 = vmul.f32 -1.442695, %v10778_v43 }
 0x202   : > { %v9422_v56 = vpop.eup %9421  ;;  %1670 = vst.msk [vmem:[#allocation2 + $0x51] sm:$0xff] %vm1055_vm1, %v1637_v46  ;;  %v10781_v62 = vld [vmem:[#allocation2 + $0x20] sm:$0xff]  ;;  %v10783_v21 = vld [vmem:[#allocation2 + $0x18] sm:$0xff]  ;;  %v1547_v8 = vadd.f32 1.0, %v9420_v0  ;;  %9439 = vpow2.f32 %v7978_v45  ;;  %v1371_v59 = vpop.f32.mrb[35].mxu1  ;;  %v1808_v40 = vrot.slane %v10785_v3, 1 }
 0x203   : > { %1669 = vst.msk [vmem:[#allocation2 + $0x49] sm:$0xff] %vm1055_vm1, %v1636_v44  ;;  %2181 = vrot.lane.b32.xlu1 %v10781_v62, %s10109_s20  ;;  %2179 = vrot.lane.b32.xlu0 %v10783_v21, %s10109_s20  ;;  %v1805_v35 = vrot.slane %v10783_v21, 1  ;;  %v1806_v53 = vrot.slane %v10781_v62, 1  ;;  %v1546_v58 = vadd.f32 1.0, %v9422_v56  ;;  %v1886_v0 = vrot.slane %v10783_v21, 2 }
 0x204   : > { %v9424_v32 = vpop.eup %9423  ;;  %9441 = vrcp.f32 %v1547_v8  ;;  %v1887_v44 = vrot.slane %v10781_v62, 2 }
 0x205   : > { %v9426_v55 = vpop.eup %9425  ;;  %v1807_v52 = vsel %vm1799_vm3, %v1805_v35, %v1806_v53  ;;  %v8768_v46 = vpop.f32.mrb[36].mxu1  ;;  %9443 = vrcp.f32 %v1546_v58  ;;  %v1549_v57 = vadd.f32 1.0, %v9424_v32 }
 0x206   : > { %v9428_v45 = vpop.eup %9427  ;;  %v1381_v4 = vpop.f32.mrb[37].mxu1  ;;  %v1548_v12 = vadd.f32 1.0, %v9426_v55 }
 0x207   : > { %v9430_v41 = vpop.eup %9429  ;;  %v1639_v8 = vmul.f32 %v9428_v45, %v10712_v38  ;;  %1991 = vrot.lane.b32.xlu1 %v1807_v52, %s10106_s28  ;;  %2275 = vrot.lane.b32.xlu0 %v1807_v52, %s10110_s21  ;;  %9445 = vrcp.f32 %v1549_v57  ;;  %v1888_v38 = vsel %vm1880_vm4, %v1886_v0, %v1887_v44  ;;  %v1809_v45 = vsel %vm1799_vm3, %v1806_v53, %v1808_v40 }
 0x208   : > { %v9432_v56 = vpop.eup %9431  ;;  %v1638_v35 = vmul.f32 %v9430_v41, %v10715_v1  ;;  %9447 = vpow2.f32 %v7977_v16  ;;  %v10808_v52 = vadd.f32 %v8765_v34, %v10685_v63  ;;  %v10814_v1 = vadd.f32 %v10685_v63, %v1371_v59 }
 0x209   : > { %v9434_v19 = vpop.eup %9433  ;;  %1672 = vst.msk [vmem:[#allocation2 + $0x69] sm:$0xff] %vm1055_vm1, %v1639_v8  ;;  %v1551_v50 = vadd.f32 1.0, %v9432_v56  ;;  %v8771_v32 = vpop.f32.mrb[38].mxu1  ;;  %9449 = vrcp.f32 %v1548_v12  ;;  %v1889_v8 = vrot.slane %v10785_v3, 2  ;;  %v10828_v12 = vadd.f32 %v8768_v46, %v10685_v63  ;;  %v10841_v46 = vld [vmem:[#allocation2 + $0x30] sm:$0xff] }
 0x20a   : > { %v9436_v58 = vpop.eup %9435  ;;  %1671 = vst.msk [vmem:[#allocation2 + $0x61] sm:$0xff] %vm1055_vm1, %v1638_v35  ;;  %v1391_v2 = vpop.f32.mrb[39].mxu1  ;;  %v1550_v53 = vadd.f32 1.0, %v9434_v19  ;;  %v10831_v3 = vadd.f32 %v10685_v63, %v1381_v4  ;;  %v10834_v56 = vadd.f32 %v8771_v32, %v10685_v63  ;;  %v10847_v32 = vld [vmem:[#allocation2 + $0x38] sm:$0xff] }
 0x20b   : > { %v9438_v41 = vpop.eup %9437  ;;  %2371 = vrot.lane.b32.xlu1 %v1888_v38, %s10111_s23  ;;  %2277 = vrot.lane.b32.xlu0 %v1809_v45, %s10110_s21  ;;  %v1641_v57 = vmul.f32 %v9436_v58, %v10726_v54  ;;  %9451 = vrcp.f32 %v1551_v50  ;;  %v7980_v54 = vmul.f32 -1.442695, %v10808_v52  ;;  %v7979_v50 = vmul.f32 -1.442695, %v10814_v1 }
 0x20c   : > { %v9440_v55 = vpop.eup %9439  ;;  %v1640_v16 = vmul.f32 %v9438_v41, %v10729_v42  ;;  %9453 = vrcp.f32 %v1550_v53  ;;  %v14586_v29 = vrot.slane %v10847_v32, 1 }
 0x20d   : > { %1674 = vst.msk [vmem:[#allocation2 + $0x81] sm:$0xff] %vm1055_vm1, %v1641_v57  ;;  %v1553_v34 = vadd.f32 1.0, %v9440_v55  ;;  %v10818_v40 = vpop.f32.mrb[40].mxu1  ;;  %v7981_v57 = vmul.f32 -1.442695, %v10831_v3 }
 0x20e   : > { %v9442_v0 = vpop.eup %9441  ;;  %1673 = vst.msk [vmem:[#allocation2 + $0x79] sm:$0xff] %vm1055_vm1, %v1640_v16  ;;  %v1401_v59 = vpop.f32.mrb[41].mxu1  ;;  %v7984_v55 = vmul.f32 -1.442695, %v10834_v56 }
 0x20f   : > { %2087 = vrot.lane.b32.xlu1 %v1888_v38, %s10107_s15  ;;  %1993 = vrot.lane.b32.xlu0 %v1809_v45, %s10106_s28  ;;  %v1643_v19 = vmul.f32 %v9442_v0, %v10734_v14  ;;  %9455 = vrcp.f32 %v1553_v34  ;;  %v9444_v42 = vpop.eup %9443  ;;  %v10839_v14 = vadd.f32 %v10685_v63, %v1391_v2  ;;  %v1890_v45 = vsel %vm1880_vm4, %v1887_v44, %v1889_v8  ;;  %v3022_v8 = vld [vmem:[%s14524_s5 + $0x28] sm:$0xff] }
 0x210   : > { %9457 = vpow2.f32 %v7980_v54  ;;  %v1642_v35 = vmul.f32 %v9444_v42, %v10737_v20  ;;  %v7982_v20 = vmul.f32 -1.442695, %v10828_v12  ;;  %v1810_v34 = vrot.slane %v10841_v46, 1 }
 0x211   : > { %1676 = vst.msk [vmem:[#allocation2 + $0x99] sm:$0xff] %vm1055_vm1, %v1643_v19  ;;  %9459 = vpow2.f32 %v7979_v50  ;;  %v8777_v58 = vpop.f32.mrb[42].mxu1  ;;  %v9446_v38 = vpop.eup %9445  ;;  %v7983_v16 = vmul.f32 -1.442695, %v10839_v14 }
 0x212   : > { %v1411_v41 = vpop.f32.mrb[43].mxu1  ;;  %v9448_v4 = vpop.eup %9447  ;;  %1675 = vst.msk [vmem:[#allocation2 + $0x91] sm:$0xff] %vm1055_vm1, %v1642_v35  ;;  %v1645_v2 = vmul.f32 %v9446_v38, %v10742_v30  ;;  %9461 = vpow2.f32 %v7982_v20  ;;  %v3021_v30 = vld [vmem:[%s14524_s5 + $0x20] sm:$0xff] }
 0x213   : > { %2467 = vrot.lane.b32.xlu1 %v10841_v46, %s10105_s27  ;;  %2373 = vrot.lane.b32.xlu0 %v1890_v45, %s10111_s23  ;;  %v1552_v44 = vadd.f32 1.0, %v9448_v4  ;;  %v9450_v53 = vpop.eup %9449  ;;  %9463 = vpow2.f32 %v7981_v57  ;;  %v9180_v20 = vpack.c.bf16 %v3022_v8, %v3021_v30 }
 0x214   : > { %1678 = vst.msk [vmem:[#allocation2 + $0xb1] sm:$0xff] %vm1055_vm1, %v1645_v2  ;;  %v1644_v50 = vmul.f32 %v9450_v53, %v10745_v9  ;;  %v10876_v9 = vld [vmem:[#allocation2 + $0x40] sm:$0x3] }
 0x215   : > { %v8780_v54 = vpop.f32.mrb[44].mxu1  ;;  %v9452_v19 = vpop.eup %9451  ;;  %9465 = vrcp.f32 %v1552_v44  ;;  %9181 = vmatprep.subr.bf16.mxu1 %v9180_v20 }
 0x216   : > { %v1421_v42 = vpop.f32.mrb[45].mxu1  ;;  %v9454_v35 = vpop.eup %9453  ;;  %v1647_v38 = vmul.f32 %v9452_v19, %v10753_v17  ;;  %9467 = vpow2.f32 %v7984_v55  ;;  %1677 = vst.msk [vmem:[#allocation2 + $0xa9] sm:$0xff] %vm1055_vm1, %v1644_v50  ;;  %v10882_v55 = vadd.f32 %v10818_v40, %v10685_v63  ;;  %v3023_v40 = vld [vmem:[%s14524_s5 + $0x30] sm:$0xff]  ;;  %9183 = vmatpush3.bf16.msra.mxu1 %v9180_v20  ;;  %v1891_v19 = vrot.slane %v10841_v46, 2 }
 0x217   : > { %2183 = vrot.lane.b32.xlu1 %v10841_v46, %s10109_s20  ;;  %2089 = vrot.lane.b32.xlu0 %v1890_v45, %s10107_s15  ;;  %v1646_v2 = vmul.f32 %v9454_v35, %v10763_v47  ;;  %9469 = vpow2.f32 %v7983_v16  ;;  %v10874_v45 = vsel %vm1799_vm3, %v1810_v34, %v14586_v29  ;;  %v10885_v47 = vadd.f32 %v10685_v63, %v1401_v59  ;;  %v3024_v59 = vld [vmem:[%s14524_s5 + $0x38] sm:$0xff] }
 0x218   : > { %1680 = vst.msk [vmem:[#allocation2 + $0xc9] sm:$0xff] %vm1055_vm1, %v1647_v38  ;;  %v7986_v34 = vmul.f32 -1.442695, %v10882_v55  ;;  %v1892_v50 = vrot.slane %v10847_v32, 2  ;;  %v9184_v35 = vpack.c.bf16 %v3024_v59, %v3023_v40  ;;  %v14587_v40 = vrot.slane %v10847_v32, 1 }
 0x219   : > { %v9456_v4 = vpop.eup %9455  ;;  %v8783_v57 = vpop.f32.mrb[46].mxu1  ;;  %1679 = vst.msk [vmem:[#allocation2 + $0xc1] sm:$0xff] %vm1055_vm1, %v1646_v2  ;;  %v7985_v30 = vmul.f32 -1.442695, %v10885_v47 }
 0x21a   : > { %v9458_v0 = vpop.eup %9457  ;;  %v1649_v17 = vmul.f32 %v9456_v4, %v10771_v6  ;;  %v1431_v44 = vpop.f32.mrb[47].mxu1  ;;  %v10893_v6 = vadd.f32 %v8777_v58, %v10685_v63  ;;  %v1813_v58 = vrot.slane %v10876_v9, 1  ;;  %v3025_v4 = vld [vmem:[%s14524_s5 + $0x40] sm:$0xff]  ;;  %9185 = vmatprep.subr.bf16.mxu1 %v9184_v35 }
 0x21b   : > { %v9460_v16 = vpop.eup %9459  ;;  %2563 = vrot.lane.b32.xlu1 %v10874_v45, %s10108_s16  ;;  %2469 = vrot.lane.b32.xlu0 %v10847_v32, %s10105_s27  ;;  %v1555_v29 = vadd.f32 1.0, %v9458_v0  ;;  %v10905_v0 = vadd.f32 %v10685_v63, %v1411_v41  ;;  %v10916_v41 = vadd.f32 %v8780_v54, %v10685_v63 }
 0x21c   : > { %1682 = vst.msk [vmem:[#allocation2 + $0xe1] sm:$0xff] %vm1055_vm1, %v1649_v17  ;;  %v1554_v53 = vadd.f32 1.0, %v9460_v16  ;;  %v7988_v8 = vmul.f32 -1.442695, %v10893_v6  ;;  %v9462_v38 = vpop.eup %9461  ;;  %v10923_v16 = vadd.f32 %v10685_v63, %v1421_v42  ;;  %v1814_v59 = vsel %vm1799_vm3, %v14587_v40, %v1813_v58  ;;  %9187 = vmatpush3.bf16.msra.mxu1 %v9184_v35 }
 0x21d   : > { %9471 = vrcp.f32 %v1555_v29  ;;  %v9464_v2 = vpop.eup %9463  ;;  %v1557_v20 = vadd.f32 1.0, %v9462_v38  ;;  %v7987_v17 = vmul.f32 -1.442695, %v10905_v0  ;;  %v10934_v42 = vadd.f32 %v10685_v63, %v1431_v44  ;;  %8800 = vmatprep.subr.mxu1 %v3025_v4  ;;  %v11182_v33 = vld [vmem:[#allocation2 + $0xa8] sm:$0xff] }
 0x21e   : > { %9473 = vrcp.f32 %v1554_v53  ;;  %v1556_v54 = vadd.f32 1.0, %v9464_v2  ;;  %v10929_v53 = vadd.f32 %v8783_v57, %v10685_v63  ;;  %v7990_v58 = vmul.f32 -1.442695, %v10916_v41 }
 0x21f   : > { %2279 = vrot.lane.b32.xlu1 %v10874_v45, %s10110_s21  ;;  %2185 = vrot.lane.b32.xlu0 %v10847_v32, %s10109_s20  ;;  %9475 = vpow2.f32 %v7986_v34  ;;  %v9466_v29 = vpop.eup %9465  ;;  %v1894_v44 = vrot.slane %v10876_v9, 2 }
 0x220   : > { %9477 = vpow2.f32 %v7985_v30  ;;  %v9468_v34 = vpop.eup %9467  ;;  %v1893_v30 = vsel %vm1880_vm4, %v1891_v19, %v1892_v50  ;;  %v1648_v38 = vmul.f32 %v9466_v29, %v10778_v43  ;;  %v7989_v43 = vmul.f32 -1.442695, %v10923_v16  ;;  %8801 = vmatpush3.msra.mxu1 %v3025_v4 }
 0x221   : > { %9479 = vpow2.f32 %v7988_v8  ;;  %v9470_v37 = vpop.eup %9469  ;;  %v1559_v57 = vadd.f32 1.0, %v9468_v34  ;;  %v7992_v63 = vmul.f32 -1.442695, %v10929_v53  ;;  %v7991_v19 = vmul.f32 -1.442695, %v10934_v42 }
 0x222   : > { %9481 = vrcp.f32 %v1557_v20  ;;  %1681 = vst.msk [vmem:[#allocation2 + $0xd9] sm:$0xff] %vm1055_vm1, %v1648_v38  ;;  %v1558_v8 = vadd.f32 1.0, %v9470_v37  ;;  %v1895_v9 = vsel %vm1880_vm4, %v1892_v50, %v1894_v44 }
 0x223   : > { %2659 = vrot.lane.b32.xlu1 %v1893_v30, %s10112_s24  ;;  %2565 = vrot.lane.b32.xlu0 %v1814_v59, %s10108_s16  ;;  %9483 = vrcp.f32 %v1556_v54 }
 0x224   : > { %9485 = vpow2.f32 %v7987_v17 }
 0x225   : > { %9487 = vrcp.f32 %v1559_v57 }
 0x226   : > { %9489 = vrcp.f32 %v1558_v8 }
 0x227   : > { %v9472_v35 = vpop.eup %9471  ;;  %2281 = vrot.lane.b32.xlu1 %v1814_v59, %s10110_s21  ;;  %1995 = vrot.lane.b32.xlu0 %v10874_v45, %s10106_s28  ;;  %9491 = vpow2.f32 %v7990_v58 }
 0x228   : > { %v9474_v37 = vpop.eup %9473  ;;  %v1651_v2 = vmul.f32 %v9472_v35, %v10808_v52  ;;  %9493 = vpow2.f32 %v7989_v43 }
 0x229   : > { %v9476_v20 = vpop.eup %9475  ;;  %v1650_v17 = vmul.f32 %v9474_v37, %v10814_v1  ;;  %9495 = vpow2.f32 %v7992_v63 }
 0x22a   : > { %v9478_v4 = vpop.eup %9477  ;;  %1684 = vst.msk [vmem:[#allocation2 + $0xf9] sm:$0xff] %vm1055_vm1, %v1651_v2  ;;  %v1561_v29 = vadd.f32 1.0, %v9476_v20  ;;  %9497 = vpow2.f32 %v7991_v19 }
 0x22b   : > { %v9480_v40 = vpop.eup %9479  ;;  %2661 = vrot.lane.b32.xlu1 %v1895_v9, %s10112_s24  ;;  %2375 = vrot.lane.b32.xlu0 %v1893_v30, %s10111_s23  ;;  %1683 = vst.msk [vmem:[#allocation2 + $0xf1] sm:$0xff] %vm1055_vm1, %v1650_v17  ;;  %v1560_v52 = vadd.f32 1.0, %v9478_v4 }
 0x22c   : > { %v9482_v45 = vpop.eup %9481  ;;  %9499 = vrcp.f32 %v1561_v29  ;;  %v1563_v54 = vadd.f32 1.0, %v9480_v40 }
 0x22d   : > { %v9484_v1 = vpop.eup %9483  ;;  %v1653_v34 = vmul.f32 %v9482_v45, %v10828_v12  ;;  %9501 = vrcp.f32 %v1560_v52 }
 0x22e   : > { %v9486_v50 = vpop.eup %9485  ;;  %v1652_v38 = vmul.f32 %v9484_v1, %v10831_v3  ;;  %9503 = vrcp.f32 %v1563_v54  ;;  %v10962_v3 = vld [vmem:[#allocation2 + $0x48] sm:$0xff] }
 0x22f   : > { %v9488_v57 = vpop.eup %9487  ;;  %2091 = vrot.lane.b32.xlu1 %v1893_v30, %s10107_s15  ;;  %1997 = vrot.lane.b32.xlu0 %v1814_v59, %s10106_s28  ;;  %1686 = vst.msk [vmem:[#allocation2 + $0x111] sm:$0xff] %vm1055_vm1, %v1653_v34  ;;  %v1562_v58 = vadd.f32 1.0, %v9486_v50  ;;  %v10968_v59 = vld [vmem:[#allocation2 + $0x50] sm:$0xff]  ;;  %v1815_v20 = vrot.slane %v10962_v3, 1  ;;  %v1896_v34 = vrot.slane %v10962_v3, 2 }
 0x230   : > { %v9490_v8 = vpop.eup %9489  ;;  %1685 = vst.msk [vmem:[#allocation2 + $0x109] sm:$0xff] %vm1055_vm1, %v1652_v38  ;;  %v1655_v43 = vmul.f32 %v9488_v57, %v10834_v56  ;;  %v1816_v17 = vrot.slane %v10968_v59, 1 }
 0x231   : > { %v9492_v63 = vpop.eup %9491  ;;  %v1654_v12 = vmul.f32 %v9490_v8, %v10839_v14  ;;  %9505 = vrcp.f32 %v1562_v58 }
 0x232   : > { %v9494_v44 = vpop.eup %9493  ;;  %1688 = vst.msk [vmem:[#allocation2 + $0x129] sm:$0xff] %vm1055_vm1, %v1655_v43  ;;  %v1565_v30 = vadd.f32 1.0, %v9492_v63  ;;  %v1817_v54 = vsel %vm1799_vm3, %v1815_v20, %v1816_v17 }
 0x233   : > { %v9496_v19 = vpop.eup %9495  ;;  %2471 = vrot.lane.b32.xlu1 %v10962_v3, %s10105_s27  ;;  %2377 = vrot.lane.b32.xlu0 %v1895_v9, %s10111_s23  ;;  %1687 = vst.msk [vmem:[#allocation2 + $0x121] sm:$0xff] %vm1055_vm1, %v1654_v12  ;;  %v1564_v56 = vadd.f32 1.0, %v9494_v44 }
 0x234   : > { %v9498_v35 = vpop.eup %9497  ;;  %9507 = vrcp.f32 %v1565_v30  ;;  %v1567_v14 = vadd.f32 1.0, %v9496_v19 }
 0x235   : > { %9509 = vrcp.f32 %v1564_v56  ;;  %v1566_v37 = vadd.f32 1.0, %v9498_v35  ;;  %v1711_v35 = vld [vmem:[#allocation2 + $0x70] sm:$0x3] }
 0x236   : > { %v9500_v2 = vpop.eup %9499  ;;  %9511 = vrcp.f32 %v1567_v14  ;;  %v11028_v14 = vpop.permute.xlu0 %2527 }
 0x237   : > { %v9502_v4 = vpop.eup %9501  ;;  %2187 = vrot.lane.b32.xlu1 %v10962_v3, %s10109_s20  ;;  %2093 = vrot.lane.b32.xlu0 %v1895_v9, %s10107_s15  ;;  %v1657_v29 = vmul.f32 %v9500_v2, %v10882_v55  ;;  %9513 = vrcp.f32 %v1566_v37  ;;  %v1708_v9 = vld [vmem:[#allocation2 + $0x58] sm:$0x3]  ;;  %v11030_v37 = vpop.permute.xlu1 %2529 }
 0x238   : > { %v9504_v40 = vpop.eup %9503  ;;  %v1656_v52 = vmul.f32 %v9502_v4, %v10885_v47  ;;  %v1818_v50 = vrot.slane %v1708_v9, 1 }
 0x239   : > { %1690 = vst.msk [vmem:[#allocation2 + $0x141] sm:$0xff] %vm1055_vm1, %v1657_v29  ;;  %v1659_v45 = vmul.f32 %v9504_v40, %v10893_v6  ;;  %v1897_v6 = vrot.slane %v10968_v59, 2 }
 0x23a   : > { %1689 = vst.msk [vmem:[#allocation2 + $0x139] sm:$0xff] %vm1055_vm1, %v1656_v52  ;;  %v1819_v12 = vsel %vm1799_vm3, %v1816_v17, %v1818_v50  ;;  %v1823_v17 = vrot.slane %v1711_v35, 1  ;;  %v1988_v40 = vpop.permute.xlu0 %1987 }
 0x23b   : > { %v9506_v1 = vpop.eup %9505  ;;  %2567 = vrot.lane.b32.xlu1 %v1817_v54, %s10108_s16  ;;  %2473 = vrot.lane.b32.xlu0 %v10968_v59, %s10105_s27  ;;  %1692 = vst.msk [vmem:[#allocation2 + $0x159] sm:$0xff] %vm1055_vm1, %v1659_v45  ;;  %v1898_v63 = vsel %vm1880_vm4, %v1896_v34, %v1897_v6  ;;  %v2084_v52 = vpop.permute.xlu1 %2083  ;;  %v1904_v45 = vrot.slane %v1711_v35, 2  ;;  %v11056_v34 = vld [vmem:[#allocation2 + $0x78] sm:$0xff] }
 0x23c   : > { %v1658_v55 = vmul.f32 %v9506_v1, %v10905_v0 }
 0x23e   : > { %v9508_v47 = vpop.eup %9507  ;;  %1691 = vst.msk [vmem:[#allocation2 + $0x151] sm:$0xff] %vm1055_vm1, %v1658_v55 }
 0x23f   : > { %v9510_v38 = vpop.eup %9509  ;;  %2283 = vrot.lane.b32.xlu1 %v1817_v54, %s10110_s21  ;;  %2189 = vrot.lane.b32.xlu0 %v10968_v59, %s10109_s20  ;;  %v1661_v57 = vmul.f32 %v9508_v47, %v10916_v41  ;;  %v1899_v41 = vrot.slane %v1708_v9, 2  ;;  %v11045_v1 = vpop.permute.xlu1 %2085 }
 0x240   : > { %v9512_v58 = vpop.eup %9511  ;;  %v1660_v8 = vmul.f32 %v9510_v38, %v10923_v16 }
 0x241   : > { %v9514_v0 = vpop.eup %9513  ;;  %1694 = vst.msk [vmem:[#allocation2 + $0x171] sm:$0xff] %vm1055_vm1, %v1661_v57  ;;  %v1663_v43 = vmul.f32 %v9512_v58, %v10929_v53  ;;  %v1900_v16 = vsel %vm1880_vm4, %v1897_v6, %v1899_v41  ;;  %v11012_v53 = vld [vmem:[#allocation2 + $0x60] sm:$0xff]  ;;  %v1825_v57 = vrot.slane %v11056_v34, 1  ;;  %v1906_v41 = vrot.slane %v11056_v34, 2 }
 0x242   : > { %1693 = vst.msk [vmem:[#allocation2 + $0x169] sm:$0xff] %vm1055_vm1, %v1660_v8  ;;  %v1662_v44 = vmul.f32 %v9514_v0, %v10934_v42  ;;  %v11017_v42 = vld [vmem:[#allocation2 + $0x68] sm:$0xff]  ;;  %v1820_v30 = vrot.slane %v11012_v53, 1  ;;  %v1901_v2 = vrot.slane %v11012_v53, 2  ;;  %v11061_v6 = vld [vmem:[#allocation2 + $0x80] sm:$0xff] }
 0x243   : > { %2663 = vrot.lane.b32.xlu1 %v1898_v63, %s10112_s24  ;;  %2569 = vrot.lane.b32.xlu0 %v1819_v12, %s10108_s16  ;;  %1696 = vst.msk [vmem:[#allocation2 + $0x189] sm:$0xff] %vm1055_vm1, %v1663_v43  ;;  %v1821_v19 = vrot.slane %v11017_v42, 1  ;;  %v1902_v20 = vrot.slane %v11017_v42, 2  ;;  %v11052_v55 = vpop.permute.xlu1 %2625  ;;  %v1826_v58 = vrot.slane %v11061_v6, 1 }
 0x244   : > { %1695 = vst.msk [vmem:[#allocation2 + $0x181] sm:$0xff] %vm1055_vm1, %v1662_v44 }
 0x245   : > { %v1822_v56 = vsel %vm1799_vm3, %v1820_v30, %v1821_v19  ;;  %v1903_v4 = vsel %vm1880_vm4, %v1901_v2, %v1902_v20  ;;  %v1824_v29 = vsel %vm1799_vm3, %v1821_v19, %v1823_v17  ;;  %v1905_v9 = vsel %vm1880_vm4, %v1902_v20, %v1904_v45 }
 0x246   : > { %v1827_v43 = vsel %vm1799_vm3, %v1825_v57, %v1826_v58  ;;  %v10027_v57 = vld [vmem:[#allocation2] sm:$0xff] }
 0x247   : > { %2285 = vrot.lane.b32.xlu1 %v1819_v12, %s10110_s21  ;;  %1999 = vrot.lane.b32.xlu0 %v1817_v54, %s10106_s28  ;;  %v11043_v54 = vpop.permute.xlu0 %1989 }
 0x24b   : > { %2665 = vrot.lane.b32.xlu1 %v1900_v16, %s10112_s24  ;;  %2379 = vrot.lane.b32.xlu0 %v1898_v63, %s10111_s23  ;;  %v11054_v47 = vpop.permute.xlu0 %2623 }
 0x24c   : > { %14588 = vst [vmem:[#allocation21_spill] sm:$0xff] %v11054_v47 }
 0x24f   : > { %2095 = vrot.lane.b32.xlu1 %v1898_v63, %s10107_s15  ;;  %2001 = vrot.lane.b32.xlu0 %v1819_v12, %s10106_s28  ;;  %v1714_v63 = vld [vmem:[#allocation2 + $0x88] sm:$0x3] }
 0x250   : > { %v1828_v30 = vrot.slane %v1714_v63, 1 }
 0x252   : > { %v1829_v2 = vsel %vm1799_vm3, %v1826_v58, %v1828_v30  ;;  %v2755_v58 = vsel %vm1055_vm1, %v10027_v57, %v1988_v40  ;;  %v11108_v57 = vld [vmem:[#allocation2 + $0x90] sm:$0xff] }
 0x253   : > { %2475 = vrot.lane.b32.xlu1 %v11012_v53, %s10105_s27  ;;  %2381 = vrot.lane.b32.xlu0 %v1900_v16, %s10111_s23 }
 0x257   : > { %2191 = vrot.lane.b32.xlu1 %v11012_v53, %s10109_s20  ;;  %2097 = vrot.lane.b32.xlu0 %v1900_v16, %s10107_s15  ;;  %v1907_v16 = vrot.slane %v11061_v6, 2 }
 0x259   : > { %v1908_v35 = vsel %vm1880_vm4, %v1906_v41, %v1907_v16 }
 0x25b   : > { %2571 = vrot.lane.b32.xlu1 %v1822_v56, %s10108_s16  ;;  %2477 = vrot.lane.b32.xlu0 %v11017_v42, %s10105_s27 }
 0x25f   : > { %2287 = vrot.lane.b32.xlu1 %v1822_v56, %s10110_s21  ;;  %2193 = vrot.lane.b32.xlu0 %v11017_v42, %s10109_s20 }
 0x263   : > { %2667 = vrot.lane.b32.xlu1 %v1903_v4, %s10112_s24  ;;  %2573 = vrot.lane.b32.xlu0 %v1824_v29, %s10108_s16 }
 0x267   : > { %2289 = vrot.lane.b32.xlu1 %v1824_v29, %s10110_s21  ;;  %2003 = vrot.lane.b32.xlu0 %v1822_v56, %s10106_s28 }
 0x26b   : > { %2669 = vrot.lane.b32.xlu1 %v1905_v9, %s10112_s24  ;;  %2383 = vrot.lane.b32.xlu0 %v1903_v4, %s10111_s23 }
 0x26f   : > { %2099 = vrot.lane.b32.xlu1 %v1903_v4, %s10107_s15  ;;  %2005 = vrot.lane.b32.xlu0 %v1824_v29, %s10106_s28  ;;  %v1909_v4 = vrot.slane %v1714_v63, 2 }
 0x273   : > { %2479 = vrot.lane.b32.xlu1 %v11056_v34, %s10105_s27  ;;  %2385 = vrot.lane.b32.xlu0 %v1905_v9, %s10111_s23 }
 0x275   : > { %v11063_v50 = vpop.permute.xlu1 %2181  ;;  %v2180_v38 = vpop.permute.xlu0 %2179 }
 0x277   : > { %2195 = vrot.lane.b32.xlu1 %v11056_v34, %s10109_s20  ;;  %2101 = vrot.lane.b32.xlu0 %v1905_v9, %s10107_s15  ;;  %v1910_v9 = vsel %vm1880_vm4, %v1907_v16, %v1909_v4 }
 0x279   : > { %v11070_v8 = vpop.permute.xlu1 %1991  ;;  %v2276_v0 = vpop.permute.xlu0 %2275 }
 0x27b   : > { %2575 = vrot.lane.b32.xlu1 %v1827_v43, %s10108_s16  ;;  %2481 = vrot.lane.b32.xlu0 %v11061_v6, %s10105_s27 }
 0x27d   : > { %v2372_v12 = vpop.permute.xlu1 %2371  ;;  %v2278_v44 = vpop.permute.xlu0 %2277 }
 0x27f   : > { %2291 = vrot.lane.b32.xlu1 %v1827_v43, %s10110_s21  ;;  %2197 = vrot.lane.b32.xlu0 %v11061_v6, %s10109_s20 }
 0x281   : > { %v11081_v19 = vpop.permute.xlu1 %2087  ;;  %v11083_v56 = vpop.permute.xlu0 %1993 }
 0x283   : > { %2671 = vrot.lane.b32.xlu1 %v1908_v35, %s10112_s24  ;;  %2577 = vrot.lane.b32.xlu0 %v1829_v2, %s10108_s16 }
 0x285   : > { %v2468_v20 = vpop.permute.xlu1 %2467  ;;  %v2374_v17 = vpop.permute.xlu0 %2373 }
 0x287   : > { %2293 = vrot.lane.b32.xlu1 %v1829_v2, %s10110_s21  ;;  %2007 = vrot.lane.b32.xlu0 %v1827_v43, %s10106_s28  ;;  %v2787_v43 = vsel %vm509_vm0, %v2755_v58, %v2084_v52  ;;  %v11114_v52 = vld [vmem:[#allocation2 + $0x98] sm:$0xff] }
 0x288   : > { %v2820_v63 = vsel %vm2819_vm5, %v2787_v43, %v2180_v38 }
 0x289   : > { %v11091_v29 = vpop.permute.xlu1 %2183  ;;  %v11093_v45 = vpop.permute.xlu0 %2089  ;;  %v2853_v40 = vsel %vm2852_vm6, %v2820_v63, %v2276_v0  ;;  %v1830_v63 = vrot.slane %v11108_v57, 1 }
 0x28a   : > { %v2886_v60 = vsel %vm2885_vm7, %v2853_v40, %v2372_v12  ;;  %v1831_v40 = vrot.slane %v11114_v52, 1 }
 0x28b   : > { %2673 = vrot.lane.b32.xlu1 %v1910_v9, %s10112_s24  ;;  %2387 = vrot.lane.b32.xlu0 %v1908_v35, %s10111_s23  ;;  %v2919_v38 = vsel %vm2918_vm8, %v2886_v60, %v2468_v20 }
 0x28d   : > { %v2564_v41 = vpop.permute.xlu1 %2563  ;;  %v2470_v30 = vpop.permute.xlu0 %2469 }
 0x28e   : > { %v2952_v0 = vsel %vm2951_vm9, %v2919_v38, %v2564_v41 }
 0x28f   : > { %2103 = vrot.lane.b32.xlu1 %v1908_v35, %s10107_s15  ;;  %2009 = vrot.lane.b32.xlu0 %v1829_v2, %s10106_s28  ;;  %v10028_v35 = vld [vmem:[#allocation2 + $0x8] sm:$0xff] }
 0x290   : > { %v2756_v2 = vsel %vm1055_vm1, %v10028_v35, %v11043_v54  ;;  %v1832_v35 = vsel %vm1799_vm3, %v1830_v63, %v1831_v40  ;;  %v1912_v63 = vrot.slane %v11114_v52, 2 }
 0x291   : > { %v11103_v16 = vpop.permute.xlu1 %2279  ;;  %v11105_v4 = vpop.permute.xlu0 %2185  ;;  %v2788_v60 = vsel %vm509_vm0, %v2756_v2, %v11045_v1  ;;  %v1717_v1 = vld [vmem:[#allocation2 + $0xa0] sm:$0x3] }
 0x292   : > { %v2821_v54 = vsel %vm2819_vm5, %v2788_v60, %v11063_v50  ;;  %v1833_v60 = vrot.slane %v1717_v1, 1 }
 0x293   : > { %2483 = vrot.lane.b32.xlu1 %v11108_v57, %s10105_s27  ;;  %2389 = vrot.lane.b32.xlu0 %v1910_v9, %s10111_s23  ;;  %v2854_v38 = vsel %vm2852_vm6, %v2821_v54, %v2278_v44  ;;  %v1911_v44 = vrot.slane %v11108_v57, 2 }
 0x294   : > { %v1834_v54 = vsel %vm1799_vm3, %v1831_v40, %v1833_v60 }
 0x295   : > { %v2660_v58 = vpop.permute.xlu1 %2659  ;;  %v2566_v43 = vpop.permute.xlu0 %2565 }
 0x296   : > { %v2985_v12 = vsel %vm2984_vm10, %v2952_v0, %v2660_v58  ;;  %v2887_v0 = vsel %vm2885_vm7, %v2854_v38, %v2374_v17 }
 0x297   : > { %2199 = vrot.lane.b32.xlu1 %v11108_v57, %s10109_s20  ;;  %2105 = vrot.lane.b32.xlu0 %v1910_v9, %s10107_s15  ;;  %v2920_v9 = vsel %vm2918_vm8, %v2887_v0, %v2470_v30 }
 0x298   : > { %8802 = vmatprep.mubr.msk.f32.mxu1 %vm3033_vm11, %v2985_v12  ;;  %v2953_v50 = vsel %vm2951_vm9, %v2920_v9, %v2566_v43  ;;  %v1913_v43 = vsel %vm1880_vm4, %v1911_v44, %v1912_v63  ;;  %v1914_v9 = vrot.slane %v1717_v1, 2  ;;  %v2757_v1 = vsel %vm1055_vm1, %v10783_v21, %v11070_v8  ;;  %v11188_v8 = vld [vmem:[#allocation2 + $0xb0] sm:$0xff] }
 0x299   : > { %v11131_v20 = vpop.permute.xlu1 %2281  ;;  %v11133_v41 = vpop.permute.xlu0 %1995 }
 0x29b   : > { %2579 = vrot.lane.b32.xlu1 %v1832_v35, %s10108_s16  ;;  %2485 = vrot.lane.b32.xlu0 %v11114_v52, %s10105_s27 }
 0x29d   : > { %v2662_v2 = vpop.permute.xlu1 %2661  ;;  %v2376_v58 = vpop.permute.xlu0 %2375 }
 0x29e   : > { %v2986_v12 = vsel %vm2984_vm10, %v2953_v50, %v2662_v2 }
 0x29f   : > { %2295 = vrot.lane.b32.xlu1 %v1832_v35, %s10110_s21  ;;  %2201 = vrot.lane.b32.xlu0 %v11114_v52, %s10109_s20 }
 0x2a0   : > { %8803 = vmatmul.mubr.msk.f32.vlgmr.msra.gmra.mrb[48].mxu1 %vm3033_vm11, %v2986_v12  ;;  %v1915_v12 = vsel %vm1880_vm4, %v1912_v63, %v1914_v9 }
 0x2a1   : > { %v11150_v17 = vpop.permute.xlu1 %2091  ;;  %v11152_v30 = vpop.permute.xlu0 %1997 }
 0x2a3   : > { %2675 = vrot.lane.b32.xlu1 %v1913_v43, %s10112_s24  ;;  %2581 = vrot.lane.b32.xlu0 %v1834_v54, %s10108_s16 }
 0x2a5   : > { %v2472_v38 = vpop.permute.xlu1 %2471  ;;  %v2378_v0 = vpop.permute.xlu0 %2377 }
 0x2a7   : > { %2297 = vrot.lane.b32.xlu1 %v1834_v54, %s10110_s21  ;;  %2011 = vrot.lane.b32.xlu0 %v1832_v35, %s10106_s28  ;;  %v2789_v35 = vsel %vm509_vm0, %v2757_v1, %v11081_v19 }
 0x2a8   : > { %v2822_v63 = vsel %vm2819_vm5, %v2789_v35, %v11091_v29  ;;  %v1836_v35 = vrot.slane %v11188_v8, 1 }
 0x2a9   : > { %v11160_v50 = vpop.permute.xlu1 %2187  ;;  %v11162_v2 = vpop.permute.xlu0 %2093  ;;  %v2855_v61 = vsel %vm2852_vm6, %v2822_v63, %v11103_v16  ;;  %v1835_v16 = vrot.slane %v11182_v33, 1 }
 0x2aa   : > { %v2888_v21 = vsel %vm2885_vm7, %v2855_v61, %v2376_v58  ;;  %v2758_v61 = vsel %vm1055_vm1, %v10781_v62, %v11083_v56 }
 0x2ab   : > { %2677 = vrot.lane.b32.xlu1 %v1915_v12, %s10112_s24  ;;  %2391 = vrot.lane.b32.xlu0 %v1913_v43, %s10111_s23  ;;  %v2921_v19 = vsel %vm2918_vm8, %v2888_v21, %v2472_v38  ;;  %v2790_v58 = vsel %vm509_vm0, %v2758_v61, %v11093_v45  ;;  %v1837_v56 = vsel %vm1799_vm3, %v1835_v16, %v1836_v35  ;;  %v1720_v45 = vld [vmem:[#allocation2 + $0xb8] sm:$0x3] }
 0x2ac   : > { %v2823_v38 = vsel %vm2819_vm5, %v2790_v58, %v11105_v4  ;;  %v1838_v16 = vrot.slane %v1720_v45, 1 }
 0x2ad   : > { %v2568_v40 = vpop.permute.xlu1 %2567  ;;  %v2474_v44 = vpop.permute.xlu0 %2473  ;;  %v2856_v62 = vsel %vm2852_vm6, %v2823_v38, %v11131_v20  ;;  %v1916_v20 = vrot.slane %v11182_v33, 2 }
 0x2ae   : > { %v2954_v29 = vsel %vm2951_vm9, %v2921_v19, %v2568_v40  ;;  %v2889_v21 = vsel %vm2885_vm7, %v2856_v62, %v2378_v0  ;;  %v1839_v61 = vsel %vm1799_vm3, %v1836_v35, %v1838_v16  ;;  %v1919_v62 = vrot.slane %v1720_v45, 2 }
 0x2af   : > { %2107 = vrot.lane.b32.xlu1 %v1913_v43, %s10107_s15  ;;  %2013 = vrot.lane.b32.xlu0 %v1834_v54, %s10106_s28  ;;  %v2759_v45 = vsel %vm1055_vm1, %v10841_v46, %v11133_v41  ;;  %v11264_v41 = vld [vmem:[#allocation2 + $0xc8] sm:$0xff] }
 0x2b1   : > { %v11176_v60 = vpop.permute.xlu1 %2283  ;;  %v11178_v9 = vpop.permute.xlu0 %2189 }
 0x2b3   : > { %2487 = vrot.lane.b32.xlu1 %v11182_v33, %s10105_s27  ;;  %2393 = vrot.lane.b32.xlu0 %v1915_v12, %s10111_s23 }
 0x2b5   : > { %v2664_v43 = vpop.permute.xlu1 %2663  ;;  %v2570_v54 = vpop.permute.xlu0 %2569 }
 0x2b6   : > { %v2987_v1 = vsel %vm2984_vm10, %v2954_v29, %v2664_v43 }
 0x2b7   : > { %2203 = vrot.lane.b32.xlu1 %v11182_v33, %s10109_s20  ;;  %2109 = vrot.lane.b32.xlu0 %v1915_v12, %s10107_s15  ;;  %v2922_v12 = vsel %vm2918_vm8, %v2889_v21, %v2474_v44 }
 0x2b8   : > { %8805 = vmatprep.mubr.msk.f32.mxu1 %vm3033_vm11, %v2987_v1  ;;  %v2955_v4 = vsel %vm2951_vm9, %v2922_v12, %v2570_v54  ;;  %v1917_v1 = vrot.slane %v11188_v8, 2 }
 0x2b9   : > { %v11206_v40 = vpop.permute.xlu1 %2285  ;;  %v11208_v63 = vpop.permute.xlu0 %1999 }
 0x2ba   : > { %v1918_v54 = vsel %vm1880_vm4, %v1916_v20, %v1917_v1 }
 0x2bb   : > { %2583 = vrot.lane.b32.xlu1 %v1837_v56, %s10108_s16  ;;  %2489 = vrot.lane.b32.xlu0 %v11188_v8, %s10105_s27 }
 0x2bd   : > { %v2666_v19 = vpop.permute.xlu1 %2665  ;;  %v2380_v29 = vpop.permute.xlu0 %2379 }
 0x2be   : > { %v2988_v43 = vsel %vm2984_vm10, %v2955_v4, %v2666_v19  ;;  %v1920_v4 = vsel %vm1880_vm4, %v1917_v1, %v1919_v62  ;;  %v11258_v62 = vld [vmem:[#allocation2 + $0xc0] sm:$0xff] }
 0x2bf   : > { %2299 = vrot.lane.b32.xlu1 %v1837_v56, %s10110_s21  ;;  %2205 = vrot.lane.b32.xlu0 %v11188_v8, %s10109_s20 }
 0x2c0   : > { %8806 = vmatmul.mubr.msk.f32.gmra.mrb[50].mxu1 %vm3033_vm11, %v2988_v43 }
 0x2c1   : > { %v11226_v0 = vpop.permute.xlu1 %2095  ;;  %v11228_v44 = vpop.permute.xlu0 %2001 }
 0x2c3   : > { %2679 = vrot.lane.b32.xlu1 %v1918_v54, %s10112_s24  ;;  %2585 = vrot.lane.b32.xlu0 %v1839_v61, %s10108_s16 }
 0x2c5   : > { %v2476_v58 = vpop.permute.xlu1 %2475  ;;  %v2382_v38 = vpop.permute.xlu0 %2381 }
 0x2c7   : > { %2301 = vrot.lane.b32.xlu1 %v1839_v61, %s10110_s21  ;;  %2015 = vrot.lane.b32.xlu0 %v1837_v56, %s10106_s28  ;;  %v2791_v56 = vsel %vm509_vm0, %v2759_v45, %v11150_v17 }
 0x2c8   : > { %v2824_v43 = vsel %vm2819_vm5, %v2791_v56, %v11160_v50  ;;  %v1841_v56 = vrot.slane %v11264_v41, 1 }
 0x2c9   : > { %v11236_v21 = vpop.permute.xlu1 %2191  ;;  %v11238_v12 = vpop.permute.xlu0 %2097  ;;  %v2857_v16 = vsel %vm2852_vm6, %v2824_v43, %v11176_v60  ;;  %v1840_v60 = vrot.slane %v11258_v62, 1 }
 0x2ca   : > { %v2890_v46 = vsel %vm2885_vm7, %v2857_v16, %v2380_v29  ;;  %v2760_v29 = vsel %vm1055_vm1, %v10847_v32, %v11152_v30 }
 0x2cb   : > { %2681 = vrot.lane.b32.xlu1 %v1920_v4, %s10112_s24  ;;  %2395 = vrot.lane.b32.xlu0 %v1918_v54, %s10111_s23  ;;  %v2923_v17 = vsel %vm2918_vm8, %v2890_v46, %v2476_v58  ;;  %v2792_v58 = vsel %vm509_vm0, %v2760_v29, %v11162_v2  ;;  %v1842_v30 = vsel %vm1799_vm3, %v1840_v60, %v1841_v56  ;;  %v1723_v2 = vld [vmem:[#allocation2 + $0xd0] sm:$0x3] }
 0x2cc   : > { %v1843_v60 = vrot.slane %v1723_v2, 1 }
 0x2cd   : > { %v2572_v35 = vpop.permute.xlu1 %2571  ;;  %v2478_v19 = vpop.permute.xlu0 %2477 }
 0x2ce   : > { %v2956_v50 = vsel %vm2951_vm9, %v2923_v17, %v2572_v35  ;;  %v2825_v35 = vsel %vm2819_vm5, %v2792_v58, %v11178_v9  ;;  %v1844_v29 = vsel %vm1799_vm3, %v1841_v56, %v1843_v60 }
 0x2cf   : > { %2111 = vrot.lane.b32.xlu1 %v1918_v54, %s10107_s15  ;;  %2017 = vrot.lane.b32.xlu0 %v1839_v61, %s10106_s28  ;;  %v2858_v32 = vsel %vm2852_vm6, %v2825_v35, %v11206_v40  ;;  %v1921_v40 = vrot.slane %v11258_v62, 2 }
 0x2d0   : > { %v2891_v46 = vsel %vm2885_vm7, %v2858_v32, %v2382_v38  ;;  %v1924_v32 = vrot.slane %v1723_v2, 2  ;;  %v2761_v2 = vsel %vm1055_vm1, %v10962_v3, %v11208_v63  ;;  %v11340_v63 = vld [vmem:[#allocation2 + $0xe0] sm:$0xff] }
 0x2d1   : > { %v11252_v20 = vpop.permute.xlu1 %2287  ;;  %v11254_v1 = vpop.permute.xlu0 %2193 }
 0x2d3   : > { %2491 = vrot.lane.b32.xlu1 %v11258_v62, %s10105_s27  ;;  %2397 = vrot.lane.b32.xlu0 %v1920_v4, %s10111_s23 }
 0x2d5   : > { %v2668_v54 = vpop.permute.xlu1 %2667  ;;  %v2574_v61 = vpop.permute.xlu0 %2573 }
 0x2d6   : > { %v2989_v45 = vsel %vm2984_vm10, %v2956_v50, %v2668_v54 }
 0x2d7   : > { %2207 = vrot.lane.b32.xlu1 %v11258_v62, %s10109_s20  ;;  %2113 = vrot.lane.b32.xlu0 %v1920_v4, %s10107_s15  ;;  %v2924_v4 = vsel %vm2918_vm8, %v2891_v46, %v2478_v19 }
 0x2d8   : > { %8808 = vmatprep.mubr.msk.f32.mxu1 %vm3033_vm11, %v2989_v45  ;;  %v2957_v9 = vsel %vm2951_vm9, %v2924_v4, %v2574_v61  ;;  %v1922_v45 = vrot.slane %v11264_v41, 2 }
 0x2d9   : > { %v11282_v43 = vpop.permute.xlu1 %2289  ;;  %v11284_v16 = vpop.permute.xlu0 %2003 }
 0x2da   : > { %v1923_v61 = vsel %vm1880_vm4, %v1921_v40, %v1922_v45 }
 0x2db   : > { %2587 = vrot.lane.b32.xlu1 %v1842_v30, %s10108_s16  ;;  %2493 = vrot.lane.b32.xlu0 %v11264_v41, %s10105_s27 }
 0x2dd   : > { %v2670_v17 = vpop.permute.xlu1 %2669  ;;  %v2384_v50 = vpop.permute.xlu0 %2383 }
 0x2de   : > { %v2990_v54 = vsel %vm2984_vm10, %v2957_v9, %v2670_v17  ;;  %v1925_v9 = vsel %vm1880_vm4, %v1922_v45, %v1924_v32  ;;  %v11334_v32 = vld [vmem:[#allocation2 + $0xd8] sm:$0xff] }
 0x2df   : > { %2303 = vrot.lane.b32.xlu1 %v1842_v30, %s10110_s21  ;;  %2209 = vrot.lane.b32.xlu0 %v11264_v41, %s10109_s20 }
 0x2e0   : > { %8809 = vmatmul.mubr.msk.f32.gmra.mrb[52].mxu1 %vm3033_vm11, %v2990_v54 }
 0x2e1   : > { %v11302_v38 = vpop.permute.xlu1 %2099  ;;  %v11304_v19 = vpop.permute.xlu0 %2005 }
 0x2e3   : > { %2683 = vrot.lane.b32.xlu1 %v1923_v61, %s10112_s24  ;;  %2589 = vrot.lane.b32.xlu0 %v1844_v29, %s10108_s16 }
 0x2e5   : > { %v2480_v58 = vpop.permute.xlu1 %2479  ;;  %v2386_v35 = vpop.permute.xlu0 %2385 }
 0x2e7   : > { %2305 = vrot.lane.b32.xlu1 %v1844_v29, %s10110_s21  ;;  %2019 = vrot.lane.b32.xlu0 %v1842_v30, %s10106_s28  ;;  %v2793_v30 = vsel %vm509_vm0, %v2761_v2, %v11226_v0 }
 0x2e8   : > { %v2826_v54 = vsel %vm2819_vm5, %v2793_v30, %v11236_v21  ;;  %v1846_v30 = vrot.slane %v11340_v63, 1 }
 0x2e9   : > { %v11312_v46 = vpop.permute.xlu1 %2195  ;;  %v11314_v4 = vpop.permute.xlu0 %2101  ;;  %v2859_v60 = vsel %vm2852_vm6, %v2826_v54, %v11252_v20  ;;  %v1845_v20 = vrot.slane %v11334_v32, 1 }
 0x2ea   : > { %v2892_v3 = vsel %vm2885_vm7, %v2859_v60, %v2384_v50  ;;  %v2762_v50 = vsel %vm1055_vm1, %v10968_v59, %v11228_v44 }
 0x2eb   : > { %2685 = vrot.lane.b32.xlu1 %v1925_v9, %s10112_s24  ;;  %2399 = vrot.lane.b32.xlu0 %v1923_v61, %s10111_s23  ;;  %v2925_v0 = vsel %vm2918_vm8, %v2892_v3, %v2480_v58  ;;  %v2794_v58 = vsel %vm509_vm0, %v2762_v50, %v11238_v12  ;;  %v1847_v44 = vsel %vm1799_vm3, %v1845_v20, %v1846_v30  ;;  %v1726_v12 = vld [vmem:[#allocation2 + $0xe8] sm:$0x3] }
 0x2ec   : > { %v1848_v20 = vrot.slane %v1726_v12, 1 }
 0x2ed   : > { %v2576_v56 = vpop.permute.xlu1 %2575  ;;  %v2482_v17 = vpop.permute.xlu0 %2481 }
 0x2ee   : > { %v2958_v21 = vsel %vm2951_vm9, %v2925_v0, %v2576_v56  ;;  %v2827_v56 = vsel %vm2819_vm5, %v2794_v58, %v11254_v1  ;;  %v1849_v50 = vsel %vm1799_vm3, %v1846_v30, %v1848_v20 }
 0x2ef   : > { %2115 = vrot.lane.b32.xlu1 %v1923_v61, %s10107_s15  ;;  %2021 = vrot.lane.b32.xlu0 %v1844_v29, %s10106_s28  ;;  %v2860_v59 = vsel %vm2852_vm6, %v2827_v56, %v11282_v43  ;;  %v1926_v43 = vrot.slane %v11334_v32, 2 }
 0x2f0   : > { %v2893_v3 = vsel %vm2885_vm7, %v2860_v59, %v2386_v35  ;;  %v1929_v59 = vrot.slane %v1726_v12, 2  ;;  %v2763_v12 = vsel %vm1055_vm1, %v11012_v53, %v11284_v16  ;;  %v11416_v16 = vld [vmem:[#allocation2 + $0xf8] sm:$0xff] }
 0x2f1   : > { %v11328_v40 = vpop.permute.xlu1 %2291  ;;  %v11330_v45 = vpop.permute.xlu0 %2197 }
 0x2f3   : > { %2495 = vrot.lane.b32.xlu1 %v11334_v32, %s10105_s27  ;;  %2401 = vrot.lane.b32.xlu0 %v1925_v9, %s10111_s23 }
 0x2f5   : > { %v2672_v61 = vpop.permute.xlu1 %2671  ;;  %v2578_v29 = vpop.permute.xlu0 %2577 }
 0x2f6   : > { %v2991_v2 = vsel %vm2984_vm10, %v2958_v21, %v2672_v61 }
 0x2f7   : > { %2211 = vrot.lane.b32.xlu1 %v11334_v32, %s10109_s20  ;;  %2117 = vrot.lane.b32.xlu0 %v1925_v9, %s10107_s15  ;;  %v2926_v9 = vsel %vm2918_vm8, %v2893_v3, %v2482_v17 }
 0x2f8   : > { %8811 = vmatprep.mubr.msk.f32.mxu1 %vm3033_vm11, %v2991_v2  ;;  %v2959_v1 = vsel %vm2951_vm9, %v2926_v9, %v2578_v29  ;;  %v1927_v2 = vrot.slane %v11340_v63, 2 }
 0x2f9   : > { %v11358_v54 = vpop.permute.xlu1 %2293  ;;  %v11360_v60 = vpop.permute.xlu0 %2007 }
 0x2fa   : > { %v1928_v29 = vsel %vm1880_vm4, %v1926_v43, %v1927_v2 }
 0x2fb   : > { %2591 = vrot.lane.b32.xlu1 %v1847_v44, %s10108_s16  ;;  %2497 = vrot.lane.b32.xlu0 %v11340_v63, %s10105_s27 }
 0x2fd   : > { %v2674_v0 = vpop.permute.xlu1 %2673  ;;  %v2388_v21 = vpop.permute.xlu0 %2387 }
 0x2fe   : > { %v2992_v61 = vsel %vm2984_vm10, %v2959_v1, %v2674_v0  ;;  %v1930_v1 = vsel %vm1880_vm4, %v1927_v2, %v1929_v59  ;;  %v11410_v59 = vld [vmem:[#allocation2 + $0xf0] sm:$0xff] }
 0x2ff   : > { %2307 = vrot.lane.b32.xlu1 %v1847_v44, %s10110_s21  ;;  %2213 = vrot.lane.b32.xlu0 %v11340_v63, %s10109_s20 }
 0x300   : > { %8812 = vmatmul.mubr.msk.f32.gmra.mrb[54].mxu1 %vm3033_vm11, %v2992_v61 }
 0x301   : > { %v11378_v35 = vpop.permute.xlu1 %2103  ;;  %v11380_v17 = vpop.permute.xlu0 %2009 }
 0x303   : > { %2687 = vrot.lane.b32.xlu1 %v1928_v29, %s10112_s24  ;;  %2593 = vrot.lane.b32.xlu0 %v1849_v50, %s10108_s16 }
 0x305   : > { %v2484_v58 = vpop.permute.xlu1 %2483  ;;  %v2390_v56 = vpop.permute.xlu0 %2389 }
 0x307   : > { %2309 = vrot.lane.b32.xlu1 %v1849_v50, %s10110_s21  ;;  %2023 = vrot.lane.b32.xlu0 %v1847_v44, %s10106_s28  ;;  %v2795_v44 = vsel %vm509_vm0, %v2763_v12, %v11302_v38  ;;  %v8058_v38 = vld [vmem:[%s14522_s3 + $0x8] sm:$0xff]  ;;  %v1850_v12 = vrot.slane %v11410_v59, 1 }
 0x308   : > { %v2828_v61 = vsel %vm2819_vm5, %v2795_v44, %v11312_v46  ;;  %8850 = vmatprep.subr.mxu0 %v8058_v38  ;;  %v1851_v44 = vrot.slane %v11416_v16, 1 }
 0x309   : > { %v11388_v3 = vpop.permute.xlu1 %2199  ;;  %v11390_v9 = vpop.permute.xlu0 %2105  ;;  %v2861_v20 = vsel %vm2852_vm6, %v2828_v61, %v11328_v40  ;;  %8851 = vmatpush3.msra.mxu0 %v8058_v38  ;;  %v2764_v61 = vsel %vm1055_vm1, %v11017_v42, %v11304_v19 }
 0x30a   : > { %v2894_v53 = vsel %vm2885_vm7, %v2861_v20, %v2388_v21  ;;  %v1852_v19 = vsel %vm1799_vm3, %v1850_v12, %v1851_v44 }
 0x30b   : > { %2689 = vrot.lane.b32.xlu1 %v1930_v1, %s10112_s24  ;;  %2403 = vrot.lane.b32.xlu0 %v1928_v29, %s10111_s23  ;;  %v2927_v46 = vsel %vm2918_vm8, %v2894_v53, %v2484_v58  ;;  %v2796_v58 = vsel %vm509_vm0, %v2764_v61, %v11314_v4  ;;  %v1729_v4 = vld [vmem:[#allocation2 + $0x100] sm:$0x3] }
 0x30c   : > { %v1853_v12 = vrot.slane %v1729_v4, 1 }
 0x30d   : > { %v2580_v30 = vpop.permute.xlu1 %2579  ;;  %v2486_v0 = vpop.permute.xlu0 %2485 }
 0x30e   : > { %v2960_v40 = vsel %vm2951_vm9, %v2927_v46, %v2580_v30  ;;  %v2829_v30 = vsel %vm2819_vm5, %v2796_v58, %v11330_v45  ;;  %v1854_v61 = vsel %vm1799_vm3, %v1851_v44, %v1853_v12 }
 0x30f   : > { %2119 = vrot.lane.b32.xlu1 %v1928_v29, %s10107_s15  ;;  %2025 = vrot.lane.b32.xlu0 %v1849_v50, %s10106_s28  ;;  %v2862_v42 = vsel %vm2852_vm6, %v2829_v30, %v11358_v54  ;;  %v1931_v54 = vrot.slane %v11410_v59, 2 }
 0x310   : > { %v2895_v38 = vsel %vm2885_vm7, %v2862_v42, %v2390_v56  ;;  %v1934_v42 = vrot.slane %v1729_v4, 2  ;;  %v2765_v4 = vsel %vm1055_vm1, %v11056_v34, %v11360_v60  ;;  %v11495_v60 = vld [vmem:[#allocation2 + $0x110] sm:$0xff] }
 0x311   : > { %v11404_v43 = vpop.permute.xlu1 %2295  ;;  %v11406_v2 = vpop.permute.xlu0 %2201 }
 0x313   : > { %2499 = vrot.lane.b32.xlu1 %v11410_v59, %s10105_s27  ;;  %2405 = vrot.lane.b32.xlu0 %v1930_v1, %s10111_s23 }
 0x315   : > { %v2676_v29 = vpop.permute.xlu1 %2675  ;;  %v2582_v50 = vpop.permute.xlu0 %2581 }
 0x316   : > { %v2993_v21 = vsel %vm2984_vm10, %v2960_v40, %v2676_v29 }
 0x317   : > { %2215 = vrot.lane.b32.xlu1 %v11410_v59, %s10109_s20  ;;  %2121 = vrot.lane.b32.xlu0 %v1930_v1, %s10107_s15  ;;  %v2928_v1 = vsel %vm2918_vm8, %v2895_v38, %v2486_v0 }
 0x318   : > { %8814 = vmatprep.mubr.msk.f32.mxu1 %vm3033_vm11, %v2993_v21  ;;  %v2961_v45 = vsel %vm2951_vm9, %v2928_v1, %v2582_v50  ;;  %v1932_v21 = vrot.slane %v11416_v16, 2 }
 0x319   : > { %v11437_v20 = vpop.permute.xlu1 %2297  ;;  %v11439_v53 = vpop.permute.xlu0 %2011 }
 0x31a   : > { %v1933_v50 = vsel %vm1880_vm4, %v1931_v54, %v1932_v21 }
 0x31b   : > { %2595 = vrot.lane.b32.xlu1 %v1852_v19, %s10108_s16  ;;  %2501 = vrot.lane.b32.xlu0 %v11416_v16, %s10105_s27 }
 0x31d   : > { %v2678_v46 = vpop.permute.xlu1 %2677  ;;  %v2392_v40 = vpop.permute.xlu0 %2391 }
 0x31e   : > { %v2994_v29 = vsel %vm2984_vm10, %v2961_v45, %v2678_v46  ;;  %v1935_v45 = vsel %vm1880_vm4, %v1932_v21, %v1934_v42  ;;  %v11489_v42 = vld [vmem:[#allocation2 + $0x108] sm:$0xff] }
 0x31f   : > { %2311 = vrot.lane.b32.xlu1 %v1852_v19, %s10110_s21  ;;  %2217 = vrot.lane.b32.xlu0 %v11416_v16, %s10109_s20 }
 0x320   : > { %8815 = vmatmul.mubr.msk.f32.gmra.mrb[56].mxu1 %vm3033_vm11, %v2994_v29 }
 0x321   : > { %v11457_v56 = vpop.permute.xlu1 %2107  ;;  %v11459_v0 = vpop.permute.xlu0 %2013 }
 0x323   : > { %2691 = vrot.lane.b32.xlu1 %v1933_v50, %s10112_s24  ;;  %2597 = vrot.lane.b32.xlu0 %v1854_v61, %s10108_s16 }
 0x325   : > { %v2488_v58 = vpop.permute.xlu1 %2487  ;;  %v2394_v30 = vpop.permute.xlu0 %2393 }
 0x327   : > { %2313 = vrot.lane.b32.xlu1 %v1854_v61, %s10110_s21  ;;  %2027 = vrot.lane.b32.xlu0 %v1852_v19, %s10106_s28  ;;  %v2797_v19 = vsel %vm509_vm0, %v2765_v4, %v11378_v35 }
 0x328   : > { %v2830_v29 = vsel %vm2819_vm5, %v2797_v19, %v11388_v3  ;;  %v1856_v19 = vrot.slane %v11495_v60, 1 }
 0x329   : > { %v11467_v38 = vpop.permute.xlu1 %2203  ;;  %v11469_v1 = vpop.permute.xlu0 %2109  ;;  %v2863_v12 = vsel %vm2852_vm6, %v2830_v29, %v11404_v43  ;;  %v1855_v43 = vrot.slane %v11489_v42, 1 }
 0x32a   : > { %v2896_v34 = vsel %vm2885_vm7, %v2863_v12, %v2392_v40  ;;  %v2766_v40 = vsel %vm1055_vm1, %v11061_v6, %v11380_v17 }
 0x32b   : > { %2693 = vrot.lane.b32.xlu1 %v1935_v45, %s10112_s24  ;;  %2407 = vrot.lane.b32.xlu0 %v1933_v50, %s10111_s23  ;;  %v2929_v35 = vsel %vm2918_vm8, %v2896_v34, %v2488_v58  ;;  %v2798_v58 = vsel %vm509_vm0, %v2766_v40, %v11390_v9  ;;  %v1857_v17 = vsel %vm1799_vm3, %v1855_v43, %v1856_v19  ;;  %v1732_v9 = vld [vmem:[#allocation2 + $0x118] sm:$0x3] }
 0x32c   : > { %v1858_v43 = vrot.slane %v1732_v9, 1 }
 0x32d   : > { %v2584_v44 = vpop.permute.xlu1 %2583  ;;  %v2490_v46 = vpop.permute.xlu0 %2489 }
 0x32e   : > { %v2962_v3 = vsel %vm2951_vm9, %v2929_v35, %v2584_v44  ;;  %v2831_v44 = vsel %vm2819_vm5, %v2798_v58, %v11406_v2  ;;  %v1859_v40 = vsel %vm1799_vm3, %v1856_v19, %v1858_v43 }
 0x32f   : > { %2123 = vrot.lane.b32.xlu1 %v1933_v50, %s10107_s15  ;;  %2029 = vrot.lane.b32.xlu0 %v1854_v61, %s10106_s28  ;;  %v2864_v6 = vsel %vm2852_vm6, %v2831_v44, %v11437_v20  ;;  %v1936_v20 = vrot.slane %v11489_v42, 2 }
 0x330   : > { %v2897_v34 = vsel %vm2885_vm7, %v2864_v6, %v2394_v30  ;;  %v1939_v6 = vrot.slane %v1732_v9, 2  ;;  %v2767_v9 = vsel %vm1055_vm1, %v11108_v57, %v11439_v53  ;;  %v11571_v53 = vld [vmem:[#allocation2 + $0x128] sm:$0xff] }
 0x331   : > { %v11483_v54 = vpop.permute.xlu1 %2299  ;;  %v11485_v21 = vpop.permute.xlu0 %2205 }
 0x333   : > { %2503 = vrot.lane.b32.xlu1 %v11489_v42, %s10105_s27  ;;  %2409 = vrot.lane.b32.xlu0 %v1935_v45, %s10111_s23 }
 0x335   : > { %v2680_v50 = vpop.permute.xlu1 %2679  ;;  %v2586_v61 = vpop.permute.xlu0 %2585 }
 0x336   : > { %v2995_v4 = vsel %vm2984_vm10, %v2962_v3, %v2680_v50 }
 0x337   : > { %2219 = vrot.lane.b32.xlu1 %v11489_v42, %s10109_s20  ;;  %2125 = vrot.lane.b32.xlu0 %v1935_v45, %s10107_s15  ;;  %v2930_v45 = vsel %vm2918_vm8, %v2897_v34, %v2490_v46 }
 0x338   : > { %8817 = vmatprep.mubr.msk.f32.mxu1 %vm3033_vm11, %v2995_v4  ;;  %v2963_v2 = vsel %vm2951_vm9, %v2930_v45, %v2586_v61  ;;  %v1937_v4 = vrot.slane %v11495_v60, 2 }
 0x339   : > { %v11513_v29 = vpop.permute.xlu1 %2301  ;;  %v11515_v12 = vpop.permute.xlu0 %2015 }
 0x33a   : > { %v1938_v61 = vsel %vm1880_vm4, %v1936_v20, %v1937_v4 }
 0x33b   : > { %2599 = vrot.lane.b32.xlu1 %v1857_v17, %s10108_s16  ;;  %2505 = vrot.lane.b32.xlu0 %v11495_v60, %s10105_s27 }
 0x33d   : > { %v2682_v35 = vpop.permute.xlu1 %2681  ;;  %v2396_v3 = vpop.permute.xlu0 %2395 }
 0x33e   : > { %v2996_v50 = vsel %vm2984_vm10, %v2963_v2, %v2682_v35  ;;  %v1940_v2 = vsel %vm1880_vm4, %v1937_v4, %v1939_v6  ;;  %v11565_v6 = vld [vmem:[#allocation2 + $0x120] sm:$0xff] }
 0x33f   : > { %2315 = vrot.lane.b32.xlu1 %v1857_v17, %s10110_s21  ;;  %2221 = vrot.lane.b32.xlu0 %v11495_v60, %s10109_s20 }
 0x340   : > { %8818 = vmatmul.mubr.msk.f32.gmra.mrb[58].mxu1 %vm3033_vm11, %v2996_v50 }
 0x341   : > { %v11533_v30 = vpop.permute.xlu1 %2111  ;;  %v11535_v46 = vpop.permute.xlu0 %2017 }
 0x343   : > { %2695 = vrot.lane.b32.xlu1 %v1938_v61, %s10112_s24  ;;  %2601 = vrot.lane.b32.xlu0 %v1859_v40, %s10108_s16 }
 0x345   : > { %v2492_v58 = vpop.permute.xlu1 %2491  ;;  %v2398_v44 = vpop.permute.xlu0 %2397 }
 0x347   : > { %2317 = vrot.lane.b32.xlu1 %v1859_v40, %s10110_s21  ;;  %2031 = vrot.lane.b32.xlu0 %v1857_v17, %s10106_s28  ;;  %v2799_v17 = vsel %vm509_vm0, %v2767_v9, %v11457_v56 }
 0x348   : > { %v2832_v50 = vsel %vm2819_vm5, %v2799_v17, %v11467_v38  ;;  %v1861_v17 = vrot.slane %v11571_v53, 1 }
 0x349   : > { %v11543_v34 = vpop.permute.xlu1 %2207  ;;  %v11545_v45 = vpop.permute.xlu0 %2113  ;;  %v2865_v43 = vsel %vm2852_vm6, %v2832_v50, %v11483_v54  ;;  %v1860_v54 = vrot.slane %v11565_v6, 1 }
 0x34a   : > { %v2898_v57 = vsel %vm2885_vm7, %v2865_v43, %v2396_v3  ;;  %v2768_v3 = vsel %vm1055_vm1, %v11114_v52, %v11459_v0 }
 0x34b   : > { %2697 = vrot.lane.b32.xlu1 %v1940_v2, %s10112_s24  ;;  %2411 = vrot.lane.b32.xlu0 %v1938_v61, %s10111_s23  ;;  %v2931_v56 = vsel %vm2918_vm8, %v2898_v57, %v2492_v58  ;;  %v2800_v58 = vsel %vm509_vm0, %v2768_v3, %v11469_v1  ;;  %v1862_v0 = vsel %vm1799_vm3, %v1860_v54, %v1861_v17  ;;  %v1735_v1 = vld [vmem:[#allocation2 + $0x130] sm:$0x3] }
 0x34c   : > { %v1863_v54 = vrot.slane %v1735_v1, 1 }
 0x34d   : > { %v2588_v19 = vpop.permute.xlu1 %2587  ;;  %v2494_v35 = vpop.permute.xlu0 %2493 }
 0x34e   : > { %v2964_v38 = vsel %vm2951_vm9, %v2931_v56, %v2588_v19  ;;  %v2833_v19 = vsel %vm2819_vm5, %v2800_v58, %v11485_v21  ;;  %v1864_v3 = vsel %vm1799_vm3, %v1861_v17, %v1863_v54  ;;  %v11624_v17 = vld [vmem:[#allocation2 + $0x1a0] sm:$0xff] }
 0x34f   : > { %2127 = vrot.lane.b32.xlu1 %v1938_v61, %s10107_s15  ;;  %2033 = vrot.lane.b32.xlu0 %v1859_v40, %s10106_s28  ;;  %v2866_v52 = vsel %vm2852_vm6, %v2833_v19, %v11513_v29  ;;  %v1941_v29 = vrot.slane %v11565_v6, 2 }
 0x350   : > { %v2899_v57 = vsel %vm2885_vm7, %v2866_v52, %v2398_v44  ;;  %v1944_v52 = vrot.slane %v1735_v1, 2 }
 0x351   : > { %v11559_v20 = vpop.permute.xlu1 %2303  ;;  %v11561_v4 = vpop.permute.xlu0 %2209 }
 0x353   : > { %2507 = vrot.lane.b32.xlu1 %v11565_v6, %s10105_s27  ;;  %2413 = vrot.lane.b32.xlu0 %v1940_v2, %s10111_s23 }
 0x355   : > { %v2684_v61 = vpop.permute.xlu1 %2683  ;;  %v2590_v40 = vpop.permute.xlu0 %2589 }
 0x356   : > { %v2997_v9 = vsel %vm2984_vm10, %v2964_v38, %v2684_v61 }
 0x357   : > { %2223 = vrot.lane.b32.xlu1 %v11565_v6, %s10109_s20  ;;  %2129 = vrot.lane.b32.xlu0 %v1940_v2, %s10107_s15  ;;  %v2932_v2 = vsel %vm2918_vm8, %v2899_v57, %v2494_v35 }
 0x358   : > { %8820 = vmatprep.mubr.msk.f32.mxu1 %vm3033_vm11, %v2997_v9  ;;  %v2965_v21 = vsel %vm2951_vm9, %v2932_v2, %v2590_v40  ;;  %v1942_v9 = vrot.slane %v11571_v53, 2 }
 0x359   : > { %v11589_v50 = vpop.permute.xlu1 %2305  ;;  %v11591_v43 = vpop.permute.xlu0 %2019 }
 0x35a   : > { %v1943_v40 = vsel %vm1880_vm4, %v1941_v29, %v1942_v9  ;;  %v14548_v29 = vrot.slane %v11624_v17, 2 }
 0x35b   : > { %2603 = vrot.lane.b32.xlu1 %v1862_v0, %s10108_s16  ;;  %2509 = vrot.lane.b32.xlu0 %v11571_v53, %s10105_s27 }
 0x35d   : > { %v2686_v56 = vpop.permute.xlu1 %2685  ;;  %v2400_v38 = vpop.permute.xlu0 %2399 }
 0x35e   : > { %v2998_v61 = vsel %vm2984_vm10, %v2965_v21, %v2686_v56  ;;  %v1945_v21 = vsel %vm1880_vm4, %v1942_v9, %v1944_v52  ;;  %v10029_v56 = vld [vmem:[#allocation2 + $0x198] sm:$0xff] }
 0x35f   : > { %2319 = vrot.lane.b32.xlu1 %v1862_v0, %s10110_s21  ;;  %2225 = vrot.lane.b32.xlu0 %v11571_v53, %s10109_s20 }
 0x360   : > { %8821 = vmatmul.mubr.msk.f32.gmra.mrb[60].mxu1 %vm3033_vm11, %v2998_v61  ;;  %v1982_v61 = vrot.slane %v10029_v56, 2 }
 0x361   : > { %v11609_v44 = vpop.permute.xlu1 %2115  ;;  %v11611_v35 = vpop.permute.xlu0 %2021 }
 0x362   : > { %v11637_v9 = vsel %vm1880_vm4, %v1982_v61, %v14548_v29 }
 0x363   : > { %2699 = vrot.lane.b32.xlu1 %v1943_v40, %s10112_s24  ;;  %2605 = vrot.lane.b32.xlu0 %v1864_v3, %s10108_s16 }
 0x365   : > { %v2496_v58 = vpop.permute.xlu1 %2495  ;;  %v2402_v19 = vpop.permute.xlu0 %2401 }
 0x367   : > { %2321 = vrot.lane.b32.xlu1 %v1864_v3, %s10110_s21  ;;  %2035 = vrot.lane.b32.xlu0 %v1862_v0, %s10106_s28  ;;  %v2769_v0 = vsel %vm1055_vm1, %v11182_v33, %v11515_v12  ;;  %v11650_v33 = vld [vmem:[%s14525_s6] ss:$0 sm:$0xff] }
 0x368   : > { %v2801_v52 = vsel %vm509_vm0, %v2769_v0, %v11533_v30 }
 0x369   : > { %v11619_v57 = vpop.permute.xlu1 %2211  ;;  %v11621_v2 = vpop.permute.xlu0 %2117  ;;  %v2834_v56 = vsel %vm2819_vm5, %v2801_v52, %v11543_v34  ;;  %v11660_v34 = vld [vmem:[#allocation2 + $0x140] sm:$0xff] }
 0x36a   : > { %v2867_v12 = vsel %vm2852_vm6, %v2834_v56, %v11559_v20  ;;  %v1866_v10 = vrot.slane %v11660_v34, 1 }
 0x36b   : > { %2701 = vrot.lane.b32.xlu1 %v1945_v21, %s10112_s24  ;;  %2415 = vrot.lane.b32.xlu0 %v1943_v40, %s10111_s23 }
 0x36d   : > { %v2592_v1 = vpop.permute.xlu1 %2591  ;;  %v2498_v54 = vpop.permute.xlu0 %2497 }
 0x36f   : > { %2131 = vrot.lane.b32.xlu1 %v1943_v40, %s10107_s15  ;;  %2037 = vrot.lane.b32.xlu0 %v1864_v3, %s10106_s28  ;;  %v11654_v40 = vld [vmem:[#allocation2 + $0x138] sm:$0xff]  ;;  %v2900_v3 = vsel %vm2885_vm7, %v2867_v12, %v2400_v38 }
 0x370   : > { %v2933_v61 = vsel %vm2918_vm8, %v2900_v3, %v2496_v58  ;;  %v1865_v24 = vrot.slane %v11654_v40, 1  ;;  %v2770_v58 = vsel %vm1055_vm1, %v11188_v8, %v11535_v46 }
 0x371   : > { %v11643_v49 = vpop.permute.xlu1 %2307  ;;  %v11645_v39 = vpop.permute.xlu0 %2213  ;;  %v2966_v20 = vsel %vm2951_vm9, %v2933_v61, %v2592_v1  ;;  %v2802_v1 = vsel %vm509_vm0, %v2770_v58, %v11545_v45 }
 0x373   : > { %v8804_v30 = vpop.f32.mrb[48].mxu1  ;;  %2511 = vrot.lane.b32.xlu1 %v11654_v40, %s10105_s27  ;;  %2417 = vrot.lane.b32.xlu0 %v1945_v21, %s10111_s23 }
 0x374   : > { %v11664_v0 = vadd.f32 %v8804_v30, %v11650_v33  ;;  %v3196_v52 = vpop.f32.mrb[49].mxu1  ;;  %v2835_v30 = vsel %vm2819_vm5, %v2802_v1, %v11561_v4 }
 0x375   : > { %v11668_v56 = vadd.f32 %v11650_v33, %v3196_v52  ;;  %v2688_v38 = vpop.permute.xlu1 %2687  ;;  %v2594_v12 = vpop.permute.xlu0 %2593  ;;  %v2868_v46 = vsel %vm2852_vm6, %v2835_v30, %v11589_v50  ;;  %v1867_v52 = vsel %vm1799_vm3, %v1865_v24, %v1866_v10  ;;  %v1946_v50 = vrot.slane %v11654_v40, 2 }
 0x376   : > { %v8027_v29 = vmul.f32 -1.442695, %v11664_v0  ;;  %v2999_v26 = vsel %vm2984_vm10, %v2966_v20, %v2688_v38  ;;  %v1947_v24 = vrot.slane %v11660_v34, 2 }
 0x377   : > { %v8026_v3 = vmul.f32 -1.442695, %v11668_v56  ;;  %2227 = vrot.lane.b32.xlu1 %v11654_v40, %s10109_s20  ;;  %2133 = vrot.lane.b32.xlu0 %v1945_v21, %s10107_s15  ;;  %v2901_v21 = vsel %vm2885_vm7, %v2868_v46, %v2402_v19 }
 0x378   : > { %9515 = vpow2.f32 %v8027_v29  ;;  %8823 = vmatprep.mubr.msk.f32.mxu1 %vm3033_vm11, %v2999_v26  ;;  %v1738_v26 = vld [vmem:[#allocation2 + $0x148] sm:$0x3]  ;;  %v2934_v45 = vsel %vm2918_vm8, %v2901_v21, %v2498_v54 }
 0x379   : > { %9517 = vpow2.f32 %v8026_v3  ;;  %v11686_v61 = vpop.permute.xlu1 %2309  ;;  %v11688_v8 = vpop.permute.xlu0 %2023  ;;  %v2967_v4 = vsel %vm2951_vm9, %v2934_v45, %v2594_v12  ;;  %v1868_v58 = vrot.slane %v1738_v26, 1  ;;  %v1948_v3 = vsel %vm1880_vm4, %v1946_v50, %v1947_v24 }
 0x37b   : > { %2607 = vrot.lane.b32.xlu1 %v1867_v52, %s10108_s16  ;;  %2513 = vrot.lane.b32.xlu0 %v11660_v34, %s10105_s27  ;;  %v1869_v1 = vsel %vm1799_vm3, %v1866_v10, %v1868_v58 }
 0x37d   : > { %v2690_v29 = vpop.permute.xlu1 %2689  ;;  %v2404_v20 = vpop.permute.xlu0 %2403 }
 0x37e   : > { %v3000_v38 = vsel %vm2984_vm10, %v2967_v4, %v2690_v29  ;;  %v1949_v29 = vrot.slane %v1738_v26, 2  ;;  %v2771_v26 = vsel %vm1055_vm1, %v11258_v62, %v11591_v43  ;;  %v11740_v43 = vld [vmem:[#allocation2 + $0x150] sm:$0xff] }
 0x37f   : > { %2323 = vrot.lane.b32.xlu1 %v1867_v52, %s10110_s21  ;;  %2229 = vrot.lane.b32.xlu0 %v11660_v34, %s10109_s20 }
 0x380   : > { %8824 = vmatmul.mubr.msk.f32.gmra.mrb[62].mxu1 %vm3033_vm11, %v3000_v38  ;;  %v1950_v10 = vsel %vm1880_vm4, %v1947_v24, %v1949_v29 }
 0x381   : > { %v11706_v19 = vpop.permute.xlu1 %2119  ;;  %v11708_v54 = vpop.permute.xlu0 %2025 }
 0x382   : > { %v9516_v12 = vpop.eup %9515 }
 0x383   : > { %v9518_v30 = vpop.eup %9517  ;;  %v3452_v46 = vadd.f32 1.0, %v9516_v12  ;;  %2703 = vrot.lane.b32.xlu1 %v1948_v3, %s10112_s24  ;;  %2609 = vrot.lane.b32.xlu0 %v1869_v1, %s10108_s16 }
 0x384   : > { %v3451_v21 = vadd.f32 1.0, %v9518_v30 }
 0x385   : > { %9519 = vrcp.f32 %v3452_v46  ;;  %v2500_v45 = vpop.permute.xlu1 %2499  ;;  %v2406_v4 = vpop.permute.xlu0 %2405  ;;  %v2803_v46 = vsel %vm509_vm0, %v2771_v26, %v11609_v44 }
 0x386   : > { %9521 = vrcp.f32 %v3451_v21  ;;  %v2836_v21 = vsel %vm2819_vm5, %v2803_v46, %v11619_v57  ;;  %v11749_v57 = vld [vmem:[#allocation2 + $0x158] sm:$0xff] }
 0x387   : > { %2325 = vrot.lane.b32.xlu1 %v1869_v1, %s10110_s21  ;;  %2039 = vrot.lane.b32.xlu0 %v1867_v52, %s10106_s28  ;;  %v2869_v62 = vsel %vm2852_vm6, %v2836_v21, %v11643_v49 }
 0x388   : > { %v2902_v44 = vsel %vm2885_vm7, %v2869_v62, %v2404_v20 }
 0x389   : > { %v11716_v38 = vpop.permute.xlu1 %2215  ;;  %v11718_v50 = vpop.permute.xlu0 %2121  ;;  %v2935_v49 = vsel %vm2918_vm8, %v2902_v44, %v2500_v45  ;;  %v1870_v45 = vrot.slane %v11740_v43, 1 }
 0x38b   : > { %2705 = vrot.lane.b32.xlu1 %v1950_v10, %s10112_s24  ;;  %2419 = vrot.lane.b32.xlu0 %v1948_v3, %s10111_s23 }
 0x38d   : > { %v2596_v58 = vpop.permute.xlu1 %2595  ;;  %v2502_v12 = vpop.permute.xlu0 %2501 }
 0x38f   : > { %v9520_v30 = vpop.eup %9519  ;;  %2135 = vrot.lane.b32.xlu1 %v1948_v3, %s10107_s15  ;;  %2041 = vrot.lane.b32.xlu0 %v1869_v1, %s10106_s28 }
 0x390   : > { %v9522_v52 = vpop.eup %9521  ;;  %v3548_v24 = vmul.f32 %v9520_v30, %v11664_v0  ;;  %v2968_v30 = vsel %vm2951_vm9, %v2935_v49, %v2596_v58  ;;  %v2772_v58 = vsel %vm1055_vm1, %v11264_v41, %v11611_v35 }
 0x391   : > { %v3547_v29 = vmul.f32 %v9522_v52, %v11668_v56  ;;  %v11734_v23 = vpop.permute.xlu1 %2311  ;;  %v11736_v47 = vpop.permute.xlu0 %2217 }
 0x392   : > { %v11752_v56 = vadd.f32 %v3548_v24, %v10440_v18  ;;  %v1871_v24 = vrot.slane %v11749_v57, 1 }
 0x393   : > { %v11743_v3 = vadd.f32 %v3547_v29, %v10432_v13  ;;  %v8807_v0 = vpop.f32.mrb[50].mxu1  ;;  %2515 = vrot.lane.b32.xlu1 %v11740_v43, %s10105_s27  ;;  %2421 = vrot.lane.b32.xlu0 %v1950_v10, %s10111_s23  ;;  %v2804_v29 = vsel %vm509_vm0, %v2772_v58, %v11621_v2  ;;  %v1741_v2 = vld [vmem:[#allocation2 + $0x160] sm:$0x3] }
 0x394   : > { %v11756_v1 = vadd.f32 %v8807_v0, %v11650_v33  ;;  %v3206_v13 = vpop.f32.mrb[51].mxu1  ;;  %v2837_v62 = vsel %vm2819_vm5, %v2804_v29, %v11645_v39  ;;  %v1872_v0 = vsel %vm1799_vm3, %v1870_v45, %v1871_v24 }
 0x395   : > { %v11760_v20 = vadd.f32 %v11650_v33, %v3206_v13  ;;  %8852 = vmatprep.mubr.msk.f32.mxu0 %vm1055_vm1, %v11743_v3  ;;  %v2692_v26 = vpop.permute.xlu1 %2691  ;;  %v2598_v52 = vpop.permute.xlu0 %2597  ;;  %v2870_v35 = vsel %vm2852_vm6, %v2837_v62, %v11686_v61  ;;  %v1951_v61 = vrot.slane %v11740_v43, 2 }
 0x396   : > { %v8029_v46 = vmul.f32 -1.442695, %v11756_v1  ;;  %v3001_v18 = vsel %vm2984_vm10, %v2968_v30, %v2692_v26  ;;  %8853 = vmatmul.mubr.msk.f32.vlgmr.msra.gmra.mrb[16].mxu0 %vm1055_vm1, %v11752_v56 }
 0x397   : > { %v8028_v21 = vmul.f32 -1.442695, %v11760_v20  ;;  %2231 = vrot.lane.b32.xlu1 %v11740_v43, %s10109_s20  ;;  %2137 = vrot.lane.b32.xlu0 %v1950_v10, %s10107_s15  ;;  %v2903_v10 = vsel %vm2885_vm7, %v2870_v35, %v2406_v4 }
 0x398   : > { %9523 = vpow2.f32 %v8029_v46  ;;  %8826 = vmatprep.mubr.msk.f32.mxu1 %vm3033_vm11, %v3001_v18  ;;  %v2936_v39 = vsel %vm2918_vm8, %v2903_v10, %v2502_v12  ;;  %v1952_v46 = vrot.slane %v11749_v57, 2  ;;  %v1873_v18 = vrot.slane %v1741_v2, 1 }
 0x399   : > { %9525 = vpow2.f32 %v8028_v21  ;;  %v11782_v44 = vpop.permute.xlu1 %2313  ;;  %v11784_v41 = vpop.permute.xlu0 %2027  ;;  %v2969_v49 = vsel %vm2951_vm9, %v2936_v39, %v2598_v52  ;;  %v1954_v39 = vrot.slane %v1741_v2, 2  ;;  %v2773_v2 = vsel %vm1055_vm1, %v11334_v32, %v11688_v8  ;;  %v11836_v8 = vld [vmem:[#allocation2 + $0x168] sm:$0xff] }
 0x39a   : > { %v1953_v45 = vsel %vm1880_vm4, %v1951_v61, %v1952_v46  ;;  %v1874_v58 = vsel %vm1799_vm3, %v1871_v24, %v1873_v18 }
 0x39b   : > { %2611 = vrot.lane.b32.xlu1 %v1872_v0, %s10108_s16  ;;  %2517 = vrot.lane.b32.xlu0 %v11749_v57, %s10105_s27  ;;  %v1955_v24 = vsel %vm1880_vm4, %v1952_v46, %v1954_v39 }
 0x39d   : > { %v2694_v13 = vpop.permute.xlu1 %2693  ;;  %v2408_v30 = vpop.permute.xlu0 %2407 }
 0x39e   : > { %v3002_v26 = vsel %vm2984_vm10, %v2969_v49, %v2694_v13 }
 0x39f   : > { %2327 = vrot.lane.b32.xlu1 %v1872_v0, %s10110_s21  ;;  %2233 = vrot.lane.b32.xlu0 %v11749_v57, %s10109_s20 }
 0x3a0   : > { %8827 = vmatmul.mubr.msk.f32.gmra.mrb[64].mxu1 %vm3033_vm11, %v3002_v26 }
 0x3a1   : > { %v11802_v4 = vpop.permute.xlu1 %2123  ;;  %v11804_v12 = vpop.permute.xlu0 %2029 }
 0x3a2   : > { %v9524_v52 = vpop.eup %9523 }
 0x3a3   : > { %v9526_v21 = vpop.eup %9525  ;;  %v3454_v29 = vadd.f32 1.0, %v9524_v52  ;;  %2707 = vrot.lane.b32.xlu1 %v1953_v45, %s10112_s24  ;;  %2613 = vrot.lane.b32.xlu0 %v1874_v58, %s10108_s16  ;;  %v2805_v52 = vsel %vm509_vm0, %v2773_v2, %v11706_v19 }
 0x3a4   : > { %v3453_v62 = vadd.f32 1.0, %v9526_v21  ;;  %v2838_v21 = vsel %vm2819_vm5, %v2805_v52, %v11716_v38  ;;  %v11845_v38 = vld [vmem:[#allocation2 + $0x170] sm:$0xff] }
 0x3a5   : > { %9527 = vrcp.f32 %v3454_v29  ;;  %v2504_v35 = vpop.permute.xlu1 %2503  ;;  %v2410_v10 = vpop.permute.xlu0 %2409  ;;  %v2871_v32 = vsel %vm2852_vm6, %v2838_v21, %v11734_v23 }
 0x3a6   : > { %9529 = vrcp.f32 %v3453_v62  ;;  %v2904_v19 = vsel %vm2885_vm7, %v2871_v32, %v2408_v30 }
 0x3a7   : > { %2329 = vrot.lane.b32.xlu1 %v1874_v58, %s10110_s21  ;;  %2043 = vrot.lane.b32.xlu0 %v1872_v0, %s10106_s28  ;;  %v2937_v23 = vsel %vm2918_vm8, %v2904_v19, %v2504_v35  ;;  %v1875_v35 = vrot.slane %v11836_v8, 1 }
 0x3a9   : > { %v11812_v49 = vpop.permute.xlu1 %2219  ;;  %v11814_v13 = vpop.permute.xlu0 %2125 }
 0x3ab   : > { %2709 = vrot.lane.b32.xlu1 %v1955_v24, %s10112_s24  ;;  %2423 = vrot.lane.b32.xlu0 %v1953_v45, %s10111_s23 }
 0x3ad   : > { %v2600_v26 = vpop.permute.xlu1 %2599  ;;  %v2506_v61 = vpop.permute.xlu0 %2505 }
 0x3af   : > { %v9528_v18 = vpop.eup %9527  ;;  %2139 = vrot.lane.b32.xlu1 %v1953_v45, %s10107_s15  ;;  %2045 = vrot.lane.b32.xlu0 %v1874_v58, %s10106_s28 }
 0x3b0   : > { %v9530_v0 = vpop.eup %9529  ;;  %v3550_v46 = vmul.f32 %v9528_v18, %v11756_v1  ;;  %v2970_v18 = vsel %vm2951_vm9, %v2937_v23, %v2600_v26  ;;  %v2774_v26 = vsel %vm1055_vm1, %v11340_v63, %v11708_v54 }
 0x3b1   : > { %v3549_v29 = vmul.f32 %v9530_v0, %v11760_v20  ;;  %v11830_v62 = vpop.permute.xlu1 %2315  ;;  %v11832_v39 = vpop.permute.xlu0 %2221 }
 0x3b2   : > { %v11848_v20 = vadd.f32 %v3550_v46, %v10456_v36  ;;  %v1876_v46 = vrot.slane %v11845_v38, 1 }
 0x3b3   : > { %v11839_v45 = vadd.f32 %v3549_v29, %v10451_v28  ;;  %v8810_v1 = vpop.f32.mrb[52].mxu1  ;;  %2519 = vrot.lane.b32.xlu1 %v11836_v8, %s10105_s27  ;;  %2425 = vrot.lane.b32.xlu0 %v1955_v24, %s10111_s23  ;;  %v2806_v29 = vsel %vm509_vm0, %v2774_v26, %v11718_v50  ;;  %v1744_v50 = vld [vmem:[#allocation2 + $0x178] sm:$0x3] }
 0x3b4   : > { %v11852_v58 = vadd.f32 %v8810_v1, %v11650_v33  ;;  %v3216_v28 = vpop.f32.mrb[53].mxu1  ;;  %v2839_v32 = vsel %vm2819_vm5, %v2806_v29, %v11736_v47  ;;  %v1877_v1 = vsel %vm1799_vm3, %v1875_v35, %v1876_v46 }
 0x3b5   : > { %v11856_v30 = vadd.f32 %v11650_v33, %v3216_v28  ;;  %8855 = vmatprep.mubr.msk.f32.mxu0 %vm1055_vm1, %v11839_v45  ;;  %v2696_v2 = vpop.permute.xlu1 %2695  ;;  %v2602_v0 = vpop.permute.xlu0 %2601  ;;  %v2872_v54 = vsel %vm2852_vm6, %v2839_v32, %v11782_v44  ;;  %v1956_v44 = vrot.slane %v11836_v8, 2 }
 0x3b6   : > { %v8031_v52 = vmul.f32 -1.442695, %v11852_v58  ;;  %v3003_v36 = vsel %vm2984_vm10, %v2970_v18, %v2696_v2  ;;  %8856 = vmatmul.mubr.msk.f32.gmra.mrb[18].mxu0 %vm1055_vm1, %v11848_v20 }
 0x3b7   : > { %v8030_v21 = vmul.f32 -1.442695, %v11856_v30  ;;  %2235 = vrot.lane.b32.xlu1 %v11836_v8, %s10109_s20  ;;  %2141 = vrot.lane.b32.xlu0 %v1955_v24, %s10107_s15  ;;  %v2905_v24 = vsel %vm2885_vm7, %v2872_v54, %v2410_v10 }
 0x3b8   : > { %9531 = vpow2.f32 %v8031_v52  ;;  %8829 = vmatprep.mubr.msk.f32.mxu1 %vm3033_vm11, %v3003_v36  ;;  %v2938_v47 = vsel %vm2918_vm8, %v2905_v24, %v2506_v61  ;;  %v1957_v52 = vrot.slane %v11845_v38, 2  ;;  %v1878_v36 = vrot.slane %v1744_v50, 1 }
 0x3b9   : > { %9533 = vpow2.f32 %v8030_v21  ;;  %v11878_v19 = vpop.permute.xlu1 %2317  ;;  %v11880_v63 = vpop.permute.xlu0 %2031  ;;  %v2971_v23 = vsel %vm2951_vm9, %v2938_v47, %v2602_v0  ;;  %v1959_v47 = vrot.slane %v1744_v50, 2  ;;  %v2775_v50 = vsel %vm1055_vm1, %v11410_v59, %v11784_v41  ;;  %v1745_v41 = vld [vmem:[#allocation2 + $0x180] sm:$0xff] }
 0x3ba   : > { %v1958_v35 = vsel %vm1880_vm4, %v1956_v44, %v1957_v52  ;;  %v1879_v26 = vsel %vm1799_vm3, %v1876_v46, %v1878_v36 }
 0x3bb   : > { %2615 = vrot.lane.b32.xlu1 %v1877_v1, %s10108_s16  ;;  %2521 = vrot.lane.b32.xlu0 %v11845_v38, %s10105_s27  ;;  %v1960_v46 = vsel %vm1880_vm4, %v1957_v52, %v1959_v47 }
 0x3bd   : > { %v2698_v28 = vpop.permute.xlu1 %2697  ;;  %v2412_v18 = vpop.permute.xlu0 %2411 }
 0x3be   : > { %v3004_v2 = vsel %vm2984_vm10, %v2971_v23, %v2698_v28 }
 0x3bf   : > { %2331 = vrot.lane.b32.xlu1 %v1877_v1, %s10110_s21  ;;  %2237 = vrot.lane.b32.xlu0 %v11845_v38, %s10109_s20 }
 0x3c0   : > { %8830 = vmatmul.mubr.msk.f32.gmra.mrb[66].mxu1 %vm3033_vm11, %v3004_v2 }
 0x3c1   : > { %v11898_v10 = vpop.permute.xlu1 %2127  ;;  %v11900_v61 = vpop.permute.xlu0 %2033 }
 0x3c2   : > { %v9532_v0 = vpop.eup %9531 }
 0x3c3   : > { %v9534_v21 = vpop.eup %9533  ;;  %v3456_v29 = vadd.f32 1.0, %v9532_v0  ;;  %2711 = vrot.lane.b32.xlu1 %v1958_v35, %s10112_s24  ;;  %2617 = vrot.lane.b32.xlu0 %v1879_v26, %s10108_s16  ;;  %v2807_v0 = vsel %vm509_vm0, %v2775_v50, %v11802_v4 }
 0x3c4   : > { %v3455_v32 = vadd.f32 1.0, %v9534_v21  ;;  %v2840_v21 = vsel %vm2819_vm5, %v2807_v0, %v11812_v49  ;;  %v11938_v49 = vld [vmem:[#allocation2 + $0x188] sm:$0xff] }
 0x3c5   : > { %9535 = vrcp.f32 %v3456_v29  ;;  %v2508_v54 = vpop.permute.xlu1 %2507  ;;  %v2414_v24 = vpop.permute.xlu0 %2413  ;;  %v2873_v59 = vsel %vm2852_vm6, %v2840_v21, %v11830_v62 }
 0x3c6   : > { %9537 = vrcp.f32 %v3455_v32  ;;  %v2906_v4 = vsel %vm2885_vm7, %v2873_v59, %v2412_v18 }
 0x3c7   : > { %2333 = vrot.lane.b32.xlu1 %v1879_v26, %s10110_s21  ;;  %2047 = vrot.lane.b32.xlu0 %v1877_v1, %s10106_s28 }
 0x3c9   : > { %v11908_v23 = vpop.permute.xlu1 %2223  ;;  %v11910_v28 = vpop.permute.xlu0 %2129 }
 0x3cb   : > { %2713 = vrot.lane.b32.xlu1 %v1960_v46, %s10112_s24  ;;  %2427 = vrot.lane.b32.xlu0 %v1958_v35, %s10111_s23 }
 0x3cd   : > { %v2604_v2 = vpop.permute.xlu1 %2603  ;;  %v2510_v44 = vpop.permute.xlu0 %2509 }
 0x3cf   : > { %v9536_v36 = vpop.eup %9535  ;;  %2143 = vrot.lane.b32.xlu1 %v1958_v35, %s10107_s15  ;;  %2049 = vrot.lane.b32.xlu0 %v1879_v26, %s10106_s28 }
 0x3d0   : > { %v9538_v1 = vpop.eup %9537  ;;  %v3552_v52 = vmul.f32 %v9536_v36, %v11852_v58 }
 0x3d1   : > { %v3551_v29 = vmul.f32 %v9538_v1, %v11856_v30  ;;  %v11926_v32 = vpop.permute.xlu1 %2319  ;;  %v11928_v47 = vpop.permute.xlu0 %2225  ;;  %v2939_v30 = vsel %vm2918_vm8, %v2906_v4, %v2508_v54  ;;  %v1964_v54 = vrot.slane %v1745_v41, 1 }
 0x3d2   : > { %v11941_v58 = vadd.f32 %v3552_v52, %v10461_v48  ;;  %v1965_v52 = vrot.slane %v11938_v49, 1 }
 0x3d3   : > { %v11933_v35 = vadd.f32 %v3551_v29, %v10470_v51  ;;  %v8813_v26 = vpop.f32.mrb[54].mxu1  ;;  %2523 = vrot.lane.b32.xlu1 %v1745_v41, %s10105_s27  ;;  %2429 = vrot.lane.b32.xlu0 %v1960_v46, %s10111_s23  ;;  %v2972_v51 = vsel %vm2951_vm9, %v2939_v30, %v2604_v2  ;;  %v2776_v2 = vsel %vm1055_vm1, %v11416_v16, %v11804_v12 }
 0x3d4   : > { %v11945_v62 = vadd.f32 %v8813_v26, %v11650_v33  ;;  %v3226_v36 = vpop.f32.mrb[55].mxu1  ;;  %v2808_v29 = vsel %vm509_vm0, %v2776_v2, %v11814_v13  ;;  %v1966_v12 = vsel %vm1799_vm3, %v1964_v54, %v1965_v52  ;;  %v1747_v13 = vld [vmem:[#allocation2 + $0x190] sm:$0x3] }
 0x3d5   : > { %v11949_v18 = vadd.f32 %v11650_v33, %v3226_v36  ;;  %8858 = vmatprep.mubr.msk.f32.mxu0 %vm1055_vm1, %v11933_v35  ;;  %v2700_v50 = vpop.permute.xlu1 %2699  ;;  %v2606_v1 = vpop.permute.xlu0 %2605  ;;  %v2841_v59 = vsel %vm2819_vm5, %v2808_v29, %v11832_v39 }
 0x3d6   : > { %v8033_v0 = vmul.f32 -1.442695, %v11945_v62  ;;  %v3005_v48 = vsel %vm2984_vm10, %v2972_v51, %v2700_v50  ;;  %8859 = vmatmul.mubr.msk.f32.gmra.mrb[20].mxu0 %vm1055_vm1, %v11941_v58  ;;  %v2874_v16 = vsel %vm2852_vm6, %v2841_v59, %v11878_v19  ;;  %v1970_v19 = vrot.slane %v11938_v49, 2 }
 0x3d7   : > { %v8032_v21 = vmul.f32 -1.442695, %v11949_v18  ;;  %2239 = vrot.lane.b32.xlu1 %v1745_v41, %s10109_s20  ;;  %2145 = vrot.lane.b32.xlu0 %v1960_v46, %s10107_s15  ;;  %v2907_v46 = vsel %vm2885_vm7, %v2874_v16, %v2414_v24  ;;  %v1972_v16 = vrot.slane %v1747_v13, 2 }
 0x3d8   : > { %9539 = vpow2.f32 %v8033_v0  ;;  %8832 = vmatprep.mubr.msk.f32.mxu1 %vm3033_vm11, %v3005_v48  ;;  %v2940_v39 = vsel %vm2918_vm8, %v2907_v46, %v2510_v44  ;;  %v1969_v0 = vrot.slane %v1745_v41, 2  ;;  %v1967_v48 = vrot.slane %v1747_v13, 1 }
 0x3d9   : > { %9541 = vpow2.f32 %v8032_v21  ;;  %v11969_v4 = vpop.permute.xlu1 %2321  ;;  %v11971_v26 = vpop.permute.xlu0 %2035  ;;  %v2973_v30 = vsel %vm2951_vm9, %v2940_v39, %v2606_v1 }
 0x3da   : > { %v1971_v54 = vsel %vm1880_vm4, %v1969_v0, %v1970_v19  ;;  %v1968_v2 = vsel %vm1799_vm3, %v1965_v52, %v1967_v48 }
 0x3db   : > { %2619 = vrot.lane.b32.xlu1 %v1966_v12, %s10108_s16  ;;  %2525 = vrot.lane.b32.xlu0 %v11938_v49, %s10105_s27 }
 0x3dd   : > { %v2702_v36 = vpop.permute.xlu1 %2701  ;;  %v2416_v51 = vpop.permute.xlu0 %2415 }
 0x3de   : > { %v3006_v50 = vsel %vm2984_vm10, %v2973_v30, %v2702_v36  ;;  %v1973_v30 = vsel %vm1880_vm4, %v1970_v19, %v1972_v16  ;;  %v14589_v36 = vrot.slane %v11624_v17, 2 }
 0x3df   : > { %2335 = vrot.lane.b32.xlu1 %v1966_v12, %s10110_s21  ;;  %2241 = vrot.lane.b32.xlu0 %v11938_v49, %s10109_s20  ;;  %v10031_v12 = vld [vmem:[#allocation2 + $0x1a8] sm:$0x3] }
 0x3e0   : > { %8833 = vmatmul.mubr.msk.f32.gmra.mrb[68].mxu1 %vm3033_vm11, %v3006_v50  ;;  %v1985_v46 = vrot.slane %v10031_v12, 2 }
 0x3e1   : > { %v11988_v24 = vpop.permute.xlu1 %2131  ;;  %v11990_v44 = vpop.permute.xlu0 %2037 }
 0x3e2   : > { %v9540_v1 = vpop.eup %9539  ;;  %v1986_v13 = vsel %vm1880_vm4, %v14589_v36, %v1985_v46 }
 0x3e3   : > { %v9542_v41 = vpop.eup %9541  ;;  %v3458_v21 = vadd.f32 1.0, %v9540_v1  ;;  %2715 = vrot.lane.b32.xlu1 %v1971_v54, %s10112_s24  ;;  %2621 = vrot.lane.b32.xlu0 %v1968_v2, %s10108_s16  ;;  %v2777_v1 = vsel %vm1055_vm1, %v11489_v42, %v11880_v63 }
 0x3e4   : > { %v3457_v29 = vadd.f32 1.0, %v9542_v41 }
 0x3e5   : > { %9543 = vrcp.f32 %v3458_v21  ;;  %v2512_v49 = vpop.permute.xlu1 %2511  ;;  %v2418_v59 = vpop.permute.xlu0 %2417 }
 0x3e6   : > { %9545 = vrcp.f32 %v3457_v29 }
 0x3e7   : > { %2431 = vrot.lane.b32.xlu1 %v1971_v54, %s10111_s23  ;;  %2337 = vrot.lane.b32.xlu0 %v1968_v2, %s10110_s21  ;;  %v2809_v54 = vsel %vm509_vm0, %v2777_v1, %v11898_v10 }
 0x3e8   : > { %v2842_v2 = vsel %vm2819_vm5, %v2809_v54, %v11908_v23 }
 0x3e9   : > { %v11998_v39 = vpop.permute.xlu1 %2227  ;;  %v12000_v52 = vpop.permute.xlu0 %2133  ;;  %v2875_v42 = vsel %vm2852_vm6, %v2842_v2, %v11926_v32  ;;  %v4200_v2 = vld [vmem:[#allocation2 + $0x10] sm:$0x3] }
 0x3ea   : > { %v2908_v63 = vsel %vm2885_vm7, %v2875_v42, %v2416_v51 }
 0x3eb   : > { %2433 = vrot.lane.b32.xlu1 %v1973_v30, %s10111_s23  ;;  %2717 = vrot.lane.b32.xlu0 %v1973_v30, %s10112_s24  ;;  %v2941_v23 = vsel %vm2918_vm8, %v2908_v63, %v2512_v49  ;;  %v2778_v49 = vsel %vm1055_vm1, %v11495_v60, %v11900_v61  ;;  %v4303_v63 = vrot.slane %v4200_v2, 1 }
 0x3ec   : > { %v2810_v36 = vsel %vm509_vm0, %v2778_v49, %v11910_v28 }
 0x3ed   : > { %v2608_v50 = vpop.permute.xlu1 %2607  ;;  %v2514_v0 = vpop.permute.xlu0 %2513 }
 0x3ee   : > { %v2974_v12 = vsel %vm2951_vm9, %v2941_v23, %v2608_v50 }
 0x3ef   : > { %v9544_v48 = vpop.eup %9543  ;;  %2721 = vrot.lane.b32.xlu1 %v1986_v13, %s10112_s24  ;;  %2719 = vrot.lane.b32.xlu0 %v11637_v9, %s10112_s24  ;;  %v2843_v13 = vsel %vm2819_vm5, %v2810_v36, %v11928_v47 }
 0x3f0   : > { %v9546_v19 = vpop.eup %9545  ;;  %v3554_v17 = vmul.f32 %v9544_v48, %v11945_v62  ;;  %v2876_v1 = vsel %vm2852_vm6, %v2843_v13, %v11969_v4 }
 0x3f1   : > { %v3553_v41 = vmul.f32 %v9546_v19, %v11949_v18  ;;  %v12020_v21 = vpop.permute.xlu1 %2323  ;;  %v12022_v29 = vpop.permute.xlu0 %2229  ;;  %v2909_v60 = vsel %vm2885_vm7, %v2876_v1, %v2418_v59 }
 0x3f2   : > { %v12031_v62 = vadd.f32 %v3554_v17, %v10493_v5  ;;  %v2942_v61 = vsel %vm2918_vm8, %v2909_v60, %v2514_v0  ;;  %v4199_v17 = vld [vmem:[#allocation2 + $0x8] sm:$0xff]  ;;  %v4250_v60 = vld [vmem:[#allocation2 + $0x1a0] sm:$0xff] }
 0x3f3   : > { %v12027_v9 = vadd.f32 %v3553_v41, %v10501_v22  ;;  %v8816_v10 = vpop.f32.mrb[56].mxu1  ;;  %v4198_v41 = vld [vmem:[#allocation2] sm:$0xff]  ;;  %v4301_v42 = vrot.slane %v4199_v17, 1 }
 0x3f4   : > { %v12035_v18 = vadd.f32 %v8816_v10, %v11650_v33  ;;  %v3236_v16 = vpop.f32.mrb[57].mxu1  ;;  %v4300_v10 = vrot.slane %v4198_v41, 1 }
 0x3f5   : > { %v12039_v46 = vadd.f32 %v11650_v33, %v3236_v16  ;;  %8861 = vmatprep.mubr.msk.f32.mxu0 %vm1055_vm1, %v12027_v9  ;;  %v2704_v22 = vpop.permute.xlu1 %2703  ;;  %v2610_v32 = vpop.permute.xlu0 %2609  ;;  %v4304_v4 = vsel %vm1799_vm3, %v4301_v42, %v4303_v63 }
 0x3f6   : > { %v8035_v51 = vmul.f32 -1.442695, %v12035_v18  ;;  %v3007_v5 = vsel %vm2984_vm10, %v2974_v12, %v2704_v22  ;;  %8862 = vmatmul.mubr.msk.f32.gmra.mrb[22].mxu0 %vm1055_vm1, %v12031_v62  ;;  %v2975_v19 = vsel %vm2951_vm9, %v2942_v61, %v2610_v32  ;;  %4488 = vrot.lane.b32.xlu1 %v4304_v4, %s10106_s28  ;;  %v4302_v0 = vsel %vm1799_vm3, %v4300_v10, %v4301_v42  ;;  %v4249_v61 = vld [vmem:[#allocation2 + $0x198] sm:$0xff] }
 0x3f7   : > { %v8034_v30 = vmul.f32 -1.442695, %v12039_v46  ;;  %8835 = vmatprep.mubr.msk.f32.mxu1 %vm3033_vm11, %v3007_v5  ;;  %4486 = vrot.lane.b32.xlu0 %v4302_v0, %s10106_s28  ;;  %v4381_v12 = vrot.slane %v4199_v17, 2  ;;  %v4383_v22 = vrot.slane %v4200_v2, 2  ;;  %v4380_v5 = vrot.slane %v4198_v41, 2 }
 0x3f8   : > { %9547 = vpow2.f32 %v8035_v51  ;;  %v4251_v17 = vld [vmem:[#allocation2 + $0x1a8] sm:$0x3]  ;;  %v4477_v2 = vrot.slane %v4250_v60, 1  ;;  %v4476_v41 = vrot.slane %v4249_v61, 1 }
 0x3f9   : > { %9549 = vpow2.f32 %v8034_v30  ;;  %v12056_v50 = vpop.permute.xlu1 %2325  ;;  %v12058_v48 = vpop.permute.xlu0 %2039  ;;  %v4384_v30 = vsel %vm1880_vm4, %v4381_v12, %v4383_v22  ;;  %v4382_v1 = vsel %vm1880_vm4, %v4380_v5, %v4381_v12 }
 0x3fa   : > { %4584 = vrot.lane.b32.xlu1 %v4384_v30, %s10107_s15  ;;  %v4478_v42 = vsel %vm1799_vm3, %v4476_v41, %v4477_v2 }
 0x3fb   : > { %4582 = vrot.lane.b32.xlu0 %v4382_v1, %s10107_s15 }
 0x3fd   : > { %v2706_v54 = vpop.permute.xlu1 %2705  ;;  %v2420_v28 = vpop.permute.xlu0 %2419 }
 0x3fe   : > { %v3008_v47 = vsel %vm2984_vm10, %v2975_v19, %v2706_v54  ;;  %5028 = vrot.lane.b32.xlu1 %v4250_v60, %s10105_s27 }
 0x3ff   : > { %8836 = vmatmul.mubr.msk.f32.gmra.mrb[70].mxu1 %vm3033_vm11, %v3008_v47  ;;  %5026 = vrot.lane.b32.xlu0 %v4249_v61, %s10105_s27  ;;  %v4479_v47 = vrot.slane %v4251_v17, 1 }
 0x401   : > { %v12068_v23 = vpop.permute.xlu1 %2135  ;;  %v12070_v59 = vpop.permute.xlu0 %2041  ;;  %v4480_v4 = vsel %vm1799_vm3, %v4477_v2, %v4479_v47 }
 0x402   : > { %v9548_v16 = vpop.eup %9547  ;;  %5124 = vrot.lane.b32.xlu1 %v4480_v4, %s10108_s16 }
 0x403   : > { %v9550_v32 = vpop.eup %9549  ;;  %v3460_v51 = vadd.f32 1.0, %v9548_v16  ;;  %5122 = vrot.lane.b32.xlu0 %v4478_v42, %s10108_s16  ;;  %v2779_v16 = vsel %vm1055_vm1, %v11565_v6, %v11971_v26 }
 0x404   : > { %v3459_v49 = vadd.f32 1.0, %v9550_v32  ;;  %v2811_v22 = vsel %vm509_vm0, %v2779_v16, %v11988_v24 }
 0x405   : > { %9551 = vrcp.f32 %v3460_v51  ;;  %v2516_v36 = vpop.permute.xlu1 %2515  ;;  %v2422_v13 = vpop.permute.xlu0 %2421  ;;  %v2844_v51 = vsel %vm2819_vm5, %v2811_v22, %v11998_v39 }
 0x406   : > { %9553 = vrcp.f32 %v3459_v49  ;;  %v2877_v1 = vsel %vm2852_vm6, %v2844_v51, %v12020_v21 }
 0x407   : > { %v2910_v6 = vsel %vm2885_vm7, %v2877_v1, %v2420_v28 }
 0x409   : > { %v12079_v19 = vpop.permute.xlu1 %2231  ;;  %v12081_v54 = vpop.permute.xlu0 %2137 }
 0x40d   : > { %v2612_v63 = vpop.permute.xlu1 %2611  ;;  %v2518_v10 = vpop.permute.xlu0 %2517 }
 0x40f   : > { %v9552_v0 = vpop.eup %9551 }
 0x410   : > { %v9554_v12 = vpop.eup %9553  ;;  %v3556_v32 = vmul.f32 %v9552_v0, %v12035_v18  ;;  %v2943_v18 = vsel %vm2918_vm8, %v2910_v6, %v2516_v36 }
 0x411   : > { %v3555_v5 = vmul.f32 %v9554_v12, %v12039_v46  ;;  %v2328_v49 = vpop.permute.xlu1 %2327  ;;  %v12098_v30 = vpop.permute.xlu0 %2233  ;;  %v2976_v61 = vsel %vm2951_vm9, %v2943_v18, %v2612_v63 }
 0x412   : > { %v12107_v24 = vadd.f32 %v3556_v32, %v10519_v25  ;;  %v2780_v25 = vsel %vm1055_vm1, %v11571_v53, %v11990_v44 }
 0x413   : > { %v12103_v60 = vadd.f32 %v3555_v5, %v10525_v31  ;;  %v8819_v26 = vpop.f32.mrb[58].mxu1  ;;  %v2812_v41 = vsel %vm509_vm0, %v2780_v25, %v12000_v52 }
 0x414   : > { %v3252_v39 = vadd.f32 %v8819_v26, %v11650_v33  ;;  %v3246_v46 = vpop.f32.mrb[59].mxu1  ;;  %v2845_v47 = vsel %vm2819_vm5, %v2812_v41, %v12022_v29 }
 0x415   : > { %v3247_v17 = vadd.f32 %v11650_v33, %v3246_v46  ;;  %8864 = vmatprep.mubr.msk.f32.mxu0 %vm1055_vm1, %v12103_v60  ;;  %v2708_v31 = vpop.permute.xlu1 %2707  ;;  %v2614_v21 = vpop.permute.xlu0 %2613  ;;  %v2878_v4 = vsel %vm2852_vm6, %v2845_v47, %v12056_v50 }
 0x416   : > { %v8037_v2 = vmul.f32 -1.442695, %v3252_v39  ;;  %v3009_v28 = vsel %vm2984_vm10, %v2976_v61, %v2708_v31  ;;  %8865 = vmatmul.mubr.msk.f32.gmra.mrb[24].mxu0 %vm1055_vm1, %v12107_v24  ;;  %v2911_v0 = vsel %vm2885_vm7, %v2878_v4, %v2422_v13  ;;  %v2781_v61 = vsel %vm1055_vm1, %v11654_v40, %v12058_v48 }
 0x417   : > { %v8036_v36 = vmul.f32 -1.442695, %v3247_v17  ;;  %8838 = vmatprep.mubr.msk.f32.mxu1 %vm3033_vm11, %v3009_v28  ;;  %v2944_v53 = vsel %vm2918_vm8, %v2911_v0, %v2518_v10 }
 0x418   : > { %9555 = vpow2.f32 %v8037_v2  ;;  %v2977_v44 = vsel %vm2951_vm9, %v2944_v53, %v2614_v21  ;;  %v2813_v21 = vsel %vm509_vm0, %v2781_v61, %v12068_v23 }
 0x419   : > { %9557 = vpow2.f32 %v8036_v36  ;;  %v2330_v42 = vpop.permute.xlu1 %2329  ;;  %v12126_v63 = vpop.permute.xlu0 %2043  ;;  %v2846_v28 = vsel %vm2819_vm5, %v2813_v21, %v12079_v19 }
 0x41a   : > { %v2879_v47 = vsel %vm2852_vm6, %v2846_v28, %v2328_v49 }
 0x41d   : > { %v2710_v16 = vpop.permute.xlu1 %2709  ;;  %v2424_v12 = vpop.permute.xlu0 %2423 }
 0x41e   : > { %v3010_v52 = vsel %vm2984_vm10, %v2977_v44, %v2710_v16  ;;  %v2912_v0 = vsel %vm2885_vm7, %v2879_v47, %v2424_v12 }
 0x41f   : > { %8839 = vmatmul.mubr.msk.f32.gmra.mrb[72].mxu1 %vm3033_vm11, %v3010_v52 }
 0x421   : > { %v12135_v29 = vpop.permute.xlu1 %2139  ;;  %v12137_v22 = vpop.permute.xlu0 %2045 }
 0x422   : > { %v9556_v32 = vpop.eup %9555 }
 0x423   : > { %v9558_v51 = vpop.eup %9557  ;;  %v3462_v5 = vadd.f32 1.0, %v9556_v32 }
 0x424   : > { %v3461_v50 = vadd.f32 1.0, %v9558_v51 }
 0x425   : > { %9559 = vrcp.f32 %v3462_v5  ;;  %v2520_v13 = vpop.permute.xlu1 %2519  ;;  %v2426_v1 = vpop.permute.xlu0 %2425 }
 0x426   : > { %9561 = vrcp.f32 %v3461_v50  ;;  %v2945_v23 = vsel %vm2918_vm8, %v2912_v0, %v2520_v13 }
 0x429   : > { %v12139_v10 = vpop.permute.xlu1 %2235  ;;  %v12141_v6 = vpop.permute.xlu0 %2141 }
 0x42d   : > { %v2616_v26 = vpop.permute.xlu1 %2615  ;;  %v2522_v18 = vpop.permute.xlu0 %2521 }
 0x42f   : > { %v9560_v46 = vpop.eup %9559 }
 0x430   : > { %v9562_v31 = vpop.eup %9561  ;;  %v3558_v2 = vmul.f32 %v9560_v46, %v3252_v39 }
 0x431   : > { %v3557_v25 = vmul.f32 %v9562_v31, %v3247_v17  ;;  %v2332_v36 = vpop.permute.xlu1 %2331  ;;  %v12150_v41 = vpop.permute.xlu0 %2237  ;;  %v2978_v17 = vsel %vm2951_vm9, %v2945_v23, %v2616_v26 }
 0x432   : > { %v12158_v48 = vadd.f32 %v3558_v2, %v10543_v15  ;;  %v2782_v15 = vsel %vm1055_vm1, %v11660_v34, %v12070_v59 }
 0x433   : > { %v12154_v4 = vadd.f32 %v3557_v25, %v10548_v11  ;;  %v8822_v40 = vpop.f32.mrb[60].mxu1 }
 0x434   : > { %v3262_v39 = vadd.f32 %v8822_v40, %v11650_v33  ;;  %v3256_v19 = vpop.f32.mrb[61].mxu1  ;;  %v2783_v40 = vsel %vm1055_vm1, %v11740_v43, %v12126_v63 }
 0x435   : > { %v3257_v53 = vadd.f32 %v11650_v33, %v3256_v19  ;;  %8867 = vmatprep.mubr.msk.f32.mxu0 %vm1055_vm1, %v12154_v4  ;;  %v2712_v11 = vpop.permute.xlu1 %2711  ;;  %v2618_v49 = vpop.permute.xlu0 %2617  ;;  %v2814_v33 = vsel %vm509_vm0, %v2782_v15, %v12081_v54  ;;  %v2815_v19 = vsel %vm509_vm0, %v2783_v40, %v12135_v29  ;;  %v12204_v29 = vld [vmem:[%s14525_s6] ss:$0 sm:$0xff] }
 0x436   : > { %v8039_v44 = vmul.f32 -1.442695, %v3262_v39  ;;  %v3011_v16 = vsel %vm2984_vm10, %v2978_v17, %v2712_v11  ;;  %8868 = vmatmul.mubr.msk.f32.gmra.mrb[26].mxu0 %vm1055_vm1, %v12158_v48  ;;  %v2847_v52 = vsel %vm2819_vm5, %v2814_v33, %v12098_v30  ;;  %v2848_v11 = vsel %vm2819_vm5, %v2815_v19, %v12139_v10 }
 0x437   : > { %v8038_v12 = vmul.f32 -1.442695, %v3257_v53  ;;  %8841 = vmatprep.mubr.msk.f32.mxu1 %vm3033_vm11, %v3011_v16  ;;  %v2880_v5 = vsel %vm2852_vm6, %v2847_v52, %v2330_v42  ;;  %v2881_v15 = vsel %vm2852_vm6, %v2848_v11, %v2332_v36 }
 0x438   : > { %9563 = vpow2.f32 %v8039_v44  ;;  %v2913_v50 = vsel %vm2885_vm7, %v2880_v5, %v2426_v1 }
 0x439   : > { %9565 = vpow2.f32 %v8038_v12  ;;  %v12177_v32 = vpop.permute.xlu1 %2333  ;;  %v2048_v51 = vpop.permute.xlu0 %2047  ;;  %v2946_v34 = vsel %vm2918_vm8, %v2913_v50, %v2522_v18 }
 0x43a   : > { %v2979_v59 = vsel %vm2951_vm9, %v2946_v34, %v2618_v49  ;;  %v2784_v34 = vsel %vm1055_vm1, %v11749_v57, %v12137_v22 }
 0x43d   : > { %v2714_v13 = vpop.permute.xlu1 %2713  ;;  %v2428_v26 = vpop.permute.xlu0 %2427 }
 0x43e   : > { %v3012_v54 = vsel %vm2984_vm10, %v2979_v59, %v2714_v13  ;;  %v2914_v33 = vsel %vm2885_vm7, %v2881_v15, %v2428_v26  ;;  %v2785_v59 = vsel %vm1055_vm1, %v11836_v8, %v2048_v51  ;;  %v2816_v26 = vsel %vm509_vm0, %v2784_v34, %v12141_v6  ;;  %v14591_v34 = vld [vmem:[#allocation4_spill] sm:$0xff] }
 0x43f   : > { %8842 = vmatmul.mubr.msk.f32.gmra.mrb[74].mxu1 %vm3033_vm11, %v3012_v54 }
 0x441   : > { %v2144_v46 = vpop.permute.xlu1 %2143  ;;  %v2050_v30 = vpop.permute.xlu0 %2049 }
 0x442   : > { %v9564_v61 = vpop.eup %9563  ;;  %v2817_v54 = vsel %vm509_vm0, %v2785_v59, %v2144_v46  ;;  %v2786_v22 = vsel %vm1055_vm1, %v11845_v38, %v2050_v30 }
 0x443   : > { %v9566_v31 = vpop.eup %9565  ;;  %v3464_v21 = vadd.f32 1.0, %v9564_v61  ;;  %v2849_v61 = vsel %vm2819_vm5, %v2816_v26, %v12150_v41  ;;  %v14592_v26 = vld [vmem:[#allocation3_spill] sm:$0xff] }
 0x444   : > { %v3463_v2 = vadd.f32 1.0, %v9566_v31  ;;  %v2882_v8 = vsel %vm2852_vm6, %v2849_v61, %v12177_v32 }
 0x445   : > { %9567 = vrcp.f32 %v3464_v21  ;;  %v2524_v42 = vpop.permute.xlu1 %2523  ;;  %v2430_v28 = vpop.permute.xlu0 %2429 }
 0x446   : > { %9569 = vrcp.f32 %v3463_v2  ;;  %v2947_v63 = vsel %vm2918_vm8, %v2914_v33, %v2524_v42  ;;  %v2915_v6 = vsel %vm2885_vm7, %v2882_v8, %v2430_v28 }
 0x449   : > { %v2240_v1 = vpop.permute.xlu1 %2239  ;;  %v2146_v18 = vpop.permute.xlu0 %2145 }
 0x44a   : > { %v2850_v31 = vsel %vm2819_vm5, %v2817_v54, %v2240_v1  ;;  %v2818_v46 = vsel %vm509_vm0, %v2786_v22, %v2146_v18 }
 0x44d   : > { %v2620_v25 = vpop.permute.xlu1 %2619  ;;  %v2526_v47 = vpop.permute.xlu0 %2525 }
 0x44e   : > { %v2948_v41 = vsel %vm2918_vm8, %v2915_v6, %v2526_v47 }
 0x44f   : > { %v9568_v0 = vpop.eup %9567 }
 0x450   : > { %v9570_v23 = vpop.eup %9569  ;;  %v3560_v17 = vmul.f32 %v9568_v0, %v3262_v39 }
 0x451   : > { %v3559_v49 = vmul.f32 %v9570_v23, %v3257_v53  ;;  %v2336_v44 = vpop.permute.xlu1 %2335  ;;  %v2242_v16 = vpop.permute.xlu0 %2241  ;;  %v14590_v23 = vld [vmem:[#allocation21_spill] sm:$0xff] }
 0x452   : > { %v12198_v43 = vadd.f32 %v3560_v17, %v10563_v7  ;;  %v2883_v51 = vsel %vm2852_vm6, %v2850_v31, %v2336_v44  ;;  %v2851_v42 = vsel %vm2819_vm5, %v2818_v46, %v2242_v16 }
 0x453   : > { %v12194_v12 = vadd.f32 %v3559_v49, %v10566_v27  ;;  %v8825_v52 = vpop.f32.mrb[62].mxu1  ;;  %v2980_v27 = vsel %vm2951_vm9, %v2947_v63, %v2620_v25 }
 0x454   : > { %v12207_v10 = vadd.f32 %v12204_v29, %v8825_v52  ;;  %v3266_v36 = vpop.f32.mrb[63].mxu1 }
 0x455   : > { %v3267_v39 = vadd.f32 %v12204_v29, %v3266_v36  ;;  %8870 = vmatprep.mubr.msk.f32.mxu0 %vm1055_vm1, %v12194_v12  ;;  %v2716_v7 = vpop.permute.xlu1 %2715  ;;  %v2622_v53 = vpop.permute.xlu0 %2621 }
 0x456   : > { %v8041_v5 = vmul.f32 -1.442695, %v12207_v10  ;;  %v3013_v50 = vsel %vm2984_vm10, %v2980_v27, %v2716_v7  ;;  %8871 = vmatmul.mubr.msk.f32.gmra.mrb[28].mxu0 %vm1055_vm1, %v12198_v43  ;;  %v2981_v1 = vsel %vm2951_vm9, %v2948_v41, %v2622_v53 }
 0x457   : > { %v8040_v13 = vmul.f32 -1.442695, %v3267_v39  ;;  %8844 = vmatprep.mubr.msk.f32.mxu1 %vm3033_vm11, %v3013_v50 }
 0x458   : > { %9571 = vpow2.f32 %v8041_v5 }
 0x459   : > { %9573 = vpow2.f32 %v8040_v13  ;;  %v2432_v21 = vpop.permute.xlu1 %2431  ;;  %v2338_v57 = vpop.permute.xlu0 %2337 }
 0x45a   : > { %v2916_v2 = vsel %vm2885_vm7, %v2883_v51, %v2432_v21  ;;  %v2884_v25 = vsel %vm2852_vm6, %v2851_v42, %v2338_v57 }
 0x45b   : > { %v2949_v38 = vsel %vm2918_vm8, %v2916_v2, %v11028_v14 }
 0x45c   : > { %v2982_v19 = vsel %vm2951_vm9, %v2949_v38, %v14590_v23 }
 0x45d   : > { %v2434_v32 = vpop.permute.xlu1 %2433  ;;  %v2718_v0 = vpop.permute.xlu0 %2717 }
 0x45e   : > { %v2917_v30 = vsel %vm2885_vm7, %v2884_v25, %v2434_v32  ;;  %v3014_v28 = vsel %vm2984_vm10, %v2981_v1, %v2718_v0 }
 0x45f   : > { %v2950_v18 = vsel %vm2918_vm8, %v2917_v30, %v11030_v37  ;;  %8845 = vmatmul.mubr.msk.f32.gmra.mrb[76].mxu1 %vm3033_vm11, %v3014_v28 }
 0x460   : > { %v2983_v47 = vsel %vm2951_vm9, %v2950_v18, %v11052_v55  ;;  %v12259_v55 = vld [vmem:[%s14523_s4 + $0x1] ss:$0 sm:$0xff] }
 0x461   : > { %v2722_v40 = vpop.permute.xlu1 %2721  ;;  %v2720_v17 = vpop.permute.xlu0 %2719 }
 0x462   : > { %v9572_v11 = vpop.eup %9571  ;;  %v3016_v14 = vsel %vm2984_vm10, %v2983_v47, %v2722_v40  ;;  %v3015_v49 = vsel %vm2984_vm10, %v2982_v19, %v2720_v17 }
 0x463   : > { %v9574_v44 = vpop.eup %9573  ;;  %v3466_v16 = vadd.f32 1.0, %v9572_v11  ;;  %8847 = vmatprep.mubr.msk.f32.mxu1 %vm3033_vm11, %v3015_v49 }
 0x464   : > { %v3465_v37 = vadd.f32 1.0, %v9574_v44  ;;  %8848 = vmatmul.mubr.msk.f32.gmra.mrb[78].mxu1 %vm3033_vm11, %v3016_v14 }
 0x465   : > { %9575 = vrcp.f32 %v3466_v16 }
 0x466   : > { %9577 = vrcp.f32 %v3465_v37  ;;  %v14593_v37 = vld [vmem:[#allocation5_spill] sm:$0xff] }
 0x469   : > { %v8854_v15 = vpop.f32.mrb[16].mxu0 }
 0x46a   : > { %v3789_v33 = vadd.f32 %v8854_v15, %v12259_v55  ;;  %v3783_v52 = vpop.f32.mrb[17].mxu0 }
 0x46b   : > { %v3784_v63 = vadd.f32 %v12259_v55, %v3783_v52 }
 0x46c   : > { %v8094_v36 = vmul.f32 -1.442695, %v3789_v33 }
 0x46d   : > { %v8093_v27 = vmul.f32 -1.442695, %v3784_v63 }
 0x46e   : > { %9579 = vpow2.f32 %v8094_v36 }
 0x46f   : > { %v9576_v7 = vpop.eup %9575  ;;  %9581 = vpow2.f32 %v8093_v27 }
 0x470   : > { %v9578_v53 = vpop.eup %9577  ;;  %v3562_v5 = vmul.f32 %v9576_v7, %v12207_v10 }
 0x471   : > { %v3561_v50 = vmul.f32 %v9578_v53, %v3267_v39 }
 0x472   : > { %v12268_v54 = vadd.f32 %v3562_v5, %v14592_v26 }
 0x473   : > { %v12265_v59 = vadd.f32 %v3561_v50, %v14591_v34  ;;  %v8828_v13 = vpop.f32.mrb[64].mxu1 }
 0x474   : > { %v3282_v61 = vadd.f32 %v12204_v29, %v8828_v13  ;;  %v3276_v31 = vpop.f32.mrb[65].mxu1 }
 0x475   : > { %v3277_v21 = vadd.f32 %v12204_v29, %v3276_v31  ;;  %8873 = vmatprep.mubr.msk.f32.mxu0 %vm1055_vm1, %v12265_v59 }
 0x476   : > { %v8043_v57 = vmul.f32 -1.442695, %v3282_v61  ;;  %8874 = vmatmul.mubr.msk.f32.gmra.mrb[30].mxu0 %vm1055_vm1, %v12268_v54 }
 0x477   : > { %v8042_v10 = vmul.f32 -1.442695, %v3277_v21 }
 0x478   : > { %v9580_v39 = vpop.eup %9579  ;;  %9583 = vpow2.f32 %v8043_v57 }
 0x479   : > { %v9582_v8 = vpop.eup %9581  ;;  %v4039_v22 = vadd.f32 1.0, %v9580_v39  ;;  %9585 = vpow2.f32 %v8042_v10 }
 0x47a   : > { %v4038_v51 = vadd.f32 1.0, %v9582_v8 }
 0x47b   : > { %9587 = vrcp.f32 %v4039_v22 }
 0x47c   : > { %9589 = vrcp.f32 %v4038_v51 }
 0x482   : > { %v9584_v6 = vpop.eup %9583 }
 0x483   : > { %v9586_v46 = vpop.eup %9585  ;;  %v3468_v2 = vadd.f32 1.0, %v9584_v6 }
 0x484   : > { %v3467_v41 = vadd.f32 1.0, %v9586_v46 }
 0x485   : > { %v9588_v42 = vpop.eup %9587  ;;  %9591 = vrcp.f32 %v3468_v2 }
 0x486   : > { %v9590_v1 = vpop.eup %9589  ;;  %v4135_v25 = vmul.f32 %v9588_v42, %v3789_v33  ;;  %9593 = vrcp.f32 %v3467_v41 }
 0x487   : > { %v4134_v32 = vmul.f32 %v9590_v1, %v3784_v63  ;;  %v14594_v63 = vld [vmem:[#allocation6_spill] sm:$0xff] }
 0x488   : > { %4167 = vst.msk [vmem:[#allocation2 + $0x21] sm:$0xff] %vm1055_vm1, %v4135_v25 }
 0x489   : > { %4166 = vst.msk [vmem:[#allocation2 + $0x19] sm:$0xff] %vm1055_vm1, %v4134_v32  ;;  %v8857_v0 = vpop.f32.mrb[18].mxu0 }
 0x48a   : > { %v3799_v38 = vadd.f32 %v8857_v0, %v12259_v55  ;;  %v3793_v30 = vpop.f32.mrb[19].mxu0  ;;  %v8125_v0 = vld [vmem:[%s14524_s5 + $0x48] sm:$0xff] }
 0x48b   : > { %v3794_v28 = vadd.f32 %v12259_v55, %v3793_v30  ;;  %v8126_v30 = vld [vmem:[%s14524_s5 + $0x50] sm:$0xff] }
 0x48c   : > { %v8096_v18 = vmul.f32 -1.442695, %v3799_v38 }
 0x48d   : > { %v8095_v47 = vmul.f32 -1.442695, %v3794_v28 }
 0x48e   : > { %9595 = vpow2.f32 %v8096_v18 }
 0x48f   : > { %v9592_v40 = vpop.eup %9591  ;;  %9597 = vpow2.f32 %v8095_v47  ;;  %v4203_v16 = vld [vmem:[#allocation2 + $0x28] sm:$0x3]  ;;  %v9188_v47 = vpack.c.bf16 %v8126_v30, %v8125_v0 }
 0x490   : > { %v9594_v23 = vpop.eup %9593  ;;  %v3564_v19 = vmul.f32 %v9592_v40, %v3282_v61  ;;  %v4202_v17 = vld [vmem:[#allocation2 + $0x20] sm:$0xff]  ;;  %v12280_v11 = vld [vmem:[#allocation2 + $0x18] sm:$0xff]  ;;  %v4308_v34 = vrot.slane %v4203_v16, 1  ;;  %v4388_v8 = vrot.slane %v4203_v16, 2  ;;  %v8133_v0 = vld [vmem:[%s14524_s5 + $0x88] sm:$0xff] }
 0x491   : > { %v3563_v14 = vmul.f32 %v9594_v23, %v3277_v21  ;;  %4680 = vrot.lane.b32.xlu1 %v4202_v17, %s10109_s20  ;;  %v4306_v49 = vrot.slane %v4202_v17, 1  ;;  %v4305_v44 = vrot.slane %v12280_v11, 1  ;;  %4678 = vrot.lane.b32.xlu0 %v12280_v11, %s10109_s20  ;;  %v4386_v27 = vrot.slane %v4202_v17, 2  ;;  %v8128_v17 = vld [vmem:[%s14524_s5 + $0x60] sm:$0xff] }
 0x492   : > { %v12291_v36 = vadd.f32 %v3564_v19, %v14594_v63  ;;  %v4385_v7 = vrot.slane %v12280_v11, 2  ;;  %9189 = vmatprep.subr.bf16.mxu1 %v9188_v47  ;;  %v8127_v19 = vld [vmem:[%s14524_s5 + $0x58] sm:$0xff]  ;;  %v8129_v63 = vld [vmem:[%s14524_s5 + $0x68] sm:$0xff] }
 0x493   : > { %v12287_v15 = vadd.f32 %v3563_v14, %v14593_v37  ;;  %v8831_v33 = vpop.f32.mrb[66].mxu1  ;;  %v4307_v52 = vsel %vm1799_vm3, %v4305_v44, %v4306_v49  ;;  %v4309_v10 = vsel %vm1799_vm3, %v4306_v49, %v4308_v34  ;;  %v4389_v22 = vsel %vm1880_vm4, %v4386_v27, %v4388_v8  ;;  %9191 = vmatpush3.bf16.msra.mxu1 %v9188_v47  ;;  %v8131_v8 = vld [vmem:[%s14524_s5 + $0x78] sm:$0xff] }
 0x494   : > { %v3292_v53 = vadd.f32 %v12204_v29, %v8831_v33  ;;  %v3286_v5 = vpop.f32.mrb[67].mxu1  ;;  %v4387_v31 = vsel %vm1880_vm4, %v4385_v7, %v4386_v27  ;;  %v9192_v14 = vpack.c.bf16 %v8128_v17, %v8127_v19  ;;  %v8130_v27 = vld [vmem:[%s14524_s5 + $0x70] sm:$0xff] }
 0x495   : > { %v3287_v50 = vadd.f32 %v12204_v29, %v3286_v5  ;;  %4490 = vrot.lane.b32.xlu1 %v4307_v52, %s10106_s28  ;;  %8876 = vmatprep.mubr.msk.f32.mxu0 %vm1055_vm1, %v12287_v15  ;;  %v14595_v5 = vld [vmem:[#allocation7_spill] sm:$0xff] }
 0x496   : > { %v8045_v13 = vmul.f32 -1.442695, %v3292_v53  ;;  %4774 = vrot.lane.b32.xlu0 %v4307_v52, %s10110_s21  ;;  %8877 = vmatmul.mubr.msk.f32.gmra.mrb[32].mxu0 %vm1055_vm1, %v12291_v36 }
 0x497   : > { %v8044_v26 = vmul.f32 -1.442695, %v3287_v50  ;;  %9193 = vmatprep.subr.bf16.mxu1 %v9192_v14 }
 0x498   : > { %v9596_v61 = vpop.eup %9595  ;;  %9599 = vpow2.f32 %v8045_v13  ;;  %9195 = vmatpush3.bf16.msra.mxu1 %v9192_v14  ;;  %v14597_v13 = vld [vmem:[#allocation8_spill] sm:$0xff] }
 0x499   : > { %v9598_v21 = vpop.eup %9597  ;;  %v4041_v57 = vadd.f32 1.0, %v9596_v61  ;;  %9601 = vpow2.f32 %v8044_v26  ;;  %4870 = vrot.lane.b32.xlu1 %v4387_v31, %s10111_s23 }
 0x49a   : > { %v4040_v39 = vadd.f32 1.0, %v9598_v21  ;;  %4776 = vrot.lane.b32.xlu0 %v4309_v10, %s10110_s21 }
 0x49b   : > { %9603 = vrcp.f32 %v4041_v57 }
 0x49c   : > { %9605 = vrcp.f32 %v4040_v39 }
 0x49d   : > { %4586 = vrot.lane.b32.xlu1 %v4387_v31, %s10107_s15 }
 0x49e   : > { %4492 = vrot.lane.b32.xlu0 %v4309_v10, %s10106_s28 }
 0x4a2   : > { %v9600_v51 = vpop.eup %9599  ;;  %4872 = vrot.lane.b32.xlu0 %v4389_v22, %s10111_s23 }
 0x4a3   : > { %v9602_v6 = vpop.eup %9601  ;;  %v3470_v46 = vadd.f32 1.0, %v9600_v51 }
 0x4a4   : > { %v3469_v2 = vadd.f32 1.0, %v9602_v6 }
 0x4a5   : > { %v9604_v41 = vpop.eup %9603  ;;  %9607 = vrcp.f32 %v3470_v46 }
 0x4a6   : > { %v9606_v42 = vpop.eup %9605  ;;  %v4137_v1 = vmul.f32 %v9604_v41, %v3799_v38  ;;  %9609 = vrcp.f32 %v3469_v2  ;;  %4588 = vrot.lane.b32.xlu0 %v4389_v22, %s10107_s15  ;;  %v8132_v22 = vld [vmem:[%s14524_s5 + $0x80] sm:$0xff] }
 0x4a7   : > { %v4136_v25 = vmul.f32 %v9606_v42, %v3794_v28  ;;  %v9200_v6 = vpack.c.bf16 %v8132_v22, %v8131_v8  ;;  %v14599_v8 = vld [vmem:[#allocation9_spill] sm:$0xff] }
 0x4a8   : > { %4169 = vst.msk [vmem:[#allocation2 + $0x39] sm:$0xff] %vm1055_vm1, %v4137_v1 }
 0x4a9   : > { %4168 = vst.msk [vmem:[#allocation2 + $0x31] sm:$0xff] %vm1055_vm1, %v4136_v25  ;;  %v8860_v32 = vpop.f32.mrb[20].mxu0 }
 0x4aa   : > { %v12320_v18 = vadd.f32 %v8860_v32, %v12259_v55  ;;  %v3803_v38 = vpop.f32.mrb[21].mxu0 }
 0x4ab   : > { %v12323_v28 = vadd.f32 %v12259_v55, %v3803_v38 }
 0x4ac   : > { %v8098_v40 = vmul.f32 -1.442695, %v12320_v18 }
 0x4ad   : > { %v8097_v23 = vmul.f32 -1.442695, %v12323_v28 }
 0x4ae   : > { %9611 = vpow2.f32 %v8098_v40 }
 0x4af   : > { %v9608_v49 = vpop.eup %9607  ;;  %9613 = vpow2.f32 %v8097_v23  ;;  %v12344_v7 = vld [vmem:[#allocation2 + $0x40] sm:$0x3] }
 0x4b0   : > { %v9610_v44 = vpop.eup %9609  ;;  %v3566_v16 = vmul.f32 %v9608_v49, %v3292_v53  ;;  %v4204_v37 = vld [vmem:[#allocation2 + $0x30] sm:$0xff]  ;;  %v12333_v33 = vld [vmem:[#allocation2 + $0x38] sm:$0xff]  ;;  %v9196_v53 = vpack.c.bf16 %v8130_v27, %v8129_v63  ;;  %v4313_v39 = vrot.slane %v12344_v7, 1  ;;  %v4393_v14 = vrot.slane %v12344_v7, 2 }
 0x4b1   : > { %v3565_v52 = vmul.f32 %v9610_v44, %v3287_v50  ;;  %4966 = vrot.lane.b32.xlu1 %v4204_v37, %s10105_s27  ;;  %4968 = vrot.lane.b32.xlu0 %v12333_v33, %s10105_s27  ;;  %v4310_v21 = vrot.slane %v4204_v37, 1  ;;  %v4311_v57 = vrot.slane %v12333_v33, 1  ;;  %v4390_v30 = vrot.slane %v4204_v37, 2 }
 0x4b2   : > { %v12350_v26 = vadd.f32 %v3566_v16, %v14597_v13  ;;  %9197 = vmatprep.subr.bf16.mxu1 %v9196_v53  ;;  %v4391_v38 = vrot.slane %v12333_v33, 2 }
 0x4b3   : > { %v12347_v34 = vadd.f32 %v3565_v52, %v14595_v5  ;;  %v8834_v50 = vpop.f32.mrb[68].mxu1  ;;  %9199 = vmatpush3.bf16.msra.mxu1 %v9196_v53  ;;  %v4312_v41 = vsel %vm1799_vm3, %v4310_v21, %v4311_v57  ;;  %v4314_v25 = vsel %vm1799_vm3, %v4311_v57, %v4313_v39 }
 0x4b4   : > { %14598 = vst [vmem:[#allocation4_spill] sm:$0xff] %v12350_v26  ;;  %v12353_v61 = vadd.f32 %v12204_v29, %v8834_v50  ;;  %v3296_v31 = vpop.f32.mrb[69].mxu1  ;;  %9201 = vmatprep.subr.bf16.mxu1 %v9200_v6  ;;  %v4392_v47 = vsel %vm1880_vm4, %v4390_v30, %v4391_v38 }
 0x4b5   : > { %14596 = vst [vmem:[#allocation21_spill] sm:$0xff] %v12347_v34  ;;  %v12357_v10 = vadd.f32 %v12204_v29, %v3296_v31  ;;  %4682 = vrot.lane.b32.xlu1 %v4204_v37, %s10109_s20  ;;  %8879 = vmatprep.mubr.msk.f32.mxu0 %vm1055_vm1, %v12347_v34 }
 0x4b6   : > { %v8047_v51 = vmul.f32 -1.442695, %v12353_v61  ;;  %4684 = vrot.lane.b32.xlu0 %v12333_v33, %s10109_s20  ;;  %8880 = vmatmul.mubr.msk.f32.gmra.mrb[34].mxu0 %vm1055_vm1, %v12350_v26  ;;  %v4394_v33 = vsel %vm1880_vm4, %v4391_v38, %v4393_v14 }
 0x4b7   : > { %v8046_v46 = vmul.f32 -1.442695, %v12357_v10  ;;  %9203 = vmatpush3.bf16.msra.mxu1 %v9200_v6 }
 0x4b8   : > { %v9612_v2 = vpop.eup %9611  ;;  %9615 = vpow2.f32 %v8047_v51  ;;  %8916 = vmatprep.subr.mxu1 %v8133_v0 }
 0x4b9   : > { %v9614_v42 = vpop.eup %9613  ;;  %v4043_v1 = vadd.f32 1.0, %v9612_v2  ;;  %9617 = vpow2.f32 %v8046_v46  ;;  %5062 = vrot.lane.b32.xlu1 %v4312_v41, %s10108_s16  ;;  %v14601_v46 = vld [vmem:[#allocation10_spill] sm:$0xff] }
 0x4ba   : > { %v4042_v32 = vadd.f32 1.0, %v9614_v42  ;;  %5064 = vrot.lane.b32.xlu0 %v4314_v25, %s10108_s16 }
 0x4bb   : > { %9619 = vrcp.f32 %v4043_v1  ;;  %8917 = vmatpush3.msra.mxu1 %v8133_v0 }
 0x4bc   : > { %9621 = vrcp.f32 %v4042_v32 }
 0x4bd   : > { %4778 = vrot.lane.b32.xlu1 %v4312_v41, %s10110_s21 }
 0x4be   : > { %4494 = vrot.lane.b32.xlu0 %v4312_v41, %s10106_s28 }
 0x4c1   : > { %5158 = vrot.lane.b32.xlu1 %v4392_v47, %s10112_s24 }
 0x4c2   : > { %v9616_v40 = vpop.eup %9615  ;;  %4874 = vrot.lane.b32.xlu0 %v4392_v47, %s10111_s23 }
 0x4c3   : > { %v9618_v23 = vpop.eup %9617  ;;  %v3472_v19 = vadd.f32 1.0, %v9616_v40 }
 0x4c4   : > { %v3471_v17 = vadd.f32 1.0, %v9618_v23 }
 0x4c5   : > { %v9620_v49 = vpop.eup %9619  ;;  %9623 = vrcp.f32 %v3472_v19  ;;  %4780 = vrot.lane.b32.xlu1 %v4314_v25, %s10110_s21 }
 0x4c6   : > { %v9622_v44 = vpop.eup %9621  ;;  %v4139_v16 = vmul.f32 %v9620_v49, %v12320_v18  ;;  %9625 = vrcp.f32 %v3471_v17  ;;  %4496 = vrot.lane.b32.xlu0 %v4314_v25, %s10106_s28 }
 0x4c7   : > { %v4138_v37 = vmul.f32 %v9622_v44, %v12323_v28 }
 0x4c8   : > { %4171 = vst.msk [vmem:[#allocation2 + $0x51] sm:$0xff] %vm1055_vm1, %v4139_v16 }
 0x4c9   : > { %4170 = vst.msk [vmem:[#allocation2 + $0x49] sm:$0xff] %vm1055_vm1, %v4138_v37  ;;  %5160 = vrot.lane.b32.xlu1 %v4394_v33, %s10112_s24  ;;  %v8863_v52 = vpop.f32.mrb[22].mxu0 }
 0x4ca   : > { %v12398_v63 = vadd.f32 %v8863_v52, %v12259_v55  ;;  %4876 = vrot.lane.b32.xlu0 %v4394_v33, %s10111_s23  ;;  %v3813_v18 = vpop.f32.mrb[23].mxu0 }
 0x4cb   : > { %v3814_v27 = vadd.f32 %v12259_v55, %v3813_v18 }
 0x4cc   : > { %v8100_v7 = vmul.f32 -1.442695, %v12398_v63 }
 0x4cd   : > { %v8099_v28 = vmul.f32 -1.442695, %v3814_v27  ;;  %4590 = vrot.lane.b32.xlu1 %v4392_v47, %s10107_s15 }
 0x4ce   : > { %9627 = vpow2.f32 %v8100_v7  ;;  %4592 = vrot.lane.b32.xlu0 %v4394_v33, %s10107_s15 }
 0x4cf   : > { %v9624_v53 = vpop.eup %9623  ;;  %9629 = vpow2.f32 %v8099_v28  ;;  %v4209_v39 = vld [vmem:[#allocation2 + $0x58] sm:$0x3] }
 0x4d0   : > { %v9626_v5 = vpop.eup %9625  ;;  %v3568_v50 = vmul.f32 %v9624_v53, %v12353_v61  ;;  %v4207_v13 = vld [vmem:[#allocation2 + $0x48] sm:$0xff]  ;;  %v4208_v31 = vld [vmem:[#allocation2 + $0x50] sm:$0xff]  ;;  %v4318_v1 = vrot.slane %v4209_v39, 1  ;;  %v4398_v37 = vrot.slane %v4209_v39, 2 }
 0x4d1   : > { %v3567_v21 = vmul.f32 %v9626_v5, %v12357_v10  ;;  %4970 = vrot.lane.b32.xlu1 %v4207_v13, %s10105_s27  ;;  %v4315_v41 = vrot.slane %v4207_v13, 1  ;;  %v4316_v42 = vrot.slane %v4208_v31, 1  ;;  %v4395_v23 = vrot.slane %v4207_v13, 2 }
 0x4d2   : > { %4972 = vrot.lane.b32.xlu0 %v4208_v31, %s10105_s27  ;;  %v8837_v57 = vpop.f32.mrb[70].mxu1  ;;  %v12414_v2 = vadd.f32 %v3568_v50, %v14601_v46  ;;  %v4396_v19 = vrot.slane %v4208_v31, 2 }
 0x4d3   : > { %v12410_v22 = vadd.f32 %v3567_v21, %v14599_v8  ;;  %v3312_v51 = vadd.f32 %v12204_v29, %v8837_v57  ;;  %v3306_v6 = vpop.f32.mrb[71].mxu1  ;;  %v4317_v0 = vsel %vm1799_vm3, %v4315_v41, %v4316_v42  ;;  %v4319_v47 = vsel %vm1799_vm3, %v4316_v42, %v4318_v1  ;;  %v14603_v42 = vld [vmem:[#allocation11_spill] sm:$0xff] }
 0x4d4   : > { %14602 = vst [vmem:[#allocation5_spill] sm:$0xff] %v12414_v2  ;;  %v3307_v61 = vadd.f32 %v12204_v29, %v3306_v6  ;;  %v4397_v17 = vsel %vm1880_vm4, %v4395_v23, %v4396_v19  ;;  %v4399_v28 = vsel %vm1880_vm4, %v4396_v19, %v4398_v37 }
 0x4d5   : > { %14600 = vst [vmem:[#allocation3_spill] sm:$0xff] %v12410_v22  ;;  %v8049_v10 = vmul.f32 -1.442695, %v3312_v51  ;;  %4686 = vrot.lane.b32.xlu1 %v4207_v13, %s10109_s20  ;;  %8882 = vmatprep.mubr.msk.f32.mxu0 %vm1055_vm1, %v12410_v22  ;;  %v12446_v13 = vpop.permute.xlu0 %4486 }
 0x4d6   : > { %v8048_v25 = vmul.f32 -1.442695, %v3307_v61  ;;  %4688 = vrot.lane.b32.xlu0 %v4208_v31, %s10109_s20  ;;  %8883 = vmatmul.mubr.msk.f32.gmra.mrb[36].mxu0 %vm1055_vm1, %v12414_v2 }
 0x4d7   : > { %9631 = vpow2.f32 %v8049_v10 }
 0x4d8   : > { %v9628_v32 = vpop.eup %9627  ;;  %9633 = vpow2.f32 %v8048_v25 }
 0x4d9   : > { %v9630_v30 = vpop.eup %9629  ;;  %v4045_v38 = vadd.f32 1.0, %v9628_v32  ;;  %5066 = vrot.lane.b32.xlu1 %v4317_v0, %s10108_s16  ;;  %v12455_v41 = vpop.permute.xlu0 %4582  ;;  %v14605_v32 = vld [vmem:[#allocation12_spill] sm:$0xff] }
 0x4da   : > { %v4044_v40 = vadd.f32 1.0, %v9630_v30  ;;  %5068 = vrot.lane.b32.xlu0 %v4319_v47, %s10108_s16  ;;  %v12468_v30 = vpop.permute.xlu1 %4488 }
 0x4db   : > { %9635 = vrcp.f32 %v4045_v38 }
 0x4dc   : > { %9637 = vrcp.f32 %v4044_v40 }
 0x4dd   : > { %4782 = vrot.lane.b32.xlu1 %v4317_v0, %s10110_s21 }
 0x4de   : > { %4498 = vrot.lane.b32.xlu0 %v4317_v0, %s10106_s28 }
 0x4e1   : > { %v9632_v14 = vpop.eup %9631  ;;  %5162 = vrot.lane.b32.xlu1 %v4397_v17, %s10112_s24 }
 0x4e2   : > { %v9634_v49 = vpop.eup %9633  ;;  %v3474_v44 = vadd.f32 1.0, %v9632_v14  ;;  %4878 = vrot.lane.b32.xlu0 %v4397_v17, %s10111_s23  ;;  %v12483_v14 = vpop.permute.xlu0 %5026 }
 0x4e3   : > { %v3473_v16 = vadd.f32 1.0, %v9634_v49 }
 0x4e4   : > { %9639 = vrcp.f32 %v3474_v44 }
 0x4e5   : > { %v9636_v33 = vpop.eup %9635  ;;  %9641 = vrcp.f32 %v3473_v16  ;;  %4784 = vrot.lane.b32.xlu1 %v4319_v47, %s10110_s21 }
 0x4e6   : > { %v9638_v52 = vpop.eup %9637  ;;  %v4141_v18 = vmul.f32 %v9636_v33, %v12398_v63  ;;  %4500 = vrot.lane.b32.xlu0 %v4319_v47, %s10106_s28 }
 0x4e7   : > { %v4140_v7 = vmul.f32 %v9638_v52, %v3814_v27 }
 0x4e8   : > { %4173 = vst.msk [vmem:[#allocation2 + $0x69] sm:$0xff] %vm1055_vm1, %v4141_v18  ;;  %v12488_v18 = vpop.permute.xlu1 %4584 }
 0x4e9   : > { %4172 = vst.msk [vmem:[#allocation2 + $0x61] sm:$0xff] %vm1055_vm1, %v4140_v7  ;;  %5164 = vrot.lane.b32.xlu1 %v4399_v28, %s10112_s24  ;;  %v8866_v53 = vpop.f32.mrb[24].mxu0 }
 0x4ea   : > { %v12440_v5 = vadd.f32 %v8866_v53, %v12259_v55  ;;  %4880 = vrot.lane.b32.xlu0 %v4399_v28, %s10111_s23  ;;  %v3823_v50 = vpop.f32.mrb[25].mxu0  ;;  %v12493_v53 = vpop.permute.xlu0 %5122 }
 0x4eb   : > { %v12444_v63 = vadd.f32 %v12259_v55, %v3823_v50 }
 0x4ec   : > { %v8102_v27 = vmul.f32 -1.442695, %v12440_v5  ;;  %v12496_v50 = vpop.permute.xlu1 %5028 }
 0x4ed   : > { %v8101_v31 = vmul.f32 -1.442695, %v12444_v63  ;;  %4594 = vrot.lane.b32.xlu1 %v4397_v17, %s10107_s15 }
 0x4ee   : > { %v9640_v21 = vpop.eup %9639  ;;  %9643 = vpow2.f32 %v8102_v27  ;;  %4596 = vrot.lane.b32.xlu0 %v4399_v28, %s10107_s15 }
 0x4ef   : > { %v9642_v57 = vpop.eup %9641  ;;  %v3570_v39 = vmul.f32 %v9640_v21, %v3312_v51  ;;  %9645 = vpow2.f32 %v8101_v31  ;;  %v4212_v25 = vld [vmem:[#allocation2 + $0x70] sm:$0x3] }
 0x4f0   : > { %v3569_v8 = vmul.f32 %v9642_v57, %v3307_v61  ;;  %v4210_v6 = vld [vmem:[#allocation2 + $0x60] sm:$0xff]  ;;  %v12452_v46 = vld [vmem:[#allocation2 + $0x68] sm:$0xff]  ;;  %v4323_v19 = vrot.slane %v4212_v25, 1 }
 0x4f1   : > { %4974 = vrot.lane.b32.xlu1 %v4210_v6, %s10105_s27  ;;  %v12463_v0 = vadd.f32 %v3570_v39, %v14605_v32  ;;  %v4320_v47 = vrot.slane %v4210_v6, 1  ;;  %v4321_v40 = vrot.slane %v12452_v46, 1  ;;  %v4400_v7 = vrot.slane %v4210_v6, 2  ;;  %v12505_v32 = vpop.permute.xlu1 %5124 }
 0x4f2   : > { %v12458_v10 = vadd.f32 %v3569_v8, %v14603_v42  ;;  %4976 = vrot.lane.b32.xlu0 %v12452_v46, %s10105_s27  ;;  %v8840_v1 = vpop.f32.mrb[72].mxu1  ;;  %v4401_v28 = vrot.slane %v12452_v46, 2 }
 0x4f3   : > { %14606 = vst [vmem:[#allocation7_spill] sm:$0xff] %v12463_v0  ;;  %v12466_v51 = vadd.f32 %v12204_v29, %v8840_v1  ;;  %v3316_v61 = vpop.f32.mrb[73].mxu1  ;;  %v4322_v44 = vsel %vm1799_vm3, %v4320_v47, %v4321_v40  ;;  %v4324_v33 = vsel %vm1799_vm3, %v4321_v40, %v4323_v19 }
 0x4f4   : > { %14604 = vst [vmem:[#allocation6_spill] sm:$0xff] %v12458_v10  ;;  %v12471_v38 = vadd.f32 %v12204_v29, %v3316_v61  ;;  %8885 = vmatprep.mubr.msk.f32.mxu0 %vm1055_vm1, %v12458_v10  ;;  %v4402_v27 = vsel %vm1880_vm4, %v4400_v7, %v4401_v28 }
 0x4f5   : > { %v8051_v23 = vmul.f32 -1.442695, %v12466_v51  ;;  %4690 = vrot.lane.b32.xlu1 %v4210_v6, %s10109_s20  ;;  %8886 = vmatmul.mubr.msk.f32.gmra.mrb[38].mxu0 %vm1055_vm1, %v12463_v0  ;;  %v4403_v6 = vrot.slane %v4212_v25, 2 }
 0x4f6   : > { %v8050_v17 = vmul.f32 -1.442695, %v12471_v38  ;;  %4692 = vrot.lane.b32.xlu0 %v12452_v46, %s10109_s20 }
 0x4f7   : > { %9647 = vpow2.f32 %v8051_v23  ;;  %v4404_v40 = vsel %vm1880_vm4, %v4401_v28, %v4403_v6  ;;  %v14609_v6 = vld [vmem:[#allocation14_spill] sm:$0xff] }
 0x4f8   : > { %v9644_v49 = vpop.eup %9643  ;;  %9649 = vpow2.f32 %v8050_v17 }
 0x4f9   : > { %v9646_v16 = vpop.eup %9645  ;;  %v4047_v37 = vadd.f32 1.0, %v9644_v49  ;;  %5070 = vrot.lane.b32.xlu1 %v4322_v44, %s10108_s16 }
 0x4fa   : > { %v4046_v52 = vadd.f32 1.0, %v9646_v16  ;;  %5072 = vrot.lane.b32.xlu0 %v4324_v33, %s10108_s16 }
 0x4fb   : > { %9651 = vrcp.f32 %v4047_v37 }
 0x4fc   : > { %9653 = vrcp.f32 %v4046_v52 }
 0x4fd   : > { %4786 = vrot.lane.b32.xlu1 %v4322_v44, %s10110_s21 }
 0x4fe   : > { %4502 = vrot.lane.b32.xlu0 %v4322_v44, %s10106_s28 }
 0x501   : > { %v9648_v31 = vpop.eup %9647  ;;  %5166 = vrot.lane.b32.xlu1 %v4402_v27, %s10112_s24 }
 0x502   : > { %v9650_v21 = vpop.eup %9649  ;;  %v3476_v57 = vadd.f32 1.0, %v9648_v31  ;;  %4882 = vrot.lane.b32.xlu0 %v4402_v27, %s10111_s23  ;;  %v14607_v31 = vld [vmem:[#allocation13_spill] sm:$0xff] }
 0x503   : > { %v3475_v39 = vadd.f32 1.0, %v9650_v21  ;;  %v12501_v8 = vpop.permute.xlu0 %4678 }
 0x504   : > { %9655 = vrcp.f32 %v3476_v57 }
 0x505   : > { %v9652_v46 = vpop.eup %9651  ;;  %9657 = vrcp.f32 %v3475_v39  ;;  %4788 = vrot.lane.b32.xlu1 %v4324_v33, %s10110_s21 }
 0x506   : > { %v9654_v42 = vpop.eup %9653  ;;  %v4143_v1 = vmul.f32 %v9652_v46, %v12440_v5  ;;  %4504 = vrot.lane.b32.xlu0 %v4324_v33, %s10106_s28 }
 0x507   : > { %v4142_v61 = vmul.f32 %v9654_v42, %v12444_v63  ;;  %v12522_v63 = vpop.permute.xlu1 %4680 }
 0x508   : > { %4175 = vst.msk [vmem:[#allocation2 + $0x81] sm:$0xff] %vm1055_vm1, %v4143_v1  ;;  %v12510_v47 = vpop.permute.xlu0 %4774 }
 0x509   : > { %4174 = vst.msk [vmem:[#allocation2 + $0x79] sm:$0xff] %vm1055_vm1, %v4142_v61  ;;  %5168 = vrot.lane.b32.xlu1 %v4404_v40, %s10112_s24  ;;  %v8869_v25 = vpop.f32.mrb[26].mxu0 }
 0x50a   : > { %v12516_v23 = vadd.f32 %v8869_v25, %v12259_v55  ;;  %4884 = vrot.lane.b32.xlu0 %v4404_v40, %s10111_s23  ;;  %v3833_v5 = vpop.f32.mrb[27].mxu0 }
 0x50b   : > { %v12520_v19 = vadd.f32 %v12259_v55, %v3833_v5  ;;  %v12538_v57 = vpop.permute.xlu1 %4490 }
 0x50c   : > { %v8104_v17 = vmul.f32 -1.442695, %v12516_v23  ;;  %v12526_v44 = vpop.permute.xlu0 %4776 }
 0x50d   : > { %v8103_v49 = vmul.f32 -1.442695, %v12520_v19  ;;  %4598 = vrot.lane.b32.xlu1 %v4402_v27, %s10107_s15 }
 0x50e   : > { %v9656_v16 = vpop.eup %9655  ;;  %9659 = vpow2.f32 %v8104_v17  ;;  %4600 = vrot.lane.b32.xlu0 %v4404_v40, %s10107_s15 }
 0x50f   : > { %v9658_v37 = vpop.eup %9657  ;;  %v3572_v33 = vmul.f32 %v9656_v16, %v12466_v51  ;;  %9661 = vpow2.f32 %v8103_v49  ;;  %v4215_v39 = vld [vmem:[#allocation2 + $0x88] sm:$0x3] }
 0x510   : > { %v3571_v52 = vmul.f32 %v9658_v37, %v12471_v38  ;;  %v4213_v7 = vld [vmem:[#allocation2 + $0x78] sm:$0xff]  ;;  %v12532_v28 = vld [vmem:[#allocation2 + $0x80] sm:$0xff]  ;;  %v12545_v46 = vpop.permute.xlu0 %4492  ;;  %v4328_v5 = vrot.slane %v4215_v39, 1 }
 0x511   : > { %4978 = vrot.lane.b32.xlu1 %v4213_v7, %s10105_s27  ;;  %v12543_v51 = vadd.f32 %v3572_v33, %v14609_v6  ;;  %v4325_v61 = vrot.slane %v4213_v7, 1  ;;  %v4326_v40 = vrot.slane %v12532_v28, 1  ;;  %v12564_v33 = vpop.permute.xlu1 %4870  ;;  %v4405_v6 = vrot.slane %v4213_v7, 2 }
 0x512   : > { %v12536_v21 = vadd.f32 %v3571_v52, %v14607_v31  ;;  %4980 = vrot.lane.b32.xlu0 %v12532_v28, %s10105_s27  ;;  %v8843_v27 = vpop.f32.mrb[74].mxu1 }
 0x513   : > { %14610 = vst [vmem:[#allocation9_spill] sm:$0xff] %v12543_v51  ;;  %v12548_v38 = vadd.f32 %v12204_v29, %v8843_v27  ;;  %v3326_v42 = vpop.f32.mrb[75].mxu1  ;;  %v4327_v49 = vsel %vm1799_vm3, %v4325_v61, %v4326_v40  ;;  %v4329_v31 = vsel %vm1799_vm3, %v4326_v40, %v4328_v5 }
 0x514   : > { %14608 = vst [vmem:[#allocation8_spill] sm:$0xff] %v12536_v21  ;;  %v12551_v1 = vadd.f32 %v12204_v29, %v3326_v42  ;;  %8888 = vmatprep.mubr.msk.f32.mxu0 %vm1055_vm1, %v12536_v21  ;;  %v12566_v52 = vpop.permute.xlu0 %4872  ;;  %v4406_v42 = vrot.slane %v12532_v28, 2 }
 0x515   : > { %v8053_v25 = vmul.f32 -1.442695, %v12548_v38  ;;  %4694 = vrot.lane.b32.xlu1 %v4213_v7, %s10109_s20  ;;  %8889 = vmatmul.mubr.msk.f32.gmra.mrb[40].mxu0 %vm1055_vm1, %v12543_v51  ;;  %v12574_v61 = vpop.permute.xlu1 %4586 }
 0x516   : > { %v8052_v17 = vmul.f32 -1.442695, %v12551_v1  ;;  %4696 = vrot.lane.b32.xlu0 %v12532_v28, %s10109_s20 }
 0x517   : > { %9663 = vpow2.f32 %v8053_v25 }
 0x518   : > { %v9660_v29 = vpop.eup %9659  ;;  %9665 = vpow2.f32 %v8052_v17  ;;  %v12576_v25 = vpop.permute.xlu0 %4588  ;;  %v4407_v17 = vsel %vm1880_vm4, %v4405_v6, %v4406_v42 }
 0x519   : > { %v9662_v16 = vpop.eup %9661  ;;  %v4049_v37 = vadd.f32 1.0, %v9660_v29  ;;  %5074 = vrot.lane.b32.xlu1 %v4327_v49, %s10108_s16 }
 0x51a   : > { %v4048_v27 = vadd.f32 1.0, %v9662_v16  ;;  %5076 = vrot.lane.b32.xlu0 %v4329_v31, %s10108_s16 }
 0x51b   : > { %9667 = vrcp.f32 %v4049_v37  ;;  %v4408_v37 = vrot.slane %v4215_v39, 2  ;;  %v10033_v39 = vld [vmem:[#allocation2] sm:$0xff] }
 0x51c   : > { %9669 = vrcp.f32 %v4048_v27 }
 0x51d   : > { %4790 = vrot.lane.b32.xlu1 %v4327_v49, %s10110_s21 }
 0x51e   : > { %4506 = vrot.lane.b32.xlu0 %v4327_v49, %s10106_s28 }
 0x521   : > { %v9664_v29 = vpop.eup %9663  ;;  %5170 = vrot.lane.b32.xlu1 %v4407_v17, %s10112_s24 }
 0x522   : > { %v9666_v40 = vpop.eup %9665  ;;  %v3478_v5 = vadd.f32 1.0, %v9664_v29  ;;  %4886 = vrot.lane.b32.xlu0 %v4407_v17, %s10111_s23 }
 0x523   : > { %v3477_v7 = vadd.f32 1.0, %v9666_v40  ;;  %v4967_v16 = vpop.permute.xlu1 %4966  ;;  %v12581_v28 = vpop.permute.xlu0 %4968 }
 0x524   : > { %9671 = vrcp.f32 %v3478_v5  ;;  %v4409_v5 = vsel %vm1880_vm4, %v4406_v42, %v4408_v37 }
 0x525   : > { %v9668_v49 = vpop.eup %9667  ;;  %9673 = vrcp.f32 %v3477_v7  ;;  %4792 = vrot.lane.b32.xlu1 %v4329_v31, %s10110_s21  ;;  %v5254_v7 = vsel %vm1055_vm1, %v10033_v39, %v12446_v13 }
 0x526   : > { %v9670_v27 = vpop.eup %9669  ;;  %v4145_v6 = vmul.f32 %v9668_v49, %v12516_v23  ;;  %4508 = vrot.lane.b32.xlu0 %v4329_v31, %s10106_s28  ;;  %v5286_v42 = vsel %vm509_vm0, %v5254_v7, %v12455_v41  ;;  %v10034_v7 = vld [vmem:[#allocation2 + $0x8] sm:$0xff] }
 0x527   : > { %v4144_v51 = vmul.f32 %v9670_v27, %v12520_v19  ;;  %v12587_v29 = vpop.permute.xlu1 %4682 }
 0x528   : > { %4177 = vst.msk [vmem:[#allocation2 + $0x99] sm:$0xff] %vm1055_vm1, %v4145_v6  ;;  %v12590_v40 = vpop.permute.xlu0 %4684 }
 0x529   : > { %4176 = vst.msk [vmem:[#allocation2 + $0x91] sm:$0xff] %vm1055_vm1, %v4144_v51  ;;  %5172 = vrot.lane.b32.xlu1 %v4409_v5, %s10112_s24  ;;  %v8872_v23 = vpop.f32.mrb[28].mxu0 }
 0x52a   : > { %v12598_v31 = vadd.f32 %v8872_v23, %v12259_v55  ;;  %4888 = vrot.lane.b32.xlu0 %v4409_v5, %s10111_s23  ;;  %v3843_v19 = vpop.f32.mrb[29].mxu0 }
 0x52b   : > { %v12602_v49 = vadd.f32 %v12259_v55, %v3843_v19  ;;  %v5063_v27 = vpop.permute.xlu1 %5062  ;;  %v5318_v55 = vsel %vm2819_vm5, %v5286_v42, %v12501_v8  ;;  %v5255_v19 = vsel %vm1055_vm1, %v10034_v7, %v12468_v30  ;;  %v10035_v7 = vld [vmem:[%s14525_s6] ss:$0 sm:$0xff] }
 0x52c   : > { %v8106_v13 = vmul.f32 -1.442695, %v12598_v31  ;;  %v12607_v37 = vpop.permute.xlu0 %5064 }
 0x52d   : > { %v8105_v51 = vmul.f32 -1.442695, %v12602_v49  ;;  %4602 = vrot.lane.b32.xlu1 %v4407_v17, %s10107_s15  ;;  %v5350_v17 = vsel %vm2852_vm6, %v5318_v55, %v12510_v47 }
 0x52e   : > { %v9672_v6 = vpop.eup %9671  ;;  %9675 = vpow2.f32 %v8106_v13  ;;  %4604 = vrot.lane.b32.xlu0 %v4409_v5, %s10107_s15  ;;  %v5382_v8 = vsel %vm2885_vm7, %v5350_v17, %v12564_v33 }
 0x52f   : > { %v9674_v39 = vpop.eup %9673  ;;  %v3574_v23 = vmul.f32 %v9672_v6, %v12548_v38  ;;  %9677 = vpow2.f32 %v8105_v51  ;;  %v12615_v41 = vpop.permute.xlu1 %4778  ;;  %v14611_v38 = vld [vmem:[#allocation15_spill] sm:$0xff]  ;;  %v5414_v30 = vsel %vm2918_vm8, %v5382_v8, %v4967_v16  ;;  %v5287_v51 = vsel %vm509_vm0, %v5255_v19, %v12488_v18  ;;  %v14613_v6 = vld [vmem:[#allocation16_spill] sm:$0xff] }
 0x530   : > { %v3573_v13 = vmul.f32 %v9674_v39, %v12551_v1  ;;  %v12622_v21 = vpop.permute.xlu0 %4494  ;;  %v12624_v5 = vld [vmem:[#allocation2 + $0x90] sm:$0xff]  ;;  %v12626_v0 = vld [vmem:[#allocation2 + $0x98] sm:$0xff]  ;;  %v12638_v1 = vld [vmem:[#allocation2 + $0xa0] sm:$0x3]  ;;  %v5446_v33 = vsel %vm2951_vm9, %v5414_v30, %v5063_v27 }
 0x531   : > { %4982 = vrot.lane.b32.xlu1 %v12624_v5, %s10105_s27  ;;  %v12643_v39 = vadd.f32 %v3574_v23, %v14613_v6  ;;  %v4330_v18 = vrot.slane %v12624_v5, 1  ;;  %v4331_v27 = vrot.slane %v12626_v0, 1  ;;  %v4333_v19 = vrot.slane %v12638_v1, 1 }
 0x532   : > { %v12633_v42 = vadd.f32 %v3573_v13, %v14611_v38  ;;  %4984 = vrot.lane.b32.xlu0 %v12626_v0, %s10105_s27  ;;  %v8846_v47 = vpop.f32.mrb[76].mxu1 }
 0x533   : > { %14614 = vst [vmem:[#allocation11_spill] sm:$0xff] %v12643_v39  ;;  %v5159_v55 = vpop.permute.xlu1 %5158  ;;  %v12649_v16 = vadd.f32 %v10035_v7, %v8846_v47  ;;  %v3336_v17 = vpop.f32.mrb[77].mxu1  ;;  %v5319_v47 = vsel %vm2819_vm5, %v5287_v51, %v12522_v63  ;;  %v4332_v10 = vsel %vm1799_vm3, %v4330_v18, %v4331_v27 }
 0x534   : > { %14612 = vst [vmem:[#allocation10_spill] sm:$0xff] %v12633_v42  ;;  %v5478_v13 = vsel %vm2984_vm10, %v5446_v33, %v5159_v55  ;;  %v12652_v8 = vpop.permute.xlu0 %4874  ;;  %v12654_v38 = vadd.f32 %v10035_v7, %v3336_v17  ;;  %8891 = vmatprep.mubr.msk.f32.mxu0 %vm1055_vm1, %v12633_v42  ;;  %v5351_v17 = vsel %vm2852_vm6, %v5319_v47, %v12526_v44 }
 0x535   : > { %v8055_v23 = vmul.f32 -1.442695, %v12649_v16  ;;  %4698 = vrot.lane.b32.xlu1 %v12624_v5, %s10109_s20  ;;  %8918 = vmatprep.mubr.msk.f32.mxu1 %vm3033_vm11, %v5478_v13  ;;  %v5383_v63 = vsel %vm2885_vm7, %v5351_v17, %v12566_v52 }
 0x536   : > { %v8054_v30 = vmul.f32 -1.442695, %v12654_v38  ;;  %4700 = vrot.lane.b32.xlu0 %v12626_v0, %s10109_s20  ;;  %8892 = vmatmul.mubr.msk.f32.gmra.mrb[42].mxu0 %vm1055_vm1, %v12643_v39  ;;  %v5415_v44 = vsel %vm2918_vm8, %v5383_v63, %v12581_v28  ;;  %v4411_v28 = vrot.slane %v12626_v0, 2 }
 0x537   : > { %9679 = vpow2.f32 %v8055_v23  ;;  %v12672_v6 = vpop.permute.xlu1 %4780  ;;  %v8849_v33 = vpop.f32.mrb[78].mxu1  ;;  %v4334_v23 = vsel %vm1799_vm3, %v4331_v27, %v4333_v19  ;;  %v5447_v18 = vsel %vm2951_vm9, %v5415_v44, %v12607_v37 }
 0x538   : > { %v9676_v55 = vpop.eup %9675  ;;  %9681 = vpow2.f32 %v8054_v30  ;;  %v12676_v13 = vpop.permute.xlu0 %4496  ;;  %v12678_v42 = vadd.f32 %v10035_v7, %v8849_v33 }
 0x539   : > { %v3346_v2 = vpop.f32.mrb[79].mxu1  ;;  %v9678_v39 = vpop.eup %9677  ;;  %v4051_v51 = vadd.f32 1.0, %v9676_v55  ;;  %5078 = vrot.lane.b32.xlu1 %v4332_v10, %s10108_s16 }
 0x53a   : > { %v12685_v22 = vadd.f32 %v10035_v7, %v3346_v2  ;;  %v4050_v30 = vadd.f32 1.0, %v9678_v39  ;;  %v8057_v47 = vmul.f32 -1.442695, %v12678_v42  ;;  %5080 = vrot.lane.b32.xlu0 %v4334_v23, %s10108_s16  ;;  %v4410_v7 = vrot.slane %v12624_v5, 2 }
 0x53b   : > { %9683 = vrcp.f32 %v4051_v51  ;;  %v5161_v33 = vpop.permute.xlu1 %5160 }
 0x53c   : > { %v8056_v52 = vmul.f32 -1.442695, %v12685_v22  ;;  %9685 = vrcp.f32 %v4050_v30  ;;  %v5479_v27 = vsel %vm2984_vm10, %v5447_v18, %v5161_v33  ;;  %v12695_v2 = vpop.permute.xlu0 %4876  ;;  %v4412_v19 = vsel %vm1880_vm4, %v4410_v7, %v4411_v28 }
 0x53d   : > { %9687 = vpow2.f32 %v8057_v47  ;;  %4794 = vrot.lane.b32.xlu1 %v4332_v10, %s10110_s21  ;;  %8919 = vmatmul.mubr.msk.f32.vlgmr.msra.gmra.mrb[80].mxu1 %vm3033_vm11, %v5479_v27 }
 0x53e   : > { %9689 = vpow2.f32 %v8056_v52  ;;  %4510 = vrot.lane.b32.xlu0 %v4332_v10, %s10106_s28  ;;  %v4413_v10 = vrot.slane %v12638_v1, 2 }
 0x53f   : > { %v12702_v37 = vpop.permute.xlu1 %4590 }
 0x540   : > { %v12704_v39 = vpop.permute.xlu0 %4592  ;;  %v4414_v1 = vsel %vm1880_vm4, %v4411_v28, %v4413_v10 }
 0x541   : > { %v9680_v55 = vpop.eup %9679  ;;  %5174 = vrot.lane.b32.xlu1 %v4412_v19, %s10112_s24 }
 0x542   : > { %v9682_v5 = vpop.eup %9681  ;;  %v3480_v17 = vadd.f32 1.0, %v9680_v55  ;;  %4890 = vrot.lane.b32.xlu0 %v4412_v19, %s10111_s23 }
 0x543   : > { %v3479_v0 = vadd.f32 1.0, %v9682_v5  ;;  %v4971_v63 = vpop.permute.xlu1 %4970 }
 0x544   : > { %9691 = vrcp.f32 %v3480_v17  ;;  %v12709_v51 = vpop.permute.xlu0 %4972 }
 0x545   : > { %v9684_v44 = vpop.eup %9683  ;;  %9693 = vrcp.f32 %v3479_v0  ;;  %4796 = vrot.lane.b32.xlu1 %v4334_v23, %s10110_s21 }
 0x546   : > { %v9686_v30 = vpop.eup %9685  ;;  %v4147_v47 = vmul.f32 %v9684_v44, %v12598_v31  ;;  %4512 = vrot.lane.b32.xlu0 %v4334_v23, %s10106_s28 }
 0x547   : > { %v9688_v18 = vpop.eup %9687  ;;  %v4146_v52 = vmul.f32 %v9686_v30, %v12602_v49  ;;  %v12716_v33 = vpop.permute.xlu1 %4686  ;;  %v12727_v49 = vld [vmem:[%s14523_s4 + $0x1] ss:$0 sm:$0xff]  ;;  %v5256_v30 = vsel %vm1055_vm1, %v12280_v11, %v12538_v57 }
 0x548   : > { %v9690_v27 = vpop.eup %9689  ;;  %4179 = vst.msk [vmem:[#allocation2 + $0xb1] sm:$0xff] %vm1055_vm1, %v4147_v47  ;;  %v3482_v7 = vadd.f32 1.0, %v9688_v18  ;;  %v12719_v55 = vpop.permute.xlu0 %4688 }
 0x549   : > { %4178 = vst.msk [vmem:[#allocation2 + $0xa9] sm:$0xff] %vm1055_vm1, %v4146_v52  ;;  %v3481_v5 = vadd.f32 1.0, %v9690_v27  ;;  %5176 = vrot.lane.b32.xlu1 %v4414_v1, %s10112_s24  ;;  %v8875_v31 = vpop.f32.mrb[30].mxu0  ;;  %v5288_v52 = vsel %vm509_vm0, %v5256_v30, %v12574_v61 }
 0x54a   : > { %9695 = vrcp.f32 %v3482_v7  ;;  %v12730_v23 = vadd.f32 %v12727_v49, %v8875_v31  ;;  %4892 = vrot.lane.b32.xlu0 %v4414_v1, %s10111_s23  ;;  %v3853_v17 = vpop.f32.mrb[31].mxu0  ;;  %v5320_v7 = vsel %vm2819_vm5, %v5288_v52, %v12587_v29  ;;  %v14615_v29 = vld [vmem:[#allocation17_spill] sm:$0xff] }
 0x54b   : > { %9697 = vrcp.f32 %v3481_v5  ;;  %v12734_v28 = vadd.f32 %v12727_v49, %v3853_v17  ;;  %v5067_v0 = vpop.permute.xlu1 %5066  ;;  %v5352_v11 = vsel %vm2852_vm6, %v5320_v7, %v12615_v41 }
 0x54c   : > { %v8108_v10 = vmul.f32 -1.442695, %v12730_v23  ;;  %v12737_v44 = vpop.permute.xlu0 %5068 }
 0x54d   : > { %v8107_v47 = vmul.f32 -1.442695, %v12734_v28  ;;  %4606 = vrot.lane.b32.xlu1 %v4412_v19, %s10107_s15 }
 0x54e   : > { %v9692_v18 = vpop.eup %9691  ;;  %9699 = vpow2.f32 %v8108_v10  ;;  %4608 = vrot.lane.b32.xlu0 %v4414_v1, %s10107_s15  ;;  %v5384_v1 = vsel %vm2885_vm7, %v5352_v11, %v12652_v8 }
 0x54f   : > { %v9694_v27 = vpop.eup %9693  ;;  %9701 = vpow2.f32 %v8107_v47  ;;  %v12749_v5 = vpop.permute.xlu1 %4782  ;;  %v3576_v57 = vmul.f32 %v9692_v18, %v12649_v16  ;;  %v5416_v41 = vsel %vm2918_vm8, %v5384_v1, %v4971_v63  ;;  %v12771_v16 = vld [vmem:[#allocation2 + $0xb8] sm:$0x3]  ;;  %v14617_v18 = vld [vmem:[#allocation18_spill] sm:$0xff] }
 0x550   : > { %v3575_v19 = vmul.f32 %v9694_v27, %v12654_v38  ;;  %v12755_v31 = vpop.permute.xlu0 %4498  ;;  %v12757_v61 = vld [vmem:[#allocation2 + $0xa8] sm:$0xff]  ;;  %v12759_v17 = vld [vmem:[#allocation2 + $0xb0] sm:$0xff]  ;;  %v5448_v38 = vsel %vm2951_vm9, %v5416_v41, %v5067_v0 }
 0x551   : > { %4986 = vrot.lane.b32.xlu1 %v12757_v61, %s10105_s27  ;;  %v12775_v52 = vadd.f32 %v3576_v57, %v14617_v18  ;;  %v4335_v63 = vrot.slane %v12757_v61, 1  ;;  %v4336_v7 = vrot.slane %v12759_v17, 1  ;;  %v4338_v57 = vrot.slane %v12771_v16, 1 }
 0x552   : > { %v12766_v10 = vadd.f32 %v3575_v19, %v14615_v29  ;;  %4988 = vrot.lane.b32.xlu0 %v12759_v17, %s10105_s27  ;;  %v10037_v19 = vld [vmem:[#allocation2 + $0x20] sm:$0xff] }
 0x553   : > { %v5163_v30 = vpop.permute.xlu1 %5162  ;;  %14618 = vst [vmem:[#allocation13_spill] sm:$0xff] %v12775_v52  ;;  %v5257_v0 = vsel %vm1055_vm1, %v10037_v19, %v12545_v46 }
 0x554   : > { %14616 = vst [vmem:[#allocation12_spill] sm:$0xff] %v12766_v10  ;;  %v9696_v47 = vpop.eup %9695  ;;  %v5480_v8 = vsel %vm2984_vm10, %v5448_v38, %v5163_v30  ;;  %v12778_v27 = vpop.permute.xlu0 %4878  ;;  %8894 = vmatprep.mubr.msk.f32.mxu0 %vm1055_vm1, %v12766_v10  ;;  %v5289_v29 = vsel %vm509_vm0, %v5257_v0, %v12576_v25 }
 0x555   : > { %v9698_v11 = vpop.eup %9697  ;;  %v3578_v1 = vmul.f32 %v9696_v47, %v12678_v42  ;;  %4702 = vrot.lane.b32.xlu1 %v12757_v61, %s10109_s20  ;;  %8921 = vmatprep.mubr.msk.f32.mxu1 %vm3033_vm11, %v5480_v8  ;;  %v5321_v46 = vsel %vm2819_vm5, %v5289_v29, %v12590_v40  ;;  %v14619_v47 = vld [vmem:[#allocation19_spill] sm:$0xff]  ;;  %v4339_v29 = vsel %vm1799_vm3, %v4336_v7, %v4338_v57  ;;  %v4416_v57 = vrot.slane %v12759_v17, 2 }
 0x556   : > { %v3577_v41 = vmul.f32 %v9698_v11, %v12685_v22  ;;  %4704 = vrot.lane.b32.xlu0 %v12759_v17, %s10109_s20  ;;  %8895 = vmatmul.mubr.msk.f32.gmra.mrb[44].mxu0 %vm1055_vm1, %v12775_v52  ;;  %v5353_v30 = vsel %vm2852_vm6, %v5321_v46, %v12672_v6  ;;  %v4337_v22 = vsel %vm1799_vm3, %v4335_v63, %v4336_v7  ;;  %v14621_v11 = vld [vmem:[#allocation20_spill] sm:$0xff]  ;;  %v4418_v17 = vrot.slane %v12771_v16, 2 }
 0x557   : > { %v12800_v42 = vpop.permute.xlu1 %4784  ;;  %v12811_v19 = vadd.f32 %v3578_v1, %v14621_v11  ;;  %v5385_v40 = vsel %vm2885_vm7, %v5353_v30, %v12695_v2 }
 0x558   : > { %v9700_v38 = vpop.eup %9699  ;;  %v12805_v18 = vadd.f32 %v3577_v41, %v14619_v47  ;;  %v12807_v25 = vpop.permute.xlu0 %4500  ;;  %v5417_v6 = vsel %vm2918_vm8, %v5385_v40, %v12709_v51  ;;  %v4415_v51 = vrot.slane %v12757_v61, 2 }
 0x559   : > { %v9702_v8 = vpop.eup %9701  ;;  %14622 = vst [vmem:[#allocation15_spill] sm:$0xff] %v12811_v19  ;;  %v4053_v0 = vadd.f32 1.0, %v9700_v38  ;;  %5082 = vrot.lane.b32.xlu1 %v4337_v22, %s10108_s16  ;;  %v5449_v63 = vsel %vm2951_vm9, %v5417_v6, %v12737_v44 }
 0x55a   : > { %14620 = vst [vmem:[#allocation14_spill] sm:$0xff] %v12805_v18  ;;  %v4052_v41 = vadd.f32 1.0, %v9702_v8  ;;  %5084 = vrot.lane.b32.xlu0 %v4339_v29, %s10108_s16  ;;  %8897 = vmatprep.mubr.msk.f32.mxu0 %vm1055_vm1, %v12805_v18  ;;  %v4417_v38 = vsel %vm1880_vm4, %v4415_v51, %v4416_v57  ;;  %v10038_v51 = vld [vmem:[#allocation2 + $0x30] sm:$0xff] }
 0x55b   : > { %9703 = vrcp.f32 %v4053_v0  ;;  %v5165_v1 = vpop.permute.xlu1 %5164  ;;  %8898 = vmatmul.mubr.msk.f32.gmra.mrb[46].mxu0 %vm1055_vm1, %v12811_v19 }
 0x55c   : > { %9705 = vrcp.f32 %v4052_v41  ;;  %v5481_v2 = vsel %vm2984_vm10, %v5449_v63, %v5165_v1  ;;  %v12827_v7 = vpop.permute.xlu0 %4880  ;;  %v4419_v41 = vsel %vm1880_vm4, %v4416_v57, %v4418_v17  ;;  %v5258_v57 = vsel %vm1055_vm1, %v10038_v51, %v12622_v21 }
 0x55d   : > { %4798 = vrot.lane.b32.xlu1 %v4337_v22, %s10110_s21  ;;  %8922 = vmatmul.mubr.msk.f32.gmra.mrb[82].mxu1 %vm3033_vm11, %v5481_v2 }
 0x55e   : > { %4514 = vrot.lane.b32.xlu0 %v4337_v22, %s10106_s28 }
 0x55f   : > { %v12834_v44 = vpop.permute.xlu1 %4594 }
 0x560   : > { %v12836_v46 = vpop.permute.xlu0 %4596 }
 0x561   : > { %5178 = vrot.lane.b32.xlu1 %v4417_v38, %s10112_s24 }
 0x562   : > { %4894 = vrot.lane.b32.xlu0 %v4417_v38, %s10111_s23 }
 0x563   : > { %v4975_v30 = vpop.permute.xlu1 %4974 }
 0x564   : > { %v12841_v47 = vpop.permute.xlu0 %4976 }
 0x565   : > { %v9704_v8 = vpop.eup %9703  ;;  %4800 = vrot.lane.b32.xlu1 %v4339_v29, %s10110_s21 }
 0x566   : > { %v9706_v11 = vpop.eup %9705  ;;  %v4149_v22 = vmul.f32 %v9704_v8, %v12730_v23  ;;  %4516 = vrot.lane.b32.xlu0 %v4339_v29, %s10106_s28  ;;  %v5290_v8 = vsel %vm509_vm0, %v5258_v57, %v12702_v37 }
 0x567   : > { %v4148_v40 = vmul.f32 %v9706_v11, %v12734_v28  ;;  %v12848_v0 = vpop.permute.xlu1 %4690  ;;  %v5322_v11 = vsel %vm2819_vm5, %v5290_v8, %v12716_v33 }
 0x568   : > { %4181 = vst.msk [vmem:[#allocation2 + $0xc9] sm:$0xff] %vm1055_vm1, %v4149_v22  ;;  %v12851_v6 = vpop.permute.xlu0 %4692 }
 0x569   : > { %4180 = vst.msk [vmem:[#allocation2 + $0xc1] sm:$0xff] %vm1055_vm1, %v4148_v40  ;;  %5180 = vrot.lane.b32.xlu1 %v4419_v41, %s10112_s24  ;;  %v8878_v16 = vpop.f32.mrb[32].mxu0  ;;  %v5354_v40 = vsel %vm2852_vm6, %v5322_v11, %v12749_v5 }
 0x56a   : > { %v12857_v63 = vadd.f32 %v12727_v49, %v8878_v16  ;;  %4896 = vrot.lane.b32.xlu0 %v4419_v41, %s10111_s23  ;;  %v3863_v23 = vpop.f32.mrb[33].mxu0  ;;  %v5386_v37 = vsel %vm2885_vm7, %v5354_v40, %v12778_v27 }
 0x56b   : > { %v12861_v28 = vadd.f32 %v12727_v49, %v3863_v23  ;;  %v5071_v29 = vpop.permute.xlu1 %5070  ;;  %v5418_v33 = vsel %vm2918_vm8, %v5386_v37, %v4975_v30 }
 0x56c   : > { %v8110_v1 = vmul.f32 -1.442695, %v12857_v63  ;;  %v5073_v2 = vpop.permute.xlu0 %5072  ;;  %v5450_v5 = vsel %vm2951_vm9, %v5418_v33, %v5071_v29 }
 0x56d   : > { %v8109_v17 = vmul.f32 -1.442695, %v12861_v28  ;;  %4610 = vrot.lane.b32.xlu1 %v4417_v38, %s10107_s15 }
 0x56e   : > { %9707 = vpow2.f32 %v8110_v1  ;;  %4612 = vrot.lane.b32.xlu0 %v4419_v41, %s10107_s15 }
 0x56f   : > { %9709 = vpow2.f32 %v8109_v17  ;;  %v12873_v22 = vpop.permute.xlu1 %4786  ;;  %v4224_v41 = vld [vmem:[#allocation2 + $0xd0] sm:$0x3]  ;;  %v10039_v17 = vld [vmem:[#allocation2 + $0x38] sm:$0xff] }
 0x570   : > { %v12877_v21 = vpop.permute.xlu0 %4502  ;;  %v12879_v16 = vld [vmem:[#allocation2 + $0xc0] sm:$0xff]  ;;  %v12881_v38 = vld [vmem:[#allocation2 + $0xc8] sm:$0xff]  ;;  %v5259_v8 = vsel %vm1055_vm1, %v10039_v17, %v12676_v13  ;;  %v4343_v30 = vrot.slane %v4224_v41, 1 }
 0x571   : > { %4990 = vrot.lane.b32.xlu1 %v12879_v16, %s10105_s27  ;;  %v4340_v57 = vrot.slane %v12879_v16, 1  ;;  %v4341_v27 = vrot.slane %v12881_v38, 1  ;;  %v5291_v29 = vsel %vm509_vm0, %v5259_v8, %v12704_v39 }
 0x572   : > { %4992 = vrot.lane.b32.xlu0 %v12881_v38, %s10105_s27  ;;  %v5323_v11 = vsel %vm2819_vm5, %v5291_v29, %v12719_v55 }
 0x573   : > { %v5167_v23 = vpop.permute.xlu1 %5166  ;;  %v5355_v13 = vsel %vm2852_vm6, %v5323_v11, %v12800_v42  ;;  %v4344_v17 = vsel %vm1799_vm3, %v4341_v27, %v4343_v30 }
 0x574   : > { %v5482_v1 = vsel %vm2984_vm10, %v5450_v5, %v5167_v23  ;;  %v12892_v51 = vpop.permute.xlu0 %4882  ;;  %v4342_v5 = vsel %vm1799_vm3, %v4340_v57, %v4341_v27  ;;  %v5387_v39 = vsel %vm2885_vm7, %v5355_v13, %v12827_v7  ;;  %v4420_v7 = vrot.slane %v12879_v16, 2 }
 0x575   : > { %4706 = vrot.lane.b32.xlu1 %v12879_v16, %s10109_s20  ;;  %8924 = vmatprep.mubr.msk.f32.mxu1 %vm3033_vm11, %v5482_v1  ;;  %v5419_v55 = vsel %vm2918_vm8, %v5387_v39, %v12841_v47 }
 0x576   : > { %4708 = vrot.lane.b32.xlu0 %v12881_v38, %s10109_s20  ;;  %v5451_v42 = vsel %vm2951_vm9, %v5419_v55, %v5073_v2 }
 0x577   : > { %v12907_v40 = vpop.permute.xlu1 %4788 }
 0x578   : > { %v9708_v37 = vpop.eup %9707  ;;  %v12911_v33 = vpop.permute.xlu0 %4504 }
 0x579   : > { %v9710_v23 = vpop.eup %9709  ;;  %v4055_v1 = vadd.f32 1.0, %v9708_v37  ;;  %5086 = vrot.lane.b32.xlu1 %v4342_v5, %s10108_s16  ;;  %v4421_v37 = vrot.slane %v12881_v38, 2  ;;  %v4423_v38 = vrot.slane %v4224_v41, 2 }
 0x57a   : > { %v4054_v8 = vadd.f32 1.0, %v9710_v23  ;;  %5088 = vrot.lane.b32.xlu0 %v4344_v17, %s10108_s16 }
 0x57b   : > { %9711 = vrcp.f32 %v4055_v1  ;;  %v5169_v29 = vpop.permute.xlu1 %5168  ;;  %v4422_v2 = vsel %vm1880_vm4, %v4420_v7, %v4421_v37 }
 0x57c   : > { %9713 = vrcp.f32 %v4054_v8  ;;  %v5483_v57 = vsel %vm2984_vm10, %v5451_v42, %v5169_v29  ;;  %v12923_v11 = vpop.permute.xlu0 %4884  ;;  %v4424_v42 = vsel %vm1880_vm4, %v4421_v37, %v4423_v38 }
 0x57d   : > { %4802 = vrot.lane.b32.xlu1 %v4342_v5, %s10110_s21  ;;  %8925 = vmatmul.mubr.msk.f32.gmra.mrb[84].mxu1 %vm3033_vm11, %v5483_v57 }
 0x57e   : > { %4518 = vrot.lane.b32.xlu0 %v4342_v5, %s10106_s28 }
 0x57f   : > { %v12930_v47 = vpop.permute.xlu1 %4598 }
 0x580   : > { %v12932_v27 = vpop.permute.xlu0 %4600 }
 0x581   : > { %5182 = vrot.lane.b32.xlu1 %v4422_v2, %s10112_s24 }
 0x582   : > { %4898 = vrot.lane.b32.xlu0 %v4422_v2, %s10111_s23 }
 0x583   : > { %v4979_v30 = vpop.permute.xlu1 %4978 }
 0x584   : > { %v12937_v13 = vpop.permute.xlu0 %4980 }
 0x585   : > { %v9712_v23 = vpop.eup %9711  ;;  %4804 = vrot.lane.b32.xlu1 %v4344_v17, %s10110_s21 }
 0x586   : > { %v9714_v39 = vpop.eup %9713  ;;  %v4151_v5 = vmul.f32 %v9712_v23, %v12857_v63  ;;  %4520 = vrot.lane.b32.xlu0 %v4344_v17, %s10106_s28  ;;  %v10040_v23 = vld [vmem:[#allocation2 + $0x48] sm:$0xff] }
 0x587   : > { %v4150_v1 = vmul.f32 %v9714_v39, %v12861_v28  ;;  %v12943_v55 = vpop.permute.xlu1 %4694  ;;  %v5260_v37 = vsel %vm1055_vm1, %v10040_v23, %v12755_v31 }
 0x588   : > { %4183 = vst.msk [vmem:[#allocation2 + $0xe1] sm:$0xff] %vm1055_vm1, %v4151_v5  ;;  %v12946_v8 = vpop.permute.xlu0 %4696  ;;  %v5292_v39 = vsel %vm509_vm0, %v5260_v37, %v12834_v44 }
 0x589   : > { %4182 = vst.msk [vmem:[#allocation2 + $0xd9] sm:$0xff] %vm1055_vm1, %v4150_v1  ;;  %5184 = vrot.lane.b32.xlu1 %v4424_v42, %s10112_s24  ;;  %v8881_v41 = vpop.f32.mrb[34].mxu0  ;;  %v5324_v5 = vsel %vm2819_vm5, %v5292_v39, %v12848_v0 }
 0x58a   : > { %v12952_v29 = vadd.f32 %v12727_v49, %v8881_v41  ;;  %4900 = vrot.lane.b32.xlu0 %v4424_v42, %s10111_s23  ;;  %v3873_v63 = vpop.f32.mrb[35].mxu0  ;;  %v5356_v41 = vsel %vm2852_vm6, %v5324_v5, %v12873_v22  ;;  %v10041_v5 = vld [vmem:[#allocation2 + $0x50] sm:$0xff] }
 0x58b   : > { %v12956_v28 = vadd.f32 %v12727_v49, %v3873_v63  ;;  %v5075_v17 = vpop.permute.xlu1 %5074  ;;  %v5388_v44 = vsel %vm2885_vm7, %v5356_v41, %v12892_v51  ;;  %v5261_v51 = vsel %vm1055_vm1, %v10041_v5, %v12807_v25 }
 0x58c   : > { %v8112_v57 = vmul.f32 -1.442695, %v12952_v29  ;;  %v5077_v7 = vpop.permute.xlu0 %5076 }
 0x58d   : > { %v8111_v38 = vmul.f32 -1.442695, %v12956_v28  ;;  %4614 = vrot.lane.b32.xlu1 %v4422_v2, %s10107_s15  ;;  %v5420_v2 = vsel %vm2918_vm8, %v5388_v44, %v4979_v30 }
 0x58e   : > { %9715 = vpow2.f32 %v8112_v57  ;;  %4616 = vrot.lane.b32.xlu0 %v4424_v42, %s10107_s15  ;;  %v5452_v42 = vsel %vm2951_vm9, %v5420_v2, %v5075_v17  ;;  %v5293_v17 = vsel %vm509_vm0, %v5261_v51, %v12836_v46 }
 0x58f   : > { %9717 = vpow2.f32 %v8111_v38  ;;  %v12968_v1 = vpop.permute.xlu1 %4790  ;;  %v4227_v0 = vld [vmem:[#allocation2 + $0xe8] sm:$0x3]  ;;  %v5325_v41 = vsel %vm2819_vm5, %v5293_v17, %v12851_v6 }
 0x590   : > { %v12972_v31 = vpop.permute.xlu0 %4506  ;;  %v4225_v63 = vld [vmem:[#allocation2 + $0xd8] sm:$0xff]  ;;  %v12974_v23 = vld [vmem:[#allocation2 + $0xe0] sm:$0xff]  ;;  %v4348_v30 = vrot.slane %v4227_v0, 1  ;;  %v5357_v25 = vsel %vm2852_vm6, %v5325_v41, %v12907_v40 }
 0x591   : > { %4994 = vrot.lane.b32.xlu1 %v4225_v63, %s10105_s27  ;;  %v4345_v38 = vrot.slane %v4225_v63, 1  ;;  %v4346_v39 = vrot.slane %v12974_v23, 1  ;;  %v5389_v46 = vsel %vm2885_vm7, %v5357_v25, %v12923_v11  ;;  %v4425_v11 = vrot.slane %v4225_v63, 2 }
 0x592   : > { %4996 = vrot.lane.b32.xlu0 %v12974_v23, %s10105_s27  ;;  %v5421_v6 = vsel %vm2918_vm8, %v5389_v46, %v12937_v13 }
 0x593   : > { %v5171_v57 = vpop.permute.xlu1 %5170  ;;  %v4349_v51 = vsel %vm1799_vm3, %v4346_v39, %v4348_v30  ;;  %v5453_v40 = vsel %vm2951_vm9, %v5421_v6, %v5077_v7 }
 0x594   : > { %v5484_v22 = vsel %vm2984_vm10, %v5452_v42, %v5171_v57  ;;  %v12984_v37 = vpop.permute.xlu0 %4886  ;;  %v4347_v57 = vsel %vm1799_vm3, %v4345_v38, %v4346_v39 }
 0x595   : > { %4710 = vrot.lane.b32.xlu1 %v4225_v63, %s10109_s20  ;;  %8927 = vmatprep.mubr.msk.f32.mxu1 %vm3033_vm11, %v5484_v22 }
 0x596   : > { %4712 = vrot.lane.b32.xlu0 %v12974_v23, %s10109_s20 }
 0x597   : > { %v12997_v44 = vpop.permute.xlu1 %4792 }
 0x598   : > { %v9716_v2 = vpop.eup %9715  ;;  %v13001_v42 = vpop.permute.xlu0 %4508 }
 0x599   : > { %v9718_v22 = vpop.eup %9717  ;;  %v4057_v5 = vadd.f32 1.0, %v9716_v2  ;;  %5090 = vrot.lane.b32.xlu1 %v4347_v57, %s10108_s16  ;;  %v4426_v2 = vrot.slane %v12974_v23, 2  ;;  %v4428_v23 = vrot.slane %v4227_v0, 2 }
 0x59a   : > { %v4056_v17 = vadd.f32 1.0, %v9718_v22  ;;  %5092 = vrot.lane.b32.xlu0 %v4349_v51, %s10108_s16 }
 0x59b   : > { %9719 = vrcp.f32 %v4057_v5  ;;  %v5173_v41 = vpop.permute.xlu1 %5172  ;;  %v4427_v7 = vsel %vm1880_vm4, %v4425_v11, %v4426_v2  ;;  %v10042_v11 = vld [vmem:[#allocation2 + $0x60] sm:$0xff] }
 0x59c   : > { %9721 = vrcp.f32 %v4056_v17  ;;  %v5485_v38 = vsel %vm2984_vm10, %v5453_v40, %v5173_v41  ;;  %v13013_v19 = vpop.permute.xlu0 %4888  ;;  %v4429_v17 = vsel %vm1880_vm4, %v4426_v2, %v4428_v23  ;;  %v5262_v2 = vsel %vm1055_vm1, %v10042_v11, %v12877_v21 }
 0x59d   : > { %4806 = vrot.lane.b32.xlu1 %v4347_v57, %s10110_s21  ;;  %8928 = vmatmul.mubr.msk.f32.gmra.mrb[86].mxu1 %vm3033_vm11, %v5485_v38 }
 0x59e   : > { %4522 = vrot.lane.b32.xlu0 %v4347_v57, %s10106_s28 }
 0x59f   : > { %v13019_v13 = vpop.permute.xlu1 %4602 }
 0x5a0   : > { %v13021_v39 = vpop.permute.xlu0 %4604 }
 0x5a1   : > { %5186 = vrot.lane.b32.xlu1 %v4427_v7, %s10112_s24 }
 0x5a2   : > { %4902 = vrot.lane.b32.xlu0 %v4427_v7, %s10111_s23 }
 0x5a3   : > { %v4983_v30 = vpop.permute.xlu1 %4982 }
 0x5a4   : > { %v13026_v63 = vpop.permute.xlu0 %4984 }
 0x5a5   : > { %v9720_v25 = vpop.eup %9719  ;;  %4808 = vrot.lane.b32.xlu1 %v4349_v51, %s10110_s21 }
 0x5a6   : > { %v9722_v22 = vpop.eup %9721  ;;  %v4153_v57 = vmul.f32 %v9720_v25, %v12952_v29  ;;  %4524 = vrot.lane.b32.xlu0 %v4349_v51, %s10106_s28  ;;  %v5294_v25 = vsel %vm509_vm0, %v5262_v2, %v12930_v47 }
 0x5a7   : > { %v4152_v46 = vmul.f32 %v9722_v22, %v12956_v28  ;;  %v13032_v5 = vpop.permute.xlu1 %4698  ;;  %v5326_v22 = vsel %vm2819_vm5, %v5294_v25, %v12943_v55  ;;  %v6105_v55 = vld [vmem:[%s14526_s7] sm:$0xff]  ;;  %v10043_v25 = vld [vmem:[#allocation2 + $0x68] sm:$0xff] }
 0x5a8   : > { %4185 = vst.msk [vmem:[#allocation2 + $0xf9] sm:$0xff] %vm1055_vm1, %v4153_v57  ;;  %v13035_v6 = vpop.permute.xlu0 %4700  ;;  %8966 = vmatprep.subr.mxu0 %v6105_v55 }
 0x5a9   : > { %4184 = vst.msk [vmem:[#allocation2 + $0xf1] sm:$0xff] %vm1055_vm1, %v4152_v46  ;;  %5188 = vrot.lane.b32.xlu1 %v4429_v17, %s10112_s24  ;;  %v8884_v0 = vpop.f32.mrb[36].mxu0  ;;  %v5358_v46 = vsel %vm2852_vm6, %v5326_v22, %v12968_v1  ;;  %8967 = vmatpush3.msra.mxu0 %v6105_v55 }
 0x5aa   : > { %v13041_v40 = vadd.f32 %v12727_v49, %v8884_v0  ;;  %4904 = vrot.lane.b32.xlu0 %v4429_v17, %s10111_s23  ;;  %v3883_v29 = vpop.f32.mrb[37].mxu0  ;;  %v5390_v47 = vsel %vm2885_vm7, %v5358_v46, %v12984_v37 }
 0x5ab   : > { %v13045_v28 = vadd.f32 %v12727_v49, %v3883_v29  ;;  %v5079_v51 = vpop.permute.xlu1 %5078 }
 0x5ac   : > { %v8114_v41 = vmul.f32 -1.442695, %v13041_v40  ;;  %v5081_v38 = vpop.permute.xlu0 %5080 }
 0x5ad   : > { %v8113_v23 = vmul.f32 -1.442695, %v13045_v28  ;;  %4618 = vrot.lane.b32.xlu1 %v4427_v7, %s10107_s15  ;;  %v5422_v7 = vsel %vm2918_vm8, %v5390_v47, %v4983_v30  ;;  %v5263_v30 = vsel %vm1055_vm1, %v10043_v25, %v12911_v33 }
 0x5ae   : > { %9723 = vpow2.f32 %v8114_v41  ;;  %4620 = vrot.lane.b32.xlu0 %v4429_v17, %s10107_s15  ;;  %v5454_v17 = vsel %vm2951_vm9, %v5422_v7, %v5079_v51  ;;  %v5295_v51 = vsel %vm509_vm0, %v5263_v30, %v12932_v27 }
 0x5af   : > { %9725 = vpow2.f32 %v8113_v23  ;;  %v13057_v57 = vpop.permute.xlu1 %4794  ;;  %v4230_v1 = vld [vmem:[#allocation2 + $0x100] sm:$0x3]  ;;  %v5327_v46 = vsel %vm2819_vm5, %v5295_v51, %v12946_v8 }
 0x5b0   : > { %v13061_v21 = vpop.permute.xlu0 %4510  ;;  %v4228_v0 = vld [vmem:[#allocation2 + $0xf0] sm:$0xff]  ;;  %v13063_v29 = vld [vmem:[#allocation2 + $0xf8] sm:$0xff]  ;;  %v4353_v22 = vrot.slane %v4230_v1, 1  ;;  %v5359_v33 = vsel %vm2852_vm6, %v5327_v46, %v12997_v44 }
 0x5b1   : > { %4998 = vrot.lane.b32.xlu1 %v4228_v0, %s10105_s27  ;;  %v4350_v2 = vrot.slane %v4228_v0, 1  ;;  %v4351_v23 = vrot.slane %v13063_v29, 1  ;;  %v5391_v27 = vsel %vm2885_vm7, %v5359_v33, %v13013_v19  ;;  %v4430_v19 = vrot.slane %v4228_v0, 2 }
 0x5b2   : > { %5000 = vrot.lane.b32.xlu0 %v13063_v29, %s10105_s27  ;;  %v5423_v8 = vsel %vm2918_vm8, %v5391_v27, %v13026_v63 }
 0x5b3   : > { %v5175_v41 = vpop.permute.xlu1 %5174  ;;  %v4354_v25 = vsel %vm1799_vm3, %v4351_v23, %v4353_v22  ;;  %v5455_v44 = vsel %vm2951_vm9, %v5423_v8, %v5081_v38 }
 0x5b4   : > { %v5486_v11 = vsel %vm2984_vm10, %v5454_v17, %v5175_v41  ;;  %v13076_v37 = vpop.permute.xlu0 %4890  ;;  %v4352_v17 = vsel %vm1799_vm3, %v4350_v2, %v4351_v23 }
 0x5b5   : > { %4714 = vrot.lane.b32.xlu1 %v4228_v0, %s10109_s20  ;;  %8930 = vmatprep.mubr.msk.f32.mxu1 %vm3033_vm11, %v5486_v11 }
 0x5b6   : > { %4716 = vrot.lane.b32.xlu0 %v13063_v29, %s10109_s20 }
 0x5b7   : > { %v13089_v47 = vpop.permute.xlu1 %4796 }
 0x5b8   : > { %v9724_v55 = vpop.eup %9723  ;;  %v13093_v7 = vpop.permute.xlu0 %4512 }
 0x5b9   : > { %v9726_v41 = vpop.eup %9725  ;;  %v4059_v11 = vadd.f32 1.0, %v9724_v55  ;;  %5094 = vrot.lane.b32.xlu1 %v4352_v17, %s10108_s16  ;;  %v4431_v55 = vrot.slane %v13063_v29, 2  ;;  %v4433_v29 = vrot.slane %v4230_v1, 2 }
 0x5ba   : > { %v4058_v30 = vadd.f32 1.0, %v9726_v41  ;;  %5096 = vrot.lane.b32.xlu0 %v4354_v25, %s10108_s16 }
 0x5bb   : > { %9727 = vrcp.f32 %v4059_v11  ;;  %v5177_v51 = vpop.permute.xlu1 %5176  ;;  %v4432_v38 = vsel %vm1880_vm4, %v4430_v19, %v4431_v55 }
 0x5bc   : > { %9729 = vrcp.f32 %v4058_v30  ;;  %v5487_v2 = vsel %vm2984_vm10, %v5455_v44, %v5177_v51  ;;  %v13105_v46 = vpop.permute.xlu0 %4892  ;;  %v4434_v30 = vsel %vm1880_vm4, %v4431_v55, %v4433_v29  ;;  %v10044_v55 = vld [vmem:[#allocation2 + $0x78] sm:$0xff] }
 0x5bd   : > { %4810 = vrot.lane.b32.xlu1 %v4352_v17, %s10110_s21  ;;  %8931 = vmatmul.mubr.msk.f32.gmra.mrb[88].mxu1 %vm3033_vm11, %v5487_v2  ;;  %v5264_v29 = vsel %vm1055_vm1, %v10044_v55, %v12972_v31 }
 0x5be   : > { %4526 = vrot.lane.b32.xlu0 %v4352_v17, %s10106_s28 }
 0x5bf   : > { %v13111_v63 = vpop.permute.xlu1 %4606 }
 0x5c0   : > { %v13113_v23 = vpop.permute.xlu0 %4608 }
 0x5c1   : > { %5190 = vrot.lane.b32.xlu1 %v4432_v38, %s10112_s24 }
 0x5c2   : > { %4906 = vrot.lane.b32.xlu0 %v4432_v38, %s10111_s23 }
 0x5c3   : > { %v4987_v22 = vpop.permute.xlu1 %4986 }
 0x5c4   : > { %v13118_v0 = vpop.permute.xlu0 %4988 }
 0x5c5   : > { %v9728_v33 = vpop.eup %9727  ;;  %4812 = vrot.lane.b32.xlu1 %v4354_v25, %s10110_s21 }
 0x5c6   : > { %v9730_v41 = vpop.eup %9729  ;;  %v4155_v17 = vmul.f32 %v9728_v33, %v13041_v40  ;;  %4528 = vrot.lane.b32.xlu0 %v4354_v25, %s10106_s28  ;;  %v5296_v33 = vsel %vm509_vm0, %v5264_v29, %v13019_v13 }
 0x5c7   : > { %v4154_v27 = vmul.f32 %v9730_v41, %v13045_v28  ;;  %v13124_v11 = vpop.permute.xlu1 %4702  ;;  %v5328_v41 = vsel %vm2819_vm5, %v5296_v33, %v13032_v5  ;;  %v10045_v33 = vld [vmem:[#allocation2 + $0x80] sm:$0xff] }
 0x5c8   : > { %4187 = vst.msk [vmem:[#allocation2 + $0x111] sm:$0xff] %vm1055_vm1, %v4155_v17  ;;  %v13127_v8 = vpop.permute.xlu0 %4704  ;;  %v8887_v44 = vpop.f32.mrb[38].mxu0 }
 0x5c9   : > { %4186 = vst.msk [vmem:[#allocation2 + $0x109] sm:$0xff] %vm1055_vm1, %v4154_v27  ;;  %5192 = vrot.lane.b32.xlu1 %v4434_v30, %s10112_s24  ;;  %v13133_v1 = vadd.f32 %v12727_v49, %v8887_v44  ;;  %v3893_v40 = vpop.f32.mrb[39].mxu0  ;;  %v5360_v27 = vsel %vm2852_vm6, %v5328_v41, %v13057_v57 }
 0x5ca   : > { %4908 = vrot.lane.b32.xlu0 %v4434_v30, %s10111_s23  ;;  %v13137_v28 = vadd.f32 %v12727_v49, %v3893_v40 }
 0x5cb   : > { %v8116_v25 = vmul.f32 -1.442695, %v13133_v1  ;;  %v5083_v51 = vpop.permute.xlu1 %5082 }
 0x5cc   : > { %v8115_v2 = vmul.f32 -1.442695, %v13137_v28  ;;  %v5085_v19 = vpop.permute.xlu0 %5084 }
 0x5cd   : > { %9731 = vpow2.f32 %v8116_v25  ;;  %4622 = vrot.lane.b32.xlu1 %v4432_v38, %s10107_s15  ;;  %v5392_v38 = vsel %vm2885_vm7, %v5360_v27, %v13076_v37  ;;  %v5265_v37 = vsel %vm1055_vm1, %v10045_v33, %v13001_v42 }
 0x5ce   : > { %9733 = vpow2.f32 %v8115_v2  ;;  %4624 = vrot.lane.b32.xlu0 %v4434_v30, %s10107_s15  ;;  %v5424_v13 = vsel %vm2918_vm8, %v5392_v38, %v4987_v22 }
 0x5cf   : > { %v13149_v17 = vpop.permute.xlu1 %4798  ;;  %v4233_v5 = vld [vmem:[#allocation2 + $0x118] sm:$0x3]  ;;  %v5456_v30 = vsel %vm2951_vm9, %v5424_v13, %v5083_v51  ;;  %v5297_v51 = vsel %vm509_vm0, %v5265_v37, %v13021_v39 }
 0x5d0   : > { %v13153_v44 = vpop.permute.xlu0 %4514  ;;  %v4231_v31 = vld [vmem:[#allocation2 + $0x108] sm:$0xff]  ;;  %v13155_v40 = vld [vmem:[#allocation2 + $0x110] sm:$0xff]  ;;  %v4358_v22 = vrot.slane %v4233_v5, 1  ;;  %v5329_v27 = vsel %vm2819_vm5, %v5297_v51, %v13035_v6 }
 0x5d1   : > { %5002 = vrot.lane.b32.xlu1 %v4231_v31, %s10105_s27  ;;  %v4355_v55 = vrot.slane %v4231_v31, 1  ;;  %v4356_v29 = vrot.slane %v13155_v40, 1  ;;  %v5361_v42 = vsel %vm2852_vm6, %v5329_v27, %v13089_v47  ;;  %v4436_v27 = vrot.slane %v13155_v40, 2 }
 0x5d2   : > { %5004 = vrot.lane.b32.xlu0 %v13155_v40, %s10105_s27  ;;  %v5393_v39 = vsel %vm2885_vm7, %v5361_v42, %v13105_v46  ;;  %v4435_v46 = vrot.slane %v4231_v31, 2 }
 0x5d3   : > { %v5179_v25 = vpop.permute.xlu1 %5178  ;;  %v4359_v37 = vsel %vm1799_vm3, %v4356_v29, %v4358_v22  ;;  %v5425_v6 = vsel %vm2918_vm8, %v5393_v39, %v13118_v0 }
 0x5d4   : > { %v5488_v57 = vsel %vm2984_vm10, %v5456_v30, %v5179_v25  ;;  %v13165_v2 = vpop.permute.xlu0 %4894  ;;  %v5457_v47 = vsel %vm2951_vm9, %v5425_v6, %v5085_v19  ;;  %v4437_v19 = vsel %vm1880_vm4, %v4435_v46, %v4436_v27 }
 0x5d5   : > { %4718 = vrot.lane.b32.xlu1 %v4231_v31, %s10109_s20  ;;  %8933 = vmatprep.mubr.msk.f32.mxu1 %vm3033_vm11, %v5488_v57  ;;  %v4357_v57 = vsel %vm1799_vm3, %v4355_v55, %v4356_v29 }
 0x5d6   : > { %4720 = vrot.lane.b32.xlu0 %v13155_v40, %s10109_s20  ;;  %v4438_v40 = vrot.slane %v4233_v5, 2 }
 0x5d7   : > { %v9732_v41 = vpop.eup %9731  ;;  %v13178_v38 = vpop.permute.xlu1 %4800 }
 0x5d8   : > { %v9734_v13 = vpop.eup %9733  ;;  %v4061_v30 = vadd.f32 1.0, %v9732_v41  ;;  %v13182_v25 = vpop.permute.xlu0 %4516  ;;  %v4439_v6 = vsel %vm1880_vm4, %v4436_v27, %v4438_v40 }
 0x5d9   : > { %v4060_v33 = vadd.f32 1.0, %v9734_v13  ;;  %5098 = vrot.lane.b32.xlu1 %v4357_v57, %s10108_s16 }
 0x5da   : > { %9735 = vrcp.f32 %v4061_v30  ;;  %5100 = vrot.lane.b32.xlu0 %v4359_v37, %s10108_s16 }
 0x5db   : > { %9737 = vrcp.f32 %v4060_v33  ;;  %v5181_v51 = vpop.permute.xlu1 %5180 }
 0x5dc   : > { %v5489_v55 = vsel %vm2984_vm10, %v5457_v47, %v5181_v51  ;;  %v13194_v41 = vpop.permute.xlu0 %4896 }
 0x5dd   : > { %4814 = vrot.lane.b32.xlu1 %v4357_v57, %s10110_s21  ;;  %8934 = vmatmul.mubr.msk.f32.gmra.mrb[90].mxu1 %vm3033_vm11, %v5489_v55 }
 0x5de   : > { %4530 = vrot.lane.b32.xlu0 %v4357_v57, %s10106_s28 }
 0x5df   : > { %v13200_v0 = vpop.permute.xlu1 %4610 }
 0x5e0   : > { %v13202_v29 = vpop.permute.xlu0 %4612 }
 0x5e1   : > { %5194 = vrot.lane.b32.xlu1 %v4437_v19, %s10112_s24 }
 0x5e2   : > { %4910 = vrot.lane.b32.xlu0 %v4437_v19, %s10111_s23 }
 0x5e3   : > { %v4991_v22 = vpop.permute.xlu1 %4990 }
 0x5e4   : > { %v9736_v31 = vpop.eup %9735  ;;  %v13207_v13 = vpop.permute.xlu0 %4992 }
 0x5e5   : > { %v9738_v42 = vpop.eup %9737  ;;  %v4157_v30 = vmul.f32 %v9736_v31, %v13133_v1  ;;  %4816 = vrot.lane.b32.xlu1 %v4359_v37, %s10110_s21  ;;  %v10046_v31 = vld [vmem:[#allocation2 + $0x90] sm:$0xff] }
 0x5e6   : > { %v4156_v57 = vmul.f32 %v9738_v42, %v13137_v28  ;;  %4532 = vrot.lane.b32.xlu0 %v4359_v37, %s10106_s28  ;;  %v5266_v27 = vsel %vm1055_vm1, %v10046_v31, %v13061_v21 }
 0x5e7   : > { %4189 = vst.msk [vmem:[#allocation2 + $0x129] sm:$0xff] %vm1055_vm1, %v4157_v30  ;;  %v13214_v39 = vpop.permute.xlu1 %4706  ;;  %v5298_v40 = vsel %vm509_vm0, %v5266_v27, %v13111_v63 }
 0x5e8   : > { %4188 = vst.msk [vmem:[#allocation2 + $0x121] sm:$0xff] %vm1055_vm1, %v4156_v57  ;;  %v13217_v33 = vpop.permute.xlu0 %4708  ;;  %v8890_v5 = vpop.f32.mrb[40].mxu0 }
 0x5e9   : > { %5196 = vrot.lane.b32.xlu1 %v4439_v6, %s10112_s24  ;;  %v13222_v1 = vadd.f32 %v12727_v49, %v8890_v5  ;;  %v3903_v47 = vpop.f32.mrb[41].mxu0 }
 0x5ea   : > { %4912 = vrot.lane.b32.xlu0 %v4439_v6, %s10111_s23  ;;  %v13226_v28 = vadd.f32 %v12727_v49, %v3903_v47  ;;  %v5330_v49 = vsel %vm2819_vm5, %v5298_v40, %v13124_v11 }
 0x5eb   : > { %v8118_v37 = vmul.f32 -1.442695, %v13222_v1  ;;  %v5087_v51 = vpop.permute.xlu1 %5086  ;;  %v5362_v21 = vsel %vm2852_vm6, %v5330_v49, %v13149_v17 }
 0x5ec   : > { %v8117_v55 = vmul.f32 -1.442695, %v13226_v28  ;;  %v5089_v46 = vpop.permute.xlu0 %5088 }
 0x5ed   : > { %9739 = vpow2.f32 %v8118_v37  ;;  %4626 = vrot.lane.b32.xlu1 %v4437_v19, %s10107_s15  ;;  %v5394_v19 = vsel %vm2885_vm7, %v5362_v21, %v13165_v2  ;;  %v10047_v2 = vld [vmem:[#allocation2 + $0x98] sm:$0xff] }
 0x5ee   : > { %9741 = vpow2.f32 %v8117_v55  ;;  %4628 = vrot.lane.b32.xlu0 %v4439_v6, %s10107_s15  ;;  %v5426_v63 = vsel %vm2918_vm8, %v5394_v19, %v4991_v22  ;;  %v13252_v11 = vld [vmem:[#allocation2 + $0x130] sm:$0x3]  ;;  %v5267_v27 = vsel %vm1055_vm1, %v10047_v2, %v13093_v7 }
 0x5ef   : > { %v13238_v42 = vpop.permute.xlu1 %4802  ;;  %v4234_v30 = vld [vmem:[#allocation2 + $0x120] sm:$0xff]  ;;  %v13240_v57 = vld [vmem:[#allocation2 + $0x128] sm:$0xff]  ;;  %v5458_v6 = vsel %vm2951_vm9, %v5426_v63, %v5087_v51  ;;  %v4363_v22 = vrot.slane %v13252_v11, 1  ;;  %v5299_v51 = vsel %vm509_vm0, %v5267_v27, %v13113_v23 }
 0x5f0   : > { %v13244_v5 = vpop.permute.xlu0 %4518  ;;  %v4360_v55 = vrot.slane %v4234_v30, 1  ;;  %v4361_v31 = vrot.slane %v13240_v57, 1  ;;  %v5331_v49 = vsel %vm2819_vm5, %v5299_v51, %v13127_v8 }
 0x5f1   : > { %5006 = vrot.lane.b32.xlu1 %v4234_v30, %s10105_s27  ;;  %v5363_v7 = vsel %vm2852_vm6, %v5331_v49, %v13178_v38 }
 0x5f2   : > { %5008 = vrot.lane.b32.xlu0 %v13240_v57, %s10105_s27  ;;  %v5395_v23 = vsel %vm2885_vm7, %v5363_v7, %v13194_v41  ;;  %v4364_v2 = vsel %vm1799_vm3, %v4361_v31, %v4363_v22  ;;  %v4440_v41 = vrot.slane %v4234_v30, 2 }
 0x5f3   : > { %v5183_v47 = vpop.permute.xlu1 %5182  ;;  %v5427_v8 = vsel %vm2918_vm8, %v5395_v23, %v13207_v13  ;;  %v10049_v23 = vld [vmem:[#allocation2 + $0x198] sm:$0xff] }
 0x5f4   : > { %v5490_v37 = vsel %vm2984_vm10, %v5458_v6, %v5183_v47  ;;  %v13256_v17 = vpop.permute.xlu0 %4898  ;;  %v4362_v47 = vsel %vm1799_vm3, %v4360_v55, %v4361_v31  ;;  %v5459_v38 = vsel %vm2951_vm9, %v5427_v8, %v5089_v46 }
 0x5f5   : > { %4722 = vrot.lane.b32.xlu1 %v4234_v30, %s10109_s20  ;;  %8936 = vmatprep.mubr.msk.f32.mxu1 %vm3033_vm11, %v5490_v37 }
 0x5f6   : > { %4724 = vrot.lane.b32.xlu0 %v13240_v57, %s10109_s20 }
 0x5f7   : > { %v9740_v40 = vpop.eup %9739  ;;  %v13270_v21 = vpop.permute.xlu1 %4804 }
 0x5f8   : > { %v9742_v19 = vpop.eup %9741  ;;  %v4063_v63 = vadd.f32 1.0, %v9740_v40  ;;  %v13274_v6 = vpop.permute.xlu0 %4520  ;;  %v4441_v40 = vrot.slane %v13240_v57, 2  ;;  %v4443_v57 = vrot.slane %v13252_v11, 2 }
 0x5f9   : > { %v4062_v37 = vadd.f32 1.0, %v9742_v19  ;;  %5102 = vrot.lane.b32.xlu1 %v4362_v47, %s10108_s16 }
 0x5fa   : > { %9743 = vrcp.f32 %v4063_v63  ;;  %5104 = vrot.lane.b32.xlu0 %v4364_v2, %s10108_s16  ;;  %v4442_v46 = vsel %vm1880_vm4, %v4440_v41, %v4441_v40  ;;  %v13304_v63 = vld [vmem:[#allocation2 + $0x1a0] sm:$0xff] }
 0x5fb   : > { %9745 = vrcp.f32 %v4062_v37  ;;  %v5185_v27 = vpop.permute.xlu1 %5184  ;;  %v4481_v37 = vrot.slane %v10049_v23, 2 }
 0x5fc   : > { %v5491_v55 = vsel %vm2984_vm10, %v5459_v38, %v5185_v27  ;;  %v13286_v51 = vpop.permute.xlu0 %4900 }
 0x5fd   : > { %4818 = vrot.lane.b32.xlu1 %v4362_v47, %s10110_s21  ;;  %8937 = vmatmul.mubr.msk.f32.gmra.mrb[92].mxu1 %vm3033_vm11, %v5491_v55  ;;  %v13320_v55 = vld [vmem:[%s14523_s4 + $0x1] ss:$0 sm:$0xff] }
 0x5fe   : > { %4534 = vrot.lane.b32.xlu0 %v4362_v47, %s10106_s28  ;;  %v14562_v47 = vrot.slane %v13304_v63, 2 }
 0x5ff   : > { %v13292_v13 = vpop.permute.xlu1 %4614 }
 0x600   : > { %v13294_v31 = vpop.permute.xlu0 %4616  ;;  %v13329_v41 = vsel %vm1880_vm4, %v4481_v37, %v14562_v47  ;;  %v13346_v37 = vld [vmem:[%s14525_s6 + $0x1] ss:$0 sm:$0xff] }
 0x601   : > { %5198 = vrot.lane.b32.xlu1 %v4442_v46, %s10112_s24 }
 0x602   : > { %4914 = vrot.lane.b32.xlu0 %v4442_v46, %s10111_s23 }
 0x603   : > { %v4995_v22 = vpop.permute.xlu1 %4994 }
 0x604   : > { %v9744_v30 = vpop.eup %9743  ;;  %v13299_v49 = vpop.permute.xlu0 %4996 }
 0x605   : > { %v9746_v19 = vpop.eup %9745  ;;  %v4159_v7 = vmul.f32 %v9744_v30, %v13222_v1  ;;  %4820 = vrot.lane.b32.xlu1 %v4364_v2, %s10110_s21  ;;  %v4444_v1 = vsel %vm1880_vm4, %v4441_v40, %v4443_v57 }
 0x606   : > { %v4158_v8 = vmul.f32 %v9746_v19, %v13226_v28  ;;  %4536 = vrot.lane.b32.xlu0 %v4364_v2, %s10106_s28 }
 0x607   : > { %4191 = vst.msk [vmem:[#allocation2 + $0x141] sm:$0xff] %vm1055_vm1, %v4159_v7  ;;  %v13310_v38 = vpop.permute.xlu1 %4710  ;;  %v5268_v7 = vsel %vm1055_vm1, %v12757_v61, %v13153_v44 }
 0x608   : > { %4190 = vst.msk [vmem:[#allocation2 + $0x139] sm:$0xff] %vm1055_vm1, %v4158_v8  ;;  %v13313_v11 = vpop.permute.xlu0 %4712  ;;  %v5300_v8 = vsel %vm509_vm0, %v5268_v7, %v13200_v0 }
 0x609   : > { %5200 = vrot.lane.b32.xlu1 %v4444_v1, %s10112_s24  ;;  %v8893_v27 = vpop.f32.mrb[42].mxu0 }
 0x60a   : > { %v13323_v28 = vadd.f32 %v13320_v55, %v8893_v27  ;;  %4916 = vrot.lane.b32.xlu0 %v4444_v1, %s10111_s23  ;;  %v3913_v2 = vpop.f32.mrb[43].mxu0  ;;  %v5332_v27 = vsel %vm2819_vm5, %v5300_v8, %v13214_v39 }
 0x60b   : > { %v13332_v40 = vadd.f32 %v13320_v55, %v3913_v2  ;;  %v5091_v30 = vpop.permute.xlu1 %5090  ;;  %v5364_v0 = vsel %vm2852_vm6, %v5332_v27, %v13238_v42 }
 0x60c   : > { %v8120_v57 = vmul.f32 -1.442695, %v13323_v28  ;;  %v5093_v19 = vpop.permute.xlu0 %5092 }
 0x60d   : > { %v8119_v23 = vmul.f32 -1.442695, %v13332_v40  ;;  %4630 = vrot.lane.b32.xlu1 %v4442_v46, %s10107_s15 }
 0x60e   : > { %9747 = vpow2.f32 %v8120_v57  ;;  %4632 = vrot.lane.b32.xlu0 %v4444_v1, %s10107_s15  ;;  %v5396_v57 = vsel %vm2885_vm7, %v5364_v0, %v13256_v17  ;;  %v13373_v42 = vld [vmem:[#allocation2 + $0x148] sm:$0x3] }
 0x60f   : > { %9749 = vpow2.f32 %v8119_v23  ;;  %v13350_v61 = vpop.permute.xlu1 %4806  ;;  %v13352_v44 = vld [vmem:[#allocation2 + $0x138] sm:$0xff]  ;;  %v13354_v46 = vld [vmem:[#allocation2 + $0x140] sm:$0xff]  ;;  %v5428_v23 = vsel %vm2918_vm8, %v5396_v57, %v4995_v22 }
 0x610   : > { %v13358_v2 = vpop.permute.xlu0 %4522  ;;  %v8920_v1 = vpop.f32.mrb[80].mxu1  ;;  %v5460_v27 = vsel %vm2951_vm9, %v5428_v23, %v5091_v30  ;;  %v4365_v22 = vrot.slane %v13352_v44, 1  ;;  %v4366_v57 = vrot.slane %v13354_v46, 1  ;;  %v4368_v30 = vrot.slane %v13373_v42, 1 }
 0x611   : > { %v13363_v7 = vadd.f32 %v8920_v1, %v13346_v37  ;;  %5010 = vrot.lane.b32.xlu1 %v13352_v44, %s10105_s27  ;;  %v5690_v39 = vpop.f32.mrb[81].mxu1 }
 0x612   : > { %v13369_v8 = vadd.f32 %v13346_v37, %v5690_v39  ;;  %5012 = vrot.lane.b32.xlu0 %v13354_v46, %s10105_s27  ;;  %v10051_v39 = vld [vmem:[#allocation2 + $0xb0] sm:$0xff] }
 0x613   : > { %v8169_v17 = vmul.f32 -1.442695, %v13363_v7  ;;  %v5187_v0 = vpop.permute.xlu1 %5186  ;;  %v5269_v52 = vsel %vm1055_vm1, %v10051_v39, %v13182_v25 }
 0x614   : > { %v8168_v1 = vmul.f32 -1.442695, %v13369_v8  ;;  %v5492_v47 = vsel %vm2984_vm10, %v5460_v27, %v5187_v0  ;;  %v13379_v18 = vpop.permute.xlu0 %4902  ;;  %v5301_v23 = vsel %vm509_vm0, %v5269_v52, %v13202_v29 }
 0x615   : > { %9751 = vpow2.f32 %v8169_v17  ;;  %4726 = vrot.lane.b32.xlu1 %v13352_v44, %s10109_s20  ;;  %8939 = vmatprep.mubr.msk.f32.mxu1 %vm3033_vm11, %v5492_v47  ;;  %v5333_v27 = vsel %vm2819_vm5, %v5301_v23, %v13217_v33  ;;  %v4367_v47 = vsel %vm1799_vm3, %v4365_v22, %v4366_v57 }
 0x616   : > { %9753 = vpow2.f32 %v8168_v1  ;;  %4728 = vrot.lane.b32.xlu0 %v13354_v46, %s10109_s20  ;;  %v5365_v17 = vsel %vm2852_vm6, %v5333_v27, %v13270_v21  ;;  %v4369_v1 = vsel %vm1799_vm3, %v4366_v57, %v4368_v30 }
 0x617   : > { %v13395_v0 = vpop.permute.xlu1 %4808  ;;  %v5397_v52 = vsel %vm2885_vm7, %v5365_v17, %v13286_v51  ;;  %v4445_v51 = vrot.slane %v13352_v44, 2 }
 0x618   : > { %v9748_v25 = vpop.eup %9747  ;;  %v13399_v39 = vpop.permute.xlu0 %4524  ;;  %v5429_v33 = vsel %vm2918_vm8, %v5397_v52, %v13299_v49 }
 0x619   : > { %v9750_v10 = vpop.eup %9749  ;;  %v4065_v29 = vadd.f32 1.0, %v9748_v25  ;;  %5106 = vrot.lane.b32.xlu1 %v4367_v47, %s10108_s16  ;;  %v5461_v21 = vsel %vm2951_vm9, %v5429_v33, %v5093_v19  ;;  %v4446_v25 = vrot.slane %v13354_v46, 2 }
 0x61a   : > { %v4064_v23 = vadd.f32 1.0, %v9750_v10  ;;  %5108 = vrot.lane.b32.xlu0 %v4369_v1, %s10108_s16 }
 0x61b   : > { %9755 = vrcp.f32 %v4065_v29  ;;  %v5189_v27 = vpop.permute.xlu1 %5188  ;;  %v4447_v17 = vsel %vm1880_vm4, %v4445_v51, %v4446_v25 }
 0x61c   : > { %9757 = vrcp.f32 %v4064_v23  ;;  %v5493_v22 = vsel %vm2984_vm10, %v5461_v21, %v5189_v27  ;;  %v13411_v26 = vpop.permute.xlu0 %4904 }
 0x61d   : > { %4822 = vrot.lane.b32.xlu1 %v4367_v47, %s10110_s21  ;;  %8940 = vmatmul.mubr.msk.f32.gmra.mrb[94].mxu1 %vm3033_vm11, %v5493_v22 }
 0x61e   : > { %4538 = vrot.lane.b32.xlu0 %v4367_v47, %s10106_s28  ;;  %v4448_v47 = vrot.slane %v13373_v42, 2 }
 0x61f   : > { %v9752_v10 = vpop.eup %9751  ;;  %v13418_v49 = vpop.permute.xlu1 %4618 }
 0x620   : > { %v9754_v19 = vpop.eup %9753  ;;  %v5946_v57 = vadd.f32 1.0, %v9752_v10  ;;  %v13420_v30 = vpop.permute.xlu0 %4620  ;;  %v4449_v10 = vsel %vm1880_vm4, %v4446_v25, %v4448_v47  ;;  %v5270_v47 = vsel %vm1055_vm1, %v12879_v16, %v13244_v5 }
 0x621   : > { %v5945_v52 = vadd.f32 1.0, %v9754_v19  ;;  %5202 = vrot.lane.b32.xlu1 %v4447_v17, %s10112_s24 }
 0x622   : > { %9759 = vrcp.f32 %v5946_v57  ;;  %4918 = vrot.lane.b32.xlu0 %v4447_v17, %s10111_s23 }
 0x623   : > { %9761 = vrcp.f32 %v5945_v52  ;;  %v4999_v46 = vpop.permute.xlu1 %4998 }
 0x624   : > { %v13425_v29 = vpop.permute.xlu0 %5000 }
 0x625   : > { %v9756_v33 = vpop.eup %9755  ;;  %4824 = vrot.lane.b32.xlu1 %v4369_v1, %s10110_s21 }
 0x626   : > { %v9758_v23 = vpop.eup %9757  ;;  %v4161_v21 = vmul.f32 %v9756_v33, %v13323_v28  ;;  %4540 = vrot.lane.b32.xlu0 %v4369_v1, %s10106_s28 }
 0x627   : > { %v4160_v27 = vmul.f32 %v9758_v23, %v13332_v40  ;;  %v13432_v22 = vpop.permute.xlu1 %4714 }
 0x628   : > { %4193 = vst.msk [vmem:[#allocation2 + $0x159] sm:$0xff] %vm1055_vm1, %v4161_v21  ;;  %v13435_v51 = vpop.permute.xlu0 %4716 }
 0x629   : > { %4192 = vst.msk [vmem:[#allocation2 + $0x151] sm:$0xff] %vm1055_vm1, %v4160_v27  ;;  %5204 = vrot.lane.b32.xlu1 %v4449_v10, %s10112_s24  ;;  %v8896_v42 = vpop.f32.mrb[44].mxu0  ;;  %v5302_v27 = vsel %vm509_vm0, %v5270_v47, %v13292_v13 }
 0x62a   : > { %v13441_v19 = vadd.f32 %v13320_v55, %v8896_v42  ;;  %4920 = vrot.lane.b32.xlu0 %v4449_v10, %s10111_s23  ;;  %v3923_v28 = vpop.f32.mrb[45].mxu0  ;;  %v5334_v34 = vsel %vm2819_vm5, %v5302_v27, %v13310_v38 }
 0x62b   : > { %v13445_v40 = vadd.f32 %v13320_v55, %v3923_v28  ;;  %v5095_v1 = vpop.permute.xlu1 %5094 }
 0x62c   : > { %v9760_v57 = vpop.eup %9759  ;;  %v8122_v52 = vmul.f32 -1.442695, %v13441_v19  ;;  %v13448_v33 = vpop.permute.xlu0 %5096 }
 0x62d   : > { %v9762_v25 = vpop.eup %9761  ;;  %v6042_v23 = vmul.f32 %v9760_v57, %v13363_v7  ;;  %v8121_v21 = vmul.f32 -1.442695, %v13445_v40  ;;  %4634 = vrot.lane.b32.xlu1 %v4447_v17, %s10107_s15  ;;  %v5366_v17 = vsel %vm2852_vm6, %v5334_v34, %v13350_v61 }
 0x62e   : > { %v6041_v42 = vmul.f32 %v9762_v25, %v13369_v8  ;;  %9763 = vpow2.f32 %v8122_v52  ;;  %4636 = vrot.lane.b32.xlu0 %v4449_v10, %s10107_s15  ;;  %v8899_v28 = vpop.f32.mrb[46].mxu0  ;;  %v5398_v47 = vsel %vm2885_vm7, %v5366_v17, %v13379_v18 }
 0x62f   : > { %9765 = vpow2.f32 %v8121_v21  ;;  %v13463_v16 = vadd.f32 %v13320_v55, %v8899_v28  ;;  %v13465_v5 = vpop.permute.xlu1 %4810  ;;  %v3933_v7 = vpop.f32.mrb[47].mxu0  ;;  %v6074_v25 = vadd.f32 %v6042_v23, %v11752_v56  ;;  %v13496_v56 = vld [vmem:[#allocation2 + $0x160] sm:$0x3] }
 0x630   : > { %v6073_v13 = vadd.f32 %v6041_v42, %v11743_v3  ;;  %v13471_v8 = vadd.f32 %v13320_v55, %v3933_v7  ;;  %v13473_v10 = vpop.permute.xlu0 %4526  ;;  %v8923_v57 = vpop.f32.mrb[82].mxu1  ;;  %v13475_v52 = vld [vmem:[#allocation2 + $0x150] sm:$0xff]  ;;  %v13477_v38 = vld [vmem:[#allocation2 + $0x158] sm:$0xff]  ;;  %v5430_v55 = vsel %vm2918_vm8, %v5398_v47, %v4999_v46 }
 0x631   : > { %v8124_v21 = vmul.f32 -1.442695, %v13463_v16  ;;  %v13484_v34 = vadd.f32 %v8923_v57, %v13346_v37  ;;  %5014 = vrot.lane.b32.xlu1 %v13475_v52, %s10105_s27  ;;  %v5700_v3 = vpop.f32.mrb[83].mxu1  ;;  %v5462_v18 = vsel %vm2951_vm9, %v5430_v55, %v5095_v1  ;;  %v4370_v46 = vrot.slane %v13475_v52, 1  ;;  %v10052_v57 = vld [vmem:[#allocation2 + $0xc8] sm:$0xff] }
 0x632   : > { %v8123_v61 = vmul.f32 -1.442695, %v13471_v8  ;;  %v13491_v27 = vadd.f32 %v13346_v37, %v5700_v3  ;;  %5016 = vrot.lane.b32.xlu0 %v13477_v38, %s10105_s27  ;;  %8968 = vmatprep.mubr.msk.f32.mxu0 %vm1055_vm1, %v6073_v13  ;;  %v4371_v13 = vrot.slane %v13477_v38, 1  ;;  %v5271_v1 = vsel %vm1055_vm1, %v10052_v57, %v13274_v6 }
 0x633   : > { %9767 = vpow2.f32 %v8124_v21  ;;  %v8171_v23 = vmul.f32 -1.442695, %v13484_v34  ;;  %v5191_v42 = vpop.permute.xlu1 %5190  ;;  %8969 = vmatmul.mubr.msk.f32.vlgmr.msra.gmra.mrb[48].mxu0 %vm1055_vm1, %v6074_v25  ;;  %v4373_v25 = vrot.slane %v13496_v56, 1  ;;  %v5303_v47 = vsel %vm509_vm0, %v5271_v1, %v13294_v31 }
 0x634   : > { %9769 = vpow2.f32 %v8123_v61  ;;  %v8170_v28 = vmul.f32 -1.442695, %v13491_v27  ;;  %v5494_v7 = vsel %vm2984_vm10, %v5462_v18, %v5191_v42  ;;  %v13504_v17 = vpop.permute.xlu0 %4906  ;;  %v5335_v21 = vsel %vm2819_vm5, %v5303_v47, %v13313_v11 }
 0x635   : > { %9771 = vpow2.f32 %v8171_v23  ;;  %4730 = vrot.lane.b32.xlu1 %v13475_v52, %s10109_s20  ;;  %8942 = vmatprep.mubr.msk.f32.mxu1 %vm3033_vm11, %v5494_v7  ;;  %v5367_v55 = vsel %vm2852_vm6, %v5335_v21, %v13395_v0  ;;  %v4372_v18 = vsel %vm1799_vm3, %v4370_v46, %v4371_v13  ;;  %v4450_v1 = vrot.slane %v13475_v52, 2 }
 0x636   : > { %9773 = vpow2.f32 %v8170_v28  ;;  %4732 = vrot.lane.b32.xlu0 %v13477_v38, %s10109_s20  ;;  %v5399_v31 = vsel %vm2885_vm7, %v5367_v55, %v13411_v26  ;;  %v4374_v28 = vsel %vm1799_vm3, %v4371_v13, %v4373_v25  ;;  %v4451_v13 = vrot.slane %v13477_v38, 2 }
 0x637   : > { %v13519_v3 = vpop.permute.xlu1 %4812  ;;  %v5431_v11 = vsel %vm2918_vm8, %v5399_v31, %v13425_v29 }
 0x638   : > { %v9764_v6 = vpop.eup %9763  ;;  %v13523_v61 = vpop.permute.xlu0 %4528  ;;  %v5463_v0 = vsel %vm2951_vm9, %v5431_v11, %v13448_v33 }
 0x639   : > { %v9766_v23 = vpop.eup %9765  ;;  %v4067_v42 = vadd.f32 1.0, %v9764_v6  ;;  %5110 = vrot.lane.b32.xlu1 %v4372_v18, %s10108_s16 }
 0x63a   : > { %v4066_v7 = vadd.f32 1.0, %v9766_v23  ;;  %5112 = vrot.lane.b32.xlu0 %v4374_v28, %s10108_s16 }
 0x63b   : > { %9775 = vrcp.f32 %v4067_v42  ;;  %v5193_v46 = vpop.permute.xlu1 %5192  ;;  %v4452_v42 = vsel %vm1880_vm4, %v4450_v1, %v4451_v13 }
 0x63c   : > { %9777 = vrcp.f32 %v4066_v7  ;;  %v5495_v57 = vsel %vm2984_vm10, %v5463_v0, %v5193_v46  ;;  %v13536_v26 = vpop.permute.xlu0 %4908  ;;  %v4453_v0 = vrot.slane %v13496_v56, 2 }
 0x63d   : > { %v9768_v25 = vpop.eup %9767  ;;  %4826 = vrot.lane.b32.xlu1 %v4372_v18, %s10110_s21  ;;  %8943 = vmatmul.mubr.msk.f32.gmra.mrb[96].mxu1 %vm3033_vm11, %v5495_v57 }
 0x63e   : > { %v9770_v29 = vpop.eup %9769  ;;  %v4069_v47 = vadd.f32 1.0, %v9768_v25  ;;  %4542 = vrot.lane.b32.xlu0 %v4372_v18, %s10106_s28 }
 0x63f   : > { %v9772_v33 = vpop.eup %9771  ;;  %v4068_v21 = vadd.f32 1.0, %v9770_v29  ;;  %v13543_v6 = vpop.permute.xlu1 %4622 }
 0x640   : > { %v9774_v55 = vpop.eup %9773  ;;  %9779 = vrcp.f32 %v4069_v47  ;;  %v5948_v23 = vadd.f32 1.0, %v9772_v33  ;;  %v13545_v31 = vpop.permute.xlu0 %4624  ;;  %v4454_v33 = vsel %vm1880_vm4, %v4451_v13, %v4453_v0 }
 0x641   : > { %9781 = vrcp.f32 %v4068_v21  ;;  %v5947_v11 = vadd.f32 1.0, %v9774_v55  ;;  %5206 = vrot.lane.b32.xlu1 %v4452_v42, %s10112_s24 }
 0x642   : > { %9783 = vrcp.f32 %v5948_v23  ;;  %4922 = vrot.lane.b32.xlu0 %v4452_v42, %s10111_s23 }
 0x643   : > { %9785 = vrcp.f32 %v5947_v11  ;;  %v5003_v18 = vpop.permute.xlu1 %5002 }
 0x644   : > { %v13550_v7 = vpop.permute.xlu0 %5004 }
 0x645   : > { %v9776_v46 = vpop.eup %9775  ;;  %4828 = vrot.lane.b32.xlu1 %v4374_v28, %s10110_s21 }
 0x646   : > { %v9778_v57 = vpop.eup %9777  ;;  %v4163_v25 = vmul.f32 %v9776_v46, %v13441_v19  ;;  %4544 = vrot.lane.b32.xlu0 %v4374_v28, %s10106_s28  ;;  %v10053_v46 = vld [vmem:[#allocation2 + $0xd8] sm:$0xff] }
 0x647   : > { %v4162_v1 = vmul.f32 %v9778_v57, %v13445_v40  ;;  %v13557_v29 = vpop.permute.xlu1 %4718  ;;  %v5272_v13 = vsel %vm1055_vm1, %v10053_v46, %v13358_v2 }
 0x648   : > { %4195 = vst.msk [vmem:[#allocation2 + $0x171] sm:$0xff] %vm1055_vm1, %v4163_v25  ;;  %v13560_v47 = vpop.permute.xlu0 %4720  ;;  %v5304_v57 = vsel %vm509_vm0, %v5272_v13, %v13418_v49 }
 0x649   : > { %4194 = vst.msk [vmem:[#allocation2 + $0x169] sm:$0xff] %vm1055_vm1, %v4162_v1  ;;  %5208 = vrot.lane.b32.xlu1 %v4454_v33, %s10112_s24 }
 0x64a   : > { %v9780_v56 = vpop.eup %9779  ;;  %4924 = vrot.lane.b32.xlu0 %v4454_v33, %s10111_s23 }
 0x64b   : > { %v9782_v19 = vpop.eup %9781  ;;  %v4165_v28 = vmul.f32 %v9780_v56, %v13463_v16  ;;  %v5099_v21 = vpop.permute.xlu1 %5098 }
 0x64c   : > { %v9784_v40 = vpop.eup %9783  ;;  %v4164_v55 = vmul.f32 %v9782_v19, %v13471_v8  ;;  %v5101_v23 = vpop.permute.xlu0 %5100  ;;  %v5336_v8 = vsel %vm2819_vm5, %v5304_v57, %v13432_v22 }
 0x64d   : > { %v9786_v11 = vpop.eup %9785  ;;  %4197 = vst.msk [vmem:[#allocation2 + $0x189] sm:$0xff] %vm1055_vm1, %v4165_v28  ;;  %v6044_v0 = vmul.f32 %v9784_v40, %v13484_v34  ;;  %4638 = vrot.lane.b32.xlu1 %v4452_v42, %s10107_s15  ;;  %v5368_v2 = vsel %vm2852_vm6, %v5336_v8, %v13465_v5 }
 0x64e   : > { %4196 = vst.msk [vmem:[#allocation2 + $0x181] sm:$0xff] %vm1055_vm1, %v4164_v55  ;;  %v6043_v16 = vmul.f32 %v9786_v11, %v13491_v27  ;;  %4640 = vrot.lane.b32.xlu0 %v4454_v33, %s10107_s15  ;;  %v5400_v33 = vsel %vm2885_vm7, %v5368_v2, %v13504_v17 }
 0x64f   : > { %v13580_v25 = vpop.permute.xlu1 %4814  ;;  %v6076_v27 = vadd.f32 %v6044_v0, %v11848_v20  ;;  %v4245_v20 = vld [vmem:[#allocation2 + $0x178] sm:$0x3]  ;;  %v10054_v0 = vld [vmem:[#allocation2 + $0xe0] sm:$0xff] }
 0x650   : > { %v6075_v34 = vadd.f32 %v6043_v16, %v11839_v45  ;;  %v13585_v42 = vpop.permute.xlu0 %4530  ;;  %v8926_v1 = vpop.f32.mrb[84].mxu1  ;;  %v13587_v49 = vld [vmem:[#allocation2 + $0x168] sm:$0xff]  ;;  %v13589_v56 = vld [vmem:[#allocation2 + $0x170] sm:$0xff]  ;;  %v5432_v45 = vsel %vm2918_vm8, %v5400_v33, %v5003_v18  ;;  %v5273_v57 = vsel %vm1055_vm1, %v10054_v0, %v13399_v39 }
 0x651   : > { %v13595_v22 = vadd.f32 %v8926_v1, %v13346_v37  ;;  %5018 = vrot.lane.b32.xlu1 %v13587_v49, %s10105_s27  ;;  %v5710_v5 = vpop.f32.mrb[85].mxu1  ;;  %v5464_v17 = vsel %vm2951_vm9, %v5432_v45, %v5099_v21  ;;  %v4375_v46 = vrot.slane %v13587_v49, 1  ;;  %v4376_v13 = vrot.slane %v13589_v56, 1 }
 0x652   : > { %v13601_v19 = vadd.f32 %v13346_v37, %v5710_v5  ;;  %5020 = vrot.lane.b32.xlu0 %v13589_v56, %s10105_s27  ;;  %8971 = vmatprep.mubr.msk.f32.mxu0 %vm1055_vm1, %v6075_v34  ;;  %v4378_v21 = vrot.slane %v4245_v20, 1  ;;  %v5305_v16 = vsel %vm509_vm0, %v5273_v57, %v13420_v30  ;;  %v4458_v57 = vrot.slane %v4245_v20, 2 }
 0x653   : > { %v8173_v28 = vmul.f32 -1.442695, %v13595_v22  ;;  %v5195_v40 = vpop.permute.xlu1 %5194  ;;  %8972 = vmatmul.mubr.msk.f32.gmra.mrb[50].mxu0 %vm1055_vm1, %v6076_v27  ;;  %v5337_v8 = vsel %vm2819_vm5, %v5305_v16, %v13435_v51  ;;  %v4377_v1 = vsel %vm1799_vm3, %v4375_v46, %v4376_v13 }
 0x654   : > { %v8172_v55 = vmul.f32 -1.442695, %v13601_v19  ;;  %v5496_v18 = vsel %vm2984_vm10, %v5464_v17, %v5195_v40  ;;  %v13611_v11 = vpop.permute.xlu0 %4910  ;;  %v5369_v39 = vsel %vm2852_vm6, %v5337_v8, %v13519_v3  ;;  %v4379_v30 = vsel %vm1799_vm3, %v4376_v13, %v4378_v21 }
 0x655   : > { %9787 = vpow2.f32 %v8173_v28  ;;  %4734 = vrot.lane.b32.xlu1 %v13587_v49, %s10109_s20  ;;  %8945 = vmatprep.mubr.msk.f32.mxu1 %vm3033_vm11, %v5496_v18  ;;  %v5401_v27 = vsel %vm2885_vm7, %v5369_v39, %v13536_v26  ;;  %v4455_v17 = vrot.slane %v13587_v49, 2  ;;  %v4456_v26 = vrot.slane %v13589_v56, 2 }
 0x656   : > { %9789 = vpow2.f32 %v8172_v55  ;;  %4736 = vrot.lane.b32.xlu0 %v13589_v56, %s10109_s20  ;;  %v5433_v33 = vsel %vm2918_vm8, %v5401_v27, %v13550_v7 }
 0x657   : > { %v13626_v2 = vpop.permute.xlu1 %4816  ;;  %v5465_v51 = vsel %vm2951_vm9, %v5433_v33, %v5101_v23  ;;  %v4457_v18 = vsel %vm1880_vm4, %v4455_v17, %v4456_v26  ;;  %v4459_v8 = vsel %vm1880_vm4, %v4456_v26, %v4458_v57 }
 0x658   : > { %v13630_v34 = vpop.permute.xlu0 %4532 }
 0x659   : > { %5114 = vrot.lane.b32.xlu1 %v4377_v1, %s10108_s16 }
 0x65a   : > { %5116 = vrot.lane.b32.xlu0 %v4379_v30, %s10108_s16 }
 0x65b   : > { %v5197_v5 = vpop.permute.xlu1 %5196 }
 0x65c   : > { %v5497_v3 = vsel %vm2984_vm10, %v5465_v51, %v5197_v5  ;;  %v13642_v45 = vpop.permute.xlu0 %4912  ;;  %v10055_v51 = vld [vmem:[#allocation2 + $0xf0] sm:$0xff] }
 0x65d   : > { %4830 = vrot.lane.b32.xlu1 %v4377_v1, %s10110_s21  ;;  %8946 = vmatmul.mubr.msk.f32.gmra.mrb[98].mxu1 %vm3033_vm11, %v5497_v3  ;;  %v5274_v20 = vsel %vm1055_vm1, %v10055_v51, %v13473_v10 }
 0x65e   : > { %4546 = vrot.lane.b32.xlu0 %v4377_v1, %s10106_s28  ;;  %v5306_v5 = vsel %vm509_vm0, %v5274_v20, %v13543_v6 }
 0x65f   : > { %v9788_v7 = vpop.eup %9787  ;;  %v13649_v28 = vpop.permute.xlu1 %4626  ;;  %v5338_v17 = vsel %vm2819_vm5, %v5306_v5, %v13557_v29 }
 0x660   : > { %v9790_v40 = vpop.eup %9789  ;;  %v5950_v23 = vadd.f32 1.0, %v9788_v7  ;;  %v13651_v55 = vpop.permute.xlu0 %4628  ;;  %v5370_v7 = vsel %vm2852_vm6, %v5338_v17, %v13580_v25 }
 0x661   : > { %v5949_v46 = vadd.f32 1.0, %v9790_v40  ;;  %5210 = vrot.lane.b32.xlu1 %v4457_v18, %s10112_s24 }
 0x662   : > { %9791 = vrcp.f32 %v5950_v23  ;;  %4926 = vrot.lane.b32.xlu0 %v4457_v18, %s10111_s23  ;;  %v4246_v23 = vld [vmem:[#allocation2 + $0x180] sm:$0xff] }
 0x663   : > { %9793 = vrcp.f32 %v5949_v46  ;;  %v5007_v13 = vpop.permute.xlu1 %5006  ;;  %v4247_v46 = vld [vmem:[#allocation2 + $0x188] sm:$0xff] }
 0x664   : > { %v13656_v0 = vpop.permute.xlu0 %5008  ;;  %v4464_v51 = vrot.slane %v4247_v46, 1 }
 0x665   : > { %4832 = vrot.lane.b32.xlu1 %v4379_v30, %s10110_s21 }
 0x666   : > { %4548 = vrot.lane.b32.xlu0 %v4379_v30, %s10106_s28 }
 0x667   : > { %v13660_v21 = vpop.permute.xlu1 %4722 }
 0x668   : > { %v13662_v16 = vpop.permute.xlu0 %4724 }
 0x669   : > { %5212 = vrot.lane.b32.xlu1 %v4459_v8, %s10112_s24 }
 0x66a   : > { %4928 = vrot.lane.b32.xlu0 %v4459_v8, %s10111_s23 }
 0x66b   : > { %v5103_v39 = vpop.permute.xlu1 %5102 }
 0x66c   : > { %v9792_v1 = vpop.eup %9791  ;;  %v5105_v27 = vpop.permute.xlu0 %5104 }
 0x66d   : > { %v9794_v33 = vpop.eup %9793  ;;  %v6046_v30 = vmul.f32 %v9792_v1, %v13595_v22  ;;  %4642 = vrot.lane.b32.xlu1 %v4457_v18, %s10107_s15  ;;  %v4463_v1 = vrot.slane %v4246_v23, 1 }
 0x66e   : > { %v6045_v3 = vmul.f32 %v9794_v33, %v13601_v19  ;;  %4644 = vrot.lane.b32.xlu0 %v4459_v8, %s10107_s15  ;;  %v5402_v19 = vsel %vm2885_vm7, %v5370_v7, %v13611_v11 }
 0x66f   : > { %v13677_v26 = vpop.permute.xlu1 %4818  ;;  %v6078_v6 = vadd.f32 %v6046_v30, %v11941_v58  ;;  %v5434_v25 = vsel %vm2918_vm8, %v5402_v19, %v5007_v13  ;;  %v4248_v58 = vld [vmem:[#allocation2 + $0x190] sm:$0x3]  ;;  %v10056_v30 = vld [vmem:[#allocation2 + $0xf8] sm:$0xff] }
 0x670   : > { %v6077_v10 = vadd.f32 %v6045_v3, %v11933_v35  ;;  %v13682_v22 = vpop.permute.xlu0 %4534  ;;  %v8929_v40 = vpop.f32.mrb[86].mxu1  ;;  %v5466_v57 = vsel %vm2951_vm9, %v5434_v25, %v5103_v39  ;;  %v5275_v5 = vsel %vm1055_vm1, %v10056_v30, %v13523_v61  ;;  %v4466_v39 = vrot.slane %v4248_v58, 1  ;;  %v10057_v30 = vld [vmem:[#allocation2 + $0x1a8] sm:$0x3] }
 0x671   : > { %v13688_v18 = vadd.f32 %v8929_v40, %v13346_v37  ;;  %5022 = vrot.lane.b32.xlu1 %v4246_v23, %s10105_s27  ;;  %v5720_v29 = vpop.f32.mrb[87].mxu1  ;;  %v5307_v3 = vsel %vm509_vm0, %v5275_v5, %v13545_v31  ;;  %v4465_v40 = vsel %vm1799_vm3, %v4463_v1, %v4464_v51  ;;  %v4469_v25 = vrot.slane %v4247_v46, 2 }
 0x672   : > { %v13693_v35 = vadd.f32 %v13346_v37, %v5720_v29  ;;  %5024 = vrot.lane.b32.xlu0 %v4247_v46, %s10105_s27  ;;  %8974 = vmatprep.mubr.msk.f32.mxu0 %vm1055_vm1, %v6077_v10  ;;  %v5339_v17 = vsel %vm2819_vm5, %v5307_v3, %v13560_v47  ;;  %v4467_v31 = vsel %vm1799_vm3, %v4464_v51, %v4466_v39  ;;  %v4484_v5 = vrot.slane %v10057_v30, 2 }
 0x673   : > { %v8175_v11 = vmul.f32 -1.442695, %v13688_v18  ;;  %v5199_v8 = vpop.permute.xlu1 %5198  ;;  %8975 = vmatmul.mubr.msk.f32.gmra.mrb[52].mxu0 %vm1055_vm1, %v6078_v6  ;;  %v5371_v61 = vsel %vm2852_vm6, %v5339_v17, %v13626_v2  ;;  %v4468_v2 = vrot.slane %v4246_v23, 2  ;;  %v14623_v17 = vrot.slane %v13304_v63, 2 }
 0x674   : > { %v8174_v33 = vmul.f32 -1.442695, %v13693_v35  ;;  %v5498_v13 = vsel %vm2984_vm10, %v5466_v57, %v5199_v8  ;;  %v13702_v20 = vpop.permute.xlu0 %4914  ;;  %v5403_v6 = vsel %vm2885_vm7, %v5371_v61, %v13642_v45  ;;  %v4471_v45 = vrot.slane %v4248_v58, 2 }
 0x675   : > { %9795 = vpow2.f32 %v8175_v11  ;;  %4738 = vrot.lane.b32.xlu1 %v4246_v23, %s10109_s20  ;;  %8948 = vmatprep.mubr.msk.f32.mxu1 %vm3033_vm11, %v5498_v13  ;;  %v5435_v19 = vsel %vm2918_vm8, %v5403_v6, %v13656_v0  ;;  %v4470_v23 = vsel %vm1880_vm4, %v4468_v2, %v4469_v25  ;;  %v4485_v61 = vsel %vm1880_vm4, %v14623_v17, %v4484_v5 }
 0x676   : > { %9797 = vpow2.f32 %v8174_v33  ;;  %4740 = vrot.lane.b32.xlu0 %v4247_v46, %s10109_s20  ;;  %v5467_v47 = vsel %vm2951_vm9, %v5435_v19, %v5105_v27  ;;  %v4472_v51 = vsel %vm1880_vm4, %v4469_v25, %v4471_v45 }
 0x677   : > { %v13713_v7 = vpop.permute.xlu1 %4820 }
 0x678   : > { %v13717_v10 = vpop.permute.xlu0 %4536 }
 0x679   : > { %5118 = vrot.lane.b32.xlu1 %v4465_v40, %s10108_s16 }
 0x67a   : > { %5120 = vrot.lane.b32.xlu0 %v4467_v31, %s10108_s16 }
 0x67b   : > { %v5201_v29 = vpop.permute.xlu1 %5200 }
 0x67c   : > { %v5499_v57 = vsel %vm2984_vm10, %v5467_v47, %v5201_v29  ;;  %v13729_v11 = vpop.permute.xlu0 %4916  ;;  %v10058_v47 = vld [vmem:[#allocation2 + $0x108] sm:$0xff] }
 0x67d   : > { %4834 = vrot.lane.b32.xlu1 %v4465_v40, %s10110_s21  ;;  %8949 = vmatmul.mubr.msk.f32.gmra.mrb[100].mxu1 %vm3033_vm11, %v5499_v57 }
 0x67e   : > { %4836 = vrot.lane.b32.xlu0 %v4467_v31, %s10110_s21  ;;  %s14385_s21 = scalar_lea.vmem %s14533_s14, %s8365_s19 }
 0x67f   : > { %v9796_v8 = vpop.eup %9795  ;;  %v13734_v0 = vpop.permute.xlu1 %4630 }
 0x680   : > { %v9798_v1 = vpop.eup %9797  ;;  %v5952_v33 = vadd.f32 1.0, %v9796_v8  ;;  %v13736_v27 = vpop.permute.xlu0 %4632 }
 0x681   : > { %v5951_v46 = vadd.f32 1.0, %v9798_v1  ;;  %5214 = vrot.lane.b32.xlu1 %v4470_v23, %s10112_s24 }
 0x682   : > { %9799 = vrcp.f32 %v5952_v33  ;;  %5216 = vrot.lane.b32.xlu0 %v4472_v51, %s10112_s24 }
 0x683   : > { %9801 = vrcp.f32 %v5951_v46  ;;  %v5011_v58 = vpop.permute.xlu1 %5010 }
 0x684   : > { %v5013_v13 = vpop.permute.xlu0 %5012 }
 0x685   : > { %4930 = vrot.lane.b32.xlu1 %v4470_v23, %s10111_s23 }
 0x686   : > { %5218 = vrot.lane.b32.xlu0 %v13329_v41, %s10112_s24  ;;  %v5276_v41 = vsel %vm1055_vm1, %v10058_v47, %v13585_v42 }
 0x687   : > { %v13745_v39 = vpop.permute.xlu1 %4726  ;;  %v5308_v2 = vsel %vm509_vm0, %v5276_v41, %v13649_v28 }
 0x688   : > { %v13747_v3 = vpop.permute.xlu0 %4728  ;;  %v5340_v63 = vsel %vm2819_vm5, %v5308_v2, %v13660_v21 }
 0x689   : > { %4932 = vrot.lane.b32.xlu1 %v4472_v51, %s10111_s23  ;;  %v5372_v45 = vsel %vm2852_vm6, %v5340_v63, %v13677_v26 }
 0x68a   : > { %v5404_v28 = vsel %vm2885_vm7, %v5372_v45, %v13702_v20  ;;  %v10059_v20 = vld [vmem:[#allocation2 + $0x110] sm:$0xff] }
 0x68b   : > { %v5107_v40 = vpop.permute.xlu1 %5106  ;;  %v5436_v21 = vsel %vm2918_vm8, %v5404_v28, %v5011_v58  ;;  %v5277_v5 = vsel %vm1055_vm1, %v10059_v20, %v13630_v34 }
 0x68c   : > { %v9800_v6 = vpop.eup %9799  ;;  %v5109_v31 = vpop.permute.xlu0 %5108  ;;  %v5468_v26 = vsel %vm2951_vm9, %v5436_v21, %v5107_v40  ;;  %v5309_v58 = vsel %vm509_vm0, %v5277_v5, %v13651_v55 }
 0x68d   : > { %v9802_v19 = vpop.eup %9801  ;;  %v6048_v29 = vmul.f32 %v9800_v6, %v13688_v18  ;;  %5220 = vrot.lane.b32.xlu1 %v4485_v61, %s10112_s24  ;;  %v5341_v17 = vsel %vm2819_vm5, %v5309_v58, %v13662_v16  ;;  %v6530_v16 = vld [vmem:[%s14528_s9] sm:$0xff] }
 0x68e   : > { %v6047_v25 = vmul.f32 %v9802_v19, %v13693_v35  ;;  %v5373_v40 = vsel %vm2852_vm6, %v5341_v17, %v13713_v7  ;;  %v6531_v7 = vld [vmem:[%s14528_s9 + $0x8] sm:$0xff] }
 0x68f   : > { %v13762_v57 = vpop.permute.xlu1 %4822  ;;  %v6080_v1 = vadd.f32 %v6048_v29, %v12031_v62  ;;  %v5405_v34 = vsel %vm2885_vm7, %v5373_v40, %v13729_v11  ;;  %v9204_v2 = vpack.c.bf16 %v6531_v7, %v6530_v16 }
 0x690   : > { %v6079_v8 = vadd.f32 %v6047_v25, %v12027_v9  ;;  %v13767_v42 = vpop.permute.xlu0 %4538  ;;  %v8932_v18 = vpop.f32.mrb[88].mxu1  ;;  %v5437_v19 = vsel %vm2918_vm8, %v5405_v34, %v5013_v13 }
 0x691   : > { %v5736_v35 = vadd.f32 %v8932_v18, %v13346_v37  ;;  %v5730_v33 = vpop.f32.mrb[89].mxu1  ;;  %v5469_v47 = vsel %vm2951_vm9, %v5437_v19, %v5109_v31  ;;  %9205 = vmatprep.subr.bf16.mxu1 %v9204_v2 }
 0x692   : > { %v5731_v23 = vadd.f32 %v13346_v37, %v5730_v33  ;;  %8977 = vmatprep.mubr.msk.f32.mxu0 %vm1055_vm1, %v6079_v8  ;;  %9207 = vmatpush3.bf16.msra.mxu1 %v9204_v2 }
 0x693   : > { %v8177_v9 = vmul.f32 -1.442695, %v5736_v35  ;;  %v5203_v46 = vpop.permute.xlu1 %5202  ;;  %8978 = vmatmul.mubr.msk.f32.gmra.mrb[54].mxu0 %vm1055_vm1, %v6080_v1 }
 0x694   : > { %v8176_v51 = vmul.f32 -1.442695, %v5731_v23  ;;  %v5500_v62 = vsel %vm2984_vm10, %v5468_v26, %v5203_v46  ;;  %v4919_v30 = vpop.permute.xlu0 %4918  ;;  %v10060_v46 = vld [vmem:[#allocation2 + $0x120] sm:$0xff] }
 0x695   : > { %9803 = vpow2.f32 %v8177_v9  ;;  %8951 = vmatprep.mubr.msk.f32.mxu1 %vm3033_vm11, %v5500_v62 }
 0x696   : > { %9805 = vpow2.f32 %v8176_v51  ;;  %v5278_v51 = vsel %vm1055_vm1, %v10060_v46, %v13682_v22 }
 0x697   : > { %v13786_v61 = vpop.permute.xlu1 %4824  ;;  %v5310_v20 = vsel %vm509_vm0, %v5278_v51, %v13734_v0 }
 0x698   : > { %v13790_v6 = vpop.permute.xlu0 %4540  ;;  %v5342_v58 = vsel %vm2819_vm5, %v5310_v20, %v13745_v39 }
 0x699   : > { %v5374_v40 = vsel %vm2852_vm6, %v5342_v58, %v13762_v57 }
 0x69a   : > { %v5406_v22 = vsel %vm2885_vm7, %v5374_v40, %v4919_v30  ;;  %v10061_v30 = vld [vmem:[#allocation2 + $0x128] sm:$0xff] }
 0x69b   : > { %v5205_v41 = vpop.permute.xlu1 %5204  ;;  %v5279_v2 = vsel %vm1055_vm1, %v10061_v30, %v13717_v10 }
 0x69c   : > { %v5501_v55 = vsel %vm2984_vm10, %v5469_v47, %v5205_v41  ;;  %v4921_v29 = vpop.permute.xlu0 %4920 }
 0x69d   : > { %8952 = vmatmul.mubr.msk.f32.gmra.mrb[102].mxu1 %vm3033_vm11, %v5501_v55 }
 0x69f   : > { %v9804_v11 = vpop.eup %9803  ;;  %v13804_v25 = vpop.permute.xlu1 %4634 }
 0x6a0   : > { %v9806_v13 = vpop.eup %9805  ;;  %v5954_v31 = vadd.f32 1.0, %v9804_v11  ;;  %v13806_v63 = vpop.permute.xlu0 %4636 }
 0x6a1   : > { %v5953_v45 = vadd.f32 1.0, %v9806_v13 }
 0x6a2   : > { %9807 = vrcp.f32 %v5954_v31 }
 0x6a3   : > { %9809 = vrcp.f32 %v5953_v45  ;;  %v5015_v8 = vpop.permute.xlu1 %5014 }
 0x6a4   : > { %v5017_v18 = vpop.permute.xlu0 %5016 }
 0x6a7   : > { %v13808_v1 = vpop.permute.xlu1 %4730 }
 0x6a8   : > { %v13810_v28 = vpop.permute.xlu0 %4732 }
 0x6ab   : > { %v5111_v33 = vpop.permute.xlu1 %5110 }
 0x6ac   : > { %v9808_v21 = vpop.eup %9807  ;;  %v5113_v26 = vpop.permute.xlu0 %5112 }
 0x6ad   : > { %v9810_v9 = vpop.eup %9809  ;;  %v6050_v62 = vmul.f32 %v9808_v21, %v5736_v35 }
 0x6ae   : > { %v6049_v5 = vmul.f32 %v9810_v9, %v5731_v23  ;;  %v5438_v23 = vsel %vm2918_vm8, %v5406_v22, %v5015_v8 }
 0x6af   : > { %v4827_v17 = vpop.permute.xlu1 %4826  ;;  %v6082_v41 = vadd.f32 %v6050_v62, %v12107_v24  ;;  %v5470_v57 = vsel %vm2951_vm9, %v5438_v23, %v5111_v33 }
 0x6b0   : > { %v6081_v34 = vadd.f32 %v6049_v5, %v12103_v60  ;;  %v13821_v19 = vpop.permute.xlu0 %4542  ;;  %v8935_v47 = vpop.f32.mrb[90].mxu1 }
 0x6b1   : > { %v5746_v35 = vadd.f32 %v8935_v47, %v13346_v37  ;;  %v5740_v0 = vpop.f32.mrb[91].mxu1 }
 0x6b2   : > { %v5741_v39 = vadd.f32 %v13346_v37, %v5740_v0  ;;  %8980 = vmatprep.mubr.msk.f32.mxu0 %vm1055_vm1, %v6081_v34  ;;  %v5311_v37 = vsel %vm509_vm0, %v5279_v2, %v13736_v27 }
 0x6b3   : > { %v8179_v55 = vmul.f32 -1.442695, %v5746_v35  ;;  %v5207_v60 = vpop.permute.xlu1 %5206  ;;  %8981 = vmatmul.mubr.msk.f32.gmra.mrb[56].mxu0 %vm1055_vm1, %v6082_v41  ;;  %v5343_v11 = vsel %vm2819_vm5, %v5311_v37, %v13747_v3  ;;  %v5280_v41 = vsel %vm1055_vm1, %v13352_v44, %v13767_v42  ;;  %v13874_v42 = vld [vmem:[%s14525_s6 + $0x1] ss:$0 sm:$0xff] }
 0x6b4   : > { %v8178_v16 = vmul.f32 -1.442695, %v5741_v39  ;;  %v5502_v24 = vsel %vm2984_vm10, %v5470_v57, %v5207_v60  ;;  %v4923_v7 = vpop.permute.xlu0 %4922  ;;  %v5375_v31 = vsel %vm2852_vm6, %v5343_v11, %v13786_v61  ;;  %v5312_v0 = vsel %vm509_vm0, %v5280_v41, %v13804_v25 }
 0x6b5   : > { %9811 = vpow2.f32 %v8179_v55  ;;  %8954 = vmatprep.mubr.msk.f32.mxu1 %vm3033_vm11, %v5502_v24  ;;  %v5407_v8 = vsel %vm2885_vm7, %v5375_v31, %v4921_v29  ;;  %v5344_v57 = vsel %vm2819_vm5, %v5312_v0, %v13808_v1  ;;  %v10063_v31 = vld [vmem:[#allocation2 + $0x140] sm:$0xff] }
 0x6b6   : > { %9813 = vpow2.f32 %v8178_v16  ;;  %v5439_v10 = vsel %vm2918_vm8, %v5407_v8, %v5017_v18  ;;  %v5376_v60 = vsel %vm2852_vm6, %v5344_v57, %v4827_v17  ;;  %v5281_v8 = vsel %vm1055_vm1, %v10063_v31, %v13790_v6 }
 0x6b7   : > { %v4829_v13 = vpop.permute.xlu1 %4828  ;;  %v5471_v33 = vsel %vm2951_vm9, %v5439_v10, %v5113_v26  ;;  %v5408_v44 = vsel %vm2885_vm7, %v5376_v60, %v4923_v7  ;;  %v5313_v10 = vsel %vm509_vm0, %v5281_v8, %v13806_v63 }
 0x6b8   : > { %v13841_v45 = vpop.permute.xlu0 %4544 }
 0x6bb   : > { %v5209_v21 = vpop.permute.xlu1 %5208 }
 0x6bc   : > { %v5503_v9 = vsel %vm2984_vm10, %v5471_v33, %v5209_v21  ;;  %v4925_v27 = vpop.permute.xlu0 %4924  ;;  %v5345_v33 = vsel %vm2819_vm5, %v5313_v10, %v13810_v28 }
 0x6bd   : > { %8955 = vmatmul.mubr.msk.f32.gmra.mrb[104].mxu1 %vm3033_vm11, %v5503_v9  ;;  %v5377_v9 = vsel %vm2852_vm6, %v5345_v33, %v4829_v13 }
 0x6bf   : > { %v9812_v46 = vpop.eup %9811  ;;  %v13848_v3 = vpop.permute.xlu1 %4638 }
 0x6c0   : > { %v9814_v51 = vpop.eup %9813  ;;  %v5956_v62 = vadd.f32 1.0, %v9812_v46  ;;  %v13850_v61 = vpop.permute.xlu0 %4640 }
 0x6c1   : > { %v5955_v20 = vadd.f32 1.0, %v9814_v51  ;;  %v5409_v51 = vsel %vm2885_vm7, %v5377_v9, %v4925_v27 }
 0x6c2   : > { %9815 = vrcp.f32 %v5956_v62 }
 0x6c3   : > { %9817 = vrcp.f32 %v5955_v20  ;;  %v5019_v29 = vpop.permute.xlu1 %5018 }
 0x6c4   : > { %v5021_v18 = vpop.permute.xlu0 %5020 }
 0x6c5   : > { %v5441_v62 = vsel %vm2918_vm8, %v5409_v51, %v5021_v18 }
 0x6c7   : > { %v13852_v5 = vpop.permute.xlu1 %4734 }
 0x6c8   : > { %v13854_v26 = vpop.permute.xlu0 %4736 }
 0x6cb   : > { %v5115_v58 = vpop.permute.xlu1 %5114 }
 0x6cc   : > { %v9816_v40 = vpop.eup %9815  ;;  %v5117_v34 = vpop.permute.xlu0 %5116 }
 0x6cd   : > { %v9818_v47 = vpop.eup %9817  ;;  %v6052_v22 = vmul.f32 %v9816_v40, %v5746_v35  ;;  %v5440_v35 = vsel %vm2918_vm8, %v5408_v44, %v5019_v29  ;;  %v5473_v6 = vsel %vm2951_vm9, %v5441_v62, %v5117_v34 }
 0x6ce   : > { %v6051_v23 = vmul.f32 %v9818_v47, %v5741_v39 }
 0x6cf   : > { %v13863_v55 = vpop.permute.xlu1 %4830  ;;  %v6084_v2 = vadd.f32 %v6052_v22, %v12158_v48 }
 0x6d0   : > { %v6083_v16 = vadd.f32 %v6051_v23, %v12154_v4  ;;  %v13867_v24 = vpop.permute.xlu0 %4546  ;;  %v8938_v30 = vpop.f32.mrb[92].mxu1  ;;  %v5472_v4 = vsel %vm2951_vm9, %v5440_v35, %v5115_v58 }
 0x6d1   : > { %v5756_v25 = vadd.f32 %v13874_v42, %v8938_v30  ;;  %v5750_v1 = vpop.f32.mrb[93].mxu1 }
 0x6d2   : > { %v5751_v17 = vadd.f32 %v13874_v42, %v5750_v1  ;;  %8983 = vmatprep.mubr.msk.f32.mxu0 %vm1055_vm1, %v6083_v16  ;;  %v5282_v16 = vsel %vm1055_vm1, %v13475_v52, %v13821_v19 }
 0x6d3   : > { %v8181_v39 = vmul.f32 -1.442695, %v5756_v25  ;;  %v5211_v48 = vpop.permute.xlu1 %5210  ;;  %8984 = vmatmul.mubr.msk.f32.gmra.mrb[58].mxu0 %vm1055_vm1, %v6084_v2  ;;  %v5283_v2 = vsel %vm1055_vm1, %v13477_v38, %v13841_v45  ;;  %v5314_v44 = vsel %vm509_vm0, %v5282_v16, %v13848_v3  ;;  %v10067_v16 = vld [vmem:[%s10210_s22 + $0x18] sm:$0xff] }
 0x6d4   : > { %v8180_v7 = vmul.f32 -1.442695, %v5751_v17  ;;  %v5504_v37 = vsel %vm2984_vm10, %v5472_v4, %v5211_v48  ;;  %v4927_v11 = vpop.permute.xlu0 %4926  ;;  %v5315_v35 = vsel %vm509_vm0, %v5283_v2, %v13850_v61  ;;  %v5346_v4 = vsel %vm2819_vm5, %v5314_v44, %v13852_v5 }
 0x6d5   : > { %9819 = vpow2.f32 %v8181_v39  ;;  %8957 = vmatprep.mubr.msk.f32.mxu1 %vm3033_vm11, %v5504_v37  ;;  %v5347_v48 = vsel %vm2819_vm5, %v5315_v35, %v13854_v26  ;;  %v5378_v52 = vsel %vm2852_vm6, %v5346_v4, %v13863_v55  ;;  %v10069_v35 = vld [vmem:[%s10210_s22 + $0x28] sm:$0xff] }
 0x6d6   : > { %9821 = vpow2.f32 %v8180_v7 }
 0x6d7   : > { %v4833_v21 = vpop.permute.xlu1 %4832 }
 0x6d8   : > { %v13891_v46 = vpop.permute.xlu0 %4548  ;;  %v5379_v61 = vsel %vm2852_vm6, %v5347_v48, %v4833_v21 }
 0x6db   : > { %v5213_v20 = vpop.permute.xlu1 %5212 }
 0x6dc   : > { %v5505_v29 = vsel %vm2984_vm10, %v5473_v6, %v5213_v20  ;;  %v4929_v58 = vpop.permute.xlu0 %4928  ;;  %v5285_v6 = vsel %vm1055_vm1, %v13589_v56, %v13891_v46 }
 0x6dd   : > { %8958 = vmatmul.mubr.msk.f32.gmra.mrb[106].mxu1 %vm3033_vm11, %v5505_v29  ;;  %v5411_v7 = vsel %vm2885_vm7, %v5379_v61, %v4929_v58  ;;  %v10072_v61 = vld [vmem:[%s10210_s22 + $0x40] sm:$0xff] }
 0x6df   : > { %v9820_v63 = vpop.eup %9819  ;;  %v4643_v40 = vpop.permute.xlu1 %4642 }
 0x6e0   : > { %v9822_v28 = vpop.eup %9821  ;;  %v5958_v47 = vadd.f32 1.0, %v9820_v63  ;;  %v4645_v41 = vpop.permute.xlu0 %4644 }
 0x6e1   : > { %v5957_v13 = vadd.f32 1.0, %v9822_v28  ;;  %v5317_v58 = vsel %vm509_vm0, %v5285_v6, %v4645_v41 }
 0x6e2   : > { %9823 = vrcp.f32 %v5958_v47 }
 0x6e3   : > { %9825 = vrcp.f32 %v5957_v13  ;;  %v5023_v22 = vpop.permute.xlu1 %5022 }
 0x6e4   : > { %v5025_v27 = vpop.permute.xlu0 %5024 }
 0x6e7   : > { %v4739_v0 = vpop.permute.xlu1 %4738 }
 0x6e8   : > { %v4741_v18 = vpop.permute.xlu0 %4740 }
 0x6eb   : > { %v5119_v23 = vpop.permute.xlu1 %5118 }
 0x6ec   : > { %v9824_v34 = vpop.eup %9823  ;;  %v5121_v57 = vpop.permute.xlu0 %5120 }
 0x6ed   : > { %v9826_v60 = vpop.eup %9825  ;;  %v6054_v30 = vmul.f32 %v9824_v34, %v5756_v25  ;;  %v5410_v25 = vsel %vm2885_vm7, %v5378_v52, %v4927_v11  ;;  %v5284_v11 = vsel %vm1055_vm1, %v13587_v49, %v13867_v24  ;;  %v10064_v34 = vld [vmem:[%s10210_s22] sm:$0xff] }
 0x6ee   : > { %v6053_v1 = vmul.f32 %v9826_v60, %v5751_v17  ;;  %v5442_v26 = vsel %vm2918_vm8, %v5410_v25, %v5023_v22  ;;  %v5316_v9 = vsel %vm509_vm0, %v5284_v11, %v4643_v40  ;;  %v5349_v40 = vsel %vm2819_vm5, %v5317_v58, %v4741_v18 }
 0x6ef   : > { %v4835_v39 = vpop.permute.xlu1 %4834  ;;  %v6086_v3 = vadd.f32 %v6054_v30, %v12198_v43  ;;  %v5474_v55 = vsel %vm2951_vm9, %v5442_v26, %v5119_v23  ;;  %v5348_v62 = vsel %vm2819_vm5, %v5316_v9, %v4739_v0  ;;  %v10068_v30 = vld [vmem:[%s10210_s22 + $0x20] sm:$0xff]  ;;  %v10082_v9 = vld [vmem:[%s10210_s22 + $0x90] sm:$0xff] }
 0x6f0   : > { %v6085_v19 = vadd.f32 %v6053_v1, %v12194_v12  ;;  %v4837_v38 = vpop.permute.xlu0 %4836  ;;  %v8941_v45 = vpop.f32.mrb[94].mxu1  ;;  %v5443_v12 = vsel %vm2918_vm8, %v5411_v7, %v5025_v27  ;;  %v5380_v49 = vsel %vm2852_vm6, %v5348_v62, %v4835_v39  ;;  %v10070_v39 = vld [vmem:[%s10210_s22 + $0x30] sm:$0xff]  ;;  %v10075_v7 = vld [vmem:[%s10210_s22 + $0x58] sm:$0xff]  ;;  %v10076_v26 = vld [vmem:[%s10210_s22 + $0x60] sm:$0xff] }
 0x6f1   : > { %v5766_v17 = vadd.f32 %v13874_v42, %v8941_v45  ;;  %v5760_v5 = vpop.f32.mrb[95].mxu1  ;;  %v5475_v8 = vsel %vm2951_vm9, %v5443_v12, %v5121_v57  ;;  %v5381_v47 = vsel %vm2852_vm6, %v5349_v40, %v4837_v38  ;;  %v10066_v57 = vld [vmem:[%s10210_s22 + $0x10] sm:$0xff]  ;;  %v10083_v62 = vld [vmem:[%s10210_s22 + $0x98] sm:$0xff] }
 0x6f2   : > { %v5761_v37 = vadd.f32 %v13874_v42, %v5760_v5  ;;  %8986 = vmatprep.mubr.msk.f32.mxu0 %vm1055_vm1, %v6085_v19  ;;  %v10074_v5 = vld [vmem:[%s10210_s22 + $0x50] sm:$0xff] }
 0x6f3   : > { %v8183_v43 = vmul.f32 -1.442695, %v5766_v17  ;;  %v5215_v31 = vpop.permute.xlu1 %5214  ;;  %8987 = vmatmul.mubr.msk.f32.gmra.mrb[60].mxu0 %vm1055_vm1, %v6086_v3  ;;  %v10071_v3 = vld [vmem:[%s10210_s22 + $0x38] sm:$0xff]  ;;  %v10078_v12 = vld [vmem:[%s10210_s22 + $0x70] sm:$0xff] }
 0x6f4   : > { %v8182_v10 = vmul.f32 -1.442695, %v5761_v37  ;;  %v5506_v33 = vsel %vm2984_vm10, %v5474_v55, %v5215_v31  ;;  %v5217_v21 = vpop.permute.xlu0 %5216 }
 0x6f5   : > { %9827 = vpow2.f32 %v8183_v43  ;;  %v5507_v51 = vsel %vm2984_vm10, %v5475_v8, %v5217_v21  ;;  %8960 = vmatprep.mubr.msk.f32.mxu1 %vm3033_vm11, %v5506_v33  ;;  %v10079_v8 = vld [vmem:[%s10210_s22 + $0x78] sm:$0xff]  ;;  %v10081_v33 = vld [vmem:[%s10210_s22 + $0x88] sm:$0xff] }
 0x6f6   : > { %9829 = vpow2.f32 %v8182_v10  ;;  %8961 = vmatmul.mubr.msk.f32.gmra.mrb[108].mxu1 %vm3033_vm11, %v5507_v51  ;;  %v10080_v10 = vld [vmem:[%s10210_s22 + $0x80] sm:$0xff] }
 0x6f7   : > { %v4931_v24 = vpop.permute.xlu1 %4930 }
 0x6f8   : > { %v5412_v20 = vsel %vm2885_vm7, %v5380_v49, %v4931_v24  ;;  %v5219_v29 = vpop.permute.xlu0 %5218  ;;  %v10084_v49 = vld [vmem:[%s10210_s22 + $0xa0] sm:$0xff] }
 0x6f9   : > { %v5444_v63 = vsel %vm2918_vm8, %v5412_v20, %v12483_v14 }
 0x6fa   : > { %v5476_v28 = vsel %vm2951_vm9, %v5444_v63, %v12493_v53  ;;  %v10086_v63 = vld [vmem:[%s10210_s22 + $0xb0] sm:$0xff] }
 0x6fb   : > { %v5508_v13 = vsel %vm2984_vm10, %v5476_v28, %v5219_v29  ;;  %v4933_v22 = vpop.permute.xlu1 %4932  ;;  %v10085_v29 = vld [vmem:[%s10210_s22 + $0xa8] sm:$0xff] }
 0x6fc   : > { %v5413_v56 = vsel %vm2885_vm7, %v5381_v47, %v4933_v22  ;;  %8963 = vmatprep.mubr.msk.f32.mxu1 %vm3033_vm11, %v5508_v13 }
 0x6fd   : > { %v5445_v46 = vsel %vm2918_vm8, %v5413_v56, %v12496_v50  ;;  %v10065_v50 = vld [vmem:[%s10210_s22 + $0x8] sm:$0xff]  ;;  %v10087_v56 = vld [vmem:[%s10210_s22 + $0xb8] sm:$0xff] }
 0x6fe   : > { %v5477_v14 = vsel %vm2951_vm9, %v5445_v46, %v12505_v32 }
 0x6ff   : > { %v9828_v41 = vpop.eup %9827  ;;  %v5221_v53 = vpop.permute.xlu1 %5220 }
 0x700   : > { %v9830_v27 = vpop.eup %9829  ;;  %v5960_v0 = vadd.f32 1.0, %v9828_v41  ;;  %v5509_v18 = vsel %vm2984_vm10, %v5477_v14, %v5221_v53  ;;  %v10088_v14 = vld [vmem:[%s10210_s22 + $0xc0] sm:$0xff]  ;;  %v10089_v41 = vld [vmem:[%s10210_s22 + $0xc8] sm:$0xff]  ;;  %v10090_v53 = vld [vmem:[%s10210_s22 + $0xd0] sm:$0xff] }
 0x701   : > { %v5959_v23 = vadd.f32 1.0, %v9830_v27  ;;  %8964 = vmatmul.mubr.msk.f32.gmra.mrb[110].mxu1 %vm3033_vm11, %v5509_v18  ;;  %v10091_v27 = vld [vmem:[%s10210_s22 + $0xd8] sm:$0xff]  ;;  %v10093_v18 = vld [vmem:[%s10210_s22 + $0xe8] sm:$0xff] }
 0x702   : > { %9831 = vrcp.f32 %v5960_v0  ;;  %9020 = vmatprep.mubr.msk.f32.mxu1 %vm509_vm0, %v10064_v34  ;;  %v10092_v0 = vld [vmem:[%s10210_s22 + $0xe0] sm:$0xff] }
 0x703   : > { %9833 = vrcp.f32 %v5959_v23  ;;  %v10094_v23 = vld [vmem:[%s10210_s22 + $0xf0] sm:$0xff] }
 0x705   : > { %9021 = vmatmul.mubr.msk.f32.vlgmr.msra.gmra.mrb[112].mxu1 %vm509_vm0, %v10065_v50 }
 0x706   : > { %v13961_v32 = vpop.f32.mrb[48].mxu0  ;;  %9023 = vmatprep.mubr.msk.f32.mxu1 %vm509_vm0, %v10066_v57 }
 0x707   : > { %v13965_v60 = vpop.f32.mrb[49].mxu0 }
 0x709   : > { %9024 = vmatmul.mubr.msk.f32.gmra.mrb[114].mxu1 %vm509_vm0, %v10067_v16 }
 0x70a   : > { %9026 = vmatprep.mubr.msk.f32.mxu1 %vm509_vm0, %v10068_v30  ;;  %v10095_v30 = vld [vmem:[%s10210_s22 + $0xf8] sm:$0xff] }
 0x70c   : > { %v9832_v2 = vpop.eup %9831 }
 0x70d   : > { %v9834_v44 = vpop.eup %9833  ;;  %v6056_v1 = vmul.f32 %v9832_v2, %v5766_v17  ;;  %9027 = vmatmul.mubr.msk.f32.gmra.mrb[116].mxu1 %vm509_vm0, %v10069_v35  ;;  %v10073_v17 = vld [vmem:[%s10210_s22 + $0x48] sm:$0xff] }
 0x70e   : > { %v6055_v4 = vmul.f32 %v9834_v44, %v5761_v37  ;;  %9029 = vmatprep.mubr.msk.f32.mxu1 %vm509_vm0, %v10070_v39  ;;  %v10077_v37 = vld [vmem:[%s10210_s22 + $0x68] sm:$0xff] }
 0x70f   : > { %v6088_v19 = vadd.f32 %v6056_v1, %v12268_v54 }
 0x710   : > { %v6087_v48 = vadd.f32 %v6055_v4, %v12265_v59  ;;  %v8944_v52 = vpop.f32.mrb[96].mxu1 }
 0x711   : > { %v5776_v38 = vadd.f32 %v13874_v42, %v8944_v52  ;;  %v5770_v45 = vpop.f32.mrb[97].mxu1  ;;  %9030 = vmatmul.mubr.msk.f32.gmra.mrb[118].mxu1 %vm509_vm0, %v10071_v3 }
 0x712   : > { %v5771_v25 = vadd.f32 %v13874_v42, %v5770_v45  ;;  %8989 = vmatprep.mubr.msk.f32.mxu0 %vm1055_vm1, %v6087_v48  ;;  %9032 = vmatprep.mubr.msk.f32.mxu1 %vm509_vm0, %v10072_v61  ;;  %v14624_v48 = vld [vmem:[#allocation21_spill] sm:$0xff] }
 0x713   : > { %v8185_v59 = vmul.f32 -1.442695, %v5776_v38  ;;  %8990 = vmatmul.mubr.msk.f32.gmra.mrb[62].mxu0 %vm1055_vm1, %v6088_v19 }
 0x714   : > { %v8184_v54 = vmul.f32 -1.442695, %v5771_v25 }
 0x715   : > { %9835 = vpow2.f32 %v8185_v59  ;;  %9033 = vmatmul.mubr.msk.f32.gmra.mrb[120].mxu1 %vm509_vm0, %v10073_v17 }
 0x716   : > { %9837 = vpow2.f32 %v8184_v54  ;;  %9035 = vmatprep.mubr.msk.f32.mxu1 %vm509_vm0, %v10074_v5 }
 0x719   : > { %9036 = vmatmul.mubr.msk.f32.gmra.mrb[122].mxu1 %vm509_vm0, %v10075_v7 }
 0x71a   : > { %9038 = vmatprep.mubr.msk.f32.mxu1 %vm509_vm0, %v10076_v26 }
 0x71d   : > { %9039 = vmatmul.mubr.msk.f32.gmra.mrb[124].mxu1 %vm509_vm0, %v10077_v37 }
 0x71e   : > { %9041 = vmatprep.mubr.msk.f32.mxu1 %vm509_vm0, %v10078_v12 }
 0x71f   : > { %v9836_v55 = vpop.eup %9835 }
 0x720   : > { %v9838_v43 = vpop.eup %9837  ;;  %v5962_v31 = vadd.f32 1.0, %v9836_v55 }
 0x721   : > { %v5961_v11 = vadd.f32 1.0, %v9838_v43  ;;  %9042 = vmatmul.mubr.msk.f32.gmra.mrb[126].mxu1 %vm509_vm0, %v10079_v8  ;;  %v14626_v8 = vld [vmem:[#allocation3_spill] sm:$0xff] }
 0x722   : > { %9839 = vrcp.f32 %v5962_v31  ;;  %9044 = vmatprep.mubr.msk.f32.mxu1 %vm509_vm0, %v10080_v10 }
 0x723   : > { %9841 = vrcp.f32 %v5961_v11 }
 0x725   : > { %9045 = vmatmul.mubr.msk.f32.gmra.mrb[128].mxu1 %vm509_vm0, %v10081_v33 }
 0x726   : > { %v14003_v21 = vpop.f32.mrb[50].mxu0  ;;  %9047 = vmatprep.mubr.msk.f32.mxu1 %vm509_vm0, %v10082_v9  ;;  %v14627_v9 = vld [vmem:[#allocation5_spill] sm:$0xff] }
 0x727   : > { %v14007_v51 = vpop.f32.mrb[51].mxu0 }
 0x729   : > { %9048 = vmatmul.mubr.msk.f32.gmra.mrb[130].mxu1 %vm509_vm0, %v10083_v62 }
 0x72a   : > { %9050 = vmatprep.mubr.msk.f32.mxu1 %vm509_vm0, %v10084_v49 }
 0x72c   : > { %v9840_v24 = vpop.eup %9839 }
 0x72d   : > { %v9842_v6 = vpop.eup %9841  ;;  %v6058_v20 = vmul.f32 %v9840_v24, %v5776_v38  ;;  %9051 = vmatmul.mubr.msk.f32.gmra.mrb[132].mxu1 %vm509_vm0, %v10085_v29  ;;  %v14625_v38 = vld [vmem:[#allocation4_spill] sm:$0xff] }
 0x72e   : > { %v6057_v58 = vmul.f32 %v9842_v6, %v5771_v25  ;;  %9053 = vmatprep.mubr.msk.f32.mxu1 %vm509_vm0, %v10086_v63 }
 0x72f   : > { %v6090_v47 = vadd.f32 %v6058_v20, %v12291_v36 }
 0x730   : > { %v6089_v40 = vadd.f32 %v6057_v58, %v12287_v15  ;;  %v8947_v28 = vpop.f32.mrb[98].mxu1  ;;  %v6861_v58 = vld [vmem:[%s14531_s12] sm:$0xff] }
 0x731   : > { %v5786_v13 = vadd.f32 %v13874_v42, %v8947_v28  ;;  %v5780_v22 = vpop.f32.mrb[99].mxu1  ;;  %9054 = vmatmul.mubr.msk.f32.gmra.mrb[134].mxu1 %vm509_vm0, %v10087_v56  ;;  %9068 = vmatprep.subr.mxu0 %v6861_v58 }
 0x732   : > { %v5781_v46 = vadd.f32 %v13874_v42, %v5780_v22  ;;  %8992 = vmatprep.mubr.msk.f32.mxu0 %vm1055_vm1, %v6089_v40  ;;  %9056 = vmatprep.mubr.msk.f32.mxu1 %vm509_vm0, %v10088_v14 }
 0x733   : > { %v8187_v15 = vmul.f32 -1.442695, %v5786_v13  ;;  %8993 = vmatmul.mubr.msk.f32.gmra.mrb[64].mxu0 %vm1055_vm1, %v6090_v47 }
 0x734   : > { %v8186_v36 = vmul.f32 -1.442695, %v5781_v46  ;;  %9069 = vmatpush3.msra.mxu0 %v6861_v58 }
 0x735   : > { %9843 = vpow2.f32 %v8187_v15  ;;  %9057 = vmatmul.mubr.msk.f32.gmra.mrb[136].mxu1 %vm509_vm0, %v10089_v41 }
 0x736   : > { %9845 = vpow2.f32 %v8186_v36  ;;  %9059 = vmatprep.mubr.msk.f32.mxu1 %vm509_vm0, %v10090_v53  ;;  %v14628_v36 = vld [vmem:[#allocation6_spill] sm:$0xff] }
 0x739   : > { %9060 = vmatmul.mubr.msk.f32.gmra.mrb[138].mxu1 %vm509_vm0, %v10091_v27  ;;  %v14629_v27 = vld [vmem:[#allocation7_spill] sm:$0xff] }
 0x73a   : > { %9062 = vmatprep.mubr.msk.f32.mxu1 %vm509_vm0, %v10092_v0 }
 0x73d   : > { %9063 = vmatmul.mubr.msk.f32.gmra.mrb[140].mxu1 %vm509_vm0, %v10093_v18 }
 0x73e   : > { %9065 = vmatprep.mubr.msk.f32.mxu1 %vm509_vm0, %v10094_v23 }
 0x73f   : > { %v9844_v34 = vpop.eup %9843 }
 0x740   : > { %v9846_v50 = vpop.eup %9845  ;;  %v5964_v57 = vadd.f32 1.0, %v9844_v34 }
 0x741   : > { %v5963_v16 = vadd.f32 1.0, %v9846_v50  ;;  %9066 = vmatmul.mubr.msk.f32.gmra.mrb[142].mxu1 %vm509_vm0, %v10095_v30 }
 0x742   : > { %9847 = vrcp.f32 %v5964_v57 }
 0x743   : > { %9849 = vrcp.f32 %v5963_v16 }
 0x746   : > { %v14041_v2 = vpop.f32.mrb[52].mxu0 }
 0x747   : > { %v14043_v44 = vpop.f32.mrb[53].mxu0 }
 0x74c   : > { %v9848_v1 = vpop.eup %9847 }
 0x74d   : > { %v9850_v35 = vpop.eup %9849  ;;  %v6060_v4 = vmul.f32 %v9848_v1, %v5786_v13 }
 0x74e   : > { %v6059_v39 = vmul.f32 %v9850_v35, %v5781_v46 }
 0x74f   : > { %v6092_v45 = vadd.f32 %v6060_v4, %v14625_v38 }
 0x750   : > { %v6091_v52 = vadd.f32 %v6059_v39, %v14624_v48  ;;  %v8950_v19 = vpop.f32.mrb[100].mxu1 }
 0x751   : > { %v5796_v3 = vadd.f32 %v13874_v42, %v8950_v19  ;;  %v5790_v25 = vpop.f32.mrb[101].mxu1 }
 0x752   : > { %v5791_v61 = vadd.f32 %v13874_v42, %v5790_v25  ;;  %8995 = vmatprep.mubr.msk.f32.mxu0 %vm1055_vm1, %v6091_v52 }
 0x753   : > { %v8189_v59 = vmul.f32 -1.442695, %v5796_v3  ;;  %8996 = vmatmul.mubr.msk.f32.gmra.mrb[66].mxu0 %vm1055_vm1, %v6092_v45  ;;  %v14630_v45 = vld [vmem:[#allocation8_spill] sm:$0xff] }
 0x754   : > { %v8188_v54 = vmul.f32 -1.442695, %v5791_v61 }
 0x755   : > { %9851 = vpow2.f32 %v8189_v59 }
 0x756   : > { %9853 = vpow2.f32 %v8188_v54 }
 0x75f   : > { %v9852_v17 = vpop.eup %9851 }
 0x760   : > { %v9854_v5 = vpop.eup %9853  ;;  %v5966_v7 = vadd.f32 1.0, %v9852_v17 }
 0x761   : > { %v5965_v26 = vadd.f32 1.0, %v9854_v5 }
 0x762   : > { %9855 = vrcp.f32 %v5966_v7 }
 0x763   : > { %9857 = vrcp.f32 %v5965_v26 }
 0x766   : > { %v14051_v37 = vpop.f32.mrb[54].mxu0 }
 0x767   : > { %v14053_v12 = vpop.f32.mrb[55].mxu0 }
 0x76c   : > { %v9856_v55 = vpop.eup %9855 }
 0x76d   : > { %v9858_v43 = vpop.eup %9857  ;;  %v6062_v31 = vmul.f32 %v9856_v55, %v5796_v3  ;;  %v14087_v55 = vld [vmem:[%s14530_s11] sm:$0xff] }
 0x76e   : > { %v6061_v11 = vmul.f32 %v9858_v43, %v5791_v61  ;;  %v14631_v61 = vld [vmem:[#allocation9_spill] sm:$0xff]  ;;  %9118 = vmatprep.subr.mxu0 %v14087_v55 }
 0x76f   : > { %v6094_v62 = vadd.f32 %v6062_v31, %v14627_v9 }
 0x770   : > { %v6093_v10 = vadd.f32 %v6061_v11, %v14626_v8  ;;  %v8953_v33 = vpop.f32.mrb[102].mxu1 }
 0x771   : > { %v5806_v49 = vadd.f32 %v13874_v42, %v8953_v33  ;;  %v5800_v24 = vpop.f32.mrb[103].mxu1 }
 0x772   : > { %v5801_v6 = vadd.f32 %v13874_v42, %v5800_v24  ;;  %8998 = vmatprep.mubr.msk.f32.mxu0 %vm1055_vm1, %v6093_v10 }
 0x773   : > { %v8191_v20 = vmul.f32 -1.442695, %v5806_v49  ;;  %8999 = vmatmul.mubr.msk.f32.gmra.mrb[68].mxu0 %vm1055_vm1, %v6094_v62 }
 0x774   : > { %v8190_v29 = vmul.f32 -1.442695, %v5801_v6 }
 0x775   : > { %9859 = vpow2.f32 %v8191_v20 }
 0x776   : > { %9861 = vpow2.f32 %v8190_v29 }
 0x77f   : > { %v9860_v63 = vpop.eup %9859 }
 0x780   : > { %v9862_v40 = vpop.eup %9861  ;;  %v5968_v28 = vadd.f32 1.0, %v9860_v63 }
 0x781   : > { %v5967_v47 = vadd.f32 1.0, %v9862_v40 }
 0x782   : > { %9863 = vrcp.f32 %v5968_v28  ;;  %v14632_v28 = vld [vmem:[#allocation10_spill] sm:$0xff] }
 0x783   : > { %9865 = vrcp.f32 %v5967_v47 }
 0x786   : > { %v14064_v13 = vpop.f32.mrb[56].mxu0 }
 0x787   : > { %v14066_v22 = vpop.f32.mrb[57].mxu0 }
 0x78c   : > { %v9864_v56 = vpop.eup %9863 }
 0x78d   : > { %v9866_v46 = vpop.eup %9865  ;;  %v6064_v14 = vmul.f32 %v9864_v56, %v5806_v49  ;;  %v14633_v56 = vld [vmem:[#allocation11_spill] sm:$0xff] }
 0x78e   : > { %v6063_v15 = vmul.f32 %v9866_v46, %v5801_v6 }
 0x78f   : > { %v6096_v0 = vadd.f32 %v6064_v14, %v14629_v27 }
 0x790   : > { %v6095_v41 = vadd.f32 %v6063_v15, %v14628_v36  ;;  %v8956_v53 = vpop.f32.mrb[104].mxu1 }
 0x791   : > { %v5816_v18 = vadd.f32 %v13874_v42, %v8956_v53  ;;  %v5810_v23 = vpop.f32.mrb[105].mxu1 }
 0x792   : > { %v5811_v34 = vadd.f32 %v13874_v42, %v5810_v23  ;;  %9001 = vmatprep.mubr.msk.f32.mxu0 %vm1055_vm1, %v6095_v41 }
 0x793   : > { %v8193_v50 = vmul.f32 -1.442695, %v5816_v18  ;;  %9002 = vmatmul.mubr.msk.f32.gmra.mrb[70].mxu0 %vm1055_vm1, %v6096_v0 }
 0x794   : > { %v8192_v57 = vmul.f32 -1.442695, %v5811_v34 }
 0x795   : > { %9867 = vpow2.f32 %v8193_v50 }
 0x796   : > { %9869 = vpow2.f32 %v8192_v57 }
 0x79f   : > { %v9868_v16 = vpop.eup %9867 }
 0x7a0   : > { %v9870_v30 = vpop.eup %9869  ;;  %v5970_v1 = vadd.f32 1.0, %v9868_v16 }
 0x7a1   : > { %v5969_v35 = vadd.f32 1.0, %v9870_v30 }
 0x7a2   : > { %9871 = vrcp.f32 %v5970_v1 }
 0x7a3   : > { %9873 = vrcp.f32 %v5969_v35 }
 0x7a6   : > { %v14074_v4 = vpop.f32.mrb[58].mxu0 }
 0x7a7   : > { %v14076_v39 = vpop.f32.mrb[59].mxu0 }
 0x7ac   : > { %v9872_v48 = vpop.eup %9871 }
 0x7ad   : > { %v9874_v52 = vpop.eup %9873  ;;  %v6066_v19 = vmul.f32 %v9872_v48, %v5816_v18 }
 0x7ae   : > { %v6065_v38 = vmul.f32 %v9874_v52, %v5811_v34 }
 0x7af   : > { %v6098_v59 = vadd.f32 %v6066_v19, %v14631_v61 }
 0x7b0   : > { %v6097_v3 = vadd.f32 %v6065_v38, %v14630_v45  ;;  %v8959_v25 = vpop.f32.mrb[106].mxu1 }
 0x7b1   : > { %v5826_v54 = vadd.f32 %v13874_v42, %v8959_v25  ;;  %v5820_v17 = vpop.f32.mrb[107].mxu1 }
 0x7b2   : > { %v5821_v5 = vadd.f32 %v13874_v42, %v5820_v17  ;;  %9004 = vmatprep.mubr.msk.f32.mxu0 %vm1055_vm1, %v6097_v3 }
 0x7b3   : > { %v8195_v7 = vmul.f32 -1.442695, %v5826_v54  ;;  %9005 = vmatmul.mubr.msk.f32.gmra.mrb[72].mxu0 %vm1055_vm1, %v6098_v59 }
 0x7b4   : > { %v8194_v26 = vmul.f32 -1.442695, %v5821_v5 }
 0x7b5   : > { %9875 = vpow2.f32 %v8195_v7  ;;  %v14634_v7 = vld [vmem:[#allocation12_spill] sm:$0xff] }
 0x7b6   : > { %9877 = vpow2.f32 %v8194_v26 }
 0x7bf   : > { %v9876_v43 = vpop.eup %9875 }
 0x7c0   : > { %v9878_v31 = vpop.eup %9877  ;;  %v5972_v11 = vadd.f32 1.0, %v9876_v43 }
 0x7c1   : > { %v5971_v8 = vadd.f32 1.0, %v9878_v31  ;;  %v14635_v31 = vld [vmem:[#allocation13_spill] sm:$0xff] }
 0x7c2   : > { %9879 = vrcp.f32 %v5972_v11 }
 0x7c3   : > { %9881 = vrcp.f32 %v5971_v8  ;;  %v14111_v8 = vld [vmem:[%s14529_s10] ss:$0 sm:$0xff] }
 0x7c6   : > { %v14090_v10 = vpop.f32.mrb[60].mxu0 }
 0x7c7   : > { %v14092_v33 = vpop.f32.mrb[61].mxu0 }
 0x7c9   : > { %v8962_v9 = vpop.f32.mrb[108].mxu1 }
 0x7ca   : > { %v5836_v62 = vadd.f32 %v13874_v42, %v8962_v9  ;;  %v5830_v49 = vpop.f32.mrb[109].mxu1 }
 0x7cb   : > { %v5831_v24 = vadd.f32 %v13874_v42, %v5830_v49 }
 0x7cc   : > { %v9880_v6 = vpop.eup %9879  ;;  %v8197_v20 = vmul.f32 -1.442695, %v5836_v62 }
 0x7cd   : > { %v9882_v29 = vpop.eup %9881  ;;  %v6068_v58 = vmul.f32 %v9880_v6, %v5826_v54  ;;  %v8196_v63 = vmul.f32 -1.442695, %v5831_v24 }
 0x7ce   : > { %v6067_v40 = vmul.f32 %v9882_v29, %v5821_v5  ;;  %9883 = vpow2.f32 %v8197_v20 }
 0x7cf   : > { %9885 = vpow2.f32 %v8196_v63  ;;  %v6100_v46 = vadd.f32 %v6068_v58, %v14633_v56  ;;  %v14636_v56 = vld [vmem:[#allocation14_spill] sm:$0xff] }
 0x7d0   : > { %v6099_v47 = vadd.f32 %v6067_v40, %v14632_v28 }
 0x7d2   : > { %9007 = vmatprep.mubr.msk.f32.mxu0 %vm1055_vm1, %v6099_v47 }
 0x7d3   : > { %9008 = vmatmul.mubr.msk.f32.gmra.mrb[74].mxu0 %vm1055_vm1, %v6100_v46 }
 0x7d4   : > { %v8965_v14 = vpop.f32.mrb[110].mxu1 }
 0x7d5   : > { %v5846_v15 = vadd.f32 %v13874_v42, %v8965_v14  ;;  %v5840_v36 = vpop.f32.mrb[111].mxu1 }
 0x7d6   : > { %v5841_v41 = vadd.f32 %v13874_v42, %v5840_v36 }
 0x7d7   : > { %v8199_v53 = vmul.f32 -1.442695, %v5846_v15 }
 0x7d8   : > { %v9884_v27 = vpop.eup %9883  ;;  %v8198_v0 = vmul.f32 -1.442695, %v5841_v41  ;;  %v9022_v18 = vpop.f32.mrb[112].mxu1 }
 0x7d9   : > { %v9886_v23 = vpop.eup %9885  ;;  %v5974_v34 = vadd.f32 1.0, %v9884_v27  ;;  %9887 = vpow2.f32 %v8199_v53  ;;  %v6605_v50 = vpop.f32.mrb[113].mxu1  ;;  %v6611_v6 = vadd.f32 %v9022_v18, %v14111_v8  ;;  %v14637_v27 = vld [vmem:[#allocation15_spill] sm:$0xff] }
 0x7da   : > { %v5973_v57 = vadd.f32 1.0, %v9886_v23  ;;  %9889 = vpow2.f32 %v8198_v0  ;;  %v6606_v9 = vadd.f32 %v14111_v8, %v6605_v50 }
 0x7db   : > { %9891 = vrcp.f32 %v5974_v34  ;;  %vm6765_vm13 = vcmp.ge.f32.partialorder %v6611_v6, 0.0  ;;  %v6797_v14 = vmul.f32 0.1, %v6611_v6 }
 0x7dc   : > { %9893 = vrcp.f32 %v5973_v57  ;;  %v9025_v16 = vpop.f32.mrb[114].mxu1  ;;  %v6796_v63 = vmul.f32 0.1, %v6606_v9  ;;  %vm6764_vm12 = vcmp.ge.f32.partialorder %v6606_v9, 0.0 }
 0x7dd   : > { %v6615_v30 = vpop.f32.mrb[115].mxu1  ;;  %v6621_v36 = vadd.f32 %v9025_v16, %v14111_v8 }
 0x7de   : > { %v6616_v40 = vadd.f32 %v14111_v8, %v6615_v30  ;;  %v6828_v23 = vsel %vm6764_vm12, %v6606_v9, %v6796_v63 }
 0x7df   : > { %v6799_v50 = vmul.f32 0.1, %v6621_v36  ;;  %vm6767_vm15 = vcmp.ge.f32.partialorder %v6621_v36, 0.0 }
 0x7e0   : > { %v9028_v1 = vpop.f32.mrb[116].mxu1  ;;  %v6798_v18 = vmul.f32 0.1, %v6616_v40  ;;  %vm6766_vm14 = vcmp.ge.f32.partialorder %v6616_v40, 0.0 }
 0x7e1   : > { %v6625_v35 = vpop.f32.mrb[117].mxu1  ;;  %v6631_v57 = vadd.f32 %v9028_v1, %v14111_v8 }
 0x7e3   : > { %v9888_v48 = vpop.eup %9887  ;;  %vm6769_vm3 = vcmp.ge.f32.partialorder %v6631_v57, 0.0 }
 0x7e4   : > { %v9890_v52 = vpop.eup %9889  ;;  %v5976_v19 = vadd.f32 1.0, %v9888_v48  ;;  %v9031_v42 = vpop.f32.mrb[118].mxu1  ;;  %v6830_v48 = vsel %vm6766_vm14, %v6616_v40, %v6798_v18 }
 0x7e5   : > { %v9892_v38 = vpop.eup %9891  ;;  %v5975_v45 = vadd.f32 1.0, %v9890_v52  ;;  %v6635_v3 = vpop.f32.mrb[119].mxu1 }
 0x7e6   : > { %v9894_v25 = vpop.eup %9893  ;;  %v6070_v61 = vmul.f32 %v9892_v38, %v5836_v62  ;;  %9895 = vrcp.f32 %v5976_v19  ;;  %v14102_v59 = vpop.f32.mrb[62].mxu0  ;;  %v6801_v19 = vmul.f32 0.1, %v6631_v57  ;;  %v6641_v38 = vadd.f32 %v9031_v42, %v14111_v8 }
 0x7e7   : > { %v6069_v54 = vmul.f32 %v9894_v25, %v5831_v24  ;;  %9897 = vrcp.f32 %v5975_v45  ;;  %v14104_v17 = vpop.f32.mrb[63].mxu0  ;;  %v6831_v45 = vsel %vm6767_vm15, %v6621_v36, %v6799_v50 }
 0x7e8   : > { %v9034_v5 = vpop.f32.mrb[120].mxu1  ;;  %v6102_v11 = vadd.f32 %v6070_v61, %v14635_v31  ;;  %v6833_v42 = vsel %vm6769_vm3, %v6631_v57, %v6801_v19  ;;  %vm6771_vm5 = vcmp.ge.f32.partialorder %v6641_v38, 0.0 }
 0x7e9   : > { %v6101_v26 = vadd.f32 %v6069_v54, %v14634_v7  ;;  %v6645_v43 = vpop.f32.mrb[121].mxu1  ;;  %v6803_v7 = vmul.f32 0.1, %v6641_v38 }
 0x7eb   : > { %9010 = vmatprep.mubr.msk.f32.mxu0 %vm1055_vm1, %v6101_v26  ;;  %v6651_v26 = vadd.f32 %v9034_v5, %v14111_v8 }
 0x7ec   : > { %9011 = vmatmul.mubr.msk.f32.gmra.mrb[76].mxu0 %vm1055_vm1, %v6102_v11  ;;  %v14116_v62 = vpop.f32.mrb[122].mxu1 }
 0x7ed   : > { %v6655_v49 = vpop.f32.mrb[123].mxu1  ;;  %vm6773_vm7 = vcmp.ge.f32.partialorder %v6651_v26, 0.0 }
 0x7ee   : > { %v6656_v9 = vadd.f32 %v14111_v8, %v6655_v49 }
 0x7f0   : > { %v9896_v24 = vpop.eup %9895  ;;  %v14119_v20 = vpop.f32.mrb[124].mxu1  ;;  %vm6774_vm8 = vcmp.ge.f32.partialorder %v6656_v9, 0.0 }
 0x7f1   : > { %v9898_v29 = vpop.eup %9897  ;;  %v6072_v58 = vmul.f32 %v9896_v24, %v5846_v15  ;;  %v6665_v28 = vpop.f32.mrb[125].mxu1  ;;  %v6626_v15 = vadd.f32 %v14111_v8, %v6625_v35  ;;  %v6636_v35 = vadd.f32 %v14111_v8, %v6635_v3  ;;  %v6646_v3 = vadd.f32 %v14111_v8, %v6645_v43 }
 0x7f2   : > { %v6071_v47 = vmul.f32 %v9898_v29, %v5841_v41  ;;  %v6829_v41 = vsel %vm6765_vm13, %v6611_v6, %v6797_v14  ;;  %v6805_v43 = vmul.f32 0.1, %v6651_v26  ;;  %v6661_v6 = vadd.f32 %v14116_v62, %v14111_v8 }
 0x7f3   : > { %v6104_v0 = vadd.f32 %v6072_v58, %v14637_v27  ;;  %v6800_v30 = vmul.f32 0.1, %v6626_v15  ;;  %vm6768_vm2 = vcmp.ge.f32.partialorder %v6626_v15, 0.0  ;;  %v6802_v1 = vmul.f32 0.1, %v6636_v35 }
 0x7f4   : > { %v6103_v46 = vadd.f32 %v6071_v47, %v14636_v56  ;;  %v14124_v53 = vpop.f32.mrb[126].mxu1  ;;  %vm6770_vm4 = vcmp.ge.f32.partialorder %v6636_v35, 0.0  ;;  %v6804_v11 = vmul.f32 0.1, %v6646_v3  ;;  %vm6772_vm6 = vcmp.ge.f32.partialorder %v6646_v3, 0.0 }
 0x7f5   : > { %v14128_v34 = vpop.f32.mrb[127].mxu1  ;;  %v6832_v61 = vsel %vm6768_vm2, %v6626_v15, %v6800_v30  ;;  %v6835_v29 = vsel %vm6771_vm5, %v6641_v38, %v6803_v7  ;;  %v6806_v58 = vmul.f32 0.1, %v6656_v9  ;;  %v6666_v40 = vadd.f32 %v14111_v8, %v6665_v28 }
 0x7f6   : > { %9013 = vmatprep.mubr.msk.f32.mxu0 %vm1055_vm1, %v6103_v46  ;;  %v6836_v63 = vsel %vm6772_vm6, %v6646_v3, %v6804_v11  ;;  %v6807_v46 = vmul.f32 0.1, %v6661_v6  ;;  %v6671_v62 = vadd.f32 %v14119_v20, %v14111_v8  ;;  %v6837_v14 = vsel %vm6773_vm7, %v6651_v26, %v6805_v43 }
 0x7f7   : > { %9014 = vmatmul.mubr.msk.f32.gmra.mrb[78].mxu0 %vm1055_vm1, %v6104_v0  ;;  %vm6775_vm9 = vcmp.ge.f32.partialorder %v6661_v6, 0.0  ;;  %v6808_v27 = vmul.f32 0.1, %v6666_v40  ;;  %v6838_v28 = vsel %vm6774_vm8, %v6656_v9, %v6806_v58  ;;  %v6676_v0 = vadd.f32 %v14111_v8, %v14128_v34 }
 0x7f8   : > { %9070 = vmatprep.mubr.msk.f32.mxu0 %vm1055_vm1, %v6828_v23  ;;  %v14134_v16 = vpop.f32.mrb[128].mxu1  ;;  %vm6776_vm10 = vcmp.ge.f32.partialorder %v6666_v40, 0.0  ;;  %v6809_v23 = vmul.f32 0.1, %v6671_v62  ;;  %v6681_v15 = vadd.f32 %v14124_v53, %v14111_v8  ;;  %v6839_v20 = vsel %vm6775_vm9, %v6661_v6, %v6807_v46 }
 0x7f9   : > { %v14137_v52 = vpop.f32.mrb[129].mxu1  ;;  %vm6777_vm11 = vcmp.ge.f32.partialorder %v6671_v62, 0.0  ;;  %v6810_v50 = vmul.f32 0.1, %v6676_v0  ;;  %v6840_v57 = vsel %vm6776_vm10, %v6666_v40, %v6808_v27  ;;  %vm6778_vm12 = vcmp.ge.f32.partialorder %v6676_v0, 0.0 }
 0x7fa   : > { %v6686_v30 = vadd.f32 %v14111_v8, %v14137_v52  ;;  %v6841_v53 = vsel %vm6777_vm11, %v6671_v62, %v6809_v23  ;;  %vm6779_vm13 = vcmp.ge.f32.partialorder %v6681_v15, 0.0 }
 0x7fb   : > { %9071 = vmatmul.mubr.msk.f32.vlgmr.msra.gmra.mrb[80].mxu0 %vm1055_vm1, %v6829_v41 }
 0x7fc   : > { %9073 = vmatprep.mubr.msk.f32.mxu0 %vm1055_vm1, %v6830_v48  ;;  %v14142_v25 = vpop.f32.mrb[130].mxu1  ;;  %9119 = vmatpush3.msra.mxu0 %v14087_v55  ;;  %v6834_v55 = vsel %vm6770_vm4, %v6636_v35, %v6802_v1  ;;  %v6811_v48 = vmul.f32 0.1, %v6681_v15  ;;  %v6691_v35 = vadd.f32 %v14134_v16, %v14111_v8  ;;  %v6812_v38 = vmul.f32 0.1, %v6686_v30 }
 0x7fd   : > { %v6695_v54 = vpop.f32.mrb[131].mxu1  ;;  %vm6780_vm14 = vcmp.ge.f32.partialorder %v6686_v30, 0.0  ;;  %v6701_v3 = vadd.f32 %v14142_v25, %v14111_v8 }
 0x7fe   : > { %v6696_v1 = vadd.f32 %v14111_v8, %v6695_v54  ;;  %v6813_v52 = vmul.f32 0.1, %v6691_v35  ;;  %v6843_v7 = vsel %vm6779_vm13, %v6681_v15, %v6811_v48  ;;  %vm6781_vm15 = vcmp.ge.f32.partialorder %v6691_v35, 0.0 }
 0x7ff   : > { %9074 = vmatmul.mubr.msk.f32.gmra.mrb[82].mxu0 %vm1055_vm1, %v6831_v45  ;;  %v6842_v45 = vsel %vm6778_vm12, %v6676_v0, %v6810_v50  ;;  %v6815_v54 = vmul.f32 0.1, %v6701_v3  ;;  %vm6783_vm3 = vcmp.ge.f32.partialorder %v6701_v3, 0.0 }
 0x800   : > { %9076 = vmatprep.mubr.msk.f32.mxu0 %vm1055_vm1, %v6832_v61  ;;  %v14149_v31 = vpop.f32.mrb[132].mxu1  ;;  %v6814_v26 = vmul.f32 0.1, %v6696_v1  ;;  %vm6782_vm2 = vcmp.ge.f32.partialorder %v6696_v1, 0.0  ;;  %v6845_v43 = vsel %vm6781_vm15, %v6691_v35, %v6813_v52 }
 0x801   : > { %v6705_v24 = vpop.f32.mrb[133].mxu1  ;;  %v6711_v9 = vadd.f32 %v14149_v31, %v14111_v8 }
 0x802   : > { %v6706_v11 = vadd.f32 %v14111_v8, %v6705_v24  ;;  %v6846_v6 = vsel %vm6782_vm2, %v6696_v1, %v6814_v26 }
 0x803   : > { %9077 = vmatmul.mubr.msk.f32.gmra.mrb[84].mxu0 %vm1055_vm1, %v6833_v42  ;;  %v6844_v42 = vsel %vm6780_vm14, %v6686_v30, %v6812_v38  ;;  %v6817_v24 = vmul.f32 0.1, %v6711_v9  ;;  %vm6785_vm5 = vcmp.ge.f32.partialorder %v6711_v9, 0.0  ;;  %v14226_v38 = vld [vmem:[%s14527_s8] ss:$0 sm:$0xff] }
 0x804   : > { %9079 = vmatprep.mubr.msk.f32.mxu0 %vm1055_vm1, %v6834_v55  ;;  %v14156_v5 = vpop.f32.mrb[134].mxu1  ;;  %v6816_v25 = vmul.f32 0.1, %v6706_v11  ;;  %vm6784_vm4 = vcmp.ge.f32.partialorder %v6706_v11, 0.0 }
 0x805   : > { %v6715_v47 = vpop.f32.mrb[135].mxu1  ;;  %v6721_v58 = vadd.f32 %v14156_v5, %v14111_v8 }
 0x806   : > { %v14159_v49 = vpop.f32.mrb[64].mxu0  ;;  %v6848_v46 = vsel %vm6784_vm4, %v6706_v11, %v6816_v25  ;;  %v6281_v11 = vadd.f32 %v13961_v32, %v14226_v38 }
 0x807   : > { %v14161_v56 = vpop.f32.mrb[65].mxu0  ;;  %9080 = vmatmul.mubr.msk.f32.gmra.mrb[86].mxu0 %vm1055_vm1, %v6835_v29  ;;  %v6716_v29 = vadd.f32 %v14111_v8, %v6715_v47  ;;  %v6819_v62 = vmul.f32 0.1, %v6721_v58  ;;  %vm6787_vm7 = vcmp.ge.f32.partialorder %v6721_v58, 0.0 }
 0x808   : > { %9082 = vmatprep.mubr.msk.f32.mxu0 %vm1055_vm1, %v6836_v63  ;;  %v14167_v36 = vpop.f32.mrb[136].mxu1  ;;  %v6847_v63 = vsel %vm6783_vm3, %v6701_v3, %v6815_v54  ;;  %v6276_v3 = vadd.f32 %v14226_v38, %v13965_v60  ;;  %v6291_v54 = vadd.f32 %v14003_v21, %v14226_v38  ;;  %vm6435_vm3 = vcmp.ge.f32.partialorder %v6281_v11, 0.0 }
 0x809   : > { %v6725_v18 = vpop.f32.mrb[137].mxu1  ;;  %v6818_v40 = vmul.f32 0.1, %v6716_v29  ;;  %vm6786_vm6 = vcmp.ge.f32.partialorder %v6716_v29, 0.0  ;;  %v6731_v47 = vadd.f32 %v14167_v36, %v14111_v8  ;;  %v6851_v23 = vsel %vm6787_vm7, %v6721_v58, %v6819_v62 }
 0x80a   : > { %v6726_v31 = vadd.f32 %v14111_v8, %v6725_v18  ;;  %vm6434_vm2 = vcmp.ge.f32.partialorder %v6276_v3, 0.0  ;;  %v6469_v25 = vmul.f32 0.1, %v6291_v54  ;;  %v6306_v21 = vadd.f32 %v14226_v38, %v14053_v12 }
 0x80b   : > { %9083 = vmatmul.mubr.msk.f32.gmra.mrb[88].mxu0 %vm1055_vm1, %v6837_v14  ;;  %v6849_v14 = vsel %vm6785_vm5, %v6711_v9, %v6817_v24  ;;  %v6821_v0 = vmul.f32 0.1, %v6731_v47  ;;  %vm6789_vm9 = vcmp.ge.f32.partialorder %v6731_v47, 0.0  ;;  %vm6437_vm5 = vcmp.ge.f32.partialorder %v6291_v54, 0.0 }
 0x80c   : > { %9085 = vmatprep.mubr.msk.f32.mxu0 %vm1055_vm1, %v6838_v28  ;;  %v14175_v41 = vpop.f32.mrb[138].mxu1  ;;  %v6820_v27 = vmul.f32 0.1, %v6726_v31  ;;  %v6850_v28 = vsel %vm6786_vm6, %v6716_v29, %v6818_v40  ;;  %vm6788_vm8 = vcmp.ge.f32.partialorder %v6726_v31, 0.0  ;;  %v6311_v58 = vadd.f32 %v14051_v37, %v14226_v38 }
 0x80d   : > { %v6735_v34 = vpop.f32.mrb[139].mxu1  ;;  %v6741_v18 = vadd.f32 %v14175_v41, %v14111_v8  ;;  %v6853_v41 = vsel %vm6789_vm9, %v6731_v47, %v6821_v0  ;;  %v6472_v40 = vmul.f32 0.1, %v6306_v21  ;;  %v6326_v37 = vadd.f32 %v14226_v38, %v14076_v39 }
 0x80e   : > { %v6736_v5 = vadd.f32 %v14111_v8, %v6735_v34  ;;  %v6473_v12 = vmul.f32 0.1, %v6311_v58  ;;  %vm6441_vm9 = vcmp.ge.f32.partialorder %v6311_v58, 0.0  ;;  %v6336_v0 = vadd.f32 %v14226_v38, %v14092_v33 }
 0x80f   : > { %9086 = vmatmul.mubr.msk.f32.gmra.mrb[90].mxu0 %vm1055_vm1, %v6839_v20  ;;  %v6852_v20 = vsel %vm6788_vm8, %v6726_v31, %v6820_v27  ;;  %v6823_v30 = vmul.f32 0.1, %v6741_v18  ;;  %vm6791_vm11 = vcmp.ge.f32.partialorder %v6741_v18, 0.0  ;;  %vm6440_vm8 = vcmp.ge.f32.partialorder %v6306_v21, 0.0 }
 0x810   : > { %9088 = vmatprep.mubr.msk.f32.mxu0 %vm1055_vm1, %v6840_v57  ;;  %v14183_v19 = vpop.f32.mrb[140].mxu1  ;;  %v6822_v15 = vmul.f32 0.1, %v6736_v5  ;;  %vm6790_vm10 = vcmp.ge.f32.partialorder %v6736_v5, 0.0  ;;  %v6321_v31 = vadd.f32 %v14064_v13, %v14226_v38  ;;  %v6331_v27 = vadd.f32 %v14074_v4, %v14226_v38 }
 0x811   : > { %v6745_v61 = vpop.f32.mrb[141].mxu1  ;;  %v6751_v34 = vadd.f32 %v14183_v19, %v14111_v8  ;;  %v6855_v1 = vsel %vm6791_vm11, %v6741_v18, %v6823_v30  ;;  %v6476_v13 = vmul.f32 0.1, %v6326_v37  ;;  %v6478_v4 = vmul.f32 0.1, %v6336_v0 }
 0x812   : > { %v6746_v36 = vadd.f32 %v14111_v8, %v6745_v61  ;;  %v6854_v35 = vsel %vm6790_vm10, %v6736_v5, %v6822_v15  ;;  %v6505_v5 = vsel %vm6441_vm9, %v6311_v58, %v6473_v12  ;;  %vm6443_vm11 = vcmp.ge.f32.partialorder %v6321_v31, 0.0 }
 0x813   : > { %9089 = vmatmul.mubr.msk.f32.gmra.mrb[92].mxu0 %vm1055_vm1, %v6841_v53  ;;  %vm6793_vm13 = vcmp.ge.f32.partialorder %v6751_v34, 0.0  ;;  %v6341_v15 = vadd.f32 %v14090_v10, %v14226_v38  ;;  %v6356_v10 = vadd.f32 %v14226_v38, %v14161_v56 }
 0x814   : > { %9091 = vmatprep.mubr.msk.f32.mxu0 %vm1055_vm1, %v6842_v45  ;;  %v14190_v16 = vpop.f32.mrb[142].mxu1  ;;  %v6824_v48 = vmul.f32 0.1, %v6746_v36  ;;  %vm6792_vm12 = vcmp.ge.f32.partialorder %v6746_v36, 0.0  ;;  %v6825_v45 = vmul.f32 0.1, %v6751_v34 }
 0x815   : > { %v6755_v55 = vpop.f32.mrb[143].mxu1  ;;  %v6761_v19 = vadd.f32 %v14190_v16, %v14111_v8  ;;  %v6286_v16 = vadd.f32 %v14226_v38, %v14007_v51  ;;  %v6479_v30 = vmul.f32 0.1, %v6341_v15 }
 0x816   : > { %v6756_v53 = vadd.f32 %v14111_v8, %v6755_v55  ;;  %v6856_v52 = vsel %vm6792_vm12, %v6746_v36, %v6824_v48  ;;  %v6857_v26 = vsel %vm6793_vm13, %v6751_v34, %v6825_v45  ;;  %v6466_v8 = vmul.f32 0.1, %v6276_v3 }
 0x817   : > { %9092 = vmatmul.mubr.msk.f32.gmra.mrb[94].mxu0 %vm1055_vm1, %v6843_v7  ;;  %v6827_v7 = vmul.f32 0.1, %v6761_v19  ;;  %vm6795_vm15 = vcmp.ge.f32.partialorder %v6761_v19, 0.0  ;;  %v6467_v55 = vmul.f32 0.1, %v6281_v11  ;;  %vm6436_vm4 = vcmp.ge.f32.partialorder %v6286_v16, 0.0 }
 0x818   : > { %9094 = vmatprep.mubr.msk.f32.mxu0 %vm1055_vm1, %v6844_v42  ;;  %v6826_v61 = vmul.f32 0.1, %v6756_v53  ;;  %vm6794_vm14 = vcmp.ge.f32.partialorder %v6756_v53, 0.0  ;;  %v6468_v9 = vmul.f32 0.1, %v6286_v16  ;;  %v6498_v32 = vsel %vm6434_vm2, %v6276_v3, %v6466_v8 }
 0x819   : > { %v6859_v60 = vsel %vm6795_vm15, %v6761_v19, %v6827_v7  ;;  %v6499_v51 = vsel %vm6435_vm3, %v6281_v11, %v6467_v55  ;;  %vm6444_vm12 = vcmp.ge.f32.partialorder %v6326_v37, 0.0  ;;  %vm6445_vm13 = vcmp.ge.f32.partialorder %v6331_v27, 0.0 }
 0x81a   : > { %v6858_v42 = vsel %vm6794_vm14, %v6756_v53, %v6826_v61  ;;  %v6500_v24 = vsel %vm6436_vm4, %v6286_v16, %v6468_v9  ;;  %v6346_v36 = vadd.f32 %v14226_v38, %v14104_v17  ;;  %v6508_v33 = vsel %vm6444_vm12, %v6326_v37, %v6476_v13 }
 0x81b   : > { %9095 = vmatmul.mubr.msk.f32.gmra.mrb[96].mxu0 %vm1055_vm1, %v6845_v43  ;;  %v6296_v43 = vadd.f32 %v14226_v38, %v14043_v44  ;;  %vm6446_vm14 = vcmp.ge.f32.partialorder %v6336_v0, 0.0  ;;  %v6351_v34 = vadd.f32 %v14102_v59, %v14226_v38  ;;  %vm6447_vm15 = vcmp.ge.f32.partialorder %v6341_v15, 0.0 }
 0x81c   : > { %9097 = vmatprep.mubr.msk.f32.mxu0 %vm1055_vm1, %v6846_v6  ;;  %v6301_v6 = vadd.f32 %v14041_v2, %v14226_v38  ;;  %v6316_v2 = vadd.f32 %v14226_v38, %v14066_v22  ;;  %v6475_v22 = vmul.f32 0.1, %v6321_v31  ;;  %v6480_v48 = vmul.f32 0.1, %v6346_v36 }
 0x81d   : > { %v6470_v29 = vmul.f32 0.1, %v6296_v43  ;;  %vm6438_vm6 = vcmp.ge.f32.partialorder %v6296_v43, 0.0  ;;  %vm6448_vm2 = vcmp.ge.f32.partialorder %v6346_v36, 0.0  ;;  %v6481_v17 = vmul.f32 0.1, %v6351_v34 }
 0x81e   : > { %v6471_v44 = vmul.f32 0.1, %v6301_v6  ;;  %vm6439_vm7 = vcmp.ge.f32.partialorder %v6301_v6, 0.0  ;;  %v6474_v47 = vmul.f32 0.1, %v6316_v2  ;;  %vm6442_vm10 = vcmp.ge.f32.partialorder %v6316_v2, 0.0 }
 0x81f   : > { %9098 = vmatmul.mubr.msk.f32.gmra.mrb[98].mxu0 %vm1055_vm1, %v6847_v63  ;;  %v6501_v63 = vsel %vm6437_vm5, %v6291_v54, %v6469_v25  ;;  %v6361_v53 = vadd.f32 %v14159_v49, %v14226_v38  ;;  %v6511_v45 = vsel %vm6447_vm15, %v6341_v15, %v6479_v30  ;;  %vm6449_vm3 = vcmp.ge.f32.partialorder %v6351_v34, 0.0 }
 0x820   : > { %9100 = vmatprep.mubr.msk.f32.mxu0 %vm1055_vm1, %v6848_v46  ;;  %v6502_v46 = vsel %vm6438_vm6, %v6296_v43, %v6470_v29  ;;  %v6503_v62 = vsel %vm6439_vm7, %v6301_v6, %v6471_v44  ;;  %v6506_v39 = vsel %vm6442_vm10, %v6316_v2, %v6474_v47  ;;  %v6482_v19 = vmul.f32 0.1, %v6356_v10 }
 0x821   : > { %vm6450_vm4 = vcmp.ge.f32.partialorder %v6356_v10, 0.0  ;;  %v6483_v56 = vmul.f32 0.1, %v6361_v53  ;;  %vm6451_vm5 = vcmp.ge.f32.partialorder %v6361_v53, 0.0 }
 0x822   : > { %v6514_v7 = vsel %vm6450_vm4, %v6356_v10, %v6482_v19  ;;  %v14323_v10 = vld [vmem:[%s14532_s13] ss:$0 sm:$0xff] }
 0x823   : > { %9101 = vmatmul.mubr.msk.f32.gmra.mrb[100].mxu0 %vm1055_vm1, %v6849_v14  ;;  %v6504_v14 = vsel %vm6440_vm8, %v6306_v21, %v6472_v40 }
 0x824   : > { %9103 = vmatprep.mubr.msk.f32.mxu0 %vm1055_vm1, %v6850_v28 }
 0x826   : > { %v14213_v50 = vpop.f32.mrb[66].mxu0 }
 0x827   : > { %v14215_v57 = vpop.f32.mrb[67].mxu0  ;;  %9104 = vmatmul.mubr.msk.f32.gmra.mrb[102].mxu0 %vm1055_vm1, %v6851_v23  ;;  %v6477_v23 = vmul.f32 0.1, %v6331_v27  ;;  %v6371_v61 = vadd.f32 %v14213_v50, %v14226_v38 }
 0x828   : > { %9106 = vmatprep.mubr.msk.f32.mxu0 %vm1055_vm1, %v6852_v20  ;;  %v6507_v20 = vsel %vm6443_vm11, %v6321_v31, %v6475_v22  ;;  %v6366_v59 = vadd.f32 %v14226_v38, %v14215_v57 }
 0x829   : > { %v6485_v57 = vmul.f32 0.1, %v6371_v61  ;;  %vm6453_vm7 = vcmp.ge.f32.partialorder %v6371_v61, 0.0 }
 0x82a   : > { %v6484_v3 = vmul.f32 0.1, %v6366_v59  ;;  %vm6452_vm6 = vcmp.ge.f32.partialorder %v6366_v59, 0.0 }
 0x82b   : > { %9107 = vmatmul.mubr.msk.f32.gmra.mrb[104].mxu0 %vm1055_vm1, %v6853_v41  ;;  %v6509_v41 = vsel %vm6445_vm13, %v6331_v27, %v6477_v23  ;;  %v6517_v16 = vsel %vm6453_vm7, %v6371_v61, %v6485_v57 }
 0x82c   : > { %9109 = vmatprep.mubr.msk.f32.mxu0 %vm1055_vm1, %v6854_v35  ;;  %v6510_v35 = vsel %vm6446_vm14, %v6336_v0, %v6478_v4  ;;  %v6516_v50 = vsel %vm6452_vm6, %v6366_v59, %v6484_v3 }
 0x82f   : > { %9110 = vmatmul.mubr.msk.f32.gmra.mrb[106].mxu0 %vm1055_vm1, %v6855_v1  ;;  %v6512_v1 = vsel %vm6448_vm2, %v6346_v36, %v6480_v48 }
 0x830   : > { %9112 = vmatprep.mubr.msk.f32.mxu0 %vm1055_vm1, %v6856_v52  ;;  %v6513_v52 = vsel %vm6449_vm3, %v6351_v34, %v6481_v17 }
 0x833   : > { %9113 = vmatmul.mubr.msk.f32.gmra.mrb[108].mxu0 %vm1055_vm1, %v6857_v26 }
 0x834   : > { %9115 = vmatprep.mubr.msk.f32.mxu0 %vm1055_vm1, %v6858_v42  ;;  %v6515_v42 = vsel %vm6451_vm5, %v6361_v53, %v6483_v56 }
 0x837   : > { %9116 = vmatmul.mubr.msk.f32.gmra.mrb[110].mxu0 %vm1055_vm1, %v6859_v60 }
 0x838   : > { %9120 = vmatprep.mubr.msk.f32.mxu0 %vm1055_vm1, %v6498_v32 }
 0x83b   : > { %9121 = vmatmul.mubr.msk.f32.vlgmr.msra.gmra.mrb[80].mxu0 %vm1055_vm1, %v6499_v51 }
 0x83c   : > { %9123 = vmatprep.mubr.msk.f32.mxu0 %vm1055_vm1, %v6500_v24 }
 0x83f   : > { %9124 = vmatmul.mubr.msk.f32.gmra.mrb[82].mxu0 %vm1055_vm1, %v6501_v63 }
 0x840   : > { %9126 = vmatprep.mubr.msk.f32.mxu0 %vm1055_vm1, %v6502_v46 }
 0x843   : > { %9127 = vmatmul.mubr.msk.f32.gmra.mrb[84].mxu0 %vm1055_vm1, %v6503_v62 }
 0x844   : > { %9129 = vmatprep.mubr.msk.f32.mxu0 %vm1055_vm1, %v6504_v14 }
 0x846   : > { %v9000_v28 = vpop.f32.mrb[68].mxu0 }
 0x847   : > { %v6375_v18 = vpop.f32.mrb[69].mxu0  ;;  %9130 = vmatmul.mubr.msk.f32.gmra.mrb[86].mxu0 %vm1055_vm1, %v6505_v5  ;;  %v6381_v26 = vadd.f32 %v9000_v28, %v14226_v38 }
 0x848   : > { %9132 = vmatprep.mubr.msk.f32.mxu0 %vm1055_vm1, %v6506_v39  ;;  %v6376_v49 = vadd.f32 %v14226_v38, %v6375_v18 }
 0x849   : > { %v6487_v8 = vmul.f32 0.1, %v6381_v26  ;;  %vm6455_vm9 = vcmp.ge.f32.partialorder %v6381_v26, 0.0 }
 0x84a   : > { %v6486_v11 = vmul.f32 0.1, %v6376_v49  ;;  %vm6454_vm8 = vcmp.ge.f32.partialorder %v6376_v49, 0.0 }
 0x84b   : > { %9133 = vmatmul.mubr.msk.f32.gmra.mrb[88].mxu0 %vm1055_vm1, %v6507_v20  ;;  %v6519_v55 = vsel %vm6455_vm9, %v6381_v26, %v6487_v8 }
 0x84c   : > { %9135 = vmatprep.mubr.msk.f32.mxu0 %vm1055_vm1, %v6508_v33  ;;  %v6518_v60 = vsel %vm6454_vm8, %v6376_v49, %v6486_v11 }
 0x84f   : > { %9136 = vmatmul.mubr.msk.f32.gmra.mrb[90].mxu0 %vm1055_vm1, %v6509_v41 }
 0x850   : > { %9138 = vmatprep.mubr.msk.f32.mxu0 %vm1055_vm1, %v6510_v35 }
 0x853   : > { %9139 = vmatmul.mubr.msk.f32.gmra.mrb[92].mxu0 %vm1055_vm1, %v6511_v45 }
 0x854   : > { %9141 = vmatprep.mubr.msk.f32.mxu0 %vm1055_vm1, %v6512_v1 }
 0x857   : > { %9142 = vmatmul.mubr.msk.f32.gmra.mrb[94].mxu0 %vm1055_vm1, %v6513_v52 }
 0x858   : > { %9144 = vmatprep.mubr.msk.f32.mxu0 %vm1055_vm1, %v6514_v7 }
 0x85b   : > { %9145 = vmatmul.mubr.msk.f32.gmra.mrb[96].mxu0 %vm1055_vm1, %v6515_v42 }
 0x85c   : > { %9147 = vmatprep.mubr.msk.f32.mxu0 %vm1055_vm1, %v6516_v50 }
 0x85f   : > { %9148 = vmatmul.mubr.msk.f32.gmra.mrb[98].mxu0 %vm1055_vm1, %v6517_v16 }
 0x860   : > { %9150 = vmatprep.mubr.msk.f32.mxu0 %vm1055_vm1, %v6518_v60 }
 0x863   : > { %9151 = vmatmul.mubr.msk.f32.gmra.mrb[100].mxu0 %vm1055_vm1, %v6519_v55 }
 0x866   : > { %v9003_v54 = vpop.f32.mrb[70].mxu0 }
 0x867   : > { %v6391_v9 = vadd.f32 %v9003_v54, %v14226_v38  ;;  %v6385_v43 = vpop.f32.mrb[71].mxu0 }
 0x868   : > { %v6386_v32 = vadd.f32 %v14226_v38, %v6385_v43 }
 0x869   : > { %v6489_v51 = vmul.f32 0.1, %v6391_v9  ;;  %vm6457_vm10 = vcmp.ge.f32.partialorder %v6391_v9, 0.0 }
 0x86a   : > { %vm6456_vm11 = vcmp.ge.f32.partialorder %v6386_v32, 0.0  ;;  %v6488_v25 = vmul.f32 0.1, %v6386_v32 }
 0x86b   : > { %v6521_v29 = vsel %vm6457_vm10, %v6391_v9, %v6489_v51 }
 0x86c   : > { %v6520_v6 = vsel %vm6456_vm11, %v6386_v32, %v6488_v25 }
 0x86d   : > { %9153 = vmatprep.mubr.msk.f32.mxu0 %vm1055_vm1, %v6520_v6 }
 0x86e   : > { %9154 = vmatmul.mubr.msk.f32.gmra.mrb[102].mxu0 %vm1055_vm1, %v6521_v29 }
 0x886   : > { %v9006_v21 = vpop.f32.mrb[72].mxu0 }
 0x887   : > { %v6401_v24 = vadd.f32 %v9006_v21, %v14226_v38  ;;  %v6395_v44 = vpop.f32.mrb[73].mxu0 }
 0x888   : > { %v6396_v58 = vadd.f32 %v14226_v38, %v6395_v44 }
 0x889   : > { %v6491_v63 = vmul.f32 0.1, %v6401_v24  ;;  %vm6459_vm12 = vcmp.ge.f32.partialorder %v6401_v24, 0.0 }
 0x88a   : > { %vm6458_vm13 = vcmp.ge.f32.partialorder %v6396_v58, 0.0  ;;  %v6490_v40 = vmul.f32 0.1, %v6396_v58 }
 0x88b   : > { %v6523_v46 = vsel %vm6459_vm12, %v6401_v24, %v6491_v63 }
 0x88c   : > { %v6522_v2 = vsel %vm6458_vm13, %v6396_v58, %v6490_v40 }
 0x88d   : > { %9156 = vmatprep.mubr.msk.f32.mxu0 %vm1055_vm1, %v6522_v2 }
 0x88e   : > { %9157 = vmatmul.mubr.msk.f32.gmra.mrb[104].mxu0 %vm1055_vm1, %v6523_v46 }
 0x8a6   : > { %v9009_v12 = vpop.f32.mrb[74].mxu0 }
 0x8a7   : > { %v6411_v31 = vadd.f32 %v9009_v12, %v14226_v38  ;;  %v6405_v62 = vpop.f32.mrb[75].mxu0 }
 0x8a8   : > { %v6406_v47 = vadd.f32 %v14226_v38, %v6405_v62 }
 0x8a9   : > { %v6493_v37 = vmul.f32 0.1, %v6411_v31  ;;  %vm6461_vm14 = vcmp.ge.f32.partialorder %v6411_v31, 0.0 }
 0x8aa   : > { %vm6460_vm15 = vcmp.ge.f32.partialorder %v6406_v47, 0.0  ;;  %v6492_v14 = vmul.f32 0.1, %v6406_v47 }
 0x8ab   : > { %v6525_v27 = vsel %vm6461_vm14, %v6411_v31, %v6493_v37 }
 0x8ac   : > { %v6524_v22 = vsel %vm6460_vm15, %v6406_v47, %v6492_v14 }
 0x8ad   : > { %9159 = vmatprep.mubr.msk.f32.mxu0 %vm1055_vm1, %v6524_v22 }
 0x8ae   : > { %9160 = vmatmul.mubr.msk.f32.gmra.mrb[106].mxu0 %vm1055_vm1, %v6525_v27 }
 0x8bf   : > { %v9012_v28 = vpop.f32.mrb[76].mxu0 }
 0x8c0   : > { %v6421_v5 = vadd.f32 %v9012_v28, %v14226_v38  ;;  %v6415_v13 = vpop.f32.mrb[77].mxu0 }
 0x8c1   : > { %v6416_v0 = vadd.f32 %v14226_v38, %v6415_v13 }
 0x8c2   : > { %v6495_v18 = vmul.f32 0.1, %v6421_v5  ;;  %vm6463_vm2 = vcmp.ge.f32.partialorder %v6421_v5, 0.0 }
 0x8c3   : > { %vm6462_vm3 = vcmp.ge.f32.partialorder %v6416_v0, 0.0  ;;  %v6494_v39 = vmul.f32 0.1, %v6416_v0 }
 0x8c4   : > { %v6527_v15 = vsel %vm6463_vm2, %v6421_v5, %v6495_v18 }
 0x8c5   : > { %v6526_v23 = vsel %vm6462_vm3, %v6416_v0, %v6494_v39 }
 0x8c6   : > { %9162 = vmatprep.mubr.msk.f32.mxu0 %vm1055_vm1, %v6526_v23 }
 0x8c7   : > { %9163 = vmatmul.mubr.msk.f32.gmra.mrb[108].mxu0 %vm1055_vm1, %v6527_v15 }
 0x8ca   : > { %v9015_v20 = vpop.f32.mrb[78].mxu0 }
 0x8cb   : > { %v6431_v4 = vadd.f32 %v9015_v20, %v14226_v38  ;;  %v6425_v36 = vpop.f32.mrb[79].mxu0 }
 0x8cc   : > { %v6426_v33 = vadd.f32 %v14226_v38, %v6425_v36 }
 0x8cd   : > { %v6497_v30 = vmul.f32 0.1, %v6431_v4  ;;  %vm6465_vm4 = vcmp.ge.f32.partialorder %v6431_v4, 0.0 }
 0x8ce   : > { %vm6464_vm5 = vcmp.ge.f32.partialorder %v6426_v33, 0.0  ;;  %v6496_v34 = vmul.f32 0.1, %v6426_v33 }
 0x8cf   : > { %v6529_v48 = vsel %vm6465_vm4, %v6431_v4, %v6497_v30 }
 0x8d0   : > { %v6528_v41 = vsel %vm6464_vm5, %v6426_v33, %v6496_v34 }
 0x8d1   : > { %9165 = vmatprep.mubr.msk.f32.mxu0 %vm1055_vm1, %v6528_v41 }
 0x8d2   : > { %9166 = vmatmul.mubr.msk.f32.gmra.mrb[110].mxu0 %vm1055_vm1, %v6529_v48 }
 0x90e   : > { %v9122_v35 = vpop.f32.mrb[80].mxu0 }
 0x90f   : > { %v14326_v17 = vadd.f32 %v9122_v35, %v14323_v10  ;;  %v7345_v38 = vpop.f32.mrb[81].mxu0 }
 0x910   : > { %v14329_v53 = vadd.f32 %v14323_v10, %v7345_v38 }
 0x911   : > { %v8332_v45 = vmul.f32 -1.442695, %v14326_v17 }
 0x912   : > { %v8331_v19 = vmul.f32 -1.442695, %v14329_v53  ;;  %v9125_v59 = vpop.f32.mrb[82].mxu0 }
 0x913   : > { %9899 = vpow2.f32 %v8332_v45  ;;  %v14334_v1 = vadd.f32 %v9125_v59, %v14323_v10  ;;  %v7355_v56 = vpop.f32.mrb[83].mxu0 }
 0x914   : > { %9901 = vpow2.f32 %v8331_v19  ;;  %v14337_v61 = vadd.f32 %v14323_v10, %v7355_v56 }
 0x915   : > { %v8334_v52 = vmul.f32 -1.442695, %v14334_v1 }
 0x916   : > { %v8333_v3 = vmul.f32 -1.442695, %v14337_v61  ;;  %v9128_v49 = vpop.f32.mrb[84].mxu0 }
 0x917   : > { %9903 = vpow2.f32 %v8334_v52  ;;  %v14342_v7 = vadd.f32 %v9128_v49, %v14323_v10  ;;  %v7365_v57 = vpop.f32.mrb[85].mxu0 }
 0x918   : > { %9905 = vpow2.f32 %v8333_v3  ;;  %v14345_v26 = vadd.f32 %v14323_v10, %v7365_v57 }
 0x919   : > { %v8336_v42 = vmul.f32 -1.442695, %v14342_v7 }
 0x91a   : > { %v8335_v11 = vmul.f32 -1.442695, %v14345_v26  ;;  %v9131_v50 = vpop.f32.mrb[86].mxu0 }
 0x91b   : > { %9907 = vpow2.f32 %v8336_v42  ;;  %v14350_v8 = vadd.f32 %v9131_v50, %v14323_v10  ;;  %v7375_v16 = vpop.f32.mrb[87].mxu0 }
 0x91c   : > { %9909 = vpow2.f32 %v8335_v11  ;;  %v14353_v60 = vadd.f32 %v14323_v10, %v7375_v16 }
 0x91d   : > { %v9900_v55 = vpop.eup %9899  ;;  %v8338_v54 = vmul.f32 -1.442695, %v14350_v8 }
 0x91e   : > { %v9902_v9 = vpop.eup %9901  ;;  %v7640_v43 = vadd.f32 1.0, %v9900_v55  ;;  %v8337_v32 = vmul.f32 -1.442695, %v14353_v60  ;;  %v9134_v51 = vpop.f32.mrb[88].mxu0 }
 0x91f   : > { %v7639_v25 = vadd.f32 1.0, %v9902_v9  ;;  %9911 = vpow2.f32 %v8338_v54  ;;  %v14358_v6 = vadd.f32 %v9134_v51, %v14323_v10  ;;  %v7385_v29 = vpop.f32.mrb[89].mxu0 }
 0x920   : > { %9913 = vrcp.f32 %v7640_v43  ;;  %v14361_v21 = vadd.f32 %v14323_v10, %v7385_v29 }
 0x921   : > { %v9904_v24 = vpop.eup %9903  ;;  %9915 = vrcp.f32 %v7639_v25  ;;  %v8340_v44 = vmul.f32 -1.442695, %v14358_v6 }
 0x922   : > { %v9906_v58 = vpop.eup %9905  ;;  %v7642_v63 = vadd.f32 1.0, %v9904_v24  ;;  %9917 = vpow2.f32 %v8337_v32  ;;  %v8339_v40 = vmul.f32 -1.442695, %v14361_v21  ;;  %v9137_v2 = vpop.f32.mrb[90].mxu0 }
 0x923   : > { %v7641_v46 = vadd.f32 1.0, %v9906_v58  ;;  %9919 = vpow2.f32 %v8340_v44  ;;  %v14366_v12 = vadd.f32 %v9137_v2, %v14323_v10  ;;  %v7395_v31 = vpop.f32.mrb[91].mxu0 }
 0x924   : > { %9921 = vrcp.f32 %v7642_v63  ;;  %v14369_v62 = vadd.f32 %v14323_v10, %v7395_v31 }
 0x925   : > { %v9908_v47 = vpop.eup %9907  ;;  %9923 = vrcp.f32 %v7641_v46  ;;  %v8342_v37 = vmul.f32 -1.442695, %v14366_v12 }
 0x926   : > { %v9910_v14 = vpop.eup %9909  ;;  %v7644_v22 = vadd.f32 1.0, %v9908_v47  ;;  %9925 = vpow2.f32 %v8339_v40  ;;  %v8341_v27 = vmul.f32 -1.442695, %v14369_v62  ;;  %v9140_v28 = vpop.f32.mrb[92].mxu0 }
 0x927   : > { %v7643_v5 = vadd.f32 1.0, %v9910_v14  ;;  %9927 = vpow2.f32 %v8342_v37  ;;  %v14374_v13 = vadd.f32 %v9140_v28, %v14323_v10  ;;  %v7405_v0 = vpop.f32.mrb[93].mxu0 }
 0x928   : > { %9929 = vrcp.f32 %v7644_v22  ;;  %v14377_v18 = vadd.f32 %v14323_v10, %v7405_v0 }
 0x929   : > { %v9912_v39 = vpop.eup %9911  ;;  %9931 = vrcp.f32 %v7643_v5  ;;  %v8344_v23 = vmul.f32 -1.442695, %v14374_v13 }
 0x92a   : > { %v9914_v15 = vpop.eup %9913  ;;  %v7646_v20 = vadd.f32 1.0, %v9912_v39  ;;  %9933 = vpow2.f32 %v8341_v27  ;;  %v8343_v4 = vmul.f32 -1.442695, %v14377_v18  ;;  %v9143_v36 = vpop.f32.mrb[94].mxu0 }
 0x92b   : > { %v9916_v33 = vpop.eup %9915  ;;  %v7736_v30 = vmul.f32 %v9914_v15, %v14326_v17  ;;  %9935 = vpow2.f32 %v8344_v23  ;;  %v14390_v34 = vadd.f32 %v9143_v36, %v14323_v10  ;;  %v7415_v41 = vpop.f32.mrb[95].mxu0 }
 0x92c   : > { %v9918_v48 = vpop.eup %9917  ;;  %v7735_v35 = vmul.f32 %v9916_v33, %v14329_v53  ;;  %9937 = vrcp.f32 %v7646_v20  ;;  %v14394_v38 = vadd.f32 %v14323_v10, %v7415_v41 }
 0x92d   : > { %v9920_v45 = vpop.eup %9919  ;;  %7768 = vst.msk [vmem:[%s14385_s21 + $0x8] sm:$0xff] %vm509_vm0, %v7736_v30  ;;  %v7645_v19 = vadd.f32 1.0, %v9918_v48  ;;  %9939 = vpow2.f32 %v8343_v4  ;;  %v8346_v59 = vmul.f32 -1.442695, %v14390_v34 }
 0x92e   : > { %v9922_v17 = vpop.eup %9921  ;;  %7767 = vst.msk [vmem:[%s14385_s21] sm:$0xff] %vm509_vm0, %v7735_v35  ;;  %v7648_v56 = vadd.f32 1.0, %v9920_v45  ;;  %v8345_v52 = vmul.f32 -1.442695, %v14394_v38  ;;  %v9146_v3 = vpop.f32.mrb[96].mxu0 }
 0x92f   : > { %v9924_v53 = vpop.eup %9923  ;;  %v7738_v49 = vmul.f32 %v9922_v17, %v14334_v1  ;;  %9941 = vrcp.f32 %v7645_v19  ;;  %v14404_v57 = vadd.f32 %v9146_v3, %v14323_v10  ;;  %v7425_v42 = vpop.f32.mrb[97].mxu0 }
 0x930   : > { %v9926_v11 = vpop.eup %9925  ;;  %v7737_v50 = vmul.f32 %v9924_v53, %v14337_v61  ;;  %9943 = vrcp.f32 %v7648_v56  ;;  %v14408_v16 = vadd.f32 %v14323_v10, %v7425_v42 }
 0x931   : > { %v9928_v55 = vpop.eup %9927  ;;  %7770 = vst.msk [vmem:[%s14385_s21 + $0x18] sm:$0xff] %vm509_vm0, %v7738_v49  ;;  %v7647_v54 = vadd.f32 1.0, %v9926_v11  ;;  %9945 = vpow2.f32 %v8346_v59  ;;  %v8348_v9 = vmul.f32 -1.442695, %v14404_v57 }
 0x932   : > { %v9930_v1 = vpop.eup %9929  ;;  %7769 = vst.msk [vmem:[%s14385_s21 + $0x10] sm:$0xff] %vm509_vm0, %v7737_v50  ;;  %v7650_v43 = vadd.f32 1.0, %v9928_v55  ;;  %9947 = vpow2.f32 %v8345_v52  ;;  %v8347_v32 = vmul.f32 -1.442695, %v14408_v16  ;;  %v9149_v61 = vpop.f32.mrb[98].mxu0 }
 0x933   : > { %v9932_v51 = vpop.eup %9931  ;;  %v7740_v25 = vmul.f32 %v9930_v1, %v14342_v7  ;;  %9949 = vrcp.f32 %v7647_v54  ;;  %v14418_v29 = vadd.f32 %v9149_v61, %v14323_v10  ;;  %v7435_v24 = vpop.f32.mrb[99].mxu0 }
 0x934   : > { %v9934_v44 = vpop.eup %9933  ;;  %v7739_v58 = vmul.f32 %v9932_v51, %v14345_v26  ;;  %9951 = vrcp.f32 %v7650_v43  ;;  %v14422_v63 = vadd.f32 %v14323_v10, %v7435_v24 }
 0x935   : > { %v9936_v40 = vpop.eup %9935  ;;  %7772 = vst.msk [vmem:[%s14385_s21 + $0x28] sm:$0xff] %vm509_vm0, %v7740_v25  ;;  %v7649_v2 = vadd.f32 1.0, %v9934_v44  ;;  %9953 = vpow2.f32 %v8348_v9  ;;  %v8350_v46 = vmul.f32 -1.442695, %v14418_v29 }
 0x936   : > { %v9938_v7 = vpop.eup %9937  ;;  %7771 = vst.msk [vmem:[%s14385_s21 + $0x20] sm:$0xff] %vm509_vm0, %v7739_v58  ;;  %v7652_v31 = vadd.f32 1.0, %v9936_v40  ;;  %9955 = vpow2.f32 %v8347_v32  ;;  %v9152_v47 = vpop.f32.mrb[100].mxu0  ;;  %v8349_v14 = vmul.f32 -1.442695, %v14422_v63 }
 0x937   : > { %v9940_v37 = vpop.eup %9939  ;;  %v7742_v26 = vmul.f32 %v9938_v7, %v14350_v8  ;;  %9957 = vrcp.f32 %v7649_v2  ;;  %v14432_v22 = vadd.f32 %v9152_v47, %v14323_v10  ;;  %v7445_v27 = vpop.f32.mrb[101].mxu0 }
 0x938   : > { %9959 = vrcp.f32 %v7652_v31  ;;  %v7651_v28 = vadd.f32 1.0, %v9940_v37  ;;  %v14435_v5 = vadd.f32 %v14323_v10, %v7445_v27 }
 0x939   : > { %v9942_v0 = vpop.eup %9941  ;;  %7774 = vst.msk [vmem:[%s14385_s21 + $0x38] sm:$0xff] %vm509_vm0, %v7742_v26  ;;  %9961 = vpow2.f32 %v8350_v46  ;;  %v8352_v8 = vmul.f32 -1.442695, %v14432_v22 }
 0x93a   : > { %v9944_v39 = vpop.eup %9943  ;;  %v7741_v23 = vmul.f32 %v9942_v0, %v14353_v60  ;;  %9963 = vrcp.f32 %v7651_v28  ;;  %v8351_v15 = vmul.f32 -1.442695, %v14435_v5 }
 0x93b   : > { %v9946_v20 = vpop.eup %9945  ;;  %v7744_v4 = vmul.f32 %v9944_v39, %v14358_v6  ;;  %9965 = vpow2.f32 %v8349_v14 }
 0x93c   : > { %v9948_v36 = vpop.eup %9947  ;;  %7773 = vst.msk [vmem:[%s14385_s21 + $0x30] sm:$0xff] %vm509_vm0, %v7741_v23  ;;  %v7654_v33 = vadd.f32 1.0, %v9946_v20  ;;  %9967 = vpow2.f32 %v8352_v8 }
 0x93d   : > { %v9950_v30 = vpop.eup %9949  ;;  %7776 = vst.msk [vmem:[%s14385_s21 + $0x48] sm:$0xff] %vm509_vm0, %v7744_v4  ;;  %v7653_v41 = vadd.f32 1.0, %v9948_v36  ;;  %9969 = vpow2.f32 %v8351_v15 }
 0x93e   : > { %v9952_v60 = vpop.eup %9951  ;;  %v7743_v48 = vmul.f32 %v9950_v30, %v14361_v21  ;;  %9971 = vrcp.f32 %v7654_v33 }
 0x93f   : > { %v9954_v35 = vpop.eup %9953  ;;  %v7746_v6 = vmul.f32 %v9952_v60, %v14366_v12  ;;  %9973 = vrcp.f32 %v7653_v41 }
 0x940   : > { %v9956_v45 = vpop.eup %9955  ;;  %7775 = vst.msk [vmem:[%s14385_s21 + $0x40] sm:$0xff] %vm509_vm0, %v7743_v48  ;;  %v7656_v19 = vadd.f32 1.0, %v9954_v35 }
 0x941   : > { %v9958_v59 = vpop.eup %9957  ;;  %7778 = vst.msk [vmem:[%s14385_s21 + $0x58] sm:$0xff] %vm509_vm0, %v7746_v6  ;;  %v7655_v17 = vadd.f32 1.0, %v9956_v45  ;;  %v9155_v56 = vpop.f32.mrb[102].mxu0 }
 0x942   : > { %v9960_v52 = vpop.eup %9959  ;;  %v7745_v3 = vmul.f32 %v9958_v59, %v14369_v62  ;;  %9975 = vrcp.f32 %v7656_v19  ;;  %v7534_v21 = vadd.f32 %v9155_v56, %v14323_v10  ;;  %v7455_v53 = vpop.f32.mrb[103].mxu0 }
 0x943   : > { %v9962_v12 = vpop.eup %9961  ;;  %v7748_v49 = vmul.f32 %v9960_v52, %v14374_v13  ;;  %9977 = vrcp.f32 %v7655_v17  ;;  %v7533_v42 = vadd.f32 %v14323_v10, %v7455_v53 }
 0x944   : > { %v9964_v11 = vpop.eup %9963  ;;  %7777 = vst.msk [vmem:[%s14385_s21 + $0x50] sm:$0xff] %vm509_vm0, %v7745_v3  ;;  %v7658_v50 = vadd.f32 1.0, %v9962_v12  ;;  %v8354_v55 = vmul.f32 -1.442695, %v7534_v21 }
 0x945   : > { %v9966_v54 = vpop.eup %9965  ;;  %7780 = vst.msk [vmem:[%s14385_s21 + $0x68] sm:$0xff] %vm509_vm0, %v7748_v49  ;;  %v7747_v62 = vmul.f32 %v9964_v11, %v14377_v18  ;;  %v8353_v32 = vmul.f32 -1.442695, %v7533_v42 }
 0x946   : > { %v9968_v9 = vpop.eup %9967  ;;  %9979 = vrcp.f32 %v7658_v50  ;;  %v7657_v1 = vadd.f32 1.0, %v9966_v54 }
 0x947   : > { %v9970_v43 = vpop.eup %9969  ;;  %7779 = vst.msk [vmem:[%s14385_s21 + $0x60] sm:$0xff] %vm509_vm0, %v7747_v62  ;;  %v7660_v13 = vadd.f32 1.0, %v9968_v9  ;;  %9981 = vpow2.f32 %v8354_v55 }
 0x948   : > { %v9972_v61 = vpop.eup %9971  ;;  %9983 = vrcp.f32 %v7657_v1  ;;  %v7659_v51 = vadd.f32 1.0, %v9970_v43 }
 0x949   : > { %v9974_v25 = vpop.eup %9973  ;;  %v7750_v24 = vmul.f32 %v9972_v61, %v14390_v34  ;;  %9985 = vrcp.f32 %v7660_v13 }
 0x94a   : > { %v7749_v18 = vmul.f32 %v9974_v25, %v14394_v38  ;;  %9987 = vrcp.f32 %v7659_v51 }
 0x94b   : > { %7782 = vst.msk [vmem:[%s14385_s21 + $0x78] sm:$0xff] %vm509_vm0, %v7750_v24  ;;  %9989 = vpow2.f32 %v8353_v32 }
 0x94c   : > { %v9976_v44 = vpop.eup %9975  ;;  %7781 = vst.msk [vmem:[%s14385_s21 + $0x70] sm:$0xff] %vm509_vm0, %v7749_v18 }
 0x94d   : > { %v9978_v58 = vpop.eup %9977  ;;  %v7752_v40 = vmul.f32 %v9976_v44, %v14404_v57 }
 0x94e   : > { %v7751_v2 = vmul.f32 %v9978_v58, %v14408_v16 }
 0x94f   : > { %7784 = vst.msk [vmem:[%s14385_s21 + $0x88] sm:$0xff] %vm509_vm0, %v7752_v40 }
 0x950   : > { %v9980_v34 = vpop.eup %9979  ;;  %7783 = vst.msk [vmem:[%s14385_s21 + $0x80] sm:$0xff] %vm509_vm0, %v7751_v2 }
 0x951   : > { %v9982_v38 = vpop.eup %9981  ;;  %v7754_v46 = vmul.f32 %v9980_v34, %v14418_v29 }
 0x952   : > { %v9984_v7 = vpop.eup %9983  ;;  %v7662_v31 = vadd.f32 1.0, %v9982_v38 }
 0x953   : > { %v9986_v47 = vpop.eup %9985  ;;  %7786 = vst.msk [vmem:[%s14385_s21 + $0x98] sm:$0xff] %vm509_vm0, %v7754_v46  ;;  %v7753_v57 = vmul.f32 %v9984_v7, %v14422_v63 }
 0x954   : > { %v9988_v37 = vpop.eup %9987  ;;  %v7756_v16 = vmul.f32 %v9986_v47, %v14432_v22  ;;  %9991 = vrcp.f32 %v7662_v31 }
 0x955   : > { %v9990_v26 = vpop.eup %9989  ;;  %7785 = vst.msk [vmem:[%s14385_s21 + $0x90] sm:$0xff] %vm509_vm0, %v7753_v57  ;;  %v7755_v14 = vmul.f32 %v9988_v37, %v14435_v5 }
 0x956   : > { %7788 = vst.msk [vmem:[%s14385_s21 + $0xa8] sm:$0xff] %vm509_vm0, %v7756_v16  ;;  %v7661_v29 = vadd.f32 1.0, %v9990_v26 }
 0x957   : > { %7787 = vst.msk [vmem:[%s14385_s21 + $0xa0] sm:$0xff] %vm509_vm0, %v7755_v14 }
 0x958   : > { %9993 = vrcp.f32 %v7661_v29 }
 0x95e   : > { %v9992_v27 = vpop.eup %9991 }
 0x95f   : > { %v7758_v28 = vmul.f32 %v9992_v27, %v7534_v21 }
 0x961   : > { %7790 = vst.msk [vmem:[%s14385_s21 + $0xb8] sm:$0xff] %vm509_vm0, %v7758_v28  ;;  %v9158_v63 = vpop.f32.mrb[104].mxu0 }
 0x962   : > { %v9994_v0 = vpop.eup %9993  ;;  %v7536_v22 = vadd.f32 %v9158_v63, %v14323_v10  ;;  %v7465_v8 = vpop.f32.mrb[105].mxu0 }
 0x963   : > { %v7757_v39 = vmul.f32 %v9994_v0, %v7533_v42  ;;  %v7535_v23 = vadd.f32 %v14323_v10, %v7465_v8 }
 0x964   : > { %v8356_v5 = vmul.f32 -1.442695, %v7536_v22 }
 0x965   : > { %7789 = vst.msk [vmem:[%s14385_s21 + $0xb0] sm:$0xff] %vm509_vm0, %v7757_v39  ;;  %v8355_v15 = vmul.f32 -1.442695, %v7535_v23 }
 0x966   : > { %9995 = vpow2.f32 %v8356_v5 }
 0x967   : > { %9997 = vpow2.f32 %v8355_v15 }
 0x970   : > { %v9996_v20 = vpop.eup %9995 }
 0x971   : > { %v9998_v4 = vpop.eup %9997  ;;  %v7664_v36 = vadd.f32 1.0, %v9996_v20 }
 0x972   : > { %v7663_v33 = vadd.f32 1.0, %v9998_v4 }
 0x973   : > { %9999 = vrcp.f32 %v7664_v36 }
 0x974   : > { %10001 = vrcp.f32 %v7663_v33 }
 0x97d   : > { %v10000_v30 = vpop.eup %9999 }
 0x97e   : > { %v10002_v41 = vpop.eup %10001  ;;  %v7760_v60 = vmul.f32 %v10000_v30, %v7536_v22 }
 0x97f   : > { %v7759_v48 = vmul.f32 %v10002_v41, %v7535_v23 }
 0x980   : > { %7792 = vst.msk [vmem:[%s14385_s21 + $0xc8] sm:$0xff] %vm509_vm0, %v7760_v60 }
 0x981   : > { %7791 = vst.msk [vmem:[%s14385_s21 + $0xc0] sm:$0xff] %vm509_vm0, %v7759_v48  ;;  %v9161_v35 = vpop.f32.mrb[106].mxu0 }
 0x982   : > { %v7538_v6 = vadd.f32 %v9161_v35, %v14323_v10  ;;  %v7475_v45 = vpop.f32.mrb[107].mxu0 }
 0x983   : > { %v7537_v19 = vadd.f32 %v14323_v10, %v7475_v45 }
 0x984   : > { %v8358_v59 = vmul.f32 -1.442695, %v7538_v6 }
 0x985   : > { %v8357_v17 = vmul.f32 -1.442695, %v7537_v19 }
 0x986   : > { %10003 = vpow2.f32 %v8358_v59 }
 0x987   : > { %10005 = vpow2.f32 %v8357_v17 }
 0x990   : > { %v10004_v56 = vpop.eup %10003 }
 0x991   : > { %v10006_v52 = vpop.eup %10005  ;;  %v7666_v3 = vadd.f32 1.0, %v10004_v56 }
 0x992   : > { %v7665_v21 = vadd.f32 1.0, %v10006_v52 }
 0x993   : > { %10007 = vrcp.f32 %v7666_v3 }
 0x994   : > { %10009 = vrcp.f32 %v7665_v21 }
 0x99a   : > { %v9164_v53 = vpop.f32.mrb[108].mxu0 }
 0x99b   : > { %v7540_v12 = vadd.f32 %v9164_v53, %v14323_v10  ;;  %v7485_v49 = vpop.f32.mrb[109].mxu0 }
 0x99c   : > { %v7539_v42 = vadd.f32 %v14323_v10, %v7485_v49 }
 0x99d   : > { %v10008_v11 = vpop.eup %10007  ;;  %v8360_v50 = vmul.f32 -1.442695, %v7540_v12 }
 0x99e   : > { %v10010_v55 = vpop.eup %10009  ;;  %v7762_v54 = vmul.f32 %v10008_v11, %v7538_v6  ;;  %v8359_v62 = vmul.f32 -1.442695, %v7539_v42 }
 0x99f   : > { %v7761_v9 = vmul.f32 %v10010_v55, %v7537_v19  ;;  %10011 = vpow2.f32 %v8360_v50 }
 0x9a0   : > { %7794 = vst.msk [vmem:[%s14385_s21 + $0xd8] sm:$0xff] %vm509_vm0, %v7762_v54  ;;  %10013 = vpow2.f32 %v8359_v62 }
 0x9a1   : > { %7793 = vst.msk [vmem:[%s14385_s21 + $0xd0] sm:$0xff] %vm509_vm0, %v7761_v9 }
 0x9a5   : > { %v9167_v1 = vpop.f32.mrb[110].mxu0 }
 0x9a6   : > { %v7542_v43 = vadd.f32 %v9167_v1, %v14323_v10  ;;  %v7495_v13 = vpop.f32.mrb[111].mxu0 }
 0x9a7   : > { %v7541_v32 = vadd.f32 %v14323_v10, %v7495_v13 }
 0x9a8   : > { %v8362_v61 = vmul.f32 -1.442695, %v7542_v43 }
 0x9a9   : > { %v10012_v51 = vpop.eup %10011  ;;  %v8361_v25 = vmul.f32 -1.442695, %v7541_v32 }
 0x9aa   : > { %v10014_v24 = vpop.eup %10013  ;;  %v7668_v18 = vadd.f32 1.0, %v10012_v51  ;;  %10015 = vpow2.f32 %v8362_v61 }
 0x9ab   : > { %v7667_v44 = vadd.f32 1.0, %v10014_v24  ;;  %10017 = vpow2.f32 %v8361_v25 }
 0x9ac   : > { %10019 = vrcp.f32 %v7668_v18 }
 0x9ad   : > { %10021 = vrcp.f32 %v7667_v44 }
 0x9b4   : > { %v10016_v58 = vpop.eup %10015 }
 0x9b5   : > { %v10018_v40 = vpop.eup %10017  ;;  %v7670_v2 = vadd.f32 1.0, %v10016_v58 }
 0x9b6   : > { %v10020_v34 = vpop.eup %10019  ;;  %v7669_v38 = vadd.f32 1.0, %v10018_v40 }
 0x9b7   : > { %v10022_v10 = vpop.eup %10021  ;;  %v7764_v46 = vmul.f32 %v10020_v34, %v7540_v12  ;;  %10023 = vrcp.f32 %v7670_v2 }
 0x9b8   : > { %v7763_v7 = vmul.f32 %v10022_v10, %v7539_v42  ;;  %10025 = vrcp.f32 %v7669_v38 }
 0x9b9   : > { %7796 = vst.msk [vmem:[%s14385_s21 + $0xe8] sm:$0xff] %vm509_vm0, %v7764_v46 }
 0x9ba   : > { %7795 = vst.msk [vmem:[%s14385_s21 + $0xe0] sm:$0xff] %vm509_vm0, %v7763_v7 }
 0x9c1   : > { %v10024_v31 = vpop.eup %10023 }
 0x9c2   : > { %v10026_v47 = vpop.eup %10025  ;;  %v7766_v57 = vmul.f32 %v10024_v31, %v7542_v43 }
 0x9c3   : > { %v7765_v37 = vmul.f32 %v10026_v47, %v7541_v32 }
 0x9c4   : > { %7798 = vst.msk [vmem:[%s14385_s21 + $0xf8] sm:$0xff] %vm509_vm0, %v7766_v57 }
 0x9c5   : > { %7797 = vst.msk [vmem:[%s14385_s21 + $0xf0] sm:$0xff] %vm509_vm0, %v7765_v37 }
 0x9c6 PF: > { %s24_s29 = sadd.s32 1, %s10102_s29  }
 0x9c7   : > { %p21_p4 = scmp.ge.s32.totalorder %s24_s29, 4  }
 0x9c9   :  { %23 = sbr.rel (!%p21_p4) target bundleno = 1 (0x1), region = 111 }

</bundles_post_ra>
